<compile_context>
chip_gen: v7x
topology: tpu7x:2x2x1
jax: 0.10.0
libtpu: 0.0.40
codegen_flags: <defaults>
</compile_context>

<pallas_src>
import numpy as np

import jax
import jax.numpy as jnp
from jax.experimental import pallas as pl
from jax.experimental.pallas import tpu as pltpu

_CONV_MM_DTYPE = jnp.bfloat16   # MXU input dtype for the conv matmuls (f32 accumulate)

_WKEYS = ("w1", "b1", "w2", "b2", "w3", "b3", "w4", "b4",
          "wh1", "bh1", "wh2", "bh2")


class _Dims:
    """Static layer sizes implied by the module for a square input."""

    def __init__(self, spatial: int, in_channels: int):
        self.cin = in_channels
        self.wpad = spatial + 2                      # conv1 padding=1 (width)
        rows = spatial + 2                           # conv1 padding=1 (height)
        self.rows = rows + (rows % 2)                # even row count for parity split
        self.he = self.rows // 2                     # rows per parity plane
        self.h1 = (spatial + 2 - 5) // 2 + 1         # Conv2d(k=5, s=2, p=1)
        self.h2 = self.h1 - 2                        # Conv2d(k=3)
        self.h3 = self.h2 // 3                       # MaxPool2d(3), floor
        self.h4 = self.h3 - 2                        # Conv2d(k=3)
        self.h5 = self.h4 - 2                        # Conv2d(k=3)
        self.hf = self.h5 // 2                       # MaxPool2d(2), floor
        self.conv_out = 64 * self.hf * self.hf
        assert self.hf >= 1, "input spatial size too small for the conv stack"


# ----------------------------------------------------------------------------
# Weight packing (done once, at init -- never on the forward critical path)
# ----------------------------------------------------------------------------
def _pack_conv_toeplitz(w_oihw, w_in, stride):
    """(O, I, k, k) torch conv weight -> (k, w_in*I, w_out*O) per-kh Toeplitz."""
    w = np.asarray(w_oihw, dtype=np.float32)
    o, i, k, _ = w.shape
    w_out = (w_in - k) // stride + 1
    t = np.zeros((k, w_in * i, w_out * o), np.float32)
    for kh in range(k):
        for kw in range(k):
            blk = w[:, :, kh, kw].T                       # (I, O)
            for wo in range(w_out):
                r = (wo * stride + kw) * i
                t[kh, r:r + i, wo * o:(wo + 1) * o] = blk
    return jnp.asarray(t, dtype=_CONV_MM_DTYPE)


def _tile_bias(b, w_out):
    # output column = wo*Cout + co  ->  bias pattern tiled w_out times
    return jnp.asarray(np.tile(np.asarray(b, np.float32), w_out).reshape(1, -1))


def pack_params(params, in_channels, spatial, n_actions):
    d = _Dims(spatial, in_channels)
    cf = 64                                              # final conv channels

    def perm_rows(w):
        # PyTorch flatten order (c, h, w) -> kernel feature order (h, w, c).
        return (np.asarray(w, np.float32)
                .reshape(cf, d.hf, d.hf, -1)
                .transpose(1, 2, 0, 3)
                .reshape(d.conv_out, -1))

    wh1 = np.concatenate([perm_rows(params["a1w"]), perm_rows(params["v1w"])],
                         axis=1)                         # (conv_out, 256)
    wh1 = wh1.reshape(d.hf, d.hf * cf, 256)

    wh2 = np.zeros((256, 128), np.float32)               # lane-dense 2nd layer
    wh2[:128, :n_actions] = np.asarray(params["a2w"], np.float32)
    wh2[128:, n_actions:n_actions + 1] = np.asarray(params["v2w"], np.float32)

    bh1 = np.concatenate([np.asarray(params["a1b"], np.float32),
                          np.asarray(params["v1b"], np.float32)]).reshape(1, 256)
    bh2 = np.zeros((1, 128), np.float32)
    bh2[0, :n_actions] = np.asarray(params["a2b"], np.float32)
    bh2[0, n_actions] = np.asarray(params["v2b"], np.float32)[0]

    return {
        "w1": _pack_conv_toeplitz(params["c1w"], d.wpad, 2),
        "b1": _tile_bias(params["c1b"], d.h1),
        "w2": _pack_conv_toeplitz(params["c2w"], d.h1, 1),
        "b2": _tile_bias(params["c2b"], d.h2),
        "w3": _pack_conv_toeplitz(params["c3w"], d.h3, 1),
        "b3": _tile_bias(params["c3b"], d.h4),
        "w4": _pack_conv_toeplitz(params["c4w"], d.h4, 1),
        "b4": _tile_bias(params["c4b"], d.h5),
        "wh1": jnp.asarray(wh1),
        "bh1": jnp.asarray(bh1),
        "wh2": jnp.asarray(wh2),
        "bh2": jnp.asarray(bh2),
    }


# ----------------------------------------------------------------------------
# The fused kernel (one batch element per grid step)
# ----------------------------------------------------------------------------
def _make_kernel(d, n_actions):
    h1, h2, h3, h4, h5, hf = d.h1, d.h2, d.h3, d.h4, d.h5, d.hf

    def kernel(xe_ref, xo_ref,
               w1_ref, b1_ref, w2_ref, b2_ref, w3_ref, b3_ref, w4_ref, b4_ref,
               wh1_ref, bh1_ref, wh2_ref, bh2_ref,
               out_ref,
               y1, y2, wp, p3, y3, y4, ft):
        f32 = jnp.float32

        # ---- Conv1: k=5, stride 2, pad 1 (pre-applied) + ReLU ----------------
        # padded row 2*ho + kh lives in the even/odd parity plane, so each kh
        # contribution is one contiguous-slab matmul against the Toeplitz weight.
        acc = jnp.zeros((h1, h1 * 32), f32)
        for kh in range(5):
            src = xe_ref if kh % 2 == 0 else xo_ref
            m = kh // 2
            lhs = src[m:m + h1, :].astype(_CONV_MM_DTYPE)
            acc = acc + jnp.dot(lhs, w1_ref[kh], preferred_element_type=f32)
        y1[...] = jnp.maximum(acc + b1_ref[...], 0.0)

        # ---- Conv2: k=3, stride 1 + ReLU -------------------------------------
        acc = jnp.zeros((h2, h2 * 32), f32)
        for kh in range(3):
            lhs = y1[kh:kh + h2, :].astype(_CONV_MM_DTYPE)
            acc = acc + jnp.dot(lhs, w2_ref[kh], preferred_element_type=f32)
        y2[...] = jnp.maximum(acc + b2_ref[...], 0.0)

        # ---- MaxPool2d(3): pool along W (channel blocks), then along H -------
        for wo in range(h3):
            c0 = 3 * wo * 32
            wp[:, wo * 32:(wo + 1) * 32] = jnp.maximum(
                jnp.maximum(y2[:, c0:c0 + 32], y2[:, c0 + 32:c0 + 64]),
                y2[:, c0 + 64:c0 + 96])
        for ho in range(h3):
            r0 = 3 * ho
            p3[ho:ho + 1, :] = jnp.maximum(
                jnp.maximum(wp[r0:r0 + 1, :], wp[r0 + 1:r0 + 2, :]),
                wp[r0 + 2:r0 + 3, :])

        # ---- Conv3: k=3, stride 1 + ReLU -------------------------------------
        acc = jnp.zeros((h4, h4 * 64), f32)
        for kh in range(3):
            lhs = p3[kh:kh + h4, :].astype(_CONV_MM_DTYPE)
            acc = acc + jnp.dot(lhs, w3_ref[kh], preferred_element_type=f32)
        y3[...] = jnp.maximum(acc + b3_ref[...], 0.0)

        # ---- Conv4: k=3, stride 1 (NO ReLU, matches the module) --------------
        acc = jnp.zeros((h5, h5 * 64), f32)
        for kh in range(3):
            lhs = y3[kh:kh + h5, :].astype(_CONV_MM_DTYPE)
            acc = acc + jnp.dot(lhs, w4_ref[kh], preferred_element_type=f32)
        y4[...] = acc + b4_ref[...]

        # ---- MaxPool2d(2) -> (hf, hf*64) feature map --------------------------
        for fh in range(hf):
            for fw in range(hf):
                v = y4[2 * fh:2 * fh + 1, (2 * fw) * 64:(2 * fw + 1) * 64]
                v = jnp.maximum(v, y4[2 * fh:2 * fh + 1,
                                      (2 * fw + 1) * 64:(2 * fw + 2) * 64])
                v = jnp.maximum(v, y4[2 * fh + 1:2 * fh + 2,
                                      (2 * fw) * 64:(2 * fw + 1) * 64])
                v = jnp.maximum(v, y4[2 * fh + 1:2 * fh + 2,
                                      (2 * fw + 1) * 64:(2 * fw + 2) * 64])
                ft[fh:fh + 1, fw * 64:(fw + 1) * 64] = v

        # ---- Fused actor/critic heads -----------------------------------------
        # h = [actor_hidden(128) | critic_hidden(128)];  layer-2 is a lane-dense
        # (256,128) matrix => z[:, :n_actions] = actor logits, z[:, n_actions] =
        # critic value, remaining lanes exactly 0.
        h = bh1_ref[...]
        for fh in range(hf):
            h = h + jnp.dot(ft[fh:fh + 1, :], wh1_ref[fh],
                            preferred_element_type=f32)
        h = jnp.maximum(h, 0.0)
        z = jnp.dot(h, wh2_ref[...], preferred_element_type=f32) + bh2_ref[...]

        lane = jax.lax.broadcasted_iota(jnp.int32, (1, 128), 1)
        is_act = lane < n_actions
        logit = jnp.where(is_act, z, -1e30)
        mx = jnp.max(logit, axis=-1, keepdims=True)
        e = jnp.exp(logit - mx)
        probs = e / jnp.sum(e, axis=-1, keepdims=True)
        out_ref[...] = jnp.where(is_act, probs, z)   # [probs | value | zeros]

    return kernel


# ----------------------------------------------------------------------------
# Forward wrapper (one pallas_call per forward pass)
# ----------------------------------------------------------------------------
def make_forward(in_channels, spatial, n_actions):
    d = _Dims(spatial, in_channels)
    kernel = _make_kernel(d, n_actions)
    wc = d.wpad * in_channels

    def full_spec(shape):
        nd = len(shape)
        return pl.BlockSpec(shape, lambda b, _nd=nd: (0,) * _nd)

    def forward(packed, x_nchw):
        b = x_nchw.shape[0]
        # NCHW -> NHWC, apply conv1's padding=1, flatten to (H, W*C) rows and
        # split rows by parity (handles conv1's stride-2 along H).  These are
        # the only XLA glue ops; everything else runs inside the fused kernel.
        x = jnp.transpose(x_nchw, (0, 2, 3, 1)).astype(jnp.float32)
        x = jnp.pad(x, ((0, 0), (1, 1), (1, 1), (0, 0)))
        if x.shape[1] < d.rows:                       # pad rows to an even count
            x = jnp.pad(x, ((0, 0), (0, d.rows - x.shape[1]), (0, 0), (0, 0)))
        x2 = x.reshape(b, d.rows, wc)
        xe = x2[:, 0::2, :]
        xo = x2[:, 1::2, :]

        in_specs = [pl.BlockSpec((None, d.he, wc), lambda i: (i, 0, 0)),
                    pl.BlockSpec((None, d.he, wc), lambda i: (i, 0, 0))]
        in_specs += [full_spec(packed[k].shape) for k in _WKEYS]

        out = pl.pallas_call(
            kernel,
            grid=(b,),
            in_specs=in_specs,
            out_specs=pl.BlockSpec((None, 1, 128), lambda i: (i, 0, 0)),
            out_shape=jax.ShapeDtypeStruct((b, 1, 128), jnp.float32),
            scratch_shapes=[
                pltpu.VMEM((d.h1, d.h1 * 32), jnp.float32),   # conv1 out
                pltpu.VMEM((d.h2, d.h2 * 32), jnp.float32),   # conv2 out
                pltpu.VMEM((d.h2, d.h3 * 32), jnp.float32),   # W-pooled conv2
                pltpu.VMEM((d.h3, d.h3 * 32), jnp.float32),   # maxpool(3) out
                pltpu.VMEM((d.h4, d.h4 * 64), jnp.float32),   # conv3 out
                pltpu.VMEM((d.h5, d.h5 * 64), jnp.float32),   # conv4 out
                pltpu.VMEM((d.hf, d.hf * 64), jnp.float32),   # maxpool(2) out
            ],
            compiler_params=pltpu.CompilerParams(
                dimension_semantics=("parallel",),
                vmem_limit_bytes=32 * 1024 * 1024,
            ),
        )(xe, xo, *[packed[k] for k in _WKEYS])

        out = out.reshape(b, 128)
        return out[:, :n_actions], out[:, n_actions:n_actions + 1]

    return forward


# ----------------------------------------------------------------------------
# Parameter init (PyTorch-layout weights; packed once by pack_params)
# ----------------------------------------------------------------------------
def init_params(key, in_channels, spatial, n_actions):
    d = _Dims(spatial, in_channels)
    conv_out = d.conv_out
    ks = list(jax.random.split(key, 16))

    def cw(k, o, c, kk):
        return jax.random.normal(k, (o, c, kk, kk), jnp.float32) * (1.0 / (c * kk * kk) ** 0.5)

    def lw(k, i, o):
        return jax.random.normal(k, (i, o), jnp.float32) * (1.0 / i ** 0.5)

    def bias(k, n):
        return jax.random.normal(k, (n,), jnp.float32) * 0.01

    return {
        "c1w": cw(ks[0], 32, in_channels, 5), "c1b": bias(ks[1], 32),
        "c2w": cw(ks[2], 32, 32, 3),          "c2b": bias(ks[3], 32),
        "c3w": cw(ks[4], 64, 32, 3),          "c3b": bias(ks[5], 64),
        "c4w": cw(ks[6], 64, 64, 3),          "c4b": bias(ks[7], 64),
        "a1w": lw(ks[8], conv_out, 128),      "a1b": bias(ks[9], 128),
        "a2w": lw(ks[10], 128, n_actions),    "a2b": bias(ks[11], n_actions),
        "v1w": lw(ks[12], conv_out, 128),     "v1b": bias(ks[13], 128),
        "v2w": lw(ks[14], 128, 1),            "v2b": bias(ks[15], 1),
    }


if __name__ == "__main__":
    B, C, S = 2, 4, 42       # smallest spatial size for which the conv stack is valid
    N_ACTIONS = 6

    key = jax.random.PRNGKey(0)
    kx, kp = jax.random.split(key)
    x = jax.random.normal(kx, (B, C, S, S), jnp.float32)

    params = init_params(kp, C, S, N_ACTIONS)
    packed = pack_params(params, C, S, N_ACTIONS)     # one-time weight packing

    fwd = jax.jit(make_forward(C, S, N_ACTIONS))
    probs, value = fwd(packed, x)
    jax.block_until_ready((probs, value))

    assert probs.shape == (B, N_ACTIONS), probs.shape
    assert value.shape == (B, 1), value.shape
    assert bool(jnp.all(jnp.isfinite(probs))) and bool(jnp.all(jnp.isfinite(value)))
    assert bool(jnp.allclose(jnp.sum(probs, axis=1), 1.0, atol=1e-5))
    print("KERNEL_OK")
</pallas_src>

<mosaic_0001>
module attributes {stable_mosaic.version = 11 : i64} {
  func.func @kernel(%arg0: i32, %arg1: memref<1x22x176xf32, #tpu.memory_space<vmem>>, %arg2: memref<1x22x176xf32, #tpu.memory_space<vmem>>, %arg3: memref<5x176x640xbf16, #tpu.memory_space<vmem>>, %arg4: memref<1x640xf32, #tpu.memory_space<vmem>>, %arg5: memref<3x640x576xbf16, #tpu.memory_space<vmem>>, %arg6: memref<1x576xf32, #tpu.memory_space<vmem>>, %arg7: memref<3x192x256xbf16, #tpu.memory_space<vmem>>, %arg8: memref<1x256xf32, #tpu.memory_space<vmem>>, %arg9: memref<3x256x128xbf16, #tpu.memory_space<vmem>>, %arg10: memref<1x128xf32, #tpu.memory_space<vmem>>, %arg11: memref<1x64x256xf32, #tpu.memory_space<vmem>>, %arg12: memref<1x256xf32, #tpu.memory_space<vmem>>, %arg13: memref<256x128xf32, #tpu.memory_space<vmem>>, %arg14: memref<1x128xf32, #tpu.memory_space<vmem>>, %arg15: memref<1x1x128xf32, #tpu.memory_space<vmem>>, %arg16: memref<20x640xf32, #tpu.memory_space<vmem>>, %arg17: memref<18x576xf32, #tpu.memory_space<vmem>>, %arg18: memref<18x192xf32, #tpu.memory_space<vmem>>, %arg19: memref<6x192xf32, #tpu.memory_space<vmem>>, %arg20: memref<4x256xf32, #tpu.memory_space<vmem>>, %arg21: memref<2x128xf32, #tpu.memory_space<vmem>>, %arg22: memref<1x64xf32, #tpu.memory_space<vmem>>) attributes {dimension_semantics = [#tpu.dimension_semantics<parallel>], iteration_bounds = array<i64: 2>, scalar_prefetch = 0 : i64, scratch_operands = 7 : i64, tpu.core_type = #tpu.core_type<tc>, window_params = [{transform_indices = @transform_0, window_bounds = array<i64: 1, 22, 176>}, {transform_indices = @transform_1, window_bounds = array<i64: 1, 22, 176>}, {pipeline_mode = #tpu.pipeline_mode<synchronous>, transform_indices = @transform_2, window_bounds = array<i64: 5, 176, 640>}, {pipeline_mode = #tpu.pipeline_mode<synchronous>, transform_indices = @transform_3, window_bounds = array<i64: 1, 640>}, {pipeline_mode = #tpu.pipeline_mode<synchronous>, transform_indices = @transform_4, window_bounds = array<i64: 3, 640, 576>}, {pipeline_mode = #tpu.pipeline_mode<synchronous>, transform_indices = @transform_5, window_bounds = array<i64: 1, 576>}, {pipeline_mode = #tpu.pipeline_mode<synchronous>, transform_indices = @transform_6, window_bounds = array<i64: 3, 192, 256>}, {pipeline_mode = #tpu.pipeline_mode<synchronous>, transform_indices = @transform_7, window_bounds = array<i64: 1, 256>}, {pipeline_mode = #tpu.pipeline_mode<synchronous>, transform_indices = @transform_8, window_bounds = array<i64: 3, 256, 128>}, {pipeline_mode = #tpu.pipeline_mode<synchronous>, transform_indices = @transform_9, window_bounds = array<i64: 1, 128>}, {pipeline_mode = #tpu.pipeline_mode<synchronous>, transform_indices = @transform_10, window_bounds = array<i64: 1, 64, 256>}, {pipeline_mode = #tpu.pipeline_mode<synchronous>, transform_indices = @transform_11, window_bounds = array<i64: 1, 256>}, {pipeline_mode = #tpu.pipeline_mode<synchronous>, transform_indices = @transform_12, window_bounds = array<i64: 256, 128>}, {pipeline_mode = #tpu.pipeline_mode<synchronous>, transform_indices = @transform_13, window_bounds = array<i64: 1, 128>}, {transform_indices = @transform_14, window_bounds = array<i64: 1, 1, 128>}]} {
    %cst = arith.constant 0.000000e+00 : f32
    %0 = vector.broadcast %cst : f32 to vector<20x640xf32>
    %c0 = arith.constant 0 : index
    %c0_0 = arith.constant 0 : index
    %c0_1 = arith.constant 0 : index
    %1 = vector.load %arg1[%c0, %c0_0, %c0_1] : memref<1x22x176xf32, #tpu.memory_space<vmem>>, vector<1x20x176xf32>
    %2 = vector.shape_cast %1 : vector<1x20x176xf32> to vector<20x176xf32>
    %3 = arith.truncf %2 : vector<20x176xf32> to vector<20x176xbf16>
    %c0_2 = arith.constant 0 : index
    %c0_3 = arith.constant 0 : index
    %c0_4 = arith.constant 0 : index
    %4 = vector.load %arg3[%c0_2, %c0_3, %c0_4] : memref<5x176x640xbf16, #tpu.memory_space<vmem>>, vector<1x176x640xbf16>
    %5 = vector.shape_cast %4 : vector<1x176x640xbf16> to vector<176x640xbf16>
    %cst_5 = arith.constant dense<0.000000e+00> : vector<20x640xf32>
    %6 = tpu.matmul %3, %5, %cst_5 {dimension_numbers = #tpu.dot_dimension_numbers<[1], [0], [0], [1], [0, 0, 1, 1], [], []>} : vector<20x176xbf16>, vector<176x640xbf16>, vector<20x640xf32> -> vector<20x640xf32>
    %7 = arith.addf %0, %6 : vector<20x640xf32>
    %c0_6 = arith.constant 0 : index
    %c0_7 = arith.constant 0 : index
    %c0_8 = arith.constant 0 : index
    %8 = vector.load %arg2[%c0_6, %c0_7, %c0_8] : memref<1x22x176xf32, #tpu.memory_space<vmem>>, vector<1x20x176xf32>
    %9 = vector.shape_cast %8 : vector<1x20x176xf32> to vector<20x176xf32>
    %10 = arith.truncf %9 : vector<20x176xf32> to vector<20x176xbf16>
    %c1 = arith.constant 1 : index
    %c0_9 = arith.constant 0 : index
    %c0_10 = arith.constant 0 : index
    %11 = vector.load %arg3[%c1, %c0_9, %c0_10] : memref<5x176x640xbf16, #tpu.memory_space<vmem>>, vector<1x176x640xbf16>
    %12 = vector.shape_cast %11 : vector<1x176x640xbf16> to vector<176x640xbf16>
    %cst_11 = arith.constant dense<0.000000e+00> : vector<20x640xf32>
    %13 = tpu.matmul %10, %12, %cst_11 {dimension_numbers = #tpu.dot_dimension_numbers<[1], [0], [0], [1], [0, 0, 1, 1], [], []>} : vector<20x176xbf16>, vector<176x640xbf16>, vector<20x640xf32> -> vector<20x640xf32>
    %14 = arith.addf %7, %13 : vector<20x640xf32>
    %c0_12 = arith.constant 0 : index
    %c1_13 = arith.constant 1 : index
    %c0_14 = arith.constant 0 : index
    %15 = vector.load %arg1[%c0_12, %c1_13, %c0_14] : memref<1x22x176xf32, #tpu.memory_space<vmem>>, vector<1x20x176xf32>
    %16 = vector.shape_cast %15 : vector<1x20x176xf32> to vector<20x176xf32>
    %17 = arith.truncf %16 : vector<20x176xf32> to vector<20x176xbf16>
    %c2 = arith.constant 2 : index
    %c0_15 = arith.constant 0 : index
    %c0_16 = arith.constant 0 : index
    %18 = vector.load %arg3[%c2, %c0_15, %c0_16] : memref<5x176x640xbf16, #tpu.memory_space<vmem>>, vector<1x176x640xbf16>
    %19 = vector.shape_cast %18 : vector<1x176x640xbf16> to vector<176x640xbf16>
    %cst_17 = arith.constant dense<0.000000e+00> : vector<20x640xf32>
    %20 = tpu.matmul %17, %19, %cst_17 {dimension_numbers = #tpu.dot_dimension_numbers<[1], [0], [0], [1], [0, 0, 1, 1], [], []>} : vector<20x176xbf16>, vector<176x640xbf16>, vector<20x640xf32> -> vector<20x640xf32>
    %21 = arith.addf %14, %20 : vector<20x640xf32>
    %c0_18 = arith.constant 0 : index
    %c1_19 = arith.constant 1 : index
    %c0_20 = arith.constant 0 : index
    %22 = vector.load %arg2[%c0_18, %c1_19, %c0_20] : memref<1x22x176xf32, #tpu.memory_space<vmem>>, vector<1x20x176xf32>
    %23 = vector.shape_cast %22 : vector<1x20x176xf32> to vector<20x176xf32>
    %24 = arith.truncf %23 : vector<20x176xf32> to vector<20x176xbf16>
    %c3 = arith.constant 3 : index
    %c0_21 = arith.constant 0 : index
    %c0_22 = arith.constant 0 : index
    %25 = vector.load %arg3[%c3, %c0_21, %c0_22] : memref<5x176x640xbf16, #tpu.memory_space<vmem>>, vector<1x176x640xbf16>
    %26 = vector.shape_cast %25 : vector<1x176x640xbf16> to vector<176x640xbf16>
    %cst_23 = arith.constant dense<0.000000e+00> : vector<20x640xf32>
    %27 = tpu.matmul %24, %26, %cst_23 {dimension_numbers = #tpu.dot_dimension_numbers<[1], [0], [0], [1], [0, 0, 1, 1], [], []>} : vector<20x176xbf16>, vector<176x640xbf16>, vector<20x640xf32> -> vector<20x640xf32>
    %28 = arith.addf %21, %27 : vector<20x640xf32>
    %c0_24 = arith.constant 0 : index
    %c2_25 = arith.constant 2 : index
    %c0_26 = arith.constant 0 : index
    %29 = vector.load %arg1[%c0_24, %c2_25, %c0_26] : memref<1x22x176xf32, #tpu.memory_space<vmem>>, vector<1x20x176xf32>
    %30 = vector.shape_cast %29 : vector<1x20x176xf32> to vector<20x176xf32>
    %31 = arith.truncf %30 : vector<20x176xf32> to vector<20x176xbf16>
    %c4 = arith.constant 4 : index
    %c0_27 = arith.constant 0 : index
    %c0_28 = arith.constant 0 : index
    %32 = vector.load %arg3[%c4, %c0_27, %c0_28] : memref<5x176x640xbf16, #tpu.memory_space<vmem>>, vector<1x176x640xbf16>
    %33 = vector.shape_cast %32 : vector<1x176x640xbf16> to vector<176x640xbf16>
    %cst_29 = arith.constant dense<0.000000e+00> : vector<20x640xf32>
    %34 = tpu.matmul %31, %33, %cst_29 {dimension_numbers = #tpu.dot_dimension_numbers<[1], [0], [0], [1], [0, 0, 1, 1], [], []>} : vector<20x176xbf16>, vector<176x640xbf16>, vector<20x640xf32> -> vector<20x640xf32>
    %35 = arith.addf %28, %34 : vector<20x640xf32>
    %c0_30 = arith.constant 0 : index
    %c0_31 = arith.constant 0 : index
    %36 = vector.load %arg4[%c0_30, %c0_31] : memref<1x640xf32, #tpu.memory_space<vmem>>, vector<1x640xf32>
    %37 = vector.broadcast %36 : vector<1x640xf32> to vector<20x640xf32>
    %38 = arith.addf %35, %37 : vector<20x640xf32>
    %cst_32 = arith.constant 0.000000e+00 : f32
    %39 = vector.broadcast %cst_32 : f32 to vector<20x640xf32>
    %40 = arith.maximumf %38, %39 : vector<20x640xf32>
    %c0_33 = arith.constant 0 : index
    %c0_34 = arith.constant 0 : index
    %41 = vector.load %arg16[%c0_33, %c0_34] : memref<20x640xf32, #tpu.memory_space<vmem>>, vector<20x640xf32>
    tpu.vector_store %arg16[%c0_33, %c0_34], %40 {strides = array<i32>} : memref<20x640xf32, #tpu.memory_space<vmem>>, vector<20x640xf32>,
    %cst_35 = arith.constant 0.000000e+00 : f32
    %42 = vector.broadcast %cst_35 : f32 to vector<18x576xf32>
    %c0_36 = arith.constant 0 : index
    %c0_37 = arith.constant 0 : index
    %43 = vector.load %arg16[%c0_36, %c0_37] : memref<20x640xf32, #tpu.memory_space<vmem>>, vector<18x640xf32>
    %44 = arith.truncf %43 : vector<18x640xf32> to vector<18x640xbf16>
    %c0_38 = arith.constant 0 : index
    %c0_39 = arith.constant 0 : index
    %c0_40 = arith.constant 0 : index
    %45 = vector.load %arg5[%c0_38, %c0_39, %c0_40] : memref<3x640x576xbf16, #tpu.memory_space<vmem>>, vector<1x640x576xbf16>
    %46 = vector.shape_cast %45 : vector<1x640x576xbf16> to vector<640x576xbf16>
    %cst_41 = arith.constant dense<0.000000e+00> : vector<18x576xf32>
    %47 = tpu.matmul %44, %46, %cst_41 {dimension_numbers = #tpu.dot_dimension_numbers<[1], [0], [0], [1], [0, 0, 1, 1], [], []>} : vector<18x640xbf16>, vector<640x576xbf16>, vector<18x576xf32> -> vector<18x576xf32>
    %48 = arith.addf %42, %47 : vector<18x576xf32>
    %c1_42 = arith.constant 1 : index
    %c0_43 = arith.constant 0 : index
    %49 = vector.load %arg16[%c1_42, %c0_43] : memref<20x640xf32, #tpu.memory_space<vmem>>, vector<18x640xf32>
    %50 = arith.truncf %49 : vector<18x640xf32> to vector<18x640xbf16>
    %c1_44 = arith.constant 1 : index
    %c0_45 = arith.constant 0 : index
    %c0_46 = arith.constant 0 : index
    %51 = vector.load %arg5[%c1_44, %c0_45, %c0_46] : memref<3x640x576xbf16, #tpu.memory_space<vmem>>, vector<1x640x576xbf16>
    %52 = vector.shape_cast %51 : vector<1x640x576xbf16> to vector<640x576xbf16>
    %cst_47 = arith.constant dense<0.000000e+00> : vector<18x576xf32>
    %53 = tpu.matmul %50, %52, %cst_47 {dimension_numbers = #tpu.dot_dimension_numbers<[1], [0], [0], [1], [0, 0, 1, 1], [], []>} : vector<18x640xbf16>, vector<640x576xbf16>, vector<18x576xf32> -> vector<18x576xf32>
    %54 = arith.addf %48, %53 : vector<18x576xf32>
    %c2_48 = arith.constant 2 : index
    %c0_49 = arith.constant 0 : index
    %55 = vector.load %arg16[%c2_48, %c0_49] : memref<20x640xf32, #tpu.memory_space<vmem>>, vector<18x640xf32>
    %56 = arith.truncf %55 : vector<18x640xf32> to vector<18x640xbf16>
    %c2_50 = arith.constant 2 : index
    %c0_51 = arith.constant 0 : index
    %c0_52 = arith.constant 0 : index
    %57 = vector.load %arg5[%c2_50, %c0_51, %c0_52] : memref<3x640x576xbf16, #tpu.memory_space<vmem>>, vector<1x640x576xbf16>
    %58 = vector.shape_cast %57 : vector<1x640x576xbf16> to vector<640x576xbf16>
    %cst_53 = arith.constant dense<0.000000e+00> : vector<18x576xf32>
    %59 = tpu.matmul %56, %58, %cst_53 {dimension_numbers = #tpu.dot_dimension_numbers<[1], [0], [0], [1], [0, 0, 1, 1], [], []>} : vector<18x640xbf16>, vector<640x576xbf16>, vector<18x576xf32> -> vector<18x576xf32>
    %60 = arith.addf %54, %59 : vector<18x576xf32>
    %c0_54 = arith.constant 0 : index
    %c0_55 = arith.constant 0 : index
    %61 = vector.load %arg6[%c0_54, %c0_55] : memref<1x576xf32, #tpu.memory_space<vmem>>, vector<1x576xf32>
    %62 = vector.broadcast %61 : vector<1x576xf32> to vector<18x576xf32>
    %63 = arith.addf %60, %62 : vector<18x576xf32>
    %cst_56 = arith.constant 0.000000e+00 : f32
    %64 = vector.broadcast %cst_56 : f32 to vector<18x576xf32>
    %65 = arith.maximumf %63, %64 : vector<18x576xf32>
    %c0_57 = arith.constant 0 : index
    %c0_58 = arith.constant 0 : index
    %66 = vector.load %arg17[%c0_57, %c0_58] : memref<18x576xf32, #tpu.memory_space<vmem>>, vector<18x576xf32>
    tpu.vector_store %arg17[%c0_57, %c0_58], %65 {strides = array<i32>} : memref<18x576xf32, #tpu.memory_space<vmem>>, vector<18x576xf32>,
    %c0_59 = arith.constant 0 : index
    %c0_60 = arith.constant 0 : index
    %67 = vector.load %arg17[%c0_59, %c0_60] : memref<18x576xf32, #tpu.memory_space<vmem>>, vector<18x32xf32>
    %c0_61 = arith.constant 0 : index
    %c32 = arith.constant 32 : index
    %68 = vector.load %arg17[%c0_61, %c32] : memref<18x576xf32, #tpu.memory_space<vmem>>, vector<18x32xf32>
    %69 = arith.maximumf %67, %68 : vector<18x32xf32>
    %c0_62 = arith.constant 0 : index
    %c64 = arith.constant 64 : index
    %70 = vector.load %arg17[%c0_62, %c64] : memref<18x576xf32, #tpu.memory_space<vmem>>, vector<18x32xf32>
    %71 = arith.maximumf %69, %70 : vector<18x32xf32>
    %c0_63 = arith.constant 0 : index
    %c0_64 = arith.constant 0 : index
    %72 = vector.load %arg18[%c0_63, %c0_64] : memref<18x192xf32, #tpu.memory_space<vmem>>, vector<18x32xf32>
    tpu.vector_store %arg18[%c0_63, %c0_64], %71 {strides = array<i32>} : memref<18x192xf32, #tpu.memory_space<vmem>>, vector<18x32xf32>,
    %c0_65 = arith.constant 0 : index
    %c96 = arith.constant 96 : index
    %73 = vector.load %arg17[%c0_65, %c96] : memref<18x576xf32, #tpu.memory_space<vmem>>, vector<18x32xf32>
    %c0_66 = arith.constant 0 : index
    %c128 = arith.constant 128 : index
    %74 = vector.load %arg17[%c0_66, %c128] : memref<18x576xf32, #tpu.memory_space<vmem>>, vector<18x32xf32>
    %75 = arith.maximumf %73, %74 : vector<18x32xf32>
    %c0_67 = arith.constant 0 : index
    %c160 = arith.constant 160 : index
    %76 = vector.load %arg17[%c0_67, %c160] : memref<18x576xf32, #tpu.memory_space<vmem>>, vector<18x32xf32>
    %77 = arith.maximumf %75, %76 : vector<18x32xf32>
    %c0_68 = arith.constant 0 : index
    %c32_69 = arith.constant 32 : index
    %78 = vector.load %arg18[%c0_68, %c32_69] : memref<18x192xf32, #tpu.memory_space<vmem>>, vector<18x32xf32>
    tpu.vector_store %arg18[%c0_68, %c32_69], %77 {strides = array<i32>} : memref<18x192xf32, #tpu.memory_space<vmem>>, vector<18x32xf32>,
    %c0_70 = arith.constant 0 : index
    %c192 = arith.constant 192 : index
    %79 = vector.load %arg17[%c0_70, %c192] : memref<18x576xf32, #tpu.memory_space<vmem>>, vector<18x32xf32>
    %c0_71 = arith.constant 0 : index
    %c224 = arith.constant 224 : index
    %80 = vector.load %arg17[%c0_71, %c224] : memref<18x576xf32, #tpu.memory_space<vmem>>, vector<18x32xf32>
    %81 = arith.maximumf %79, %80 : vector<18x32xf32>
    %c0_72 = arith.constant 0 : index
    %c256 = arith.constant 256 : index
    %82 = vector.load %arg17[%c0_72, %c256] : memref<18x576xf32, #tpu.memory_space<vmem>>, vector<18x32xf32>
    %83 = arith.maximumf %81, %82 : vector<18x32xf32>
    %c0_73 = arith.constant 0 : index
    %c64_74 = arith.constant 64 : index
    %84 = vector.load %arg18[%c0_73, %c64_74] : memref<18x192xf32, #tpu.memory_space<vmem>>, vector<18x32xf32>
    tpu.vector_store %arg18[%c0_73, %c64_74], %83 {strides = array<i32>} : memref<18x192xf32, #tpu.memory_space<vmem>>, vector<18x32xf32>,
    %c0_75 = arith.constant 0 : index
    %c288 = arith.constant 288 : index
    %85 = vector.load %arg17[%c0_75, %c288] : memref<18x576xf32, #tpu.memory_space<vmem>>, vector<18x32xf32>
    %c0_76 = arith.constant 0 : index
    %c320 = arith.constant 320 : index
    %86 = vector.load %arg17[%c0_76, %c320] : memref<18x576xf32, #tpu.memory_space<vmem>>, vector<18x32xf32>
    %87 = arith.maximumf %85, %86 : vector<18x32xf32>
    %c0_77 = arith.constant 0 : index
    %c352 = arith.constant 352 : index
    %88 = vector.load %arg17[%c0_77, %c352] : memref<18x576xf32, #tpu.memory_space<vmem>>, vector<18x32xf32>
    %89 = arith.maximumf %87, %88 : vector<18x32xf32>
    %c0_78 = arith.constant 0 : index
    %c96_79 = arith.constant 96 : index
    %90 = vector.load %arg18[%c0_78, %c96_79] : memref<18x192xf32, #tpu.memory_space<vmem>>, vector<18x32xf32>
    tpu.vector_store %arg18[%c0_78, %c96_79], %89 {strides = array<i32>} : memref<18x192xf32, #tpu.memory_space<vmem>>, vector<18x32xf32>,
    %c0_80 = arith.constant 0 : index
    %c384 = arith.constant 384 : index
    %91 = vector.load %arg17[%c0_80, %c384] : memref<18x576xf32, #tpu.memory_space<vmem>>, vector<18x32xf32>
    %c0_81 = arith.constant 0 : index
    %c416 = arith.constant 416 : index
    %92 = vector.load %arg17[%c0_81, %c416] : memref<18x576xf32, #tpu.memory_space<vmem>>, vector<18x32xf32>
    %93 = arith.maximumf %91, %92 : vector<18x32xf32>
    %c0_82 = arith.constant 0 : index
    %c448 = arith.constant 448 : index
    %94 = vector.load %arg17[%c0_82, %c448] : memref<18x576xf32, #tpu.memory_space<vmem>>, vector<18x32xf32>
    %95 = arith.maximumf %93, %94 : vector<18x32xf32>
    %c0_83 = arith.constant 0 : index
    %c128_84 = arith.constant 128 : index
    %96 = vector.load %arg18[%c0_83, %c128_84] : memref<18x192xf32, #tpu.memory_space<vmem>>, vector<18x32xf32>
    tpu.vector_store %arg18[%c0_83, %c128_84], %95 {strides = array<i32>} : memref<18x192xf32, #tpu.memory_space<vmem>>, vector<18x32xf32>,
    %c0_85 = arith.constant 0 : index
    %c480 = arith.constant 480 : index
    %97 = vector.load %arg17[%c0_85, %c480] : memref<18x576xf32, #tpu.memory_space<vmem>>, vector<18x32xf32>
    %c0_86 = arith.constant 0 : index
    %c512 = arith.constant 512 : index
    %98 = vector.load %arg17[%c0_86, %c512] : memref<18x576xf32, #tpu.memory_space<vmem>>, vector<18x32xf32>
    %99 = arith.maximumf %97, %98 : vector<18x32xf32>
    %c0_87 = arith.constant 0 : index
    %c544 = arith.constant 544 : index
    %100 = vector.load %arg17[%c0_87, %c544] : memref<18x576xf32, #tpu.memory_space<vmem>>, vector<18x32xf32>
    %101 = arith.maximumf %99, %100 : vector<18x32xf32>
    %c0_88 = arith.constant 0 : index
    %c160_89 = arith.constant 160 : index
    %102 = vector.load %arg18[%c0_88, %c160_89] : memref<18x192xf32, #tpu.memory_space<vmem>>, vector<18x32xf32>
    tpu.vector_store %arg18[%c0_88, %c160_89], %101 {strides = array<i32>} : memref<18x192xf32, #tpu.memory_space<vmem>>, vector<18x32xf32>,
    %c0_90 = arith.constant 0 : index
    %c0_91 = arith.constant 0 : index
    %103 = vector.load %arg18[%c0_90, %c0_91] : memref<18x192xf32, #tpu.memory_space<vmem>>, vector<1x192xf32>
    %c1_92 = arith.constant 1 : index
    %c0_93 = arith.constant 0 : index
    %104 = vector.load %arg18[%c1_92, %c0_93] : memref<18x192xf32, #tpu.memory_space<vmem>>, vector<1x192xf32>
    %105 = arith.maximumf %103, %104 : vector<1x192xf32>
    %c2_94 = arith.constant 2 : index
    %c0_95 = arith.constant 0 : index
    %106 = vector.load %arg18[%c2_94, %c0_95] : memref<18x192xf32, #tpu.memory_space<vmem>>, vector<1x192xf32>
    %107 = arith.maximumf %105, %106 : vector<1x192xf32>
    %c0_96 = arith.constant 0 : index
    %c0_97 = arith.constant 0 : index
    %108 = vector.load %arg19[%c0_96, %c0_97] : memref<6x192xf32, #tpu.memory_space<vmem>>, vector<1x192xf32>
    tpu.vector_store %arg19[%c0_96, %c0_97], %107 {strides = array<i32>} : memref<6x192xf32, #tpu.memory_space<vmem>>, vector<1x192xf32>,
    %c3_98 = arith.constant 3 : index
    %c0_99 = arith.constant 0 : index
    %109 = vector.load %arg18[%c3_98, %c0_99] : memref<18x192xf32, #tpu.memory_space<vmem>>, vector<1x192xf32>
    %c4_100 = arith.constant 4 : index
    %c0_101 = arith.constant 0 : index
    %110 = vector.load %arg18[%c4_100, %c0_101] : memref<18x192xf32, #tpu.memory_space<vmem>>, vector<1x192xf32>
    %111 = arith.maximumf %109, %110 : vector<1x192xf32>
    %c5 = arith.constant 5 : index
    %c0_102 = arith.constant 0 : index
    %112 = vector.load %arg18[%c5, %c0_102] : memref<18x192xf32, #tpu.memory_space<vmem>>, vector<1x192xf32>
    %113 = arith.maximumf %111, %112 : vector<1x192xf32>
    %c1_103 = arith.constant 1 : index
    %c0_104 = arith.constant 0 : index
    %114 = vector.load %arg19[%c1_103, %c0_104] : memref<6x192xf32, #tpu.memory_space<vmem>>, vector<1x192xf32>
    tpu.vector_store %arg19[%c1_103, %c0_104], %113 {strides = array<i32>} : memref<6x192xf32, #tpu.memory_space<vmem>>, vector<1x192xf32>,
    %c6 = arith.constant 6 : index
    %c0_105 = arith.constant 0 : index
    %115 = vector.load %arg18[%c6, %c0_105] : memref<18x192xf32, #tpu.memory_space<vmem>>, vector<1x192xf32>
    %c7 = arith.constant 7 : index
    %c0_106 = arith.constant 0 : index
    %116 = vector.load %arg18[%c7, %c0_106] : memref<18x192xf32, #tpu.memory_space<vmem>>, vector<1x192xf32>
    %117 = arith.maximumf %115, %116 : vector<1x192xf32>
    %c8 = arith.constant 8 : index
    %c0_107 = arith.constant 0 : index
    %118 = vector.load %arg18[%c8, %c0_107] : memref<18x192xf32, #tpu.memory_space<vmem>>, vector<1x192xf32>
    %119 = arith.maximumf %117, %118 : vector<1x192xf32>
    %c2_108 = arith.constant 2 : index
    %c0_109 = arith.constant 0 : index
    %120 = vector.load %arg19[%c2_108, %c0_109] : memref<6x192xf32, #tpu.memory_space<vmem>>, vector<1x192xf32>
    tpu.vector_store %arg19[%c2_108, %c0_109], %119 {strides = array<i32>} : memref<6x192xf32, #tpu.memory_space<vmem>>, vector<1x192xf32>,
    %c9 = arith.constant 9 : index
    %c0_110 = arith.constant 0 : index
    %121 = vector.load %arg18[%c9, %c0_110] : memref<18x192xf32, #tpu.memory_space<vmem>>, vector<1x192xf32>
    %c10 = arith.constant 10 : index
    %c0_111 = arith.constant 0 : index
    %122 = vector.load %arg18[%c10, %c0_111] : memref<18x192xf32, #tpu.memory_space<vmem>>, vector<1x192xf32>
    %123 = arith.maximumf %121, %122 : vector<1x192xf32>
    %c11 = arith.constant 11 : index
    %c0_112 = arith.constant 0 : index
    %124 = vector.load %arg18[%c11, %c0_112] : memref<18x192xf32, #tpu.memory_space<vmem>>, vector<1x192xf32>
    %125 = arith.maximumf %123, %124 : vector<1x192xf32>
    %c3_113 = arith.constant 3 : index
    %c0_114 = arith.constant 0 : index
    %126 = vector.load %arg19[%c3_113, %c0_114] : memref<6x192xf32, #tpu.memory_space<vmem>>, vector<1x192xf32>
    tpu.vector_store %arg19[%c3_113, %c0_114], %125 {strides = array<i32>} : memref<6x192xf32, #tpu.memory_space<vmem>>, vector<1x192xf32>,
    %c12 = arith.constant 12 : index
    %c0_115 = arith.constant 0 : index
    %127 = vector.load %arg18[%c12, %c0_115] : memref<18x192xf32, #tpu.memory_space<vmem>>, vector<1x192xf32>
    %c13 = arith.constant 13 : index
    %c0_116 = arith.constant 0 : index
    %128 = vector.load %arg18[%c13, %c0_116] : memref<18x192xf32, #tpu.memory_space<vmem>>, vector<1x192xf32>
    %129 = arith.maximumf %127, %128 : vector<1x192xf32>
    %c14 = arith.constant 14 : index
    %c0_117 = arith.constant 0 : index
    %130 = vector.load %arg18[%c14, %c0_117] : memref<18x192xf32, #tpu.memory_space<vmem>>, vector<1x192xf32>
    %131 = arith.maximumf %129, %130 : vector<1x192xf32>
    %c4_118 = arith.constant 4 : index
    %c0_119 = arith.constant 0 : index
    %132 = vector.load %arg19[%c4_118, %c0_119] : memref<6x192xf32, #tpu.memory_space<vmem>>, vector<1x192xf32>
    tpu.vector_store %arg19[%c4_118, %c0_119], %131 {strides = array<i32>} : memref<6x192xf32, #tpu.memory_space<vmem>>, vector<1x192xf32>,
    %c15 = arith.constant 15 : index
    %c0_120 = arith.constant 0 : index
    %133 = vector.load %arg18[%c15, %c0_120] : memref<18x192xf32, #tpu.memory_space<vmem>>, vector<1x192xf32>
    %c16 = arith.constant 16 : index
    %c0_121 = arith.constant 0 : index
    %134 = vector.load %arg18[%c16, %c0_121] : memref<18x192xf32, #tpu.memory_space<vmem>>, vector<1x192xf32>
    %135 = arith.maximumf %133, %134 : vector<1x192xf32>
    %c17 = arith.constant 17 : index
    %c0_122 = arith.constant 0 : index
    %136 = vector.load %arg18[%c17, %c0_122] : memref<18x192xf32, #tpu.memory_space<vmem>>, vector<1x192xf32>
    %137 = arith.maximumf %135, %136 : vector<1x192xf32>
    %c5_123 = arith.constant 5 : index
    %c0_124 = arith.constant 0 : index
    %138 = vector.load %arg19[%c5_123, %c0_124] : memref<6x192xf32, #tpu.memory_space<vmem>>, vector<1x192xf32>
    tpu.vector_store %arg19[%c5_123, %c0_124], %137 {strides = array<i32>} : memref<6x192xf32, #tpu.memory_space<vmem>>, vector<1x192xf32>,
    %cst_125 = arith.constant 0.000000e+00 : f32
    %139 = vector.broadcast %cst_125 : f32 to vector<4x256xf32>
    %c0_126 = arith.constant 0 : index
    %c0_127 = arith.constant 0 : index
    %140 = vector.load %arg19[%c0_126, %c0_127] : memref<6x192xf32, #tpu.memory_space<vmem>>, vector<4x192xf32>
    %141 = arith.truncf %140 : vector<4x192xf32> to vector<4x192xbf16>
    %c0_128 = arith.constant 0 : index
    %c0_129 = arith.constant 0 : index
    %c0_130 = arith.constant 0 : index
    %142 = vector.load %arg7[%c0_128, %c0_129, %c0_130] : memref<3x192x256xbf16, #tpu.memory_space<vmem>>, vector<1x192x256xbf16>
    %143 = vector.shape_cast %142 : vector<1x192x256xbf16> to vector<192x256xbf16>
    %cst_131 = arith.constant dense<0.000000e+00> : vector<4x256xf32>
    %144 = tpu.matmul %141, %143, %cst_131 {dimension_numbers = #tpu.dot_dimension_numbers<[1], [0], [0], [1], [0, 0, 1, 1], [], []>} : vector<4x192xbf16>, vector<192x256xbf16>, vector<4x256xf32> -> vector<4x256xf32>
    %145 = arith.addf %139, %144 : vector<4x256xf32>
    %c1_132 = arith.constant 1 : index
    %c0_133 = arith.constant 0 : index
    %146 = vector.load %arg19[%c1_132, %c0_133] : memref<6x192xf32, #tpu.memory_space<vmem>>, vector<4x192xf32>
    %147 = arith.truncf %146 : vector<4x192xf32> to vector<4x192xbf16>
    %c1_134 = arith.constant 1 : index
    %c0_135 = arith.constant 0 : index
    %c0_136 = arith.constant 0 : index
    %148 = vector.load %arg7[%c1_134, %c0_135, %c0_136] : memref<3x192x256xbf16, #tpu.memory_space<vmem>>, vector<1x192x256xbf16>
    %149 = vector.shape_cast %148 : vector<1x192x256xbf16> to vector<192x256xbf16>
    %cst_137 = arith.constant dense<0.000000e+00> : vector<4x256xf32>
    %150 = tpu.matmul %147, %149, %cst_137 {dimension_numbers = #tpu.dot_dimension_numbers<[1], [0], [0], [1], [0, 0, 1, 1], [], []>} : vector<4x192xbf16>, vector<192x256xbf16>, vector<4x256xf32> -> vector<4x256xf32>
    %151 = arith.addf %145, %150 : vector<4x256xf32>
    %c2_138 = arith.constant 2 : index
    %c0_139 = arith.constant 0 : index
    %152 = vector.load %arg19[%c2_138, %c0_139] : memref<6x192xf32, #tpu.memory_space<vmem>>, vector<4x192xf32>
    %153 = arith.truncf %152 : vector<4x192xf32> to vector<4x192xbf16>
    %c2_140 = arith.constant 2 : index
    %c0_141 = arith.constant 0 : index
    %c0_142 = arith.constant 0 : index
    %154 = vector.load %arg7[%c2_140, %c0_141, %c0_142] : memref<3x192x256xbf16, #tpu.memory_space<vmem>>, vector<1x192x256xbf16>
    %155 = vector.shape_cast %154 : vector<1x192x256xbf16> to vector<192x256xbf16>
    %cst_143 = arith.constant dense<0.000000e+00> : vector<4x256xf32>
    %156 = tpu.matmul %153, %155, %cst_143 {dimension_numbers = #tpu.dot_dimension_numbers<[1], [0], [0], [1], [0, 0, 1, 1], [], []>} : vector<4x192xbf16>, vector<192x256xbf16>, vector<4x256xf32> -> vector<4x256xf32>
    %157 = arith.addf %151, %156 : vector<4x256xf32>
    %c0_144 = arith.constant 0 : index
    %c0_145 = arith.constant 0 : index
    %158 = vector.load %arg8[%c0_144, %c0_145] : memref<1x256xf32, #tpu.memory_space<vmem>>, vector<1x256xf32>
    %159 = vector.broadcast %158 : vector<1x256xf32> to vector<4x256xf32>
    %160 = arith.addf %157, %159 : vector<4x256xf32>
    %cst_146 = arith.constant 0.000000e+00 : f32
    %161 = vector.broadcast %cst_146 : f32 to vector<4x256xf32>
    %162 = arith.maximumf %160, %161 : vector<4x256xf32>
    %c0_147 = arith.constant 0 : index
    %c0_148 = arith.constant 0 : index
    %163 = vector.load %arg20[%c0_147, %c0_148] : memref<4x256xf32, #tpu.memory_space<vmem>>, vector<4x256xf32>
    tpu.vector_store %arg20[%c0_147, %c0_148], %162 {strides = array<i32>} : memref<4x256xf32, #tpu.memory_space<vmem>>, vector<4x256xf32>,
    %cst_149 = arith.constant 0.000000e+00 : f32
    %164 = vector.broadcast %cst_149 : f32 to vector<2x128xf32>
    %c0_150 = arith.constant 0 : index
    %c0_151 = arith.constant 0 : index
    %165 = vector.load %arg20[%c0_150, %c0_151] : memref<4x256xf32, #tpu.memory_space<vmem>>, vector<2x256xf32>
    %166 = arith.truncf %165 : vector<2x256xf32> to vector<2x256xbf16>
    %c0_152 = arith.constant 0 : index
    %c0_153 = arith.constant 0 : index
    %c0_154 = arith.constant 0 : index
    %167 = vector.load %arg9[%c0_152, %c0_153, %c0_154] : memref<3x256x128xbf16, #tpu.memory_space<vmem>>, vector<1x256x128xbf16>
    %168 = vector.shape_cast %167 : vector<1x256x128xbf16> to vector<256x128xbf16>
    %cst_155 = arith.constant dense<0.000000e+00> : vector<2x128xf32>
    %169 = tpu.matmul %166, %168, %cst_155 {dimension_numbers = #tpu.dot_dimension_numbers<[1], [0], [0], [1], [0, 0, 1, 1], [], []>} : vector<2x256xbf16>, vector<256x128xbf16>, vector<2x128xf32> -> vector<2x128xf32>
    %170 = arith.addf %164, %169 : vector<2x128xf32>
    %c1_156 = arith.constant 1 : index
    %c0_157 = arith.constant 0 : index
    %171 = vector.load %arg20[%c1_156, %c0_157] : memref<4x256xf32, #tpu.memory_space<vmem>>, vector<2x256xf32>
    %172 = arith.truncf %171 : vector<2x256xf32> to vector<2x256xbf16>
    %c1_158 = arith.constant 1 : index
    %c0_159 = arith.constant 0 : index
    %c0_160 = arith.constant 0 : index
    %173 = vector.load %arg9[%c1_158, %c0_159, %c0_160] : memref<3x256x128xbf16, #tpu.memory_space<vmem>>, vector<1x256x128xbf16>
    %174 = vector.shape_cast %173 : vector<1x256x128xbf16> to vector<256x128xbf16>
    %cst_161 = arith.constant dense<0.000000e+00> : vector<2x128xf32>
    %175 = tpu.matmul %172, %174, %cst_161 {dimension_numbers = #tpu.dot_dimension_numbers<[1], [0], [0], [1], [0, 0, 1, 1], [], []>} : vector<2x256xbf16>, vector<256x128xbf16>, vector<2x128xf32> -> vector<2x128xf32>
    %176 = arith.addf %170, %175 : vector<2x128xf32>
    %c2_162 = arith.constant 2 : index
    %c0_163 = arith.constant 0 : index
    %177 = vector.load %arg20[%c2_162, %c0_163] : memref<4x256xf32, #tpu.memory_space<vmem>>, vector<2x256xf32>
    %178 = arith.truncf %177 : vector<2x256xf32> to vector<2x256xbf16>
    %c2_164 = arith.constant 2 : index
    %c0_165 = arith.constant 0 : index
    %c0_166 = arith.constant 0 : index
    %179 = vector.load %arg9[%c2_164, %c0_165, %c0_166] : memref<3x256x128xbf16, #tpu.memory_space<vmem>>, vector<1x256x128xbf16>
    %180 = vector.shape_cast %179 : vector<1x256x128xbf16> to vector<256x128xbf16>
    %cst_167 = arith.constant dense<0.000000e+00> : vector<2x128xf32>
    %181 = tpu.matmul %178, %180, %cst_167 {dimension_numbers = #tpu.dot_dimension_numbers<[1], [0], [0], [1], [0, 0, 1, 1], [], []>} : vector<2x256xbf16>, vector<256x128xbf16>, vector<2x128xf32> -> vector<2x128xf32>
    %182 = arith.addf %176, %181 : vector<2x128xf32>
    %c0_168 = arith.constant 0 : index
    %c0_169 = arith.constant 0 : index
    %183 = vector.load %arg10[%c0_168, %c0_169] : memref<1x128xf32, #tpu.memory_space<vmem>>, vector<1x128xf32>
    %184 = vector.broadcast %183 : vector<1x128xf32> to vector<2x128xf32>
    %185 = arith.addf %182, %184 : vector<2x128xf32>
    %c0_170 = arith.constant 0 : index
    %c0_171 = arith.constant 0 : index
    %186 = vector.load %arg21[%c0_170, %c0_171] : memref<2x128xf32, #tpu.memory_space<vmem>>, vector<2x128xf32>
    tpu.vector_store %arg21[%c0_170, %c0_171], %185 {strides = array<i32>} : memref<2x128xf32, #tpu.memory_space<vmem>>, vector<2x128xf32>,
    %c0_172 = arith.constant 0 : index
    %c0_173 = arith.constant 0 : index
    %187 = vector.load %arg21[%c0_172, %c0_173] : memref<2x128xf32, #tpu.memory_space<vmem>>, vector<1x64xf32>
    %c0_174 = arith.constant 0 : index
    %c64_175 = arith.constant 64 : index
    %188 = vector.load %arg21[%c0_174, %c64_175] : memref<2x128xf32, #tpu.memory_space<vmem>>, vector<1x64xf32>
    %189 = arith.maximumf %187, %188 : vector<1x64xf32>
    %c1_176 = arith.constant 1 : index
    %c0_177 = arith.constant 0 : index
    %190 = vector.load %arg21[%c1_176, %c0_177] : memref<2x128xf32, #tpu.memory_space<vmem>>, vector<1x64xf32>
    %191 = arith.maximumf %189, %190 : vector<1x64xf32>
    %c1_178 = arith.constant 1 : index
    %c64_179 = arith.constant 64 : index
    %192 = vector.load %arg21[%c1_178, %c64_179] : memref<2x128xf32, #tpu.memory_space<vmem>>, vector<1x64xf32>
    %193 = arith.maximumf %191, %192 : vector<1x64xf32>
    %c0_180 = arith.constant 0 : index
    %c0_181 = arith.constant 0 : index
    %194 = vector.load %arg22[%c0_180, %c0_181] : memref<1x64xf32, #tpu.memory_space<vmem>>, vector<1x64xf32>
    tpu.vector_store %arg22[%c0_180, %c0_181], %193 {strides = array<i32>} : memref<1x64xf32, #tpu.memory_space<vmem>>, vector<1x64xf32>,
    %c0_182 = arith.constant 0 : index
    %c0_183 = arith.constant 0 : index
    %195 = vector.load %arg12[%c0_182, %c0_183] : memref<1x256xf32, #tpu.memory_space<vmem>>, vector<1x256xf32>
    %c0_184 = arith.constant 0 : index
    %c0_185 = arith.constant 0 : index
    %196 = vector.load %arg22[%c0_184, %c0_185] : memref<1x64xf32, #tpu.memory_space<vmem>>, vector<1x64xf32>
    %c0_186 = arith.constant 0 : index
    %c0_187 = arith.constant 0 : index
    %c0_188 = arith.constant 0 : index
    %197 = vector.load %arg11[%c0_186, %c0_187, %c0_188] : memref<1x64x256xf32, #tpu.memory_space<vmem>>, vector<1x64x256xf32>
    %198 = vector.shape_cast %197 : vector<1x64x256xf32> to vector<64x256xf32>
    %cst_189 = arith.constant dense<0.000000e+00> : vector<1x256xf32>
    %199 = tpu.matmul %196, %198, %cst_189 {dimension_numbers = #tpu.dot_dimension_numbers<[1], [0], [0], [1], [0, 0, 1, 1], [], []>} : vector<1x64xf32>, vector<64x256xf32>, vector<1x256xf32> -> vector<1x256xf32>
    %200 = arith.addf %195, %199 : vector<1x256xf32>
    %cst_190 = arith.constant 0.000000e+00 : f32
    %201 = vector.broadcast %cst_190 : f32 to vector<1x256xf32>
    %202 = arith.maximumf %200, %201 : vector<1x256xf32>
    %c0_191 = arith.constant 0 : index
    %c0_192 = arith.constant 0 : index
    %203 = vector.load %arg13[%c0_191, %c0_192] : memref<256x128xf32, #tpu.memory_space<vmem>>, vector<256x128xf32>
    %cst_193 = arith.constant dense<0.000000e+00> : vector<1x128xf32>
    %204 = tpu.matmul %202, %203, %cst_193 {dimension_numbers = #tpu.dot_dimension_numbers<[1], [0], [0], [1], [0, 0, 1, 1], [], []>} : vector<1x256xf32>, vector<256x128xf32>, vector<1x128xf32> -> vector<1x128xf32>
    %c0_194 = arith.constant 0 : index
    %c0_195 = arith.constant 0 : index
    %205 = vector.load %arg14[%c0_194, %c0_195] : memref<1x128xf32, #tpu.memory_space<vmem>>, vector<1x128xf32>
    %206 = arith.addf %204, %205 : vector<1x128xf32>
    %207 = tpu.iota {dimensions = array<i32: 1>} : vector<1x128xi32>
    %c6_i32 = arith.constant 6 : i32
    %208 = vector.broadcast %c6_i32 : i32 to vector<1x128xi32>
    %209 = arith.cmpi slt, %207, %208 : vector<1x128xi32>
    %cst_196 = arith.constant -1.000000e+30 : f32
    %210 = vector.broadcast %cst_196 : f32 to vector<1x128xf32>
    %211 = arith.select %209, %206, %210 : vector<1x128xi1>, vector<1x128xf32>
    %cst_197 = arith.constant dense<0xFF800000> : vector<1xf32>
    %212 = vector.multi_reduction <maximumf>, %211, %cst_197 [1] : vector<1x128xf32> to vector<1xf32>
    %213 = vector.shape_cast %212 : vector<1xf32> to vector<1x1xf32>
    %214 = vector.broadcast %213 : vector<1x1xf32> to vector<1x128xf32>
    %215 = arith.subf %211, %214 : vector<1x128xf32>
    %216 = math.exp %215 : vector<1x128xf32>
    %cst_198 = arith.constant dense<0.000000e+00> : vector<1xf32>
    %217 = vector.multi_reduction <add>, %216, %cst_198 [1] : vector<1x128xf32> to vector<1xf32>
    %218 = vector.shape_cast %217 : vector<1xf32> to vector<1x1xf32>
    %219 = vector.broadcast %218 : vector<1x1xf32> to vector<1x128xf32>
    %220 = arith.divf %216, %219 : vector<1x128xf32>
    %221 = arith.select %209, %220, %206 : vector<1x128xi1>, vector<1x128xf32>
    %c0_199 = arith.constant 0 : index
    %c0_200 = arith.constant 0 : index
    %c0_201 = arith.constant 0 : index
    %222 = vector.load %arg15[%c0_199, %c0_200, %c0_201] : memref<1x1x128xf32, #tpu.memory_space<vmem>>, vector<1x1x128xf32>
    %223 = vector.shape_cast %222 : vector<1x1x128xf32> to vector<1x128xf32>
    %224 = vector.shape_cast %221 : vector<1x128xf32> to vector<1x1x128xf32>
    tpu.vector_store %arg15[%c0_199, %c0_200, %c0_201], %224 {strides = array<i32>} : memref<1x1x128xf32, #tpu.memory_space<vmem>>, vector<1x1x128xf32>,
    return
  }
  func.func @transform_0(%arg0: i32) -> (i32, i32, i32) {
    %c0_i32 = arith.constant 0 : i32
    %c0_i32_0 = arith.constant 0 : i32
    %c0_i32_1 = arith.constant 0 : i32
    return %arg0, %c0_i32, %c0_i32_0 : i32, i32, i32
  }
  func.func @transform_1(%arg0: i32) -> (i32, i32, i32) {
    %c0_i32 = arith.constant 0 : i32
    %c0_i32_0 = arith.constant 0 : i32
    %c0_i32_1 = arith.constant 0 : i32
    return %arg0, %c0_i32, %c0_i32_0 : i32, i32, i32
  }
  func.func @transform_2(%arg0: i32) -> (i32, i32, i32) {
    %c0_i32 = arith.constant 0 : i32
    %c0_i32_0 = arith.constant 0 : i32
    %c0_i32_1 = arith.constant 0 : i32
    %c0_i32_2 = arith.constant 0 : i32
    return %c0_i32, %c0_i32_0, %c0_i32_1 : i32, i32, i32
  }
  func.func @transform_3(%arg0: i32) -> (i32, i32) {
    %c0_i32 = arith.constant 0 : i32
    %c0_i32_0 = arith.constant 0 : i32
    %c0_i32_1 = arith.constant 0 : i32
    return %c0_i32, %c0_i32_0 : i32, i32
  }
  func.func @transform_4(%arg0: i32) -> (i32, i32, i32) {
    %c0_i32 = arith.constant 0 : i32
    %c0_i32_0 = arith.constant 0 : i32
    %c0_i32_1 = arith.constant 0 : i32
    %c0_i32_2 = arith.constant 0 : i32
    return %c0_i32, %c0_i32_0, %c0_i32_1 : i32, i32, i32
  }
  func.func @transform_5(%arg0: i32) -> (i32, i32) {
    %c0_i32 = arith.constant 0 : i32
    %c0_i32_0 = arith.constant 0 : i32
    %c0_i32_1 = arith.constant 0 : i32
    return %c0_i32, %c0_i32_0 : i32, i32
  }
  func.func @transform_6(%arg0: i32) -> (i32, i32, i32) {
    %c0_i32 = arith.constant 0 : i32
    %c0_i32_0 = arith.constant 0 : i32
    %c0_i32_1 = arith.constant 0 : i32
    %c0_i32_2 = arith.constant 0 : i32
    return %c0_i32, %c0_i32_0, %c0_i32_1 : i32, i32, i32
  }
  func.func @transform_7(%arg0: i32) -> (i32, i32) {
    %c0_i32 = arith.constant 0 : i32
    %c0_i32_0 = arith.constant 0 : i32
    %c0_i32_1 = arith.constant 0 : i32
    return %c0_i32, %c0_i32_0 : i32, i32
  }
  func.func @transform_8(%arg0: i32) -> (i32, i32, i32) {
    %c0_i32 = arith.constant 0 : i32
    %c0_i32_0 = arith.constant 0 : i32
    %c0_i32_1 = arith.constant 0 : i32
    %c0_i32_2 = arith.constant 0 : i32
    return %c0_i32, %c0_i32_0, %c0_i32_1 : i32, i32, i32
  }
  func.func @transform_9(%arg0: i32) -> (i32, i32) {
    %c0_i32 = arith.constant 0 : i32
    %c0_i32_0 = arith.constant 0 : i32
    %c0_i32_1 = arith.constant 0 : i32
    return %c0_i32, %c0_i32_0 : i32, i32
  }
  func.func @transform_10(%arg0: i32) -> (i32, i32, i32) {
    %c0_i32 = arith.constant 0 : i32
    %c0_i32_0 = arith.constant 0 : i32
    %c0_i32_1 = arith.constant 0 : i32
    %c0_i32_2 = arith.constant 0 : i32
    return %c0_i32, %c0_i32_0, %c0_i32_1 : i32, i32, i32
  }
  func.func @transform_11(%arg0: i32) -> (i32, i32) {
    %c0_i32 = arith.constant 0 : i32
    %c0_i32_0 = arith.constant 0 : i32
    %c0_i32_1 = arith.constant 0 : i32
    return %c0_i32, %c0_i32_0 : i32, i32
  }
  func.func @transform_12(%arg0: i32) -> (i32, i32) {
    %c0_i32 = arith.constant 0 : i32
    %c0_i32_0 = arith.constant 0 : i32
    %c0_i32_1 = arith.constant 0 : i32
    return %c0_i32, %c0_i32_0 : i32, i32
  }
  func.func @transform_13(%arg0: i32) -> (i32, i32) {
    %c0_i32 = arith.constant 0 : i32
    %c0_i32_0 = arith.constant 0 : i32
    %c0_i32_1 = arith.constant 0 : i32
    return %c0_i32, %c0_i32_0 : i32, i32
  }
  func.func @transform_14(%arg0: i32) -> (i32, i32, i32) {
    %c0_i32 = arith.constant 0 : i32
    %c0_i32_0 = arith.constant 0 : i32
    %c0_i32_1 = arith.constant 0 : i32
    return %arg0, %c0_i32, %c0_i32_0 : i32, i32, i32
  }
}

</mosaic_0001>

<bundles_post_ra>
// kernel: forward.1
= control target key start
LH: loop header
LB: loop body
LE: loop exit
PB: predicated region body
PF: predicated region fallthrough
CT: control target
= control target key end

     0   :  { %s14449_s29 = smov 0   ;;  %s18460_s0 = inlined_call_operand.vmem [shape: f32[2,22,176], index: 0, kind: input, shape index: {}]   ;;  %s18461_s1 = inlined_call_operand.vmem [shape: f32[2,22,176], index: 1, kind: input, shape index: {}]   ;;  %s18462_s2 = inlined_call_operand.vmem [shape: bf16[5,176,640], index: 2, kind: input, shape index: {}]   ;;  %s18463_s3 = inlined_call_operand.vmem [shape: f32[1,640], index: 3, kind: input, shape index: {}]   ;;  %s18464_s4 = inlined_call_operand.vmem [shape: bf16[3,640,576], index: 4, kind: input, shape index: {}]   ;;  %s18465_s5 = inlined_call_operand.vmem [shape: f32[1,576], index: 5, kind: input, shape index: {}]   ;;  %s18466_s6 = inlined_call_operand.vmem [shape: bf16[3,192,256], index: 6, kind: input, shape index: {}]   ;;  %s18467_s7 = inlined_call_operand.vmem [shape: f32[1,256], index: 7, kind: input, shape index: {}]   ;;  %s18468_s8 = inlined_call_operand.vmem [shape: bf16[3,256,128], index: 8, kind: input, shape index: {}]   ;;  %s18469_s9 = inlined_call_operand.vmem [shape: f32[1,128], index: 9, kind: input, shape index: {}]   ;;  %s18470_s10 = inlined_call_operand.vmem [shape: f32[1,64,256], index: 10, kind: input, shape index: {}]   ;;  %s18471_s11 = inlined_call_operand.vmem [shape: f32[1,256], index: 11, kind: input, shape index: {}]   ;;  %s18472_s12 = inlined_call_operand.vmem [shape: f32[256,128], index: 12, kind: input, shape index: {}]   ;;  %s18473_s13 = inlined_call_operand.vmem [shape: f32[1,128], index: 13, kind: input, shape index: {}]   ;;  %s18474_s14 = inlined_call_operand.vmem [shape: f32[2,1,128], index: 14, kind: output, shape index: {}]  }
   0x1 LB: > { %s10552_s30 = sadd.s32 4294967295, %s14367_s29   ;;  %p10556_p0 = scmp.ge.s32.totalorder %s14367_s29, 1  ;;  %s14367_s29 = sphi %s14449_s29, %s24_s29  }
   0x2   : > { %p422_p1 = scmp.lt.s32.totalorder %s14367_s29, 3 }
   0x4   : > { %p423_p2 = pnand %p10556_p0, %p422_p1 }
   0x5   : > { %v12964_v0 = vld [vmem:[%s18462_s2 + $0x1bc] ss:$20 sps:$4 sm:$0xff] (!%p423_p2)   ;;  %v12966_v1 = vld [vmem:[%s18462_s2 + $0x1c4] ss:$20 sps:$4 sm:$0xff] (!%p423_p2)   ;;  %v12969_v3 = vld [vmem:[%s18462_s2 + $0x1c0] ss:$20 sps:$4 sm:$0xff] (!%p423_p2)  }
   0x6   : > { %426 = sbr.rel (%p423_p2) target bundleno = 3080 (0xc08), region = 76  ;;  %931 = vmatprep.subr.bf16.mxu0 (!%p423_p2), %v12964_v0  ;;  %v12968_v2 = vld [vmem:[%s18462_s2 + $0x1b8] ss:$20 sps:$4 sm:$0xff] (!%p423_p2)   ;;  %982 = vmatprep.subr.bf16.mxu1 (!%p423_p2), %v12966_v1  ;;  %v12974_v6 = vld [vmem:[%s18462_s2 + $0x1e0] ss:$20 sps:$4 sm:$0xff] (!%p423_p2)   ;;  %p471_p3 = scmp.lt.s32.totalorder (!%p423_p2), %s10552_s30, 1 }
   0x7   : > { %v12970_v4 = vld [vmem:[%s18462_s2 + $0x1e4] ss:$20 sps:$4 sm:$0xff] (!%p423_p2)   ;;  %932 = vmatpush1.bf16.msra.mxu0 (!%p423_p2), %v12968_v2  ;;  %983 = vmatpush1.bf16.msra.mxu1 (!%p423_p2), %v12969_v3  ;;  %v12972_v5 = vld [vmem:[%s18462_s2 + $0x1ec] ss:$20 sps:$4 sm:$0xff] (!%p423_p2)   ;;  %v12975_v7 = vld [vmem:[%s18462_s2 + $0x1e8] ss:$20 sps:$4 sm:$0xff] (!%p423_p2)  }
   0x8   : > { %933 = vmatprep.subr.bf16.mxu0 (!%p423_p2), %v12970_v4  ;;  %984 = vmatprep.subr.bf16.mxu1 (!%p423_p2), %v12972_v5  ;;  %v12976_v8 = vld [vmem:[%s18462_s2 + $0x20c] ss:$20 sps:$4 sm:$0xff] (!%p423_p2)   ;;  %v12978_v9 = vld [vmem:[%s18462_s2 + $0x214] ss:$20 sps:$4 sm:$0xff] (!%p423_p2)   ;;  %v12981_v11 = vld [vmem:[%s18462_s2 + $0x210] ss:$20 sps:$4 sm:$0xff] (!%p423_p2)  }
   0x9   : > { %v12980_v10 = vld [vmem:[%s18462_s2 + $0x208] ss:$20 sps:$4 sm:$0xff] (!%p423_p2)   ;;  %v12986_v14 = vld [vmem:[%s18462_s2 + $0x230] ss:$20 sps:$4 sm:$0xff] (!%p423_p2)   ;;  %v12987_v15 = vld [vmem:[%s18462_s2 + $0x238] ss:$20 sps:$4 sm:$0xff] (!%p423_p2)  }
   0xa   : > { %v12982_v12 = vld [vmem:[%s18462_s2 + $0x234] ss:$20 sps:$4 sm:$0xff] (!%p423_p2)   ;;  %v12984_v13 = vld [vmem:[%s18462_s2 + $0x23c] ss:$20 sps:$4 sm:$0xff] (!%p423_p2)   ;;  %v12990_v17 = vld [vmem:[%s18462_s2 + $0x264] ss:$20 sps:$4 sm:$0xff] (!%p423_p2)  }
   0xb   : > { %934 = vmatpush1.bf16.msra.mxu0 (!%p423_p2), %v12974_v6  ;;  %985 = vmatpush1.bf16.msra.mxu1 (!%p423_p2), %v12975_v7  ;;  %v12988_v16 = vld [vmem:[%s18462_s2 + $0x25c] ss:$20 sps:$4 sm:$0xff] (!%p423_p2)   ;;  %v12992_v18 = vld [vmem:[%s18462_s2 + $0x258] ss:$20 sps:$4 sm:$0xff] (!%p423_p2)   ;;  %v12993_v19 = vld [vmem:[%s18462_s2 + $0x260] ss:$20 sps:$4 sm:$0xff] (!%p423_p2)  }
   0xc   : > { %935 = vmatprep.subr.bf16.mxu0 (!%p423_p2), %v12976_v8  ;;  %986 = vmatprep.subr.bf16.mxu1 (!%p423_p2), %v12978_v9  ;;  %v12994_v20 = vld [vmem:[%s18462_s2 + $0x284] ss:$20 sps:$4 sm:$0xff] (!%p423_p2)   ;;  %v12996_v21 = vld [vmem:[%s18462_s2 + $0x28c] ss:$20 sps:$4 sm:$0xff] (!%p423_p2)   ;;  %v12999_v23 = vld [vmem:[%s18462_s2 + $0x288] ss:$20 sps:$4 sm:$0xff] (!%p423_p2)  }
   0xd   : > { %s18478_s30 = smov (!%p471_p3, %s10552_s30), 1  ;;  %v12998_v22 = vld [vmem:[%s18462_s2 + $0x280] ss:$20 sps:$4 sm:$0xff]   ;;  %v13004_v26 = vld [vmem:[%s18462_s2 + $0x2a8] ss:$20 sps:$4 sm:$0xff]   ;;  %vm924_vm0 = vcmask 392192  }
   0xe   : > { %v13000_v24 = vld [vmem:[%s18462_s2 + $0x2ac] ss:$20 sps:$4 sm:$0xff]   ;;  %v13002_v25 = vld [vmem:[%s18462_s2 + $0x2b4] ss:$20 sps:$4 sm:$0xff]   ;;  %s12950_s25 = smul.u32 48, %s18478_s30  ;;  %v14369_v53 = vmov 0   ;;  %s483_s15 = scalar_lea.vmem %s18474_s14, %s18478_s30 }
   0xf   : > { %936 = vmatpush1.bf16.msra.mxu0 %v12980_v10  ;;  %987 = vmatpush1.bf16.msra.mxu1 %v12981_v11  ;;  %v13005_v27 = vld [vmem:[%s18462_s2 + $0x2b0] ss:$20 sps:$4 sm:$0xff]   ;;  %v13006_v28 = vld [vmem:[%s18462_s2 + $0x2d4] ss:$20 sps:$4 sm:$0xff]   ;;  %v13011_v31 = vld [vmem:[%s18462_s2 + $0x2d8] ss:$20 sps:$4 sm:$0xff]  }
  0x10   : > { %937 = vmatprep.subr.bf16.mxu0 %v12982_v12  ;;  %988 = vmatprep.subr.bf16.mxu1 %v12984_v13  ;;  %v13008_v29 = vld [vmem:[%s18462_s2 + $0x2dc] ss:$20 sps:$4 sm:$0xff]   ;;  %s14559_s22 = scalar_lea.vmem %s18461_s1, %s12950_s25  ;;  %v13014_v33 = vld [vmem:[%s18462_s2 + $0x304] ss:$20 sps:$4 sm:$0xff]   ;;  %v13017_v38 = vld [vmem:[%s18462_s2 + $0x300] ss:$20 sps:$4 sm:$0xff]   ;;  %s14668_s28 = scalar_lea.vmem %s18460_s0, %s12950_s25 }
  0x11   : > { %v13010_v30 = vld [vmem:[%s18462_s2 + $0x2d0] ss:$20 sps:$4 sm:$0xff]   ;;  %v562_v34 = vld [vmem:[%s14559_s22 + $0x8] sm:$0xff]  ;;  %v564_v35 = vld [vmem:[%s14559_s22 + $0x18] sm:$0xff]  ;;  %vm1598_vm1 = vsmask.f32 7424 }
  0x12   : > { %v13012_v32 = vld [vmem:[%s18462_s2 + $0x2fc] ss:$20 sps:$4 sm:$0xff]   ;;  %v14575_v36 = vpack.c.bf16 %v564_v35, %v562_v34  ;;  %v13016_v37 = vld [vmem:[%s18462_s2 + $0x2f8] ss:$20 sps:$4 sm:$0xff]   ;;  %v13022_v41 = vld [vmem:[%s18462_s2 + $0x320] ss:$20 sps:$4 sm:$0xff]  }
  0x13   : > { %938 = vmatpush1.bf16.msra.mxu0 %v12986_v14  ;;  %989 = vmatpush1.bf16.msra.mxu1 %v12987_v15  ;;  %v13018_v39 = vld [vmem:[%s18462_s2 + $0x324] ss:$20 sps:$4 sm:$0xff]   ;;  %v13020_v40 = vld [vmem:[%s18462_s2 + $0x32c] ss:$20 sps:$4 sm:$0xff]   ;;  %v13023_v42 = vld [vmem:[%s18462_s2 + $0x328] ss:$20 sps:$4 sm:$0xff]  }
  0x14   : > { %939 = vmatprep.subr.bf16.mxu0 %v12988_v16  ;;  %990 = vmatprep.subr.bf16.mxu1 %v12990_v17  ;;  %v13024_v43 = vld [vmem:[%s18462_s2 + $0x34c] ss:$20 sps:$4 sm:$0xff]   ;;  %v13026_v44 = vld [vmem:[%s18462_s2 + $0x354] ss:$20 sps:$4 sm:$0xff]   ;;  %v13029_v46 = vld [vmem:[%s18462_s2 + $0x350] ss:$20 sps:$4 sm:$0xff]  }
  0x15   : > { %10680 = vmatprep.mubr.msk.bf16.mxu0 %vm924_vm0, %v14575_v36  ;;  %10682 = vmatprep.mubr.msk.bf16.mxu1 %vm924_vm0, %v14575_v36  ;;  %v13028_v45 = vld [vmem:[%s18462_s2 + $0x348] ss:$20 sps:$4 sm:$0xff]   ;;  %v561_v47 = vld [vmem:[%s14559_s22] sm:$0xff]  ;;  %v563_v48 = vld [vmem:[%s14559_s22 + $0x10] sm:$0xff]  ;;  %vm2731_vm2 = vcmask 1046528   ;;  %s14370_s18 = smov 96  }
  0x16   : > { %v13032_v49 = vld [vmem:[%s18462_s2 + $0xc] ss:$20 sps:$4 sm:$0xff]   ;;  %v14616_v50 = vpack.c.bf16 %v563_v48, %v561_v47  ;;  %v13030_v51 = vld [vmem:[%s18462_s2 + $0x8] ss:$20 sps:$4 sm:$0xff]   ;;  %v13034_v55 = vld [vmem:[%s18462_s2 + $0x30] ss:$20 sps:$4 sm:$0xff]  }
  0x17   : > { %940 = vmatpush1.bf16.msra.mxu0 %v12992_v18  ;;  %991 = vmatpush1.bf16.msra.mxu1 %v12993_v19  ;;  %v13033_v52 = vld [vmem:[%s18462_s2 + $0x1c8] ss:$20 sps:$4 sm:$0xff]   ;;  %v13037_v56 = vld [vmem:[%s18462_s2 + $0x1f0] ss:$20 sps:$4 sm:$0xff]   ;;  %v13038_v58 = vld [vmem:[%s18462_s2 + $0x58] ss:$20 sps:$4 sm:$0xff]  }
  0x18   : > { %941 = vmatprep.subr.bf16.mxu0 %v12994_v20  ;;  %992 = vmatprep.subr.bf16.mxu1 %v12996_v21  ;;  %v13036_v54 = vld [vmem:[%s18462_s2 + $0x34] ss:$20 sps:$4 sm:$0xff]   ;;  %v13040_v57 = vld [vmem:[%s18462_s2 + $0x5c] ss:$20 sps:$4 sm:$0xff]   ;;  %v13041_v59 = vld [vmem:[%s18462_s2 + $0x218] ss:$20 sps:$4 sm:$0xff]  }
  0x19   : > { %v566_v60 = vld [vmem:[%s14559_s22 + $0x28] sm:$0xf]  ;;  %v13044_v61 = vld [vmem:[%s18462_s2 + $0x84] ss:$20 sps:$4 sm:$0xff]   ;;  %v565_v63 = vld [vmem:[%s14559_s22 + $0x20] sm:$0xf] }
  0x1a   : > { %v14651_v62 = vpack.c.bf16 %v566_v60, %v566_v60  ;;  %v14654_v0 = vpack.c.bf16 %v565_v63, %v565_v63  ;;  %v13042_v1 = vld [vmem:[%s18462_s2 + $0x80] ss:$20 sps:$4 sm:$0xff]   ;;  %v486_v4 = vld [vmem:[%s14668_s28 + $0x8] sm:$0xff]  ;;  %v14689_v7 = vld [vmem:[%s14668_s28 + $0x18] sm:$0xff]  ;;  %s14371_s25 = smov 64   ;;  %vm8722_vm3 = vcmask 523264  }
  0x1b   : > { %942 = vmatpush1.bf16.msra.mxu0 %v12998_v22  ;;  %993 = vmatpush1.bf16.msra.mxu1 %v12999_v23  ;;  %v13045_v2 = vld [vmem:[%s18462_s2 + $0x240] ss:$20 sps:$4 sm:$0xff]   ;;  %v13046_v5 = vld [vmem:[%s18462_s2 + $0xa8] ss:$20 sps:$4 sm:$0xff]   ;;  %v14696_v9 = vpack.c.bf16 %v14689_v7, %v486_v4  ;;  %v13050_v10 = vld [vmem:[%s18462_s2 + $0xd0] ss:$20 sps:$4 sm:$0xff]  }
  0x1c   : > { %943 = vmatprep.subr.bf16.mxu0 %v13000_v24  ;;  %994 = vmatprep.subr.bf16.mxu1 %v13002_v25  ;;  %v13048_v3 = vld [vmem:[%s18462_s2 + $0xac] ss:$20 sps:$4 sm:$0xff]   ;;  %v13049_v6 = vld [vmem:[%s18462_s2 + $0x268] ss:$20 sps:$4 sm:$0xff]   ;;  %v13053_v11 = vld [vmem:[%s18462_s2 + $0x290] ss:$20 sps:$4 sm:$0xff]  }
  0x1d   : > { %v13052_v8 = vld [vmem:[%s18462_s2 + $0xd4] ss:$20 sps:$4 sm:$0xff]   ;;  %v13056_v12 = vld [vmem:[%s18462_s2 + $0xfc] ss:$20 sps:$4 sm:$0xff]   ;;  %v13054_v13 = vld [vmem:[%s18462_s2 + $0xf8] ss:$20 sps:$4 sm:$0xff]  }
  0x1e   : > { %v13057_v14 = vld [vmem:[%s18462_s2 + $0x2b8] ss:$20 sps:$4 sm:$0xff]   ;;  %v13058_v16 = vld [vmem:[%s18462_s2 + $0x120] ss:$20 sps:$4 sm:$0xff]   ;;  %v13062_v19 = vld [vmem:[%s18462_s2 + $0x148] ss:$20 sps:$4 sm:$0xff]  }
  0x1f   : > { %944 = vmatpush1.bf16.msra.mxu0 %v13004_v26  ;;  %995 = vmatpush1.bf16.msra.mxu1 %v13005_v27  ;;  %v13060_v15 = vld [vmem:[%s18462_s2 + $0x124] ss:$20 sps:$4 sm:$0xff]   ;;  %v13061_v17 = vld [vmem:[%s18462_s2 + $0x2e0] ss:$20 sps:$4 sm:$0xff]   ;;  %v13065_v20 = vld [vmem:[%s18462_s2 + $0x308] ss:$20 sps:$4 sm:$0xff]  }
  0x20   : > { %945 = vmatprep.subr.bf16.mxu0 %v13006_v28  ;;  %996 = vmatprep.subr.bf16.mxu1 %v13008_v29  ;;  %v13064_v18 = vld [vmem:[%s18462_s2 + $0x14c] ss:$20 sps:$4 sm:$0xff]   ;;  %v13068_v21 = vld [vmem:[%s18462_s2 + $0x174] ss:$20 sps:$4 sm:$0xff]   ;;  %v13066_v22 = vld [vmem:[%s18462_s2 + $0x170] ss:$20 sps:$4 sm:$0xff]  }
  0x21   : > { %v13069_v23 = vld [vmem:[%s18462_s2 + $0x330] ss:$20 sps:$4 sm:$0xff]   ;;  %v13070_v25 = vld [vmem:[%s18462_s2 + $0x198] ss:$20 sps:$4 sm:$0xff]   ;;  %v13090_v47 = vld [vmem:[%s18462_s2 + $0xa0] ss:$20 sps:$4 sm:$0xff]  }
  0x22   : > { %v13072_v24 = vld [vmem:[%s18462_s2 + $0x19c] ss:$20 sps:$4 sm:$0xff]   ;;  %v13073_v26 = vld [vmem:[%s18462_s2 + $0x358] ss:$20 sps:$4 sm:$0xff]   ;;  %v485_v27 = vld [vmem:[%s14668_s28] sm:$0xff]  ;;  %vm8733_vm4 = vcmask 517120  }
  0x23   : > { %946 = vmatpush1.bf16.msra.mxu0 %v13010_v30  ;;  %997 = vmatpush1.bf16.msra.mxu1 %v13011_v31  ;;  %v14758_v28 = vld [vmem:[%s14668_s28 + $0x10] sm:$0xff]  ;;  %v13076_v29 = vld [vmem:[%s18462_s2 + $0x4] ss:$20 sps:$4 sm:$0xff]   ;;  %v490_v31 = vld [vmem:[%s14668_s28 + $0x28] sm:$0xf]  ;;  %vm8765_vm5 = vcmask 261120  }
  0x24   : > { %947 = vmatprep.subr.bf16.mxu0 %v13012_v32  ;;  %998 = vmatprep.subr.bf16.mxu1 %v13014_v33  ;;  %v14765_v30 = vpack.c.bf16 %v14758_v28, %v485_v27  ;;  %v13074_v32 = vld [vmem:[%s18462_s2] ss:$20 sps:$4 sm:$0xff]   ;;  %v13077_v33 = vld [vmem:[%s18462_s2 + $0x10] ss:$20 sps:$4 sm:$0xff]   ;;  %v14778_v35 = vpack.c.bf16 %v490_v31, %v490_v31  ;;  %v13110_v63 = vld [vmem:[%s18462_s2 + $0x168] ss:$20 sps:$4 sm:$0xff]  }
  0x25   : > { %v13080_v34 = vld [vmem:[%s18462_s2 + $0x2c] ss:$20 sps:$4 sm:$0xff]   ;;  %v13093_v48 = vld [vmem:[%s18462_s2 + $0xb0] ss:$20 sps:$4 sm:$0xff]   ;;  %v13141_v27 = vld [vmem:[%s18462_s2 + $0x3f4] ss:$20 sps:$4 sm:$0xff]  }
  0x26   : > { %v13106_v60 = vld [vmem:[%s18462_s2 + $0x140] ss:$20 sps:$4 sm:$0xff]   ;;  %v13139_v31 = vld [vmem:[%s18462_s2 + $0x3f0] ss:$20 sps:$4 sm:$0xff]   ;;  %vm8815_vm6 = vcmask 523520   ;;  %vm8856_vm7 = vcmask 785920  }
  0x27   : > { %948 = vmatpush1.bf16.msra.mxu0 %v13016_v37  ;;  %999 = vmatpush1.bf16.msra.mxu1 %v13017_v38  ;;  %v13081_v37 = vld [vmem:[%s18462_s2 + $0x38] ss:$20 sps:$4 sm:$0xff]   ;;  %v489_v38 = vld [vmem:[%s14668_s28 + $0x20] sm:$0xf]  ;;  %vm8903_vm8 = vcmask 1048320   ;;  %vm8768_vm9 = vcmask 254976  }
  0x28   : > { %949 = vmatprep.subr.bf16.mxu0 %v13018_v39  ;;  %1000 = vmatprep.subr.bf16.mxu1 %v13020_v40  ;;  %v13084_v39 = vld [vmem:[%s18462_s2 + $0x54] ss:$20 sps:$4 sm:$0xff]   ;;  %v14797_v40 = vpack.c.bf16 %v489_v38, %v489_v38  ;;  %v13148_v38 = vld [vmem:[%s18462_s2 + $0x438] ss:$20 sps:$4 sm:$0xff]   ;;  %vm8818_vm11 = vcmask 517376   ;;  %vm8859_vm12 = vcmask 779776  }
  0x29   : > { %v13117_v4 = vld [vmem:[%s18462_s2 + $0x1a0] ss:$20 sps:$4 sm:$0xff]   ;;  %vm8906_vm13 = vcmask 1042176   ;;  %vm10247_vm14 = vcmask 516096  }
  0x2b   : > { %950 = vmatpush1.bf16.msra.mxu0 %v13022_v41  ;;  %1001 = vmatpush1.bf16.msra.mxu1 %v13023_v42  ;;  %v13082_v41 = vld [vmem:[%s18462_s2 + $0x50] ss:$20 sps:$4 sm:$0xff]   ;;  %v13085_v42 = vld [vmem:[%s18462_s2 + $0x60] ss:$20 sps:$4 sm:$0xff]  }
  0x2c   : > { %951 = vmatprep.subr.bf16.mxu0 %v13024_v43  ;;  %1002 = vmatprep.subr.bf16.mxu1 %v13026_v44  ;;  %v13088_v43 = vld [vmem:[%s18462_s2 + $0x7c] ss:$20 sps:$4 sm:$0xff]   ;;  %v13086_v44 = vld [vmem:[%s18462_s2 + $0x78] ss:$20 sps:$4 sm:$0xff]  }
  0x2f   : > { %952 = vmatpush1.bf16.msra.mxu0 %v13028_v45  ;;  %1003 = vmatpush1.bf16.msra.mxu1 %v13029_v46  ;;  %v13089_v45 = vld [vmem:[%s18462_s2 + $0x88] ss:$20 sps:$4 sm:$0xff]   ;;  %v13092_v46 = vld [vmem:[%s18462_s2 + $0xa4] ss:$20 sps:$4 sm:$0xff]  }
  0x30   : > { %1033 = vmatprep.subr.bf16.mxu0 %v14369_v53  ;;  %1424 = vmatprep.subr.bf16.mxu1 %v13032_v49  ;;  %v13096_v49 = vld [vmem:[%s18462_s2 + $0xcc] ss:$20 sps:$4 sm:$0xff]  }
  0x32   : > { %964 = vmatmul.mubr.bf16.vlgmr.msra.gmra.mrb[0].mxu0 %v14616_v50  ;;  %1015 = vmatmul.mubr.bf16.vlgmr.msra.gmra.mrb[0].mxu1 %v14616_v50 }
  0x33   : > { %1034 = vmatpush1.bf16.msra.mxu0 %v13033_v52  ;;  %1425 = vmatpush1.bf16.msra.mxu1 %v13030_v51  ;;  %v13097_v51 = vld [vmem:[%s18462_s2 + $0xd8] ss:$20 sps:$4 sm:$0xff]   ;;  %v13100_v52 = vld [vmem:[%s18462_s2 + $0xf4] ss:$20 sps:$4 sm:$0xff]  }
  0x34   : > { %1035 = vmatprep.subr.bf16.mxu0 %v14369_v53  ;;  %1426 = vmatprep.subr.bf16.mxu1 %v13036_v54  ;;  %v13098_v54 = vld [vmem:[%s18462_s2 + $0xf0] ss:$20 sps:$4 sm:$0xff]  }
  0x35   : > { %10681 = vmatprep.mubr.msk.bf16.mxu0 %vm924_vm0, %v14651_v62  ;;  %10683 = vmatprep.mubr.msk.bf16.mxu1 %vm924_vm0, %v14651_v62 }
  0x37   : > { %1036 = vmatpush1.bf16.msra.mxu0 %v13037_v56  ;;  %1427 = vmatpush1.bf16.msra.mxu1 %v13034_v55  ;;  %v13101_v55 = vld [vmem:[%s18462_s2 + $0x100] ss:$20 sps:$4 sm:$0xff]   ;;  %v13104_v56 = vld [vmem:[%s18462_s2 + $0x11c] ss:$20 sps:$4 sm:$0xff]  }
  0x38   : > { %1037 = vmatprep.subr.bf16.mxu0 %v14369_v53  ;;  %1428 = vmatprep.subr.bf16.mxu1 %v13040_v57  ;;  %v13102_v57 = vld [vmem:[%s18462_s2 + $0x118] ss:$20 sps:$4 sm:$0xff]  }
  0x3a   : > { %974 = vmatmul.mubr.bf16.gmra.mrb[4].mxu0 %v14654_v0  ;;  %1025 = vmatmul.mubr.bf16.gmra.mrb[4].mxu1 %v14654_v0 }
  0x3b   : > { %1038 = vmatpush1.bf16.msra.mxu0 %v13041_v59  ;;  %1429 = vmatpush1.bf16.msra.mxu1 %v13038_v58  ;;  %v13105_v58 = vld [vmem:[%s18462_s2 + $0x128] ss:$20 sps:$4 sm:$0xff]   ;;  %v13108_v59 = vld [vmem:[%s18462_s2 + $0x144] ss:$20 sps:$4 sm:$0xff]  }
  0x3c   : > { %1039 = vmatprep.subr.bf16.mxu0 %v14369_v53  ;;  %1430 = vmatprep.subr.bf16.mxu1 %v13044_v61  ;;  %v13109_v61 = vld [vmem:[%s18462_s2 + $0x150] ss:$20 sps:$4 sm:$0xff]  }
  0x3d   : > { %10684 = vmatprep.mubr.msk.bf16.mxu0 %vm924_vm0, %v14575_v36  ;;  %10743 = vmatprep.mubr.msk.bf16.mxu1 %vm924_vm0, %v14696_v9  ;;  %v13078_v36 = vld [vmem:[%s18462_s2 + $0x28] ss:$20 sps:$4 sm:$0xff]  }
  0x3f   : > { %1040 = vmatpush1.bf16.msra.mxu0 %v13045_v2  ;;  %1431 = vmatpush1.bf16.msra.mxu1 %v13042_v1  ;;  %v1524_v1 = vld [vmem:[%s14668_s28 + $0x8] sm:$0xfe] }
  0x40   : > { %1041 = vmatprep.subr.bf16.mxu0 %v14369_v53  ;;  %1432 = vmatprep.subr.bf16.mxu1 %v13048_v3  ;;  %v13116_v2 = vld [vmem:[%s18462_s2 + $0x194] ss:$20 sps:$4 sm:$0xff]   ;;  %v13114_v3 = vld [vmem:[%s18462_s2 + $0x190] ss:$20 sps:$4 sm:$0xff]  }
  0x43   : > { %1042 = vmatpush1.bf16.msra.mxu0 %v13049_v6  ;;  %1433 = vmatpush1.bf16.msra.mxu1 %v13046_v5  ;;  %v1528_v5 = vpack.c.bf16 %v14689_v7, %v1524_v1  ;;  %v13120_v6 = vld [vmem:[%s18462_s2 + $0x374] ss:$20 sps:$4 sm:$0xff]   ;;  %v13180_v1 = vld [vmem:[%s18462_s2 + $0x504] ss:$20 sps:$4 sm:$0xff]  }
  0x44   : > { %1043 = vmatprep.subr.bf16.mxu0 %v14369_v53  ;;  %1434 = vmatprep.subr.bf16.mxu1 %v13052_v8  ;;  %v1526_v8 = vld [vmem:[%s14668_s28 + $0x28] sm:$0x1f] }
  0x45   : > { %v1614_v7 = vshll.u32 %v1528_v5, 16 }
  0x47   : > { %1044 = vmatpush1.bf16.msra.mxu0 %v13053_v11  ;;  %1435 = vmatpush1.bf16.msra.mxu1 %v13050_v10  ;;  %v13118_v10 = vld [vmem:[%s18462_s2 + $0x370] ss:$20 sps:$4 sm:$0xff]   ;;  %v14904_v11 = vpack.c.bf16 %v1526_v8, %v1526_v8 }
  0x48   : > { %1045 = vmatprep.subr.bf16.mxu0 %v14369_v53  ;;  %1436 = vmatprep.subr.bf16.mxu1 %v13056_v12  ;;  %v13121_v12 = vld [vmem:[%s18462_s2 + $0x378] ss:$20 sps:$4 sm:$0xff]  }
  0x4b   : > { %1046 = vmatpush1.bf16.msra.mxu0 %v13057_v14  ;;  %1437 = vmatpush1.bf16.msra.mxu1 %v13054_v13  ;;  %v13126_v13 = vld [vmem:[%s18462_s2 + $0x39c] ss:$20 sps:$4 sm:$0xff]   ;;  %v13129_v14 = vld [vmem:[%s18462_s2 + $0x3a4] ss:$20 sps:$4 sm:$0xff]  }
  0x4c   : > { %1047 = vmatprep.subr.bf16.mxu0 %v14369_v53  ;;  %1438 = vmatprep.subr.bf16.mxu1 %v13060_v15  ;;  %v13124_v15 = vld [vmem:[%s18462_s2 + $0x398] ss:$20 sps:$4 sm:$0xff]  }
  0x4f   : > { %1048 = vmatpush1.bf16.msra.mxu0 %v13061_v17  ;;  %1439 = vmatpush1.bf16.msra.mxu1 %v13058_v16  ;;  %v13127_v16 = vld [vmem:[%s18462_s2 + $0x3a0] ss:$20 sps:$4 sm:$0xff]   ;;  %v1612_v17 = vshrl.u32 %v1528_v5, 16 }
  0x50   : > { %1049 = vmatprep.subr.bf16.mxu0 %v14369_v53  ;;  %1440 = vmatprep.subr.bf16.mxu1 %v13064_v18  ;;  %v1616_v18 = vrot.slane %v1614_v7, 1  ;;  %v13178_v5 = vld [vmem:[%s18462_s2 + $0x500] ss:$20 sps:$4 sm:$0xff]  }
  0x51   : > { %v13186_v7 = vld [vmem:[%s18462_s2 + $0x534] ss:$20 sps:$4 sm:$0xff]  }
  0x53   : > { %1050 = vmatpush1.bf16.msra.mxu0 %v13065_v20  ;;  %1441 = vmatpush1.bf16.msra.mxu1 %v13062_v19  ;;  %v1619_v19 = vshll.u32 %v14904_v11, 16  ;;  %v13132_v20 = vld [vmem:[%s18462_s2 + $0x3c4] ss:$20 sps:$4 sm:$0xff]  }
  0x54   : > { %1051 = vmatprep.subr.bf16.mxu0 %v14369_v53  ;;  %1442 = vmatprep.subr.bf16.mxu1 %v13068_v21  ;;  %v13135_v21 = vld [vmem:[%s18462_s2 + $0x3cc] ss:$20 sps:$4 sm:$0xff]  }
  0x57   : > { %1052 = vmatpush1.bf16.msra.mxu0 %v13069_v23  ;;  %1443 = vmatpush1.bf16.msra.mxu1 %v13066_v22  ;;  %v13130_v22 = vld [vmem:[%s18462_s2 + $0x3c0] ss:$20 sps:$4 sm:$0xff]   ;;  %v1617_v23 = vor.u32 %v1616_v18, %v1612_v17 }
  0x58   : > { %1053 = vmatprep.subr.bf16.mxu0 %v14369_v53  ;;  %1444 = vmatprep.subr.bf16.mxu1 %v13072_v24  ;;  %v14937_v24 = vrot.slane %v1619_v19, 1  ;;  %v13187_v17 = vld [vmem:[%s18462_s2 + $0x380] ss:$20 sps:$4 sm:$0xff]  }
  0x5b   : > { %1054 = vmatpush1.bf16.msra.mxu0 %v13073_v26  ;;  %1445 = vmatpush1.bf16.msra.mxu1 %v13070_v25  ;;  %v13133_v25 = vld [vmem:[%s18462_s2 + $0x3c8] ss:$20 sps:$4 sm:$0xff]   ;;  %v13138_v26 = vld [vmem:[%s18462_s2 + $0x3ec] ss:$20 sps:$4 sm:$0xff]  }
  0x5c   : > { %1373 = vmatprep.subr.bf16.mxu0 %v13076_v29  ;;  %1475 = vmatprep.subr.bf16.mxu1 %v14369_v53  ;;  %v13136_v29 = vld [vmem:[%s18462_s2 + $0x3e8] ss:$20 sps:$4 sm:$0xff]  }
  0x5e   : > { %1066 = vmatmul.mubr.bf16.vlgmr.msra.gmra.mrb[8].mxu0 %v14616_v50  ;;  %1457 = vmatmul.mubr.bf16.vlgmr.msra.gmra.mrb[0].mxu1 %v14765_v30  ;;  %v13094_v50 = vld [vmem:[%s18462_s2 + $0xc8] ss:$20 sps:$4 sm:$0xff]  }
  0x5f   : > { %1374 = vmatpush1.bf16.msra.mxu0 %v13074_v32  ;;  %1476 = vmatpush1.bf16.msra.mxu1 %v13077_v33  ;;  %v13144_v32 = vld [vmem:[%s18462_s2 + $0x414] ss:$20 sps:$4 sm:$0xff]   ;;  %v13147_v33 = vld [vmem:[%s18462_s2 + $0x41c] ss:$20 sps:$4 sm:$0xff]  }
  0x60   : > { %1375 = vmatprep.subr.bf16.mxu0 %v13080_v34  ;;  %1477 = vmatprep.subr.bf16.mxu1 %v14369_v53  ;;  %v13142_v34 = vld [vmem:[%s18462_s2 + $0x410] ss:$20 sps:$4 sm:$0xff]  }
  0x61   : > { %10685 = vmatprep.mubr.msk.bf16.mxu0 %vm924_vm0, %v14651_v62  ;;  %10744 = vmatprep.mubr.msk.bf16.mxu1 %vm924_vm0, %v14778_v35  ;;  %v13112_v62 = vld [vmem:[%s18462_s2 + $0x16c] ss:$20 sps:$4 sm:$0xff]  }
  0x63   : > { %1376 = vmatpush1.bf16.msra.mxu0 %v13078_v36  ;;  %1478 = vmatpush1.bf16.msra.mxu1 %v13081_v37  ;;  %v13150_v36 = vld [vmem:[%s18462_s2 + $0x43c] ss:$20 sps:$4 sm:$0xff]   ;;  %v13153_v37 = vld [vmem:[%s18462_s2 + $0x444] ss:$20 sps:$4 sm:$0xff]  }
  0x64   : > { %1377 = vmatprep.subr.bf16.mxu0 %v13084_v39  ;;  %1479 = vmatprep.subr.bf16.mxu1 %v14369_v53  ;;  %v13151_v39 = vld [vmem:[%s18462_s2 + $0x440] ss:$20 sps:$4 sm:$0xff]  }
  0x66   : > { %1074 = vmatmul.mubr.bf16.gmra.mrb[12].mxu0 %v14654_v0  ;;  %1467 = vmatmul.mubr.bf16.gmra.mrb[8].mxu1 %v14797_v40  ;;  %v13113_v0 = vld [vmem:[%s18462_s2 + $0x178] ss:$20 sps:$4 sm:$0xff]  }
  0x67   : > { %1378 = vmatpush1.bf16.msra.mxu0 %v13082_v41  ;;  %1480 = vmatpush1.bf16.msra.mxu1 %v13085_v42  ;;  %v13159_v41 = vld [vmem:[%s18462_s2 + $0x46c] ss:$20 sps:$4 sm:$0xff]  }
  0x68   : > { %1379 = vmatprep.subr.bf16.mxu0 %v13088_v43  ;;  %1481 = vmatprep.subr.bf16.mxu1 %v14369_v53  ;;  %v13154_v42 = vld [vmem:[%s18462_s2 + $0x460] ss:$20 sps:$4 sm:$0xff]   ;;  %v13157_v43 = vld [vmem:[%s18462_s2 + $0x468] ss:$20 sps:$4 sm:$0xff]  }
  0x69   : > { %10741 = vmatprep.mubr.msk.bf16.mxu0 %vm924_vm0, %v14696_v9  ;;  %10745 = vmatprep.mubr.msk.bf16.mxu1 %vm924_vm0, %v14696_v9  ;;  %v13123_v9 = vld [vmem:[%s18462_s2 + $0x37c] ss:$20 sps:$4 sm:$0xff]  }
  0x6b   : > { %1380 = vmatpush1.bf16.msra.mxu0 %v13086_v44  ;;  %1482 = vmatpush1.bf16.msra.mxu1 %v13089_v45  ;;  %v13162_v44 = vld [vmem:[%s18462_s2 + $0x48c] ss:$20 sps:$4 sm:$0xff]   ;;  %v13165_v45 = vld [vmem:[%s18462_s2 + $0x494] ss:$20 sps:$4 sm:$0xff]  }
  0x6c   : > { %1381 = vmatprep.subr.bf16.mxu0 %v13092_v46  ;;  %1483 = vmatprep.subr.bf16.mxu1 %v14369_v53  ;;  %v1523_v46 = vld [vmem:[%s14668_s28] sm:$0xfe] }
  0x6f   : > { %1382 = vmatpush1.bf16.msra.mxu0 %v13090_v47  ;;  %1484 = vmatpush1.bf16.msra.mxu1 %v13093_v48  ;;  %v13160_v47 = vld [vmem:[%s18462_s2 + $0x488] ss:$20 sps:$4 sm:$0xff]   ;;  %v13163_v48 = vld [vmem:[%s18462_s2 + $0x490] ss:$20 sps:$4 sm:$0xff]  }
  0x70   : > { %1383 = vmatprep.subr.bf16.mxu0 %v13096_v49  ;;  %1485 = vmatprep.subr.bf16.mxu1 %v14369_v53  ;;  %v13168_v49 = vld [vmem:[%s18462_s2 + $0x4b4] ss:$20 sps:$4 sm:$0xff]  }
  0x73   : > { %1384 = vmatpush1.bf16.msra.mxu0 %v13094_v50  ;;  %1486 = vmatpush1.bf16.msra.mxu1 %v13097_v51  ;;  %v13171_v50 = vld [vmem:[%s18462_s2 + $0x4bc] ss:$20 sps:$4 sm:$0xff]   ;;  %v1527_v51 = vpack.c.bf16 %v14758_v28, %v1523_v46  ;;  %v13177_v28 = vld [vmem:[%s18462_s2 + $0x4e4] ss:$20 sps:$4 sm:$0xff]   ;;  %v13214_v46 = vld [vmem:[%s18462_s2 + $0x64c] ss:$20 sps:$4 sm:$0xff]  }
  0x74   : > { %1385 = vmatprep.subr.bf16.mxu0 %v13100_v52  ;;  %1487 = vmatprep.subr.bf16.mxu1 %v14369_v53  ;;  %v1525_v52 = vld [vmem:[%s14668_s28 + $0x20] sm:$0x1f] }
  0x77   : > { %1386 = vmatpush1.bf16.msra.mxu0 %v13098_v54  ;;  %1488 = vmatpush1.bf16.msra.mxu1 %v13101_v55  ;;  %v13166_v54 = vld [vmem:[%s18462_s2 + $0x4b0] ss:$20 sps:$4 sm:$0xff]   ;;  %v13169_v55 = vld [vmem:[%s18462_s2 + $0x4b8] ss:$20 sps:$4 sm:$0xff]  }
  0x78   : > { %1387 = vmatprep.subr.bf16.mxu0 %v13104_v56  ;;  %1489 = vmatprep.subr.bf16.mxu1 %v14369_v53  ;;  %v13174_v56 = vld [vmem:[%s18462_s2 + $0x4dc] ss:$20 sps:$4 sm:$0xff]  }
  0x7b   : > { %1388 = vmatpush1.bf16.msra.mxu0 %v13102_v57  ;;  %1490 = vmatpush1.bf16.msra.mxu1 %v13105_v58  ;;  %v1529_v57 = vpack.c.bf16 %v1525_v52, %v1525_v52  ;;  %v1602_v58 = vshll.u32 %v1527_v51, 16  ;;  %v2090_v52 = vld [vmem:[%s14559_s22 + $0x20] sm:$0x1f] }
  0x7c   : > { %1389 = vmatprep.subr.bf16.mxu0 %v13108_v59  ;;  %1491 = vmatprep.subr.bf16.mxu1 %v14369_v53  ;;  %v2089_v59 = vld [vmem:[%s14559_s22 + $0x8] sm:$0xfe] }
  0x7f   : > { %1390 = vmatpush1.bf16.msra.mxu0 %v13106_v60  ;;  %1492 = vmatpush1.bf16.msra.mxu1 %v13109_v61  ;;  %v13172_v60 = vld [vmem:[%s18462_s2 + $0x4d8] ss:$20 sps:$4 sm:$0xff]   ;;  %v13175_v61 = vld [vmem:[%s18462_s2 + $0x4e0] ss:$20 sps:$4 sm:$0xff]  }
  0x80   : > { %1391 = vmatprep.subr.bf16.mxu0 %v13112_v62  ;;  %1493 = vmatprep.subr.bf16.mxu1 %v14369_v53  ;;  %v1600_v62 = vshrl.u32 %v1527_v51, 16  ;;  %v13218_v51 = vld [vmem:[%s18462_s2 + $0x674] ss:$20 sps:$4 sm:$0xff]  }
  0x83   : > { %1392 = vmatpush1.bf16.msra.mxu0 %v13110_v63  ;;  %1494 = vmatpush1.bf16.msra.mxu1 %v13113_v0  ;;  %v1604_v63 = vrot.slane %v1602_v58, 1  ;;  %v1607_v0 = vshll.u32 %v1529_v57, 16  ;;  %v2094_v58 = vpack.c.bf16 %v2090_v52, %v2090_v52  ;;  %v13280_v52 = vld [vmem:[%s18462_s2 + $0x70c] ss:$20 sps:$4 sm:$0xff]  }
  0x84   : > { %1393 = vmatprep.subr.bf16.mxu0 %v13116_v2  ;;  %1495 = vmatprep.subr.bf16.mxu1 %v14369_v53  ;;  %v13183_v2 = vld [vmem:[%s18462_s2 + $0x50c] ss:$20 sps:$4 sm:$0xff]  }
  0x85   : > { %v1605_v8 = vor.u32 %v1604_v63, %v1600_v62  ;;  %v2171_v62 = vshll.u32 %v2094_v58, 16  ;;  %v13226_v63 = vld [vmem:[%s18462_s2 + $0x6c4] ss:$20 sps:$4 sm:$0xff]  }
  0x87   : > { %1394 = vmatpush1.bf16.msra.mxu0 %v13114_v3  ;;  %1496 = vmatpush1.bf16.msra.mxu1 %v13117_v4  ;;  %v14352_v3 = vld [vmem:[%s14559_s22 + $0x18] sm:$0xff] }
  0x88   : > { %1923 = vmatprep.subr.bf16.mxu0 %v13120_v6  ;;  %1974 = vmatprep.subr.bf16.mxu1 %v13123_v9  ;;  %v2093_v4 = vpack.c.bf16 %v14352_v3, %v2089_v59  ;;  %v13181_v6 = vld [vmem:[%s18462_s2 + $0x508] ss:$20 sps:$4 sm:$0xff]   ;;  %v1609_v9 = vrot.slane %v1607_v0, 1  ;;  %v13220_v59 = vld [vmem:[%s18462_s2 + $0x698] ss:$20 sps:$4 sm:$0xff]  }
  0x89   : > { %v13224_v0 = vld [vmem:[%s18462_s2 + $0x6c0] ss:$20 sps:$4 sm:$0xff]  }
  0x8a   : > { %1406 = vmatmul.mubr.bf16.vlgmr.msra.gmra.mrb[0].mxu0 %v14765_v30  ;;  %1508 = vmatmul.mubr.bf16.vlgmr.msra.gmra.mrb[12].mxu1 %v14765_v30  ;;  %v14955_v30 = vsel %vm1598_vm1, %v1617_v23, %v14937_v24  ;;  %v2176_v18 = vshrl.u32 %v2093_v4, 16 }
  0x8b   : > { %1924 = vmatpush1.bf16.msra.mxu0 %v13118_v10  ;;  %1975 = vmatpush1.bf16.msra.mxu1 %v13121_v12  ;;  %v2091_v10 = vld [vmem:[%s14559_s22 + $0x28] sm:$0x1f]  ;;  %v1626_v12 = vshrl.u32 %v14904_v11, 16  ;;  %v13190_v11 = vld [vmem:[%s18462_s2 + $0x55c] ss:$20 sps:$4 sm:$0xff]  }
  0x8c   : > { %1925 = vmatprep.subr.bf16.mxu0 %v13126_v13  ;;  %1976 = vmatprep.subr.bf16.mxu1 %v13129_v14  ;;  %v2178_v13 = vshll.u32 %v2093_v4, 16  ;;  %v13184_v14 = vld [vmem:[%s18462_s2 + $0x530] ss:$20 sps:$4 sm:$0xff]   ;;  %v2173_v4 = vrot.slane %v2171_v62, 1 }
  0x8d   : > { %10742 = vmatprep.mubr.msk.bf16.mxu0 %vm924_vm0, %v14778_v35  ;;  %10746 = vmatprep.mubr.msk.bf16.mxu1 %vm924_vm0, %v14778_v35  ;;  %v13145_v35 = vld [vmem:[%s18462_s2 + $0x418] ss:$20 sps:$4 sm:$0xff]   ;;  %v15074_v19 = vor.u32 %v1626_v12, %v14937_v24  ;;  %v13235_v12 = vld [vmem:[%s18462_s2 + $0x560] ss:$20 sps:$4 sm:$0xff]   ;;  %v13284_v62 = vld [vmem:[%s18462_s2 + $0x730] ss:$20 sps:$4 sm:$0xff]  }
  0x8e   : > { %v13194_v24 = vld [vmem:[%s18462_s2 + $0x584] ss:$20 sps:$4 sm:$0xff]  }
  0x8f   : > { %1926 = vmatpush1.bf16.msra.mxu0 %v13124_v15  ;;  %1977 = vmatpush1.bf16.msra.mxu1 %v13127_v16  ;;  %v15061_v15 = vpack.c.bf16 %v2091_v10, %v2091_v10  ;;  %v15064_v16 = vsel %vm1598_vm1, %v1605_v8, %v1609_v9  ;;  %v13234_v10 = vld [vmem:[%s18462_s2 + $0x554] ss:$20 sps:$4 sm:$0xff]  }
  0x90   : > { %1927 = vmatprep.subr.bf16.mxu0 %v13132_v20  ;;  %1978 = vmatprep.subr.bf16.mxu1 %v13135_v21  ;;  %v2180_v20 = vrot.slane %v2178_v13, 1  ;;  %v13188_v21 = vld [vmem:[%s18462_s2 + $0x558] ss:$20 sps:$4 sm:$0xff]  }
  0x91   : > { %v2183_v23 = vshll.u32 %v15061_v15, 16  ;;  %v2190_v8 = vshrl.u32 %v15061_v15, 16  ;;  %v2187_v15 = vshrl.u32 %v2094_v58, 16  ;;  %v13281_v58 = vld [vmem:[%s18462_s2 + $0x710] ss:$20 sps:$4 sm:$0xff]  }
  0x92   : > { %1416 = vmatmul.mubr.bf16.gmra.mrb[16].mxu0 %v14797_v40  ;;  %1516 = vmatmul.mubr.bf16.gmra.mrb[16].mxu1 %v14797_v40  ;;  %v13156_v40 = vld [vmem:[%s18462_s2 + $0x464] ss:$20 sps:$4 sm:$0xff]  }
  0x93   : > { %1928 = vmatpush1.bf16.msra.mxu0 %v13130_v22  ;;  %1979 = vmatpush1.bf16.msra.mxu1 %v13133_v25  ;;  %v1623_v22 = vshrl.u32 %v1529_v57, 16  ;;  %v13191_v25 = vld [vmem:[%s18462_s2 + $0x3a8] ss:$20 sps:$4 sm:$0xff]   ;;  %v13219_v57 = vld [vmem:[%s18462_s2 + $0x4c0] ss:$20 sps:$4 sm:$0xff]  }
  0x94   : > { %1929 = vmatprep.subr.bf16.mxu0 %v13138_v26  ;;  %1980 = vmatprep.subr.bf16.mxu1 %v13141_v27  ;;  %v13192_v27 = vld [vmem:[%s18462_s2 + $0x580] ss:$20 sps:$4 sm:$0xff]  }
  0x95   : > { %10868 = vmatprep.mubr.msk.bf16.mxu0 %vm924_vm0, %v14955_v30  ;;  %10870 = vmatprep.mubr.msk.bf16.mxu1 %vm924_vm0, %v14955_v30  ;;  %v15093_v26 = vor.u32 %v1623_v22, %v1609_v9  ;;  %v13244_v22 = vld [vmem:[%s18462_s2 + $0x5c8] ss:$20 sps:$4 sm:$0xff]  }
  0x97   : > { %1930 = vmatpush1.bf16.msra.mxu0 %v13136_v29  ;;  %1981 = vmatpush1.bf16.msra.mxu1 %v13139_v31  ;;  %v2181_v29 = vor.u32 %v2180_v20, %v2176_v18  ;;  %v15098_v31 = vrot.slane %v2183_v23, 1  ;;  %v13242_v18 = vld [vmem:[%s18462_s2 + $0x5a4] ss:$20 sps:$4 sm:$0xff]  }
  0x98   : > { %1931 = vmatprep.subr.bf16.mxu0 %v13144_v32  ;;  %1982 = vmatprep.subr.bf16.mxu1 %v13147_v33  ;;  %v13195_v32 = vld [vmem:[%s18462_s2 + $0x3d0] ss:$20 sps:$4 sm:$0xff]   ;;  %v13198_v33 = vld [vmem:[%s18462_s2 + $0x5ac] ss:$20 sps:$4 sm:$0xff]  }
  0x99   : > { %v15221_v13 = vor.u32 %v2190_v8, %v15098_v31  ;;  %v13243_v20 = vld [vmem:[%s18462_s2 + $0x5b0] ss:$20 sps:$4 sm:$0xff]   ;;  %v13247_v23 = vld [vmem:[%s18462_s2 + $0x5d8] ss:$20 sps:$4 sm:$0xff]  }
  0x9b   : > { %1932 = vmatpush1.bf16.msra.mxu0 %v13142_v34  ;;  %1983 = vmatpush1.bf16.msra.mxu1 %v13145_v35  ;;  %v13196_v34 = vld [vmem:[%s18462_s2 + $0x5a8] ss:$20 sps:$4 sm:$0xff]   ;;  %v15114_v35 = vsel %vm1598_vm1, %v2181_v29, %v15098_v31  ;;  %v13252_v29 = vld [vmem:[%s18462_s2 + $0x618] ss:$20 sps:$4 sm:$0xff]  }
  0x9c   : > { %1933 = vmatprep.subr.bf16.mxu0 %v13150_v36  ;;  %1984 = vmatprep.subr.bf16.mxu1 %v13153_v37  ;;  %v13199_v36 = vld [vmem:[%s18462_s2 + $0x3f8] ss:$20 sps:$4 sm:$0xff]   ;;  %v13202_v37 = vld [vmem:[%s18462_s2 + $0x5d4] ss:$20 sps:$4 sm:$0xff]  }
  0x9d   : > { %v13255_v31 = vld [vmem:[%s18462_s2 + $0x628] ss:$20 sps:$4 sm:$0xff]  }
  0x9f   : > { %1934 = vmatpush1.bf16.msra.mxu0 %v13148_v38  ;;  %1985 = vmatpush1.bf16.msra.mxu1 %v13151_v39  ;;  %v13200_v38 = vld [vmem:[%s18462_s2 + $0x5d0] ss:$20 sps:$4 sm:$0xff]   ;;  %v13203_v39 = vld [vmem:[%s18462_s2 + $0x420] ss:$20 sps:$4 sm:$0xff]  }
  0xa0   : > { %1935 = vmatprep.subr.bf16.mxu0 %v13156_v40  ;;  %1986 = vmatprep.subr.bf16.mxu1 %v13159_v41  ;;  %v13204_v40 = vld [vmem:[%s18462_s2 + $0x5f8] ss:$20 sps:$4 sm:$0xff]   ;;  %v13207_v41 = vld [vmem:[%s18462_s2 + $0x448] ss:$20 sps:$4 sm:$0xff]  }
  0xa3   : > { %1936 = vmatpush1.bf16.msra.mxu0 %v13154_v42  ;;  %1987 = vmatpush1.bf16.msra.mxu1 %v13157_v43  ;;  %v13210_v42 = vld [vmem:[%s18462_s2 + $0x624] ss:$20 sps:$4 sm:$0xff]  }
  0xa4   : > { %1937 = vmatprep.subr.bf16.mxu0 %v13162_v44  ;;  %1988 = vmatprep.subr.bf16.mxu1 %v13165_v45  ;;  %v2088_v43 = vld [vmem:[%s14559_s22] sm:$0xfe] }
  0xa5   : > { %v13208_v44 = vld [vmem:[%s18462_s2 + $0x620] ss:$20 sps:$4 sm:$0xff]   ;;  %v13211_v45 = vld [vmem:[%s18462_s2 + $0x470] ss:$20 sps:$4 sm:$0xff]  }
  0xa7   : > { %1938 = vmatpush1.bf16.msra.mxu0 %v13160_v47  ;;  %1989 = vmatpush1.bf16.msra.mxu1 %v13163_v48  ;;  %v14353_v47 = vld [vmem:[%s14559_s22 + $0x10] sm:$0xff] }
  0xa8   : > { %1939 = vmatprep.subr.bf16.mxu0 %v13168_v49  ;;  %1990 = vmatprep.subr.bf16.mxu1 %v13171_v50  ;;  %v2092_v48 = vpack.c.bf16 %v14353_v47, %v2088_v43  ;;  %v13212_v49 = vld [vmem:[%s18462_s2 + $0x648] ss:$20 sps:$4 sm:$0xff]   ;;  %v13215_v50 = vld [vmem:[%s18462_s2 + $0x498] ss:$20 sps:$4 sm:$0xff]  }
  0xa9   : > { %v13268_v43 = vld [vmem:[%s18462_s2 + $0x6b8] ss:$20 sps:$4 sm:$0xff]  }
  0xaa   : > { %v14354_v47 = vld [vmem:[%s14668_s28 + $0x18] sm:$0xff] }
  0xab   : > { %1940 = vmatpush1.bf16.msra.mxu0 %v13166_v54  ;;  %1991 = vmatpush1.bf16.msra.mxu1 %v13169_v55  ;;  %v2164_v54 = vshrl.u32 %v2092_v48, 16  ;;  %v2166_v55 = vshll.u32 %v2092_v48, 16 }
  0xac   : > { %1941 = vmatprep.subr.bf16.mxu0 %v13174_v56  ;;  %1992 = vmatprep.subr.bf16.mxu1 %v13177_v28  ;;  %v13216_v56 = vld [vmem:[%s18462_s2 + $0x670] ss:$20 sps:$4 sm:$0xff]  }
  0xad   : > { %v13222_v28 = vld [vmem:[%s18462_s2 + $0x69c] ss:$20 sps:$4 sm:$0xff]  }
  0xaf   : > { %1942 = vmatpush1.bf16.msra.mxu0 %v13172_v60  ;;  %1993 = vmatpush1.bf16.msra.mxu1 %v13175_v61  ;;  %v13223_v60 = vld [vmem:[%s18462_s2 + $0x4e8] ss:$20 sps:$4 sm:$0xff]   ;;  %v2168_v61 = vrot.slane %v2166_v55, 1 }
  0xb0   : > { %1943 = vmatprep.subr.bf16.mxu0 %v13180_v1  ;;  %1994 = vmatprep.subr.bf16.mxu1 %v13183_v2  ;;  %v13227_v1 = vld [vmem:[%s18462_s2 + $0x510] ss:$20 sps:$4 sm:$0xff]   ;;  %v13230_v2 = vld [vmem:[%s18462_s2 + $0x52c] ss:$20 sps:$4 sm:$0xff]  }
  0xb1   : > { %v2169_v3 = vor.u32 %v2168_v61, %v2164_v54  ;;  %v13283_v54 = vld [vmem:[%s18462_s2 + $0x714] ss:$20 sps:$4 sm:$0xff]  }
  0xb3   : > { %1944 = vmatpush1.bf16.msra.mxu0 %v13178_v5  ;;  %1995 = vmatpush1.bf16.msra.mxu1 %v13181_v6  ;;  %v13228_v5 = vld [vmem:[%s18462_s2 + $0x528] ss:$20 sps:$4 sm:$0xff]   ;;  %v13231_v6 = vld [vmem:[%s18462_s2 + $0x538] ss:$20 sps:$4 sm:$0xff]   ;;  %v15208_v9 = vsel %vm1598_vm1, %v2169_v3, %v2173_v4 }
  0xb4   : > { %2025 = vmatprep.subr.bf16.mxu0 %v14369_v53  ;;  %2538 = vmatprep.subr.bf16.mxu1 %v13186_v7  ;;  %v13232_v7 = vld [vmem:[%s18462_s2 + $0x550] ss:$20 sps:$4 sm:$0xff]  }
  0xb5   : > { %v13295_v3 = vld [vmem:[%s18462_s2 + $0x764] ss:$20 sps:$4 sm:$0xff]  }
  0xb6   : > { %1956 = vmatmul.mubr.bf16.vlgmr.msra.gmra.mrb[0].mxu0 %v15064_v16  ;;  %2007 = vmatmul.mubr.bf16.vlgmr.msra.gmra.mrb[0].mxu1 %v15064_v16 }
  0xb7   : > { %2026 = vmatpush1.bf16.msra.mxu0 %v13187_v17  ;;  %2539 = vmatpush1.bf16.msra.mxu1 %v13184_v14  ;;  %v13238_v14 = vld [vmem:[%s18462_s2 + $0x57c] ss:$20 sps:$4 sm:$0xff]  }
  0xb8   : > { %2027 = vmatprep.subr.bf16.mxu0 %v14369_v53  ;;  %2540 = vmatprep.subr.bf16.mxu1 %v13190_v11  ;;  %v13239_v17 = vld [vmem:[%s18462_s2 + $0x588] ss:$20 sps:$4 sm:$0xff]   ;;  %v15239_v11 = vor.u32 %v2187_v15, %v2173_v4 }
  0xb9   : > { %10869 = vmatprep.mubr.msk.bf16.mxu0 %vm924_vm0, %v15074_v19  ;;  %10871 = vmatprep.mubr.msk.bf16.mxu1 %vm924_vm0, %v15074_v19  ;;  %v13299_v15 = vld [vmem:[%s18462_s2 + $0x788] ss:$20 sps:$4 sm:$0xff]  }
  0xbb   : > { %2028 = vmatpush1.bf16.msra.mxu0 %v13191_v25  ;;  %2541 = vmatpush1.bf16.msra.mxu1 %v13188_v21  ;;  %v13246_v21 = vld [vmem:[%s18462_s2 + $0x5cc] ss:$20 sps:$4 sm:$0xff]   ;;  %v13250_v25 = vld [vmem:[%s18462_s2 + $0x5f4] ss:$20 sps:$4 sm:$0xff]  }
  0xbc   : > { %2029 = vmatprep.subr.bf16.mxu0 %v14369_v53  ;;  %2542 = vmatprep.subr.bf16.mxu1 %v13194_v24  ;;  %v13248_v24 = vld [vmem:[%s18462_s2 + $0x5f0] ss:$20 sps:$4 sm:$0xff]  }
  0xbe   : > { %1966 = vmatmul.mubr.bf16.gmra.mrb[20].mxu0 %v15093_v26  ;;  %2017 = vmatmul.mubr.bf16.gmra.mrb[20].mxu1 %v15093_v26 }
  0xbf   : > { %2030 = vmatpush1.bf16.msra.mxu0 %v13195_v32  ;;  %2543 = vmatpush1.bf16.msra.mxu1 %v13192_v27  ;;  %v13254_v27 = vld [vmem:[%s18462_s2 + $0x61c] ss:$20 sps:$4 sm:$0xff]   ;;  %v13258_v32 = vld [vmem:[%s18462_s2 + $0x644] ss:$20 sps:$4 sm:$0xff]  }
  0xc0   : > { %2031 = vmatprep.subr.bf16.mxu0 %v14369_v53  ;;  %2544 = vmatprep.subr.bf16.mxu1 %v13198_v33  ;;  %v13256_v33 = vld [vmem:[%s18462_s2 + $0x640] ss:$20 sps:$4 sm:$0xff]  }
  0xc1   : > { %10872 = vmatprep.mubr.msk.bf16.mxu0 %vm924_vm0, %v14955_v30  ;;  %10997 = vmatprep.mubr.msk.bf16.mxu1 %vm924_vm0, %v15114_v35  ;;  %v13206_v30 = vld [vmem:[%s18462_s2 + $0x5fc] ss:$20 sps:$4 sm:$0xff]  }
  0xc3   : > { %2032 = vmatpush1.bf16.msra.mxu0 %v13199_v36  ;;  %2545 = vmatpush1.bf16.msra.mxu1 %v13196_v34  ;;  %v13259_v34 = vld [vmem:[%s18462_s2 + $0x650] ss:$20 sps:$4 sm:$0xff]   ;;  %v13260_v36 = vld [vmem:[%s18462_s2 + $0x668] ss:$20 sps:$4 sm:$0xff]  }
  0xc4   : > { %2033 = vmatprep.subr.bf16.mxu0 %v14369_v53  ;;  %2546 = vmatprep.subr.bf16.mxu1 %v13202_v37  ;;  %v13263_v37 = vld [vmem:[%s18462_s2 + $0x678] ss:$20 sps:$4 sm:$0xff]  }
  0xc7   : > { %2034 = vmatpush1.bf16.msra.mxu0 %v13203_v39  ;;  %2547 = vmatpush1.bf16.msra.mxu1 %v13200_v38  ;;  %v13266_v38 = vld [vmem:[%s18462_s2 + $0x694] ss:$20 sps:$4 sm:$0xff]   ;;  %v13264_v39 = vld [vmem:[%s18462_s2 + $0x690] ss:$20 sps:$4 sm:$0xff]  }
  0xc8   : > { %2035 = vmatprep.subr.bf16.mxu0 %v14369_v53  ;;  %2548 = vmatprep.subr.bf16.mxu1 %v13206_v30  ;;  %v13267_v30 = vld [vmem:[%s18462_s2 + $0x6a0] ss:$20 sps:$4 sm:$0xff]  }
  0xcb   : > { %2036 = vmatpush1.bf16.msra.mxu0 %v13207_v41  ;;  %2549 = vmatpush1.bf16.msra.mxu1 %v13204_v40  ;;  %v13270_v40 = vld [vmem:[%s18462_s2 + $0x6bc] ss:$20 sps:$4 sm:$0xff]   ;;  %v2653_v41 = vld [vmem:[%s14668_s28 + $0x8] sm:$0xfc] }
  0xcc   : > { %2037 = vmatprep.subr.bf16.mxu0 %v14369_v53  ;;  %2550 = vmatprep.subr.bf16.mxu1 %v13210_v42  ;;  %v2655_v42 = vld [vmem:[%s14668_s28 + $0x28] sm:$0x3f]  ;;  %v2657_v48 = vpack.c.bf16 %v14354_v47, %v2653_v41 }
  0xce   : > { %v2735_v55 = vrot.slane %v2657_v48, 1 }
  0xcf   : > { %2038 = vmatpush1.bf16.msra.mxu0 %v13211_v45  ;;  %2551 = vmatpush1.bf16.msra.mxu1 %v13208_v44  ;;  %v13271_v44 = vld [vmem:[%s18462_s2 + $0x6c8] ss:$20 sps:$4 sm:$0xff]   ;;  %v13274_v45 = vld [vmem:[%s18462_s2 + $0x6e4] ss:$20 sps:$4 sm:$0xff]  }
  0xd0   : > { %2039 = vmatprep.subr.bf16.mxu0 %v14369_v53  ;;  %2552 = vmatprep.subr.bf16.mxu1 %v13214_v46  ;;  %v13277_v46 = vld [vmem:[%s18462_s2 + $0x6ec] ss:$20 sps:$4 sm:$0xff]  }
  0xd3   : > { %2040 = vmatpush1.bf16.msra.mxu0 %v13215_v50  ;;  %2553 = vmatpush1.bf16.msra.mxu1 %v13212_v49  ;;  %v2659_v49 = vpack.c.bf16 %v2655_v42, %v2655_v42  ;;  %v13272_v50 = vld [vmem:[%s18462_s2 + $0x6e0] ss:$20 sps:$4 sm:$0xff]  }
  0xd4   : > { %2041 = vmatprep.subr.bf16.mxu0 %v14369_v53  ;;  %2554 = vmatprep.subr.bf16.mxu1 %v13218_v51  ;;  %v13275_v51 = vld [vmem:[%s18462_s2 + $0x6e8] ss:$20 sps:$4 sm:$0xff]  }
  0xd7   : > { %2042 = vmatpush1.bf16.msra.mxu0 %v13219_v57  ;;  %2555 = vmatpush1.bf16.msra.mxu1 %v13216_v56  ;;  %v15349_v56 = vrot.slane %v2659_v49, 1  ;;  %v13278_v57 = vld [vmem:[%s18462_s2 + $0x708] ss:$20 sps:$4 sm:$0xff]  }
  0xd8   : > { %2043 = vmatprep.subr.bf16.mxu0 %v14369_v53  ;;  %2556 = vmatprep.subr.bf16.mxu1 %v13222_v28  ;;  %v13286_v28 = vld [vmem:[%s18462_s2 + $0x734] ss:$20 sps:$4 sm:$0xff]  }
  0xdb   : > { %2044 = vmatpush1.bf16.msra.mxu0 %v13223_v60  ;;  %2557 = vmatpush1.bf16.msra.mxu1 %v13220_v59  ;;  %v13289_v59 = vld [vmem:[%s18462_s2 + $0x73c] ss:$20 sps:$4 sm:$0xff]  }
  0xdc   : > { %2045 = vmatprep.subr.bf16.mxu0 %v14369_v53  ;;  %2558 = vmatprep.subr.bf16.mxu1 %v13226_v63  ;;  %v13287_v63 = vld [vmem:[%s18462_s2 + $0x738] ss:$20 sps:$4 sm:$0xff]  }
  0xdf   : > { %2046 = vmatpush1.bf16.msra.mxu0 %v13227_v1  ;;  %2559 = vmatpush1.bf16.msra.mxu1 %v13224_v0 }
  0xe0   : > { %2487 = vmatprep.subr.bf16.mxu0 %v13230_v2  ;;  %2589 = vmatprep.subr.bf16.mxu1 %v14369_v53  ;;  %v13292_v2 = vld [vmem:[%s18462_s2 + $0x75c] ss:$20 sps:$4 sm:$0xff]  }
  0xe2   : > { %2058 = vmatmul.mubr.bf16.vlgmr.msra.gmra.mrb[24].mxu0 %v15064_v16  ;;  %2571 = vmatmul.mubr.bf16.vlgmr.msra.gmra.mrb[0].mxu1 %v15208_v9  ;;  %v13236_v16 = vld [vmem:[%s18462_s2 + $0x578] ss:$20 sps:$4 sm:$0xff]  }
  0xe3   : > { %2488 = vmatpush1.bf16.msra.mxu0 %v13228_v5  ;;  %2590 = vmatpush1.bf16.msra.mxu1 %v13231_v6 }
  0xe4   : > { %2489 = vmatprep.subr.bf16.mxu0 %v13234_v10  ;;  %2591 = vmatprep.subr.bf16.mxu1 %v14369_v53  ;;  %v13293_v10 = vld [vmem:[%s18462_s2 + $0x760] ss:$20 sps:$4 sm:$0xff]  }
  0xe5   : > { %10873 = vmatprep.mubr.msk.bf16.mxu0 %vm924_vm0, %v15074_v19  ;;  %10998 = vmatprep.mubr.msk.bf16.mxu1 %vm924_vm0, %v15221_v13  ;;  %v13240_v19 = vld [vmem:[%s18462_s2 + $0x5a0] ss:$20 sps:$4 sm:$0xff]  }
  0xe7   : > { %2490 = vmatpush1.bf16.msra.mxu0 %v13232_v7  ;;  %2592 = vmatpush1.bf16.msra.mxu1 %v13235_v12  ;;  %v13298_v7 = vld [vmem:[%s18462_s2 + $0x784] ss:$20 sps:$4 sm:$0xff]   ;;  %v13301_v12 = vld [vmem:[%s18462_s2 + $0x78c] ss:$20 sps:$4 sm:$0xff]  }
  0xe8   : > { %2491 = vmatprep.subr.bf16.mxu0 %v13238_v14  ;;  %2593 = vmatprep.subr.bf16.mxu1 %v14369_v53  ;;  %v13296_v14 = vld [vmem:[%s18462_s2 + $0x780] ss:$20 sps:$4 sm:$0xff]  }
  0xea   : > { %2066 = vmatmul.mubr.bf16.gmra.mrb[28].mxu0 %v15093_v26  ;;  %2581 = vmatmul.mubr.bf16.gmra.mrb[24].mxu1 %v15239_v11  ;;  %v13251_v26 = vld [vmem:[%s18462_s2 + $0x600] ss:$20 sps:$4 sm:$0xff]  }
  0xeb   : > { %2492 = vmatpush1.bf16.msra.mxu0 %v13236_v16  ;;  %2594 = vmatpush1.bf16.msra.mxu1 %v13239_v17  ;;  %v13304_v16 = vld [vmem:[%s18462_s2 + $0x7ac] ss:$20 sps:$4 sm:$0xff]   ;;  %v13307_v17 = vld [vmem:[%s18462_s2 + $0x7b4] ss:$20 sps:$4 sm:$0xff]  }
  0xec   : > { %2493 = vmatprep.subr.bf16.mxu0 %v13242_v18  ;;  %2595 = vmatprep.subr.bf16.mxu1 %v14369_v53  ;;  %v13305_v18 = vld [vmem:[%s18462_s2 + $0x7b0] ss:$20 sps:$4 sm:$0xff]  }
  0xed   : > { %10995 = vmatprep.mubr.msk.bf16.mxu0 %vm924_vm0, %v15114_v35  ;;  %10999 = vmatprep.mubr.msk.bf16.mxu1 %vm924_vm0, %v15114_v35  ;;  %v13262_v35 = vld [vmem:[%s18462_s2 + $0x66c] ss:$20 sps:$4 sm:$0xff]  }
  0xef   : > { %2494 = vmatpush1.bf16.msra.mxu0 %v13240_v19  ;;  %2596 = vmatpush1.bf16.msra.mxu1 %v13243_v20  ;;  %v13310_v19 = vld [vmem:[%s18462_s2 + $0x7d4] ss:$20 sps:$4 sm:$0xff]   ;;  %v13313_v20 = vld [vmem:[%s18462_s2 + $0x7dc] ss:$20 sps:$4 sm:$0xff]  }
  0xf0   : > { %2495 = vmatprep.subr.bf16.mxu0 %v13246_v21  ;;  %2597 = vmatprep.subr.bf16.mxu1 %v14369_v53  ;;  %v13308_v21 = vld [vmem:[%s18462_s2 + $0x7d0] ss:$20 sps:$4 sm:$0xff]  }
  0xf3   : > { %2496 = vmatpush1.bf16.msra.mxu0 %v13244_v22  ;;  %2598 = vmatpush1.bf16.msra.mxu1 %v13247_v23  ;;  %v13311_v22 = vld [vmem:[%s18462_s2 + $0x7d8] ss:$20 sps:$4 sm:$0xff]   ;;  %v13316_v23 = vld [vmem:[%s18462_s2 + $0x7fc] ss:$20 sps:$4 sm:$0xff]  }
  0xf4   : > { %2497 = vmatprep.subr.bf16.mxu0 %v13250_v25  ;;  %2599 = vmatprep.subr.bf16.mxu1 %v14369_v53  ;;  %v13319_v25 = vld [vmem:[%s18462_s2 + $0x804] ss:$20 sps:$4 sm:$0xff]  }
  0xf7   : > { %2498 = vmatpush1.bf16.msra.mxu0 %v13248_v24  ;;  %2600 = vmatpush1.bf16.msra.mxu1 %v13251_v26  ;;  %v13314_v24 = vld [vmem:[%s18462_s2 + $0x7f8] ss:$20 sps:$4 sm:$0xff]   ;;  %v13317_v26 = vld [vmem:[%s18462_s2 + $0x800] ss:$20 sps:$4 sm:$0xff]  }
  0xf8   : > { %2499 = vmatprep.subr.bf16.mxu0 %v13254_v27  ;;  %2601 = vmatprep.subr.bf16.mxu1 %v14369_v53  ;;  %v13322_v27 = vld [vmem:[%s18462_s2 + $0x824] ss:$20 sps:$4 sm:$0xff]  }
  0xfb   : > { %2500 = vmatpush1.bf16.msra.mxu0 %v13252_v29  ;;  %2602 = vmatpush1.bf16.msra.mxu1 %v13255_v31  ;;  %v13325_v29 = vld [vmem:[%s18462_s2 + $0x82c] ss:$20 sps:$4 sm:$0xff]  }
  0xfc   : > { %2501 = vmatprep.subr.bf16.mxu0 %v13258_v32  ;;  %2603 = vmatprep.subr.bf16.mxu1 %v14369_v53  ;;  %v13320_v31 = vld [vmem:[%s18462_s2 + $0x820] ss:$20 sps:$4 sm:$0xff]   ;;  %v13323_v32 = vld [vmem:[%s18462_s2 + $0x828] ss:$20 sps:$4 sm:$0xff]  }
  0xff   : > { %2502 = vmatpush1.bf16.msra.mxu0 %v13256_v33  ;;  %2604 = vmatpush1.bf16.msra.mxu1 %v13259_v34  ;;  %v13328_v33 = vld [vmem:[%s18462_s2 + $0x84c] ss:$20 sps:$4 sm:$0xff]   ;;  %v13331_v34 = vld [vmem:[%s18462_s2 + $0x854] ss:$20 sps:$4 sm:$0xff]  }
 0x100   : > { %2503 = vmatprep.subr.bf16.mxu0 %v13262_v35  ;;  %2605 = vmatprep.subr.bf16.mxu1 %v14369_v53  ;;  %v2652_v35 = vld [vmem:[%s14668_s28] sm:$0xfc] }
 0x103   : > { %2504 = vmatpush1.bf16.msra.mxu0 %v13260_v36  ;;  %2606 = vmatpush1.bf16.msra.mxu1 %v13263_v37  ;;  %v2654_v36 = vld [vmem:[%s14668_s28 + $0x20] sm:$0x3f]  ;;  %v13326_v37 = vld [vmem:[%s18462_s2 + $0x848] ss:$20 sps:$4 sm:$0xff]  }
 0x104   : > { %2505 = vmatprep.subr.bf16.mxu0 %v13266_v38  ;;  %2607 = vmatprep.subr.bf16.mxu1 %v14369_v53  ;;  %v13329_v38 = vld [vmem:[%s18462_s2 + $0x850] ss:$20 sps:$4 sm:$0xff]   ;;  %v2658_v42 = vpack.c.bf16 %v2654_v36, %v2654_v36  ;;  %v13363_v36 = vld [vmem:[%s18464_s4 + $0x694] ss:$20 sps:$4 sm:$0xff]  }
 0x106   : > { %v15496_v49 = vrot.slane %v2658_v42, 1  ;;  %v13370_v42 = vld [vmem:[%s18464_s4 + $0x6c0] ss:$20 sps:$4 sm:$0xff]  }
 0x107   : > { %2506 = vmatpush1.bf16.msra.mxu0 %v13264_v39  ;;  %2608 = vmatpush1.bf16.msra.mxu1 %v13267_v30  ;;  %v13334_v39 = vld [vmem:[%s18462_s2 + $0x874] ss:$20 sps:$4 sm:$0xff]   ;;  %v13337_v30 = vld [vmem:[%s18462_s2 + $0x87c] ss:$20 sps:$4 sm:$0xff]  }
 0x108   : > { %2507 = vmatprep.subr.bf16.mxu0 %v13270_v40  ;;  %2609 = vmatprep.subr.bf16.mxu1 %v14369_v53  ;;  %v14355_v40 = vld [vmem:[%s14668_s28 + $0x10] sm:$0xff] }
 0x109   : > { %v2656_v41 = vpack.c.bf16 %v14355_v40, %v2652_v35  ;;  %v13358_v35 = vld [vmem:[%s18464_s4 + $0x670] ss:$20 sps:$4 sm:$0xff]  }
 0x10a   : > { %v13372_v40 = vld [vmem:[%s18464_s4 + $0x6c4] ss:$20 sps:$4 sm:$0xff]  }
 0x10b   : > { %2508 = vmatpush1.bf16.msra.mxu0 %v13268_v43  ;;  %2610 = vmatpush1.bf16.msra.mxu1 %v13271_v44  ;;  %v13332_v44 = vld [vmem:[%s18462_s2 + $0x870] ss:$20 sps:$4 sm:$0xff]   ;;  %v2732_v48 = vrot.slane %v2656_v41, 1  ;;  %v13367_v41 = vld [vmem:[%s18464_s4 + $0x6b8] ss:$20 sps:$4 sm:$0xff]  }
 0x10c   : > { %3032 = vmatprep.subr.bf16.mxu0 %v13274_v45  ;;  %3083 = vmatprep.subr.bf16.mxu1 %v13277_v46  ;;  %v13335_v45 = vld [vmem:[%s18462_s2 + $0x878] ss:$20 sps:$4 sm:$0xff]  }
 0x10d   : > { %v15365_v60 = vpop.f32.mrb[4].mxu0  ;;  %v15367_v61 = vpop.f32.mrb[4].mxu1 }
 0x10e   : > { %2520 = vmatmul.mubr.bf16.vlgmr.msra.gmra.mrb[0].mxu0 %v15208_v9  ;;  %2622 = vmatmul.mubr.bf16.vlgmr.msra.gmra.mrb[28].mxu1 %v15208_v9  ;;  %v15379_v0 = vpop.f32.mrb[5].mxu0  ;;  %v15381_v1 = vpop.f32.mrb[5].mxu1  ;;  %v13290_v9 = vld [vmem:[%s18462_s2 + $0x758] ss:$20 sps:$4 sm:$0xff]  }
 0x10f   : > { %3033 = vmatpush1.bf16.msra.mxu0 %v13272_v50  ;;  %3084 = vmatpush1.bf16.msra.mxu1 %v13275_v51  ;;  %v979_v4 = vpop.f32.mrb[6].mxu0  ;;  %v1030_v5 = vpop.f32.mrb[6].mxu1  ;;  %v13338_v51 = vld [vmem:[%s18462_s2 + $0x6f0] ss:$20 sps:$4 sm:$0xff]  }
 0x110   : > { %3034 = vmatprep.subr.bf16.mxu0 %v13280_v52  ;;  %3085 = vmatprep.subr.bf16.mxu1 %v13283_v54  ;;  %v980_v6 = vpop.f32.mrb[7].mxu0  ;;  %v1031_v8 = vpop.f32.mrb[7].mxu1  ;;  %v2734_v52 = vsel %vm2731_vm2, %v2732_v48, %v15496_v49  ;;  %v13339_v54 = vld [vmem:[%s18462_s2 + $0x718] ss:$20 sps:$4 sm:$0xff]   ;;  %v13342_v5 = vld [vmem:[%s18462_s2 + $0x790] ss:$20 sps:$4 sm:$0xff]  }
 0x111   : > { %10996 = vmatprep.mubr.msk.bf16.mxu0 %vm924_vm0, %v15221_v13  ;;  %11000 = vmatprep.mubr.msk.bf16.mxu1 %vm924_vm0, %v15221_v13  ;;  %v15405_v13 = vsel %vm2731_vm2, %v2735_v55, %v15349_v56  ;;  %v13343_v6 = vld [vmem:[%s18462_s2 + $0x7b8] ss:$20 sps:$4 sm:$0xff]   ;;  %v13344_v8 = vld [vmem:[%s18462_s2 + $0x7e0] ss:$20 sps:$4 sm:$0xff]  }
 0x112   : > { %v13384_v48 = vld [vmem:[%s18464_s4 + $0x714] ss:$20 sps:$4 sm:$0xff]  }
 0x113   : > { %3035 = vmatpush1.bf16.msra.mxu0 %v13278_v57  ;;  %3086 = vmatpush1.bf16.msra.mxu1 %v13281_v58 }
 0x114   : > { %3036 = vmatprep.subr.bf16.mxu0 %v13286_v28  ;;  %3087 = vmatprep.subr.bf16.mxu1 %v13289_v59 }
 0x116   : > { %2530 = vmatmul.mubr.bf16.gmra.mrb[32].mxu0 %v15239_v11  ;;  %2630 = vmatmul.mubr.bf16.gmra.mrb[32].mxu1 %v15239_v11  ;;  %v13302_v11 = vld [vmem:[%s18462_s2 + $0x7a8] ss:$20 sps:$4 sm:$0xff]  }
 0x117   : > { %3037 = vmatpush1.bf16.msra.mxu0 %v13284_v62  ;;  %3088 = vmatpush1.bf16.msra.mxu1 %v13287_v63 }
 0x118   : > { %3038 = vmatprep.subr.bf16.mxu0 %v13292_v2  ;;  %3089 = vmatprep.subr.bf16.mxu1 %v13295_v3 }
 0x119   : > { %11122 = vmatprep.mubr.msk.bf16.mxu0 %vm924_vm0, %v15405_v13  ;;  %11124 = vmatprep.mubr.msk.bf16.mxu1 %vm924_vm0, %v15405_v13 }
 0x11b   : > { %3039 = vmatpush1.bf16.msra.mxu0 %v13290_v9  ;;  %3090 = vmatpush1.bf16.msra.mxu1 %v13293_v10  ;;  %v13345_v9 = vld [vmem:[%s18462_s2 + $0x808] ss:$20 sps:$4 sm:$0xff]   ;;  %v13346_v10 = vld [vmem:[%s18462_s2 + $0x830] ss:$20 sps:$4 sm:$0xff]  }
 0x11c   : > { %3040 = vmatprep.subr.bf16.mxu0 %v13298_v7  ;;  %3091 = vmatprep.subr.bf16.mxu1 %v13301_v12  ;;  %v13347_v7 = vld [vmem:[%s18462_s2 + $0x858] ss:$20 sps:$4 sm:$0xff]  }
 0x11f   : > { %3041 = vmatpush1.bf16.msra.mxu0 %v13296_v14  ;;  %3092 = vmatpush1.bf16.msra.mxu1 %v13299_v15 }
 0x120   : > { %3042 = vmatprep.subr.bf16.mxu0 %v13304_v16  ;;  %3093 = vmatprep.subr.bf16.mxu1 %v13307_v17 }
 0x123   : > { %3043 = vmatpush1.bf16.msra.mxu0 %v13302_v11  ;;  %3094 = vmatpush1.bf16.msra.mxu1 %v13305_v18 }
 0x124   : > { %3044 = vmatprep.subr.bf16.mxu0 %v13310_v19  ;;  %3095 = vmatprep.subr.bf16.mxu1 %v13313_v20 }
 0x127   : > { %3045 = vmatpush1.bf16.msra.mxu0 %v13308_v21  ;;  %3096 = vmatpush1.bf16.msra.mxu1 %v13311_v22 }
 0x128   : > { %3046 = vmatprep.subr.bf16.mxu0 %v13316_v23  ;;  %3097 = vmatprep.subr.bf16.mxu1 %v13319_v25 }
 0x12b   : > { %3047 = vmatpush1.bf16.msra.mxu0 %v13314_v24  ;;  %3098 = vmatpush1.bf16.msra.mxu1 %v13317_v26 }
 0x12c   : > { %3048 = vmatprep.subr.bf16.mxu0 %v13322_v27  ;;  %3099 = vmatprep.subr.bf16.mxu1 %v13325_v29 }
 0x12f   : > { %3049 = vmatpush1.bf16.msra.mxu0 %v13320_v31  ;;  %3100 = vmatpush1.bf16.msra.mxu1 %v13323_v32  ;;  %v13354_v31 = vld [vmem:[%s18464_s4 + $0x64c] ss:$20 sps:$4 sm:$0xff]  }
 0x130   : > { %3050 = vmatprep.subr.bf16.mxu0 %v13328_v33  ;;  %3101 = vmatprep.subr.bf16.mxu1 %v13331_v34  ;;  %v13357_v32 = vld [vmem:[%s18464_s4 + $0x66c] ss:$20 sps:$4 sm:$0xff]   ;;  %v13360_v33 = vld [vmem:[%s18464_s4 + $0x674] ss:$20 sps:$4 sm:$0xff]  }
 0x131   : > { %v15486_v43 = vpop.f32.mrb[8].mxu0  ;;  %v13355_v34 = vld [vmem:[%s18464_s4 + $0x668] ss:$20 sps:$4 sm:$0xff]  }
 0x132   : > { %v1069_v46 = vpop.f32.mrb[9].mxu0 }
 0x133   : > { %v15494_v47 = vpop.f32.mrb[10].mxu0  ;;  %3051 = vmatpush1.bf16.msra.mxu0 %v13326_v37  ;;  %3102 = vmatpush1.bf16.msra.mxu1 %v13329_v38  ;;  %v13366_v37 = vld [vmem:[%s18464_s4 + $0x69c] ss:$20 sps:$4 sm:$0xff]  }
 0x134   : > { %v1072_v50 = vpop.f32.mrb[11].mxu0  ;;  %3052 = vmatprep.subr.bf16.mxu0 %v13334_v39  ;;  %3103 = vmatprep.subr.bf16.mxu1 %v13337_v30  ;;  %v13361_v38 = vld [vmem:[%s18464_s4 + $0x690] ss:$20 sps:$4 sm:$0xff]   ;;  %v13364_v39 = vld [vmem:[%s18464_s4 + $0x698] ss:$20 sps:$4 sm:$0xff]  }
 0x135   : > { %v13369_v30 = vld [vmem:[%s18464_s4 + $0x6bc] ss:$20 sps:$4 sm:$0xff]  }
 0x136   : > { %v13376_v46 = vld [vmem:[%s18464_s4 + $0x6e8] ss:$20 sps:$4 sm:$0xff]   ;;  %v13382_v50 = vld [vmem:[%s18464_s4 + $0x710] ss:$20 sps:$4 sm:$0xff]  }
 0x137   : > { %3053 = vmatpush1.bf16.msra.mxu0 %v13332_v44  ;;  %3104 = vmatpush1.bf16.msra.mxu1 %v13335_v45  ;;  %v13378_v44 = vld [vmem:[%s18464_s4 + $0x6ec] ss:$20 sps:$4 sm:$0xff]  }
 0x138   : > { %3134 = vmatprep.subr.bf16.mxu0 %v14369_v53  ;;  %v13373_v45 = vld [vmem:[%s18464_s4 + $0x6e0] ss:$20 sps:$4 sm:$0xff]  }
 0x139   : > { %v1075_v55 = vpop.f32.mrb[12].mxu0  ;;  %v1468_v57 = vpop.f32.mrb[8].mxu1 }
 0x13a   : > { %3065 = vmatmul.mubr.bf16.vlgmr.msra.gmra.mrb[0].mxu0 %v2734_v52  ;;  %3116 = vmatmul.mubr.bf16.vlgmr.msra.gmra.mrb[0].mxu1 %v2734_v52  ;;  %v1077_v58 = vpop.f32.mrb[13].mxu0  ;;  %v15508_v28 = vadd.f32 %v1468_v57, %v15367_v61  ;;  %v1470_v59 = vpop.f32.mrb[9].mxu1  ;;  %v13340_v61 = vld [vmem:[%s18462_s2 + $0x740] ss:$20 sps:$4 sm:$0xff]   ;;  %v13393_v57 = vld [vmem:[%s18464_s4 + $0x75c] ss:$20 sps:$4 sm:$0xff]  }
 0x13b   : > { %3135 = vmatpush1.bf16.msra.mxu0 %v13338_v51  ;;  %11123 = vmatprep.mubr.msk.bf16.mxu0 %vm924_vm0, %v15349_v56  ;;  %v1078_v62 = vpop.f32.mrb[14].mxu0  ;;  %v15513_v63 = vadd.f32 %v1470_v59, %v15381_v1  ;;  %v1472_v2 = vpop.f32.mrb[10].mxu1  ;;  %v13341_v1 = vld [vmem:[%s18462_s2 + $0x768] ss:$20 sps:$4 sm:$0xff]   ;;  %v13396_v58 = vld [vmem:[%s18464_s4 + $0x764] ss:$20 sps:$4 sm:$0xff]  }
 0x13c   : > { %3136 = vmatprep.subr.bf16.mxu0 %v14369_v53  ;;  %11125 = vmatprep.mubr.msk.bf16.mxu1 %vm924_vm0, %v15349_v56  ;;  %v1079_v3 = vpop.f32.mrb[15].mxu0  ;;  %v1473_v4 = vpop.f32.mrb[11].mxu1  ;;  %v13387_v51 = vld [vmem:[%s18464_s4 + $0x734] ss:$20 sps:$4 sm:$0xff]   ;;  %v13391_v59 = vld [vmem:[%s18464_s4 + $0x758] ss:$20 sps:$4 sm:$0xff]  }
 0x13d   : > { %v13394_v62 = vld [vmem:[%s18464_s4 + $0x760] ss:$20 sps:$4 sm:$0xff]   ;;  %v13399_v2 = vld [vmem:[%s18464_s4 + $0x784] ss:$20 sps:$4 sm:$0xff]  }
 0x13e   : > { %v13402_v3 = vld [vmem:[%s18464_s4 + $0x78c] ss:$20 sps:$4 sm:$0xff]  }
 0x13f   : > { %3137 = vmatpush1.bf16.msra.mxu0 %v13339_v54  ;;  %v13385_v54 = vld [vmem:[%s18464_s4 + $0x730] ss:$20 sps:$4 sm:$0xff]   ;;  %v13397_v4 = vld [vmem:[%s18464_s4 + $0x780] ss:$20 sps:$4 sm:$0xff]  }
 0x140   : > { %3138 = vmatprep.subr.bf16.mxu0 %v14369_v53 }
 0x142   : > { %3075 = vmatmul.mubr.bf16.gmra.mrb[36].mxu0 %v15496_v49  ;;  %3126 = vmatmul.mubr.bf16.gmra.mrb[36].mxu1 %v15496_v49 }
 0x143   : > { %3139 = vmatpush1.bf16.msra.mxu0 %v13340_v61  ;;  %11126 = vmatprep.mubr.msk.bf16.mxu0 %vm924_vm0, %v15405_v13  ;;  %v13348_v13 = vld [vmem:[%s18462_s2 + $0x880] ss:$20 sps:$4 sm:$0xff]   ;;  %v13400_v61 = vld [vmem:[%s18464_s4 + $0x788] ss:$20 sps:$4 sm:$0xff]  }
 0x144   : > { %3140 = vmatprep.subr.bf16.mxu0 %v14369_v53 }
 0x147   : > { %3141 = vmatpush1.bf16.msra.mxu0 %v13341_v1  ;;  %v13405_v1 = vld [vmem:[%s18464_s4 + $0x7ac] ss:$20 sps:$4 sm:$0xff]  }
 0x148   : > { %3142 = vmatprep.subr.bf16.mxu0 %v14369_v53 }
 0x14b   : > { %3143 = vmatpush1.bf16.msra.mxu0 %v13342_v5  ;;  %v13408_v5 = vld [vmem:[%s18464_s4 + $0x7b4] ss:$20 sps:$4 sm:$0xff]  }
 0x14c   : > { %3144 = vmatprep.subr.bf16.mxu0 %v14369_v53 }
 0x14f   : > { %3145 = vmatpush1.bf16.msra.mxu0 %v13343_v6  ;;  %v13403_v6 = vld [vmem:[%s18464_s4 + $0x7a8] ss:$20 sps:$4 sm:$0xff]  }
 0x150   : > { %3146 = vmatprep.subr.bf16.mxu0 %v14369_v53 }
 0x153   : > { %3147 = vmatpush1.bf16.msra.mxu0 %v13344_v8  ;;  %v13406_v8 = vld [vmem:[%s18464_s4 + $0x7b0] ss:$20 sps:$4 sm:$0xff]  }
 0x154   : > { %3148 = vmatprep.subr.bf16.mxu0 %v14369_v53 }
 0x157   : > { %3149 = vmatpush1.bf16.msra.mxu0 %v13345_v9 }
 0x158   : > { %3150 = vmatprep.subr.bf16.mxu0 %v14369_v53 }
 0x15b   : > { %3151 = vmatpush1.bf16.msra.mxu0 %v13346_v10 }
 0x15c   : > { %3152 = vmatprep.subr.bf16.mxu0 %v14369_v53 }
 0x15d   : > { %v1509_v12 = vpop.f32.mrb[12].mxu1 }
 0x15e   : > { %v15558_v14 = vadd.f32 %v1509_v12, %v15486_v43  ;;  %v1511_v15 = vpop.f32.mrb[13].mxu1  ;;  %v13375_v43 = vld [vmem:[%s18464_s4 + $0x6e4] ss:$20 sps:$4 sm:$0xff]  }
 0x15f   : > { %v1512_v16 = vpop.f32.mrb[14].mxu1  ;;  %3153 = vmatpush1.bf16.msra.mxu0 %v13347_v7 }
 0x160   : > { %v15561_v17 = vadd.f32 %v1512_v16, %v15494_v47  ;;  %3154 = vmatprep.subr.bf16.mxu0 %v14369_v53  ;;  %v1514_v11 = vpop.f32.mrb[15].mxu1  ;;  %v13381_v47 = vld [vmem:[%s18464_s4 + $0x70c] ss:$20 sps:$4 sm:$0xff]   ;;  %v13411_v16 = vld [vmem:[%s18464_s4 + $0x7d4] ss:$20 sps:$4 sm:$0xff]  }
 0x163   : > { %3155 = vmatpush1.bf16.msra.mxu0 %v13348_v13 }
 0x164   : > { %5073 = vmatprep.subr.bf16.mxu0 %v13354_v31  ;;  %v13426_v31 = vld [vmem:[%s18464_s4 + $0x82c] ss:$20 sps:$4 sm:$0xff]  }
 0x165   : > { %v1417_v18 = vpop.f32.mrb[16].mxu0  ;;  %v1517_v19 = vpop.f32.mrb[16].mxu1 }
 0x166   : > { %v15565_v20 = vadd.f32 %v1417_v18, %v15365_v60  ;;  %v15567_v21 = vadd.f32 %v1517_v19, %v1075_v55  ;;  %v1419_v22 = vpop.f32.mrb[17].mxu0  ;;  %3167 = vmatmul.mubr.bf16.vlgmr.msra.gmra.mrb[40].mxu0 %v2734_v52  ;;  %v1519_v23 = vpop.f32.mrb[17].mxu1  ;;  %v13351_v60 = vld [vmem:[%s18464_s4 + $0x644] ss:$20 sps:$4 sm:$0xff]   ;;  %v13390_v52 = vld [vmem:[%s18464_s4 + $0x73c] ss:$20 sps:$4 sm:$0xff]  }
 0x167   : > { %v15570_v25 = vadd.f32 %v1419_v22, %v15379_v0  ;;  %11127 = vmatprep.mubr.msk.bf16.mxu0 %vm924_vm0, %v15349_v56  ;;  %v1421_v24 = vpop.f32.mrb[18].mxu0  ;;  %v1520_v26 = vpop.f32.mrb[18].mxu1  ;;  %v13349_v0 = vld [vmem:[%s18464_s4 + $0x640] ss:$20 sps:$4 sm:$0xff]   ;;  %v13352_v56 = vld [vmem:[%s18464_s4 + $0x648] ss:$20 sps:$4 sm:$0xff]   ;;  %4920 = vmatprep.subr.bf16.mxu1 %v13351_v60 }
 0x168   : > { %v1422_v27 = vpop.f32.mrb[19].mxu0  ;;  %v1521_v29 = vpop.f32.mrb[19].mxu1  ;;  %4921 = vmatpush1.bf16.msra.mxu1 %v13349_v0  ;;  %5074 = vmatpush1.bf16.msra.mxu0 %v13352_v56  ;;  %v13388_v55 = vld [vmem:[%s18464_s4 + $0x738] ss:$20 sps:$4 sm:$0xff]   ;;  %v13421_v0 = vld [vmem:[%s18464_s4 + $0x820] ss:$20 sps:$4 sm:$0xff]  }
 0x169   : > { %4922 = vmatprep.subr.bf16.mxu1 %v13357_v32  ;;  %5075 = vmatprep.subr.bf16.mxu0 %v13360_v33  ;;  %v13420_v26 = vld [vmem:[%s18464_s4 + $0x804] ss:$20 sps:$4 sm:$0xff]   ;;  %v13418_v29 = vld [vmem:[%s18464_s4 + $0x800] ss:$20 sps:$4 sm:$0xff]   ;;  %v13424_v56 = vld [vmem:[%s18464_s4 + $0x828] ss:$20 sps:$4 sm:$0xff]  }
 0x16a   : > { %v13415_v27 = vld [vmem:[%s18464_s4 + $0x7f8] ss:$20 sps:$4 sm:$0xff]   ;;  %v13427_v32 = vld [vmem:[%s18464_s4 + $0x848] ss:$20 sps:$4 sm:$0xff]   ;;  %vm10479_vm0 = vcmask 1040384  }
 0x16b   : > { %v13423_v60 = vld [vmem:[%s18464_s4 + $0x824] ss:$20 sps:$4 sm:$0xff]   ;;  %v13429_v33 = vld [vmem:[%s18464_s4 + $0x84c] ss:$20 sps:$4 sm:$0xff]  }
 0x16c   : > { %4923 = vmatpush1.bf16.msra.mxu1 %v13355_v34  ;;  %5076 = vmatpush1.bf16.msra.mxu0 %v13358_v35  ;;  %v13432_v34 = vld [vmem:[%s18464_s4 + $0x854] ss:$20 sps:$4 sm:$0xff]  }
 0x16d   : > { %4924 = vmatprep.subr.bf16.mxu1 %v13363_v36  ;;  %5077 = vmatprep.subr.bf16.mxu0 %v13366_v37  ;;  %v13435_v35 = vld [vmem:[%s18464_s4 + $0x874] ss:$20 sps:$4 sm:$0xff]   ;;  %v13430_v36 = vld [vmem:[%s18464_s4 + $0x850] ss:$20 sps:$4 sm:$0xff]  }
 0x16e   : > { %3175 = vmatmul.mubr.bf16.gmra.mrb[44].mxu0 %v15496_v49  ;;  %v13379_v49 = vld [vmem:[%s18464_s4 + $0x708] ss:$20 sps:$4 sm:$0xff]   ;;  %v13433_v37 = vld [vmem:[%s18464_s4 + $0x870] ss:$20 sps:$4 sm:$0xff]  }
 0x170   : > { %4925 = vmatpush1.bf16.msra.mxu1 %v13361_v38  ;;  %5078 = vmatpush1.bf16.msra.mxu0 %v13364_v39  ;;  %v13438_v38 = vld [vmem:[%s18464_s4 + $0x87c] ss:$20 sps:$4 sm:$0xff]  }
 0x171   : > { %4926 = vmatprep.subr.bf16.mxu1 %v13369_v30  ;;  %5079 = vmatprep.subr.bf16.mxu0 %v13372_v40  ;;  %v13441_v39 = vld [vmem:[%s18464_s4 + $0x89c] ss:$20 sps:$4 sm:$0xff]   ;;  %v13436_v30 = vld [vmem:[%s18464_s4 + $0x878] ss:$20 sps:$4 sm:$0xff]  }
 0x172   : > { %v13444_v40 = vld [vmem:[%s18464_s4 + $0x8a4] ss:$20 sps:$4 sm:$0xff]  }
 0x174   : > { %4927 = vmatpush1.bf16.msra.mxu1 %v13367_v41  ;;  %5080 = vmatpush1.bf16.msra.mxu0 %v13370_v42  ;;  %v13439_v41 = vld [vmem:[%s18464_s4 + $0x898] ss:$20 sps:$4 sm:$0xff]   ;;  %v13442_v42 = vld [vmem:[%s18464_s4 + $0x8a0] ss:$20 sps:$4 sm:$0xff]  }
 0x175   : > { %4928 = vmatprep.subr.bf16.mxu1 %v13375_v43  ;;  %5081 = vmatprep.subr.bf16.mxu0 %v13378_v44  ;;  %v13447_v43 = vld [vmem:[%s18464_s4 + $0x8c4] ss:$20 sps:$4 sm:$0xff]   ;;  %v13450_v44 = vld [vmem:[%s18464_s4 + $0x8cc] ss:$20 sps:$4 sm:$0xff]  }
 0x178   : > { %4929 = vmatpush1.bf16.msra.mxu1 %v13373_v45  ;;  %5082 = vmatpush1.bf16.msra.mxu0 %v13376_v46 }
 0x179   : > { %4930 = vmatprep.subr.bf16.mxu1 %v13381_v47  ;;  %5083 = vmatprep.subr.bf16.mxu0 %v13384_v48 }
 0x17c   : > { %4931 = vmatpush1.bf16.msra.mxu1 %v13379_v49  ;;  %5084 = vmatpush1.bf16.msra.mxu0 %v13382_v50 }
 0x17d   : > { %4932 = vmatprep.subr.bf16.mxu1 %v13387_v51  ;;  %5085 = vmatprep.subr.bf16.mxu0 %v13390_v52 }
 0x180   : > { %4933 = vmatpush1.bf16.msra.mxu1 %v13385_v54  ;;  %5086 = vmatpush1.bf16.msra.mxu0 %v13388_v55 }
 0x181   : > { %4934 = vmatprep.subr.bf16.mxu1 %v13393_v57  ;;  %5087 = vmatprep.subr.bf16.mxu0 %v13396_v58 }
 0x184   : > { %4935 = vmatpush1.bf16.msra.mxu1 %v13391_v59  ;;  %5088 = vmatpush1.bf16.msra.mxu0 %v13394_v62 }
 0x185   : > { %4936 = vmatprep.subr.bf16.mxu1 %v13399_v2  ;;  %5089 = vmatprep.subr.bf16.mxu0 %v13402_v3 }
 0x188   : > { %4937 = vmatpush1.bf16.msra.mxu1 %v13397_v4  ;;  %5090 = vmatpush1.bf16.msra.mxu0 %v13400_v61 }
 0x189   : > { %4938 = vmatprep.subr.bf16.mxu1 %v13405_v1  ;;  %5091 = vmatprep.subr.bf16.mxu0 %v13408_v5 }
 0x18c   : > { %4939 = vmatpush1.bf16.msra.mxu1 %v13403_v6  ;;  %5092 = vmatpush1.bf16.msra.mxu0 %v13406_v8 }
 0x18d   : > { %4940 = vmatprep.subr.bf16.mxu1 %v13411_v16 }
 0x191   : > { %v1967_v9 = vpop.f32.mrb[20].mxu0  ;;  %v2018_v10 = vpop.f32.mrb[20].mxu1 }
 0x192   : > { %v15696_v7 = vadd.f32 %v1967_v9, %v15565_v20  ;;  %v15699_v12 = vadd.f32 %v2018_v10, %v15508_v28  ;;  %v1969_v13 = vpop.f32.mrb[21].mxu0  ;;  %v2020_v15 = vpop.f32.mrb[21].mxu1  ;;  %v13409_v20 = vld [vmem:[%s18464_s4 + $0x7d0] ss:$20 sps:$4 sm:$0xff]   ;;  %v13412_v28 = vld [vmem:[%s18464_s4 + $0x7d8] ss:$20 sps:$4 sm:$0xff]  }
 0x193   : > { %v15705_v11 = vadd.f32 %v1969_v13, %v15570_v25  ;;  %v15708_v18 = vadd.f32 %v2020_v15, %v15513_v63  ;;  %v1971_v19 = vpop.f32.mrb[22].mxu0  ;;  %v2022_v22 = vpop.f32.mrb[22].mxu1  ;;  %v13414_v25 = vld [vmem:[%s18464_s4 + $0x7dc] ss:$20 sps:$4 sm:$0xff]   ;;  %4941 = vmatpush1.bf16.msra.mxu1 %v13409_v20  ;;  %v3199_v20 = vlaneseq }
 0x194   : > { %v1972_v23 = vpop.f32.mrb[23].mxu0  ;;  %v2023_v24 = vpop.f32.mrb[23].mxu1  ;;  %5093 = vmatprep.subr.bf16.mxu0 %v13414_v25  ;;  %v13417_v63 = vld [vmem:[%s18464_s4 + $0x7fc] ss:$20 sps:$4 sm:$0xff]  }
 0x195   : > { %5094 = vmatpush1.bf16.msra.mxu0 %v13412_v28  ;;  %4942 = vmatprep.subr.bf16.mxu1 %v13417_v63  ;;  %v15803_v28 = vshrl.u32 %v3199_v20, 7  ;;  %vm18048_vm10 = vcmp.lt.s32.totalorder %v3199_v20, 192 }
 0x196   : > { %5095 = vmatprep.subr.bf16.mxu0 %v13420_v26 }
 0x197   : > { %4943 = vmatpush1.bf16.msra.mxu1 %v13415_v27  ;;  %v15806_v23 = vsub.s32 0, %v15803_v28  ;;  %v3209_v24 = vsub.s32 2, %v15803_v28  ;;  %v3213_v25 = vsub.s32 3, %v15803_v28 }
 0x198   : > { %4944 = vmatprep.subr.bf16.mxu1 %v13423_v60 }
 0x199   : > { %5096 = vmatpush1.bf16.msra.mxu0 %v13418_v29 }
 0x19a   : > { %5097 = vmatprep.subr.bf16.mxu0 %v13426_v31 }
 0x19b   : > { %4945 = vmatpush1.bf16.msra.mxu1 %v13421_v0 }
 0x19c   : > { %4946 = vmatprep.subr.bf16.mxu1 %v13429_v33 }
 0x19d   : > { %5098 = vmatpush1.bf16.msra.mxu0 %v13424_v56 }
 0x19e   : > { %5099 = vmatprep.subr.bf16.mxu0 %v13432_v34 }
 0x19f   : > { %4947 = vmatpush1.bf16.msra.mxu1 %v13427_v32 }
 0x1a0   : > { %4948 = vmatprep.subr.bf16.mxu1 %v13435_v35 }
 0x1a1   : > { %5100 = vmatpush1.bf16.msra.mxu0 %v13430_v36 }
 0x1a2   : > { %5101 = vmatprep.subr.bf16.mxu0 %v13438_v38 }
 0x1a3   : > { %4949 = vmatpush1.bf16.msra.mxu1 %v13433_v37 }
 0x1a4   : > { %4950 = vmatprep.subr.bf16.mxu1 %v13441_v39 }
 0x1a5   : > { %5102 = vmatpush1.bf16.msra.mxu0 %v13436_v30 }
 0x1a6   : > { %5103 = vmatprep.subr.bf16.mxu0 %v13444_v40 }
 0x1a7   : > { %4951 = vmatpush1.bf16.msra.mxu1 %v13439_v41 }
 0x1a8   : > { %4971 = vmatprep.subr.bf16.mxu1 %v13447_v43 }
 0x1a9   : > { %5104 = vmatpush1.bf16.msra.mxu0 %v13442_v42 }
 0x1aa   : > { %5124 = vmatprep.subr.bf16.mxu0 %v13450_v44 }
 0x1b5   : > { %v2059_v45 = vpop.f32.mrb[24].mxu0 }
 0x1b6   : > { %v2077_v46 = vadd.f32 %v2059_v45, %v15558_v14  ;;  %v2061_v47 = vpop.f32.mrb[25].mxu0 }
 0x1b7   : > { %v2062_v48 = vpop.f32.mrb[26].mxu0 }
 0x1b8   : > { %v2082_v49 = vadd.f32 %v2062_v48, %v15561_v17  ;;  %v2064_v50 = vpop.f32.mrb[27].mxu0 }
 0x1bd   : > { %v2067_v51 = vpop.f32.mrb[28].mxu0  ;;  %v2582_v52 = vpop.f32.mrb[24].mxu1 }
 0x1be   : > { %v2087_v54 = vadd.f32 %v2067_v51, %v15567_v21  ;;  %v15789_v55 = vadd.f32 %v2582_v52, %v15699_v12  ;;  %v2584_v57 = vpop.f32.mrb[25].mxu1  ;;  %v2069_v58 = vpop.f32.mrb[29].mxu0 }
 0x1bf   : > { %v15792_v59 = vadd.f32 %v2584_v57, %v15708_v18  ;;  %v2070_v62 = vpop.f32.mrb[30].mxu0  ;;  %v2586_v2 = vpop.f32.mrb[26].mxu1 }
 0x1c0   : > { %v2071_v14 = vpop.f32.mrb[31].mxu0  ;;  %v2587_v3 = vpop.f32.mrb[27].mxu1 }
 0x1e1   : > { %v2623_v4 = vpop.f32.mrb[28].mxu1 }
 0x1e2   : > { %v15794_v61 = vadd.f32 %v2623_v4, %v2077_v46  ;;  %v2625_v17 = vpop.f32.mrb[29].mxu1 }
 0x1e3   : > { %v2626_v1 = vpop.f32.mrb[30].mxu1 }
 0x1e4   : > { %v15796_v5 = vadd.f32 %v2626_v1, %v2082_v49  ;;  %v2628_v21 = vpop.f32.mrb[31].mxu1 }
 0x1e9   : > { %v2531_v6 = vpop.f32.mrb[32].mxu0  ;;  %v2631_v8 = vpop.f32.mrb[32].mxu1 }
 0x1ea   : > { %v2647_v9 = vadd.f32 %v2531_v6, %v15696_v7  ;;  %v15799_v10 = vadd.f32 %v2631_v8, %v2087_v54  ;;  %v2533_v12 = vpop.f32.mrb[33].mxu0  ;;  %v2633_v13 = vpop.f32.mrb[33].mxu1  ;;  %v15812_v7 = vld [vmem:[%s18463_s3] sm:$0x1f] }
 0x1eb   : > { %v2648_v15 = vadd.f32 %v2533_v12, %v15705_v11  ;;  %v2535_v16 = vpop.f32.mrb[34].mxu0  ;;  %v2634_v18 = vpop.f32.mrb[34].mxu1  ;;  %v15815_v11 = vsub.s32 1, %v15803_v28  ;;  %v3202_v63 = vrot.slane %v15812_v7, %v15806_v23  ;;  %v3210_v26 = vrot.slane %v15812_v7, %v3209_v24 }
 0x1ec   : > { %v2536_v19 = vpop.f32.mrb[35].mxu0  ;;  %v2635_v22 = vpop.f32.mrb[35].mxu1  ;;  %v3214_v29 = vrot.slane %v15812_v7, %v3213_v25 }
 0x1ed   : > { %v3206_v27 = vrot.slane %v15812_v7, %v15815_v11 }
 0x20d   : > { %v3066_v60 = vpop.f32.mrb[0].mxu0  ;;  %v3117_v31 = vpop.f32.mrb[0].mxu1 }
 0x20e   : > { %v3224_v0 = vadd.f32 %v3202_v63, %v3066_v60  ;;  %v3226_v56 = vadd.f32 %v3210_v26, %v3117_v31  ;;  %v3068_v32 = vpop.f32.mrb[1].mxu0  ;;  %v3119_v33 = vpop.f32.mrb[1].mxu1 }
 0x20f   : > { %v3225_v34 = vadd.f32 %v3206_v27, %v3068_v32  ;;  %v3227_v35 = vadd.f32 %v3214_v29, %v3119_v33  ;;  %v3070_v36 = vpop.f32.mrb[2].mxu0  ;;  %v3121_v37 = vpop.f32.mrb[2].mxu1 }
 0x210   : > { %v3239_v38 = vmax.f32 %v3224_v0, 0.0  ;;  %v3241_v39 = vmax.f32 %v3226_v56, 0.0  ;;  %v3229_v30 = vadd.f32 %v3202_v63, %v3070_v36  ;;  %v15828_v40 = vadd.f32 %v3210_v26, %v3121_v37  ;;  %v3072_v41 = vpop.f32.mrb[3].mxu0  ;;  %v3123_v42 = vpop.f32.mrb[3].mxu1 }
 0x211   : > { %v3240_v43 = vmax.f32 %v3225_v34, 0.0  ;;  %v3242_v44 = vmax.f32 %v3227_v35, 0.0  ;;  %v3230_v45 = vadd.f32 %v3206_v27, %v3072_v41  ;;  %v3232_v46 = vadd.f32 %v3214_v29, %v3123_v42  ;;  %v13445_v41 = vld [vmem:[%s18464_s4 + $0x8c0] ss:$20 sps:$4 sm:$0xff]  }
 0x212   : > { %3254 = vst [vmem:[#allocation2] sm:$0xff] %v3239_v38  ;;  %3256 = vst [vmem:[#allocation2 + $0x10] sm:$0xff] %v3241_v39  ;;  %v3244_v47 = vmax.f32 %v3229_v30, 0.0  ;;  %v3246_v48 = vmax.f32 %v15828_v40, 0.0  ;;  %v13540_v40 = vld [vmem:[%s18464_s4 + $0xb24] ss:$20 sps:$4 sm:$0xff]  }
 0x213   : > { %3255 = vst [vmem:[#allocation2 + $0x8] sm:$0xff] %v3240_v43  ;;  %3257 = vst [vmem:[#allocation2 + $0x18] sm:$0xff] %v3242_v44  ;;  %v3245_v49 = vmax.f32 %v3230_v45, 0.0  ;;  %v3247_v50 = vmax.f32 %v3232_v46, 0.0  ;;  %v13448_v43 = vld [vmem:[%s18464_s4 + $0x8c8] ss:$20 sps:$4 sm:$0xff]  }
 0x214   : > { %3259 = vst [vmem:[#allocation2 + $0x28] sm:$0xff] %v3244_v47  ;;  %3261 = vst [vmem:[#allocation2 + $0x38] sm:$0xff] %v3246_v48  ;;  %v13453_v45 = vld [vmem:[%s18464_s4 + $0x8ec] ss:$20 sps:$4 sm:$0xff]   ;;  %v13456_v46 = vld [vmem:[%s18464_s4 + $0x8f4] ss:$20 sps:$4 sm:$0xff]  }
 0x215   : > { %3260 = vst [vmem:[#allocation2 + $0x30] sm:$0xff] %v3245_v49  ;;  %3262 = vst [vmem:[#allocation2 + $0x40] sm:$0xff] %v3247_v50  ;;  %v3076_v51 = vpop.f32.mrb[36].mxu0  ;;  %v3127_v52 = vpop.f32.mrb[36].mxu1 }
 0x216   : > { %v3192_v54 = vadd.f32 %v3076_v51, %v2647_v9  ;;  %v3194_v57 = vadd.f32 %v3127_v52, %v15789_v55  ;;  %v3078_v58 = vpop.f32.mrb[37].mxu0  ;;  %v3129_v62 = vpop.f32.mrb[37].mxu1 }
 0x217   : > { %v3193_v2 = vadd.f32 %v3078_v58, %v2648_v15  ;;  %v3195_v14 = vadd.f32 %v3129_v62, %v15792_v59  ;;  %v3080_v3 = vpop.f32.mrb[38].mxu0  ;;  %v3131_v4 = vpop.f32.mrb[38].mxu1  ;;  %v13459_v58 = vld [vmem:[%s18464_s4 + $0x914] ss:$20 sps:$4 sm:$0xff]   ;;  %v13462_v62 = vld [vmem:[%s18464_s4 + $0x91c] ss:$20 sps:$4 sm:$0xff]  }
 0x218   : > { %v3234_v17 = vadd.f32 %v3202_v63, %v3192_v54  ;;  %v3236_v1 = vadd.f32 %v3210_v26, %v3194_v57  ;;  %v3081_v21 = vpop.f32.mrb[39].mxu0  ;;  %v3132_v6 = vpop.f32.mrb[39].mxu1  ;;  %v13451_v54 = vld [vmem:[%s18464_s4 + $0x8e8] ss:$20 sps:$4 sm:$0xff]   ;;  %v13454_v57 = vld [vmem:[%s18464_s4 + $0x8f0] ss:$20 sps:$4 sm:$0xff]  }
 0x219   : > { %v3235_v8 = vadd.f32 %v3206_v27, %v3193_v2  ;;  %v3237_v12 = vadd.f32 %v3214_v29, %v3195_v14  ;;  %v3534_v22 = vld [vmem:[#allocation2] sm:$0xfe]  ;;  %v13460_v4 = vld [vmem:[%s18464_s4 + $0x918] ss:$20 sps:$4 sm:$0xff]   ;;  %v13465_v6 = vld [vmem:[%s18464_s4 + $0x93c] ss:$20 sps:$4 sm:$0xff]  }
 0x21a   : > { %v3249_v13 = vmax.f32 %v3234_v17, 0.0  ;;  %v3251_v16 = vmax.f32 %v3236_v1, 0.0  ;;  %v3535_v18 = vld [vmem:[#allocation2 + $0x8] sm:$0xfe]  ;;  %v3544_v59 = vpack.c.bf16 %v3244_v47, %v3534_v22  ;;  %v3537_v29 = vld [vmem:[#allocation2 + $0x18] sm:$0xfe] }
 0x21b   : > { %v3250_v19 = vmax.f32 %v3235_v8, 0.0  ;;  %v3252_v9 = vmax.f32 %v3237_v12, 0.0  ;;  %v3545_v55 = vpack.c.bf16 %v3245_v49, %v3535_v18  ;;  %v3547_v38 = vpack.c.bf16 %v3247_v50, %v3537_v29  ;;  %v13457_v14 = vld [vmem:[%s18464_s4 + $0x910] ss:$20 sps:$4 sm:$0xff]   ;;  %v13463_v18 = vld [vmem:[%s18464_s4 + $0x938] ss:$20 sps:$4 sm:$0xff]  }
 0x21c   : > { %3264 = vst [vmem:[#allocation2 + $0x50] sm:$0xf] %v3249_v13  ;;  %3266 = vst [vmem:[#allocation2 + $0x60] sm:$0xf] %v3251_v16  ;;  %v3798_v60 = vshll.u32 %v3544_v59, 16  ;;  %v3796_v36 = vshrl.u32 %v3544_v59, 16 }
 0x21d   : > { %3265 = vst [vmem:[#allocation2 + $0x58] sm:$0xf] %v3250_v19  ;;  %3267 = vst [vmem:[#allocation2 + $0x68] sm:$0xf] %v3252_v9  ;;  %v3810_v15 = vshll.u32 %v3545_v55, 16  ;;  %v3808_v33 = vshrl.u32 %v3545_v55, 16 }
 0x21e   : > { %v3800_v56 = vrot.slane %v3798_v60, 1  ;;  %v3834_v52 = vshll.u32 %v3547_v38, 16  ;;  %v3832_v1 = vshrl.u32 %v3547_v38, 16  ;;  %v13468_v8 = vld [vmem:[%s18464_s4 + $0x944] ss:$20 sps:$4 sm:$0xff]   ;;  %v3217_v13 = vsub.s32 4, %v15803_v28 }
 0x21f   : > { %v3812_v27 = vrot.slane %v3810_v15, 1  ;;  %v13466_v19 = vld [vmem:[%s18464_s4 + $0x940] ss:$20 sps:$4 sm:$0xff]   ;;  %v13471_v22 = vld [vmem:[%s18464_s4 + $0x964] ss:$20 sps:$4 sm:$0xff]  }
 0x220   : > { %v3801_v44 = vor.u32 %v3800_v56, %v3796_v36  ;;  %v3836_v3 = vrot.slane %v3834_v52, 1  ;;  %v13474_v55 = vld [vmem:[%s18464_s4 + $0x96c] ss:$20 sps:$4 sm:$0xff]   ;;  %v3218_v59 = vrot.slane %v15812_v7, %v3217_v13  ;;  %v13472_v60 = vld [vmem:[%s18464_s4 + $0x968] ss:$20 sps:$4 sm:$0xff]  }
 0x221   : > { %v3813_v39 = vor.u32 %v3812_v27, %v3808_v33  ;;  %v13469_v15 = vld [vmem:[%s18464_s4 + $0x960] ss:$20 sps:$4 sm:$0xff]   ;;  %v13475_v33 = vld [vmem:[%s18464_s4 + $0x988] ss:$20 sps:$4 sm:$0xff]   ;;  %v13481_v38 = vld [vmem:[%s18464_s4 + $0x9b0] ss:$20 sps:$4 sm:$0xff]  }
 0x222   : > { %v3837_v16 = vor.u32 %v3836_v3, %v3832_v1  ;;  %v13480_v7 = vld [vmem:[%s18464_s4 + $0x994] ss:$20 sps:$4 sm:$0xff]   ;;  %v13487_v52 = vld [vmem:[%s18464_s4 + $0x9d8] ss:$20 sps:$4 sm:$0xff]   ;;  %v13502_v1 = vld [vmem:[%s18464_s4 + $0xa30] ss:$20 sps:$4 sm:$0xff]  }
 0x223   : > { %v3539_v63 = vld [vmem:[#allocation2 + $0x50] sm:$0x7]  ;;  %v13501_v3 = vld [vmem:[%s18464_s4 + $0xa2c] ss:$20 sps:$4 sm:$0xff]  }
 0x224   : > { %v3540_v26 = vld [vmem:[#allocation2 + $0x58] sm:$0x7]  ;;  %v3549_v31 = vpack.c.bf16 %v3539_v63, %v3539_v63  ;;  %v3542_v35 = vld [vmem:[#allocation2 + $0x68] sm:$0x7] }
 0x225   : > { %v3550_v0 = vpack.c.bf16 %v3540_v26, %v3540_v26  ;;  %v15847_v47 = vpack.c.bf16 %v3542_v35, %v3542_v35  ;;  %v13477_v26 = vld [vmem:[%s18464_s4 + $0x98c] ss:$20 sps:$4 sm:$0xff]  }
 0x226   : > { %v3803_v32 = vshll.u32 %v3549_v31, 16  ;;  %v3855_v17 = vshrl.u32 %v3549_v31, 16 }
 0x227   : > { %v3815_v34 = vshll.u32 %v3550_v0, 16  ;;  %v3858_v42 = vshrl.u32 %v3550_v0, 16  ;;  %v3839_v2 = vshll.u32 %v15847_v47, 16 }
 0x228   : > { %v3805_v37 = vrot.slane %v3803_v32, 1 }
 0x229   : > { %v3817_v30 = vrot.slane %v3815_v34, 1  ;;  %v15882_v21 = vrot.slane %v3839_v2, 1  ;;  %v13483_v34 = vld [vmem:[%s18464_s4 + $0x9b4] ss:$20 sps:$4 sm:$0xff]  }
 0x22a   : > { %v15857_v51 = vsel %vm1598_vm1, %v3801_v44, %v3805_v37  ;;  %v15890_v12 = vor.u32 %v3855_v17, %v3805_v37  ;;  %v13492_v44 = vld [vmem:[%s18464_s4 + $0x9e4] ss:$20 sps:$4 sm:$0xff]   ;;  %v13493_v2 = vld [vmem:[%s18464_s4 + $0xa00] ss:$20 sps:$4 sm:$0xff]   ;;  %v13499_v17 = vld [vmem:[%s18464_s4 + $0xa28] ss:$20 sps:$4 sm:$0xff]  }
 0x22b   : > { %v15850_v49 = vsel %vm1598_vm1, %v3813_v39, %v3817_v30  ;;  %v15852_v50 = vor.u32 %v3858_v42, %v3817_v30  ;;  %v15903_v9 = vsel %vm1598_vm1, %v3837_v16, %v15882_v21  ;;  %v13484_v39 = vld [vmem:[%s18464_s4 + $0x9b8] ss:$20 sps:$4 sm:$0xff]   ;;  %v13505_v16 = vld [vmem:[%s18464_s4 + $0xa50] ss:$20 sps:$4 sm:$0xff]  }
 0x22c   : > { %4952 = vmatprep.mubr.bf16.mxu1 %v15850_v49  ;;  %5105 = vmatprep.mubr.bf16.mxu0 %v15850_v49 }
 0x22d   : > { %4953 = vmatmul.mubr.bf16.vlgmr.msra.gmra.mrb[40].mxu1 %v15857_v51  ;;  %5106 = vmatmul.mubr.bf16.vlgmr.msra.gmra.mrb[48].mxu0 %v15857_v51 }
 0x22e   : > { %4972 = vmatpush1.bf16.msra.mxu1 %v13445_v41  ;;  %5125 = vmatpush1.bf16.msra.mxu0 %v13448_v43  ;;  %v13489_v41 = vld [vmem:[%s18464_s4 + $0x9dc] ss:$20 sps:$4 sm:$0xff]  }
 0x22f   : > { %4962 = vmatprep.mubr.bf16.mxu1 %v15852_v50  ;;  %5115 = vmatprep.mubr.bf16.mxu0 %v15852_v50 }
 0x230   : > { %4973 = vmatprep.subr.bf16.mxu1 %v13453_v45  ;;  %5126 = vmatprep.subr.bf16.mxu0 %v13456_v46 }
 0x232   : > { %4974 = vmatpush1.bf16.msra.mxu1 %v13451_v54  ;;  %5127 = vmatpush1.bf16.msra.mxu0 %v13454_v57 }
 0x233   : > { %4975 = vmatprep.subr.bf16.mxu1 %v13459_v58  ;;  %5128 = vmatprep.subr.bf16.mxu0 %v13462_v62  ;;  %v13495_v58 = vld [vmem:[%s18464_s4 + $0xa04] ss:$20 sps:$4 sm:$0xff]   ;;  %v13498_v62 = vld [vmem:[%s18464_s4 + $0xa0c] ss:$20 sps:$4 sm:$0xff]  }
 0x235   : > { %4963 = vmatmul.mubr.bf16.gmra.mrb[44].mxu1 %v15890_v12  ;;  %5116 = vmatmul.mubr.bf16.gmra.mrb[52].mxu0 %v15890_v12 }
 0x236   : > { %4976 = vmatpush1.bf16.msra.mxu1 %v13457_v14  ;;  %5129 = vmatpush1.bf16.msra.mxu0 %v13460_v4  ;;  %v13496_v14 = vld [vmem:[%s18464_s4 + $0xa08] ss:$20 sps:$4 sm:$0xff]  }
 0x237   : > { %5003 = vmatprep.mubr.bf16.mxu1 %v15903_v9  ;;  %5156 = vmatprep.mubr.bf16.mxu0 %v15903_v9  ;;  %v13504_v4 = vld [vmem:[%s18464_s4 + $0xa34] ss:$20 sps:$4 sm:$0xff]  }
 0x238   : > { %4977 = vmatprep.subr.bf16.mxu1 %v13465_v6  ;;  %5130 = vmatprep.subr.bf16.mxu0 %v13468_v8  ;;  %v13507_v6 = vld [vmem:[%s18464_s4 + $0xa54] ss:$20 sps:$4 sm:$0xff]   ;;  %v13510_v8 = vld [vmem:[%s18464_s4 + $0xa5c] ss:$20 sps:$4 sm:$0xff]  }
 0x239   : > { %v3168_v63 = vpop.f32.mrb[40].mxu0 }
 0x23a   : > { %v3186_v31 = vadd.f32 %v3168_v63, %v15794_v61  ;;  %4978 = vmatpush1.bf16.msra.mxu1 %v13463_v18  ;;  %5131 = vmatpush1.bf16.msra.mxu0 %v13466_v19  ;;  %v3170_v0 = vpop.f32.mrb[41].mxu0  ;;  %v13478_v61 = vld [vmem:[%s18464_s4 + $0x990] ss:$20 sps:$4 sm:$0xff]   ;;  %v13508_v18 = vld [vmem:[%s18464_s4 + $0xa58] ss:$20 sps:$4 sm:$0xff]  }
 0x23b   : > { %v3171_v27 = vpop.f32.mrb[42].mxu0  ;;  %4979 = vmatprep.subr.bf16.mxu1 %v13471_v22  ;;  %5132 = vmatprep.subr.bf16.mxu0 %v13474_v55  ;;  %v13513_v19 = vld [vmem:[%s18464_s4 + $0xa7c] ss:$20 sps:$4 sm:$0xff]   ;;  %v13516_v22 = vld [vmem:[%s18464_s4 + $0xa84] ss:$20 sps:$4 sm:$0xff]  }
 0x23c   : > { %v3228_v29 = vadd.f32 %v3218_v59, %v3186_v31  ;;  %v3191_v56 = vadd.f32 %v3171_v27, %v15796_v5  ;;  %v3173_v32 = vpop.f32.mrb[43].mxu0  ;;  %v13486_v5 = vld [vmem:[%s18464_s4 + $0x9bc] ss:$20 sps:$4 sm:$0xff]   ;;  %v13511_v55 = vld [vmem:[%s18464_s4 + $0xa78] ss:$20 sps:$4 sm:$0xff]  }
 0x23d   : > { %v13517_v63 = vld [vmem:[%s18464_s4 + $0xaa0] ss:$20 sps:$4 sm:$0xff]   ;;  %v13534_v32 = vld [vmem:[%s18464_s4 + $0xafc] ss:$20 sps:$4 sm:$0xff]  }
 0x23e   : > { %v3243_v35 = vmax.f32 %v3228_v29, 0.0  ;;  %v15939_v36 = vadd.f32 %v3218_v59, %v3191_v56  ;;  %4980 = vmatpush1.bf16.msra.mxu1 %v13469_v15  ;;  %5133 = vmatpush1.bf16.msra.mxu0 %v13472_v60  ;;  %v13519_v15 = vld [vmem:[%s18464_s4 + $0xaa4] ss:$20 sps:$4 sm:$0xff]   ;;  %v13522_v60 = vld [vmem:[%s18464_s4 + $0xaac] ss:$20 sps:$4 sm:$0xff]  }
 0x23f   : > { %4981 = vmatprep.subr.bf16.mxu1 %v13477_v26  ;;  %5134 = vmatprep.subr.bf16.mxu0 %v13480_v7  ;;  %v13520_v26 = vld [vmem:[%s18464_s4 + $0xaa8] ss:$20 sps:$4 sm:$0xff]   ;;  %v13525_v31 = vld [vmem:[%s18464_s4 + $0xacc] ss:$20 sps:$4 sm:$0xff]   ;;  %v3536_v27 = vld [vmem:[#allocation2 + $0x10] sm:$0xfe] }
 0x240   : > { %3258 = vst [vmem:[#allocation2 + $0x20] sm:$0xff] %v3243_v35  ;;  %v3248_v37 = vmax.f32 %v15939_v36, 0.0  ;;  %v13528_v0 = vld [vmem:[%s18464_s4 + $0xad4] ss:$20 sps:$4 sm:$0xff]   ;;  %v13526_v29 = vld [vmem:[%s18464_s4 + $0xad0] ss:$20 sps:$4 sm:$0xff]  }
 0x241   : > { %v3176_v30 = vpop.f32.mrb[44].mxu0  ;;  %v13523_v7 = vld [vmem:[%s18464_s4 + $0xac8] ss:$20 sps:$4 sm:$0xff]   ;;  %v13532_v35 = vld [vmem:[%s18464_s4 + $0xaf8] ss:$20 sps:$4 sm:$0xff]  }
 0x242   : > { %3263 = vst [vmem:[#allocation2 + $0x48] sm:$0xff] %v3248_v37  ;;  %v3196_v42 = vadd.f32 %v3176_v30, %v15799_v10  ;;  %4982 = vmatpush1.bf16.msra.mxu1 %v13475_v33  ;;  %5135 = vmatpush1.bf16.msra.mxu0 %v13478_v61  ;;  %v3178_v43 = vpop.f32.mrb[45].mxu0  ;;  %v13490_v10 = vld [vmem:[%s18464_s4 + $0x9e0] ss:$20 sps:$4 sm:$0xff]   ;;  %v3546_v61 = vpack.c.bf16 %v3246_v48, %v3536_v27  ;;  %v13571_v27 = vld [vmem:[%s18464_s4 + $0xc08] ss:$20 sps:$4 sm:$0xff]  }
 0x243   : > { %4983 = vmatprep.subr.bf16.mxu1 %v13483_v34  ;;  %5136 = vmatprep.subr.bf16.mxu0 %v13486_v5  ;;  %v3179_v45 = vpop.f32.mrb[46].mxu0  ;;  %v13531_v56 = vld [vmem:[%s18464_s4 + $0xaf4] ss:$20 sps:$4 sm:$0xff]   ;;  %v3541_v33 = vld [vmem:[#allocation2 + $0x60] sm:$0x7] }
 0x244   : > { %v3238_v46 = vadd.f32 %v3218_v59, %v3196_v42  ;;  %v3180_v54 = vpop.f32.mrb[47].mxu0  ;;  %v13514_v59 = vld [vmem:[%s18464_s4 + $0xa80] ss:$20 sps:$4 sm:$0xff]   ;;  %v13529_v34 = vld [vmem:[%s18464_s4 + $0xaf0] ss:$20 sps:$4 sm:$0xff]   ;;  %v3551_v5 = vpack.c.bf16 %v3541_v33, %v3541_v33  ;;  %v3822_v48 = vshll.u32 %v3546_v61, 16 }
 0x245   : > { %v13538_v30 = vld [vmem:[%s18464_s4 + $0xb20] ss:$20 sps:$4 sm:$0xff]   ;;  %v13543_v43 = vld [vmem:[%s18464_s4 + $0xb44] ss:$20 sps:$4 sm:$0xff]   ;;  %v3820_v45 = vshrl.u32 %v3546_v61, 16 }
 0x246   : > { %v3253_v57 = vmax.f32 %v3238_v46, 0.0  ;;  %4984 = vmatpush1.bf16.msra.mxu1 %v13481_v38  ;;  %5137 = vmatpush1.bf16.msra.mxu0 %v13484_v39  ;;  %v13537_v38 = vld [vmem:[%s18464_s4 + $0xb1c] ss:$20 sps:$4 sm:$0xff]   ;;  %v13535_v39 = vld [vmem:[%s18464_s4 + $0xb18] ss:$20 sps:$4 sm:$0xff]   ;;  %v3824_v42 = vrot.slane %v3822_v48, 1 }
 0x247   : > { %4985 = vmatprep.subr.bf16.mxu1 %v13489_v41  ;;  %5138 = vmatprep.subr.bf16.mxu0 %v13492_v44  ;;  %v3827_v41 = vshll.u32 %v3551_v5, 16  ;;  %v13546_v44 = vld [vmem:[%s18464_s4 + $0xb4c] ss:$20 sps:$4 sm:$0xff]   ;;  %v13544_v54 = vld [vmem:[%s18464_s4 + $0xb48] ss:$20 sps:$4 sm:$0xff]  }
 0x248   : > { %3268 = vst [vmem:[#allocation2 + $0x70] sm:$0xf] %v3253_v57  ;;  %v3825_v57 = vor.u32 %v3824_v42, %v3820_v45  ;;  %v13577_v36 = vld [vmem:[%s18464_s4 + $0xc30] ss:$20 sps:$4 sm:$0xff]   ;;  %v13580_v61 = vld [vmem:[%s18464_s4 + $0xc38] ss:$20 sps:$4 sm:$0xff]  }
 0x249   : > { %v3829_v46 = vrot.slane %v3827_v41, 1  ;;  %v13586_v48 = vld [vmem:[%s18464_s4 + $0xc60] ss:$20 sps:$4 sm:$0xff]   ;;  %v13590_v42 = vld [vmem:[%s18464_s4 + $0xb50] ss:$20 sps:$4 sm:$0xff]  }
 0x24a   : > { %4986 = vmatpush1.bf16.msra.mxu1 %v13487_v52  ;;  %5139 = vmatpush1.bf16.msra.mxu0 %v13490_v10  ;;  %v13541_v52 = vld [vmem:[%s18464_s4 + $0xb40] ss:$20 sps:$4 sm:$0xff]   ;;  %v3864_v10 = vshrl.u32 %v15847_v47, 16  ;;  %v13547_v47 = vld [vmem:[%s18464_s4 + $0xb68] ss:$20 sps:$4 sm:$0xff]  }
 0x24b   : > { %4987 = vmatprep.subr.bf16.mxu1 %v13495_v58  ;;  %5140 = vmatprep.subr.bf16.mxu0 %v13498_v62  ;;  %v16078_v58 = vsel %vm1598_vm1, %v3825_v57, %v3829_v46  ;;  %v13592_v45 = vld [vmem:[%s18464_s4 + $0x7b8] ss:$20 sps:$4 sm:$0xff]   ;;  %v13596_v57 = vld [vmem:[%s18464_s4 + $0xba0] ss:$20 sps:$4 sm:$0xff]  }
 0x24c   : > { %v16081_v62 = vor.u32 %v3864_v10, %v15882_v21  ;;  %v13550_v21 = vld [vmem:[%s18464_s4 + $0xb70] ss:$20 sps:$4 sm:$0xff]   ;;  %v13595_v10 = vld [vmem:[%s18464_s4 + $0x7e0] ss:$20 sps:$4 sm:$0xff]  }
 0x24e   : > { %4988 = vmatpush1.bf16.msra.mxu1 %v13493_v2  ;;  %5141 = vmatpush1.bf16.msra.mxu0 %v13496_v14  ;;  %v13549_v2 = vld [vmem:[%s18464_s4 + $0xb6c] ss:$20 sps:$4 sm:$0xff]   ;;  %v13552_v14 = vld [vmem:[%s18464_s4 + $0xb74] ss:$20 sps:$4 sm:$0xff]  }
 0x24f   : > { %4989 = vmatprep.subr.bf16.mxu1 %v13501_v3  ;;  %5142 = vmatprep.subr.bf16.mxu0 %v13504_v4  ;;  %v13555_v3 = vld [vmem:[%s18464_s4 + $0xb94] ss:$20 sps:$4 sm:$0xff]   ;;  %v13558_v4 = vld [vmem:[%s18464_s4 + $0xb9c] ss:$20 sps:$4 sm:$0xff]  }
 0x252   : > { %4990 = vmatpush1.bf16.msra.mxu1 %v13499_v17  ;;  %5143 = vmatpush1.bf16.msra.mxu0 %v13502_v1  ;;  %v3861_v17 = vshrl.u32 %v3551_v5, 16  ;;  %v13553_v1 = vld [vmem:[%s18464_s4 + $0xb90] ss:$20 sps:$4 sm:$0xff]  }
 0x253   : > { %4991 = vmatprep.subr.bf16.mxu1 %v13507_v6  ;;  %5144 = vmatprep.subr.bf16.mxu0 %v13510_v8  ;;  %v13556_v8 = vld [vmem:[%s18464_s4 + $0xb98] ss:$20 sps:$4 sm:$0xff]  }
 0x254   : > { %v16108_v6 = vor.u32 %v3861_v17, %v3829_v46  ;;  %v13601_v17 = vld [vmem:[%s18464_s4 + $0x830] ss:$20 sps:$4 sm:$0xff]  }
 0x256   : > { %4992 = vmatpush1.bf16.msra.mxu1 %v13505_v16  ;;  %5145 = vmatpush1.bf16.msra.mxu0 %v13508_v18  ;;  %v13561_v16 = vld [vmem:[%s18464_s4 + $0xbbc] ss:$20 sps:$4 sm:$0xff]   ;;  %v13564_v18 = vld [vmem:[%s18464_s4 + $0xbc4] ss:$20 sps:$4 sm:$0xff]  }
 0x257   : > { %4993 = vmatprep.subr.bf16.mxu1 %v13513_v19  ;;  %5146 = vmatprep.subr.bf16.mxu0 %v13516_v22  ;;  %v13559_v19 = vld [vmem:[%s18464_s4 + $0xbb8] ss:$20 sps:$4 sm:$0xff]   ;;  %v13562_v22 = vld [vmem:[%s18464_s4 + $0xbc0] ss:$20 sps:$4 sm:$0xff]  }
 0x25a   : > { %4994 = vmatpush1.bf16.msra.mxu1 %v13511_v55  ;;  %5147 = vmatpush1.bf16.msra.mxu0 %v13514_v59  ;;  %v13567_v55 = vld [vmem:[%s18464_s4 + $0xbe4] ss:$20 sps:$4 sm:$0xff]   ;;  %v13570_v59 = vld [vmem:[%s18464_s4 + $0xbec] ss:$20 sps:$4 sm:$0xff]  }
 0x25b   : > { %4995 = vmatprep.subr.bf16.mxu1 %v13519_v15  ;;  %5148 = vmatprep.subr.bf16.mxu0 %v13522_v60  ;;  %v13565_v15 = vld [vmem:[%s18464_s4 + $0xbe0] ss:$20 sps:$4 sm:$0xff]   ;;  %v13568_v60 = vld [vmem:[%s18464_s4 + $0xbe8] ss:$20 sps:$4 sm:$0xff]  }
 0x25e   : > { %4996 = vmatpush1.bf16.msra.mxu1 %v13517_v63  ;;  %5149 = vmatpush1.bf16.msra.mxu0 %v13520_v26  ;;  %v13573_v63 = vld [vmem:[%s18464_s4 + $0xc0c] ss:$20 sps:$4 sm:$0xff]  }
 0x25f   : > { %4997 = vmatprep.subr.bf16.mxu1 %v13525_v31  ;;  %5150 = vmatprep.subr.bf16.mxu0 %v13528_v0  ;;  %v3538_v26 = vld [vmem:[#allocation2 + $0x20] sm:$0xfe]  ;;  %v13576_v31 = vld [vmem:[%s18464_s4 + $0xc14] ss:$20 sps:$4 sm:$0xff]   ;;  %v3543_v0 = vld [vmem:[#allocation2 + $0x70] sm:$0x7] }
 0x260   : > { %v3553_v33 = vpack.c.bf16 %v3543_v0, %v3543_v0  ;;  %v13617_v0 = vld [vmem:[%s18464_s4 + $0x8d0] ss:$20 sps:$4 sm:$0xff]  }
 0x262   : > { %4998 = vmatpush1.bf16.msra.mxu1 %v13523_v7  ;;  %5151 = vmatpush1.bf16.msra.mxu0 %v13526_v29  ;;  %v3548_v7 = vpack.c.bf16 %v3248_v37, %v3538_v26  ;;  %v13574_v29 = vld [vmem:[%s18464_s4 + $0xc10] ss:$20 sps:$4 sm:$0xff]   ;;  %v3851_v5 = vshll.u32 %v3553_v33, 16  ;;  %v13616_v26 = vld [vmem:[%s18464_s4 + $0xc] ss:$20 sps:$4 sm:$0xff]  }
 0x263   : > { %4999 = vmatprep.subr.bf16.mxu1 %v13531_v56  ;;  %5152 = vmatprep.subr.bf16.mxu0 %v13534_v32  ;;  %v13579_v56 = vld [vmem:[%s18464_s4 + $0xc34] ss:$20 sps:$4 sm:$0xff]   ;;  %v13582_v32 = vld [vmem:[%s18464_s4 + $0xc3c] ss:$20 sps:$4 sm:$0xff]  }
 0x264   : > { %v3846_v37 = vshll.u32 %v3548_v7, 16  ;;  %v3853_v41 = vrot.slane %v3851_v5, 1  ;;  %v13629_v5 = vld [vmem:[%s18464_s4 + $0x80] ss:$20 sps:$4 sm:$0xff]  }
 0x266   : > { %5000 = vmatpush1.bf16.msra.mxu1 %v13529_v34  ;;  %5153 = vmatpush1.bf16.msra.mxu0 %v13532_v35  ;;  %v13585_v34 = vld [vmem:[%s18464_s4 + $0xc5c] ss:$20 sps:$4 sm:$0xff]   ;;  %v13588_v35 = vld [vmem:[%s18464_s4 + $0xc64] ss:$20 sps:$4 sm:$0xff]  }
 0x267   : > { %5001 = vmatprep.subr.bf16.mxu1 %v13537_v38  ;;  %5154 = vmatprep.subr.bf16.mxu0 %v13540_v40  ;;  %v13583_v38 = vld [vmem:[%s18464_s4 + $0xc58] ss:$20 sps:$4 sm:$0xff]   ;;  %v3848_v40 = vrot.slane %v3846_v37, 1 }
 0x268   : > { %v13624_v37 = vld [vmem:[%s18464_s4 + $0x58] ss:$20 sps:$4 sm:$0xff]  }
 0x26a   : > { %5002 = vmatpush1.bf16.msra.mxu1 %v13535_v39  ;;  %5155 = vmatpush1.bf16.msra.mxu0 %v13538_v30  ;;  %v13589_v39 = vld [vmem:[%s18464_s4 + $0x790] ss:$20 sps:$4 sm:$0xff]   ;;  %v3844_v30 = vshrl.u32 %v3548_v7, 16  ;;  %v13618_v7 = vld [vmem:[%s18464_s4 + $0xa38] ss:$20 sps:$4 sm:$0xff]  }
 0x26b   : > { %5022 = vmatprep.subr.bf16.mxu1 %v13543_v43  ;;  %5175 = vmatprep.subr.bf16.mxu0 %v13546_v44  ;;  %v13591_v44 = vld [vmem:[%s18464_s4 + $0x650] ss:$20 sps:$4 sm:$0xff]  }
 0x26c   : > { %v3849_v43 = vor.u32 %v3848_v40, %v3844_v30  ;;  %v13633_v40 = vld [vmem:[%s18464_s4 + $0xab0] ss:$20 sps:$4 sm:$0xff]   ;;  %v13641_v30 = vld [vmem:[%s18464_s4 + $0xd4] ss:$20 sps:$4 sm:$0xff]  }
 0x26d   : > { %5004 = vmatmul.mubr.bf16.vlgmr.msra.gmra.mrb[40].mxu1 %v16078_v58  ;;  %5157 = vmatmul.mubr.bf16.vlgmr.msra.gmra.mrb[48].mxu0 %v16078_v58 }
 0x26e   : > { %5013 = vmatprep.mubr.bf16.mxu1 %v16081_v62  ;;  %5023 = vmatpush1.bf16.msra.mxu1 %v13541_v52  ;;  %v3854_v46 = vsel %vm1598_vm1, %v3849_v43, %v3853_v41  ;;  %v13593_v52 = vld [vmem:[%s18464_s4 + $0xb78] ss:$20 sps:$4 sm:$0xff]   ;;  %v13643_v43 = vld [vmem:[%s18464_s4 + $0xb00] ss:$20 sps:$4 sm:$0xff]  }
 0x26f   : > { %5166 = vmatprep.mubr.bf16.mxu0 %v16081_v62  ;;  %5176 = vmatpush1.bf16.msra.mxu0 %v13544_v54  ;;  %v13594_v54 = vld [vmem:[%s18464_s4 + $0x678] ss:$20 sps:$4 sm:$0xff]  }
 0x270   : > { %5024 = vmatprep.subr.bf16.mxu1 %v13549_v2  ;;  %5177 = vmatprep.subr.bf16.mxu0 %v13552_v14  ;;  %v3867_v2 = vshrl.u32 %v3553_v33, 16  ;;  %v13597_v14 = vld [vmem:[%s18464_s4 + $0x6a0] ss:$20 sps:$4 sm:$0xff]   ;;  %v13619_v33 = vld [vmem:[%s18464_s4 + $0x30] ss:$20 sps:$4 sm:$0xff]  }
 0x272   : > { %5025 = vmatpush1.bf16.msra.mxu1 %v13547_v47  ;;  %v3869_v47 = vor.u32 %v3867_v2, %v3853_v41  ;;  %v13639_v41 = vld [vmem:[%s18464_s4 + $0xd0] ss:$20 sps:$4 sm:$0xff]  }
 0x273   : > { %5178 = vmatpush1.bf16.msra.mxu0 %v13550_v21  ;;  %5026 = vmatprep.subr.bf16.mxu1 %v13555_v3  ;;  %v13598_v21 = vld [vmem:[%s18464_s4 + $0x808] ss:$20 sps:$4 sm:$0xff]   ;;  %v13655_v2 = vld [vmem:[%s18464_s4 + $0x4] ss:$20 sps:$4 sm:$0xff]  }
 0x274   : > { %5179 = vmatprep.subr.bf16.mxu0 %v13558_v4  ;;  %v13599_v3 = vld [vmem:[%s18464_s4 + $0xbc8] ss:$20 sps:$4 sm:$0xff]  }
 0x275   : > { %5014 = vmatmul.mubr.bf16.gmra.mrb[48].mxu1 %v16108_v6  ;;  %5167 = vmatmul.mubr.bf16.gmra.mrb[56].mxu0 %v16108_v6  ;;  %v13600_v4 = vld [vmem:[%s18464_s4 + $0x6c8] ss:$20 sps:$4 sm:$0xff]  }
 0x276   : > { %5027 = vmatpush1.bf16.msra.mxu1 %v13553_v1  ;;  %5054 = vmatprep.mubr.bf16.mxu1 %v14369_v53  ;;  %v13602_v1 = vld [vmem:[%s18464_s4 + $0xbf0] ss:$20 sps:$4 sm:$0xff]  }
 0x277   : > { %5180 = vmatpush1.bf16.msra.mxu0 %v13556_v8  ;;  %5028 = vmatprep.subr.bf16.mxu1 %v13561_v16  ;;  %v13603_v8 = vld [vmem:[%s18464_s4 + $0x6f0] ss:$20 sps:$4 sm:$0xff]   ;;  %v13605_v16 = vld [vmem:[%s18464_s4 + $0xc18] ss:$20 sps:$4 sm:$0xff]  }
 0x278   : > { %5181 = vmatprep.subr.bf16.mxu0 %v13564_v18  ;;  %5207 = vmatprep.mubr.bf16.mxu0 %v14369_v53  ;;  %v13606_v18 = vld [vmem:[%s18464_s4 + $0x718] ss:$20 sps:$4 sm:$0xff]  }
 0x27a   : > { %5029 = vmatpush1.bf16.msra.mxu1 %v13559_v19  ;;  %v13607_v19 = vld [vmem:[%s18464_s4 + $0x880] ss:$20 sps:$4 sm:$0xff]  }
 0x27b   : > { %5182 = vmatpush1.bf16.msra.mxu0 %v13562_v22  ;;  %5030 = vmatprep.subr.bf16.mxu1 %v13567_v55  ;;  %v13608_v22 = vld [vmem:[%s18464_s4 + $0xc40] ss:$20 sps:$4 sm:$0xff]  }
 0x27c   : > { %5183 = vmatprep.subr.bf16.mxu0 %v13570_v59  ;;  %v13609_v55 = vld [vmem:[%s18464_s4 + $0x740] ss:$20 sps:$4 sm:$0xff]   ;;  %v13610_v59 = vld [vmem:[%s18464_s4 + $0x8a8] ss:$20 sps:$4 sm:$0xff]  }
 0x27e   : > { %5031 = vmatpush1.bf16.msra.mxu1 %v13565_v15  ;;  %v13611_v15 = vld [vmem:[%s18464_s4 + $0xc68] ss:$20 sps:$4 sm:$0xff]  }
 0x27f   : > { %5184 = vmatpush1.bf16.msra.mxu0 %v13568_v60  ;;  %5032 = vmatprep.subr.bf16.mxu1 %v13573_v63  ;;  %v13612_v60 = vld [vmem:[%s18464_s4 + $0x768] ss:$20 sps:$4 sm:$0xff]   ;;  %v13613_v63 = vld [vmem:[%s18464_s4 + $0xa10] ss:$20 sps:$4 sm:$0xff]  }
 0x280   : > { %5185 = vmatprep.subr.bf16.mxu0 %v13576_v31  ;;  %v13614_v31 = vld [vmem:[%s18464_s4 + $0x8] ss:$20 sps:$4 sm:$0xff]  }
 0x282   : > { %5033 = vmatpush1.bf16.msra.mxu1 %v13571_v27  ;;  %v3270_v27 = vld [vmem:[#allocation2 + $0x8] sm:$0xff] }
 0x283   : > { %5186 = vmatpush1.bf16.msra.mxu0 %v13574_v29  ;;  %5034 = vmatprep.subr.bf16.mxu1 %v13579_v56  ;;  %v13621_v29 = vld [vmem:[%s18464_s4 + $0x34] ss:$20 sps:$4 sm:$0xff]  }
 0x284   : > { %5187 = vmatprep.subr.bf16.mxu0 %v13582_v32  ;;  %v16275_v56 = vld [vmem:[#allocation2 + $0x30] sm:$0xff] }
 0x285   : > { %v16278_v32 = vpack.c.bf16 %v16275_v56, %v3270_v27  ;;  %v13694_v27 = vld [vmem:[%s18464_s4 + $0x23c] ss:$20 sps:$4 sm:$0xff]  }
 0x286   : > { %5035 = vmatpush1.bf16.msra.mxu1 %v13577_v36  ;;  %v13626_v36 = vld [vmem:[%s18464_s4 + $0x5c] ss:$20 sps:$4 sm:$0xff]  }
 0x287   : > { %5188 = vmatpush1.bf16.msra.mxu0 %v13580_v61  ;;  %5036 = vmatprep.subr.bf16.mxu1 %v13585_v34  ;;  %v13627_v61 = vld [vmem:[%s18464_s4 + $0x920] ss:$20 sps:$4 sm:$0xff]   ;;  %v13628_v34 = vld [vmem:[%s18464_s4 + $0xa88] ss:$20 sps:$4 sm:$0xff]  }
 0x288   : > { %5189 = vmatprep.subr.bf16.mxu0 %v13588_v35  ;;  %v13631_v35 = vld [vmem:[%s18464_s4 + $0x84] ss:$20 sps:$4 sm:$0xff]  }
 0x28a   : > { %5037 = vmatpush1.bf16.msra.mxu1 %v13583_v38  ;;  %v13632_v38 = vld [vmem:[%s18464_s4 + $0x948] ss:$20 sps:$4 sm:$0xff]  }
 0x28b   : > { %5190 = vmatpush1.bf16.msra.mxu0 %v13586_v48  ;;  %12447 = vmatprep.subr.bf16.mxu1 %v13589_v39  ;;  %v13637_v48 = vld [vmem:[%s18464_s4 + $0x970] ss:$20 sps:$4 sm:$0xff]   ;;  %v13638_v39 = vld [vmem:[%s18464_s4 + $0xad8] ss:$20 sps:$4 sm:$0xff]  }
 0x28c   : > { %12746 = vmatprep.subr.bf16.mxu0 %v13590_v42 }
 0x28d   : > { %5055 = vmatmul.mubr.bf16.vlgmr.msra.gmra.mrb[40].mxu1 %v3854_v46 }
 0x28e   : > { %5208 = vmatmul.mubr.bf16.vlgmr.msra.gmra.mrb[48].mxu0 %v3854_v46  ;;  %12448 = vmatpush3.bf16.msra.mxu1 %v13591_v44  ;;  %v13646_v44 = vld [vmem:[%s18464_s4 + $0xfc] ss:$20 sps:$4 sm:$0xff]  }
 0x28f   : > { %12747 = vmatpush3.bf16.msra.mxu0 %v13590_v42  ;;  %12449 = vmatprep.subr.bf16.mxu1 %v13592_v45  ;;  %v13642_v42 = vld [vmem:[%s18464_s4 + $0x998] ss:$20 sps:$4 sm:$0xff]  }
 0x290   : > { %12748 = vmatprep.subr.bf16.mxu0 %v13593_v52  ;;  %5064 = vmatprep.mubr.bf16.mxu1 %v14369_v53  ;;  %v13644_v45 = vld [vmem:[%s18464_s4 + $0xf8] ss:$20 sps:$4 sm:$0xff]  }
 0x291   : > { %5217 = vmatprep.mubr.bf16.mxu0 %v14369_v53 }
 0x292   : > { %12450 = vmatpush3.bf16.msra.mxu1 %v13594_v54  ;;  %v13651_v54 = vld [vmem:[%s18464_s4 + $0x124] ss:$20 sps:$4 sm:$0xff]  }
 0x293   : > { %12749 = vmatpush3.bf16.msra.mxu0 %v13593_v52  ;;  %12451 = vmatprep.subr.bf16.mxu1 %v13595_v10  ;;  %v13648_v52 = vld [vmem:[%s18464_s4 + $0xb28] ss:$20 sps:$4 sm:$0xff]   ;;  %v13649_v10 = vld [vmem:[%s18464_s4 + $0x120] ss:$20 sps:$4 sm:$0xff]  }
 0x294   : > { %12750 = vmatprep.subr.bf16.mxu0 %v13596_v57 }
 0x295   : > { %5065 = vmatmul.mubr.bf16.gmra.mrb[52].mxu1 %v3869_v47 }
 0x296   : > { %5218 = vmatmul.mubr.bf16.gmra.mrb[60].mxu0 %v3869_v47  ;;  %12452 = vmatpush3.bf16.msra.mxu1 %v13597_v14  ;;  %v13658_v14 = vld [vmem:[%s18464_s4 + $0x14c] ss:$20 sps:$4 sm:$0xff]  }
 0x297   : > { %5258 = vmatprep.mubr.bf16.mxu1 %v15850_v49  ;;  %12751 = vmatpush3.bf16.msra.mxu0 %v13596_v57  ;;  %v13604_v49 = vld [vmem:[%s18464_s4 + $0x858] ss:$20 sps:$4 sm:$0xff]   ;;  %v13652_v57 = vld [vmem:[%s18464_s4 + $0x9e8] ss:$20 sps:$4 sm:$0xff]  }
 0x298   : > { %12762 = vmatprep.mubr.bf16.mxu0 %v3854_v46  ;;  %12453 = vmatprep.subr.bf16.mxu1 %v13598_v21  ;;  %v13647_v46 = vld [vmem:[%s18464_s4 + $0x9c0] ss:$20 sps:$4 sm:$0xff]   ;;  %v13656_v21 = vld [vmem:[%s18464_s4 + $0x148] ss:$20 sps:$4 sm:$0xff]  }
 0x299   : > { %12752 = vmatprep.subr.bf16.mxu0 %v13599_v3 }
 0x29a   : > { %12454 = vmatpush3.bf16.msra.mxu1 %v13600_v4  ;;  %v13664_v4 = vld [vmem:[%s18464_s4 + $0x174] ss:$20 sps:$4 sm:$0xff]  }
 0x29b   : > { %12753 = vmatpush3.bf16.msra.mxu0 %v13599_v3  ;;  %12455 = vmatprep.subr.bf16.mxu1 %v13601_v17  ;;  %v13661_v3 = vld [vmem:[%s18464_s4 + $0x2c] ss:$20 sps:$4 sm:$0xff]   ;;  %v13659_v17 = vld [vmem:[%s18464_s4 + $0x28] ss:$20 sps:$4 sm:$0xff]  }
 0x29c   : > { %12754 = vmatprep.subr.bf16.mxu0 %v13602_v1 }
 0x29e   : > { %12456 = vmatpush3.bf16.msra.mxu1 %v13603_v8  ;;  %v13667_v8 = vld [vmem:[%s18464_s4 + $0x54] ss:$20 sps:$4 sm:$0xff]  }
 0x29f   : > { %12755 = vmatpush3.bf16.msra.mxu0 %v13602_v1  ;;  %12457 = vmatprep.subr.bf16.mxu1 %v13604_v49  ;;  %v13662_v1 = vld [vmem:[%s18464_s4 + $0x170] ss:$20 sps:$4 sm:$0xff]   ;;  %v13668_v49 = vld [vmem:[%s18464_s4 + $0x198] ss:$20 sps:$4 sm:$0xff]  }
 0x2a0   : > { %12756 = vmatprep.subr.bf16.mxu0 %v13605_v16 }
 0x2a2   : > { %12458 = vmatpush3.bf16.msra.mxu1 %v13606_v18  ;;  %v13676_v18 = vld [vmem:[%s18464_s4 + $0x1c4] ss:$20 sps:$4 sm:$0xff]  }
 0x2a3   : > { %12757 = vmatpush3.bf16.msra.mxu0 %v13605_v16  ;;  %12459 = vmatprep.subr.bf16.mxu1 %v13607_v19  ;;  %v13673_v16 = vld [vmem:[%s18464_s4 + $0x7c] ss:$20 sps:$4 sm:$0xff]   ;;  %v13671_v19 = vld [vmem:[%s18464_s4 + $0x78] ss:$20 sps:$4 sm:$0xff]  }
 0x2a4   : > { %12758 = vmatprep.subr.bf16.mxu0 %v13608_v22 }
 0x2a6   : > { %12460 = vmatpush3.bf16.msra.mxu1 %v13609_v55  ;;  %v13679_v55 = vld [vmem:[%s18464_s4 + $0xa4] ss:$20 sps:$4 sm:$0xff]  }
 0x2a7   : > { %12759 = vmatpush3.bf16.msra.mxu0 %v13608_v22  ;;  %12461 = vmatprep.subr.bf16.mxu1 %v13610_v59  ;;  %v13674_v22 = vld [vmem:[%s18464_s4 + $0x1c0] ss:$20 sps:$4 sm:$0xff]  }
 0x2a8   : > { %12760 = vmatprep.subr.bf16.mxu0 %v13611_v15  ;;  %v13677_v59 = vld [vmem:[%s18464_s4 + $0xa0] ss:$20 sps:$4 sm:$0xff]  }
 0x2aa   : > { %12462 = vmatpush3.bf16.msra.mxu1 %v13612_v60  ;;  %v13685_v60 = vld [vmem:[%s18464_s4 + $0xcc] ss:$20 sps:$4 sm:$0xff]  }
 0x2ab   : > { %12761 = vmatpush3.bf16.msra.mxu0 %v13611_v15  ;;  %12475 = vmatprep.subr.bf16.mxu1 %v13613_v63  ;;  %v13680_v15 = vld [vmem:[%s18464_s4 + $0x1e8] ss:$20 sps:$4 sm:$0xff]  }
 0x2ac   : > { %6563 = vmatprep.subr.bf16.mxu0 %v13616_v26  ;;  %v13688_v63 = vld [vmem:[%s18464_s4 + $0x214] ss:$20 sps:$4 sm:$0xff]  }
 0x2ad   : > { %5259 = vmatmul.mubr.bf16.vlgmr.msra.gmra.mrb[56].mxu1 %v15857_v51  ;;  %v13622_v51 = vld [vmem:[%s18464_s4 + $0x8f8] ss:$20 sps:$4 sm:$0xff]   ;;  %v13683_v26 = vld [vmem:[%s18464_s4 + $0xc8] ss:$20 sps:$4 sm:$0xff]  }
 0x2ae   : > { %12763 = vmatmul.mubr.bf16.vlgmr.msra.gmra.mrb[64].mxu0 %v3869_v47  ;;  %5266 = vmatprep.mubr.bf16.mxu1 %v15852_v50  ;;  %v13623_v50 = vld [vmem:[%s18464_s4 + $0xa60] ss:$20 sps:$4 sm:$0xff]  }
 0x2af   : > { %12476 = vmatpush3.bf16.msra.mxu1 %v13617_v0  ;;  %6564 = vmatpush1.bf16.msra.mxu0 %v13614_v31  ;;  %v13653_v47 = vld [vmem:[%s18464_s4] ss:$20 sps:$4 sm:$0xff]   ;;  %v13686_v31 = vld [vmem:[%s18464_s4 + $0x210] ss:$20 sps:$4 sm:$0xff]  }
 0x2b0   : > { %6595 = vmatprep.mubr.bf16.mxu0 %v16278_v32  ;;  %12477 = vmatprep.subr.bf16.mxu1 %v13618_v7  ;;  %v13691_v0 = vld [vmem:[%s18464_s4 + $0xf4] ss:$20 sps:$4 sm:$0xff]   ;;  %v13689_v7 = vld [vmem:[%s18464_s4 + $0xf0] ss:$20 sps:$4 sm:$0xff]  }
 0x2b1   : > { %6565 = vmatprep.subr.bf16.mxu0 %v13621_v29  ;;  %v13692_v29 = vld [vmem:[%s18464_s4 + $0x238] ss:$20 sps:$4 sm:$0xff]  }
 0x2b3   : > { %12478 = vmatpush3.bf16.msra.mxu1 %v13622_v51  ;;  %6566 = vmatpush1.bf16.msra.mxu0 %v13619_v33  ;;  %v13697_v33 = vld [vmem:[%s18464_s4 + $0x11c] ss:$20 sps:$4 sm:$0xff]   ;;  %v13700_v51 = vld [vmem:[%s18464_s4 + $0x264] ss:$20 sps:$4 sm:$0xff]  }
 0x2b4   : > { %12479 = vmatprep.subr.bf16.mxu1 %v13623_v50  ;;  %6567 = vmatprep.subr.bf16.mxu0 %v13626_v36  ;;  %v13695_v50 = vld [vmem:[%s18464_s4 + $0x118] ss:$20 sps:$4 sm:$0xff]   ;;  %v13698_v36 = vld [vmem:[%s18464_s4 + $0x260] ss:$20 sps:$4 sm:$0xff]  }
 0x2b5   : > { %5267 = vmatmul.mubr.bf16.gmra.mrb[60].mxu1 %v15890_v12  ;;  %v13636_v12 = vld [vmem:[%s18464_s4 + $0xac] ss:$20 sps:$4 sm:$0xff]  }
 0x2b6   : > { %5306 = vmatprep.mubr.bf16.mxu1 %v15903_v9  ;;  %v13634_v9 = vld [vmem:[%s18464_s4 + $0xa8] ss:$20 sps:$4 sm:$0xff]  }
 0x2b7   : > { %12480 = vmatpush3.bf16.msra.mxu1 %v13627_v61  ;;  %6568 = vmatpush1.bf16.msra.mxu0 %v13624_v37  ;;  %v13703_v37 = vld [vmem:[%s18464_s4 + $0x144] ss:$20 sps:$4 sm:$0xff]   ;;  %v13706_v61 = vld [vmem:[%s18464_s4 + $0x28c] ss:$20 sps:$4 sm:$0xff]  }
 0x2b8   : > { %12481 = vmatprep.subr.bf16.mxu1 %v13628_v34  ;;  %6569 = vmatprep.subr.bf16.mxu0 %v13631_v35  ;;  %v3269_v34 = vld [vmem:[#allocation2] sm:$0xff] }
 0x2b9   : > { %v13701_v35 = vld [vmem:[%s18464_s4 + $0x140] ss:$20 sps:$4 sm:$0xff]  }
 0x2bb   : > { %12482 = vmatpush3.bf16.msra.mxu1 %v13632_v38  ;;  %6570 = vmatpush1.bf16.msra.mxu0 %v13629_v5  ;;  %v3280_v5 = vld [vmem:[#allocation2 + $0x58] sm:$0x3]  ;;  %v13704_v38 = vld [vmem:[%s18464_s4 + $0x288] ss:$20 sps:$4 sm:$0xff]  }
 0x2bc   : > { %12483 = vmatprep.subr.bf16.mxu1 %v13633_v40  ;;  %6571 = vmatprep.subr.bf16.mxu0 %v13636_v12  ;;  %v16473_v40 = vld [vmem:[#allocation2 + $0x28] sm:$0xff] }
 0x2bd   : > { %v16476_v12 = vpack.c.bf16 %v16473_v40, %v3269_v34  ;;  %v13755_v34 = vld [vmem:[%s18464_s4 + $0x2a8] ss:$20 sps:$4 sm:$0xff]  }
 0x2bf   : > { %12484 = vmatpush3.bf16.msra.mxu1 %v13637_v48  ;;  %6572 = vmatpush1.bf16.msra.mxu0 %v13634_v9  ;;  %v13709_v9 = vld [vmem:[%s18464_s4 + $0x16c] ss:$20 sps:$4 sm:$0xff]   ;;  %v13712_v48 = vld [vmem:[%s18464_s4 + $0x2b4] ss:$20 sps:$4 sm:$0xff]  }
 0x2c0   : > { %12485 = vmatprep.subr.bf16.mxu1 %v13638_v39  ;;  %6573 = vmatprep.subr.bf16.mxu0 %v13641_v30  ;;  %v16484_v39 = vpack.c.bf16 %v3280_v5, %v3280_v5  ;;  %v13707_v30 = vld [vmem:[%s18464_s4 + $0x168] ss:$20 sps:$4 sm:$0xff]  }
 0x2c1   : > { %v13763_v5 = vld [vmem:[%s18464_s4 + $0x2d4] ss:$20 sps:$4 sm:$0xff]  }
 0x2c3   : > { %12486 = vmatpush3.bf16.msra.mxu1 %v13642_v42  ;;  %6574 = vmatpush1.bf16.msra.mxu0 %v13639_v41  ;;  %v13710_v41 = vld [vmem:[%s18464_s4 + $0x2b0] ss:$20 sps:$4 sm:$0xff]   ;;  %v13715_v42 = vld [vmem:[%s18464_s4 + $0x194] ss:$20 sps:$4 sm:$0xff]  }
 0x2c4   : > { %12487 = vmatprep.subr.bf16.mxu1 %v13643_v43  ;;  %6575 = vmatprep.subr.bf16.mxu0 %v13646_v44  ;;  %v13718_v43 = vld [vmem:[%s18464_s4 + $0x2dc] ss:$20 sps:$4 sm:$0xff]  }
 0x2c5   : > { %v3279_v44 = vld [vmem:[#allocation2 + $0x50] sm:$0x3] }
 0x2c7   : > { %12488 = vmatpush3.bf16.msra.mxu1 %v13647_v46  ;;  %6576 = vmatpush1.bf16.msra.mxu0 %v13644_v45  ;;  %v13713_v45 = vld [vmem:[%s18464_s4 + $0x190] ss:$20 sps:$4 sm:$0xff]   ;;  %v3272_v46 = vld [vmem:[#allocation2 + $0x18] sm:$0xff] }
 0x2c8   : > { %12489 = vmatprep.subr.bf16.mxu1 %v13648_v52  ;;  %6577 = vmatprep.subr.bf16.mxu0 %v13651_v54  ;;  %v13716_v52 = vld [vmem:[%s18464_s4 + $0x2d8] ss:$20 sps:$4 sm:$0xff]   ;;  %v16506_v54 = vpack.c.bf16 %v3279_v44, %v3279_v44 }
 0x2c9   : > { %v13775_v44 = vld [vmem:[%s18464_s4 + $0x324] ss:$20 sps:$4 sm:$0xff]  }
 0x2cb   : > { %12490 = vmatpush3.bf16.msra.mxu1 %v13652_v57  ;;  %6578 = vmatpush1.bf16.msra.mxu0 %v13649_v10  ;;  %v13721_v10 = vld [vmem:[%s18464_s4 + $0x1bc] ss:$20 sps:$4 sm:$0xff]   ;;  %v13724_v57 = vld [vmem:[%s18464_s4 + $0x304] ss:$20 sps:$4 sm:$0xff]  }
 0x2cc   : > { %6410 = vmatprep.subr.bf16.mxu1 %v13655_v2  ;;  %6579 = vmatprep.subr.bf16.mxu0 %v13658_v14  ;;  %v16514_v2 = vld [vmem:[#allocation2 + $0x40] sm:$0xff] }
 0x2cd   : > { %v16517_v14 = vpack.c.bf16 %v16514_v2, %v3272_v46  ;;  %v13773_v46 = vld [vmem:[%s18464_s4 + $0x320] ss:$20 sps:$4 sm:$0xff]  }
 0x2ce   : > { %5307 = vmatmul.mubr.bf16.vlgmr.msra.gmra.mrb[64].mxu1 %v16078_v58  ;;  %v13670_v58 = vld [vmem:[%s18464_s4 + $0x19c] ss:$20 sps:$4 sm:$0xff]  }
 0x2cf   : > { %5314 = vmatprep.mubr.bf16.mxu1 %v16081_v62  ;;  %6411 = vmatpush1.bf16.msra.mxu1 %v13653_v47  ;;  %v13665_v62 = vld [vmem:[%s18464_s4 + $0x50] ss:$20 sps:$4 sm:$0xff]   ;;  %v13719_v47 = vld [vmem:[%s18464_s4 + $0x1b8] ss:$20 sps:$4 sm:$0xff]  }
 0x2d0   : > { %6580 = vmatpush1.bf16.msra.mxu0 %v13656_v21  ;;  %6412 = vmatprep.subr.bf16.mxu1 %v13661_v3  ;;  %v13722_v21 = vld [vmem:[%s18464_s4 + $0x300] ss:$20 sps:$4 sm:$0xff]   ;;  %v13727_v3 = vld [vmem:[%s18464_s4 + $0x1e4] ss:$20 sps:$4 sm:$0xff]  }
 0x2d1   : > { %6581 = vmatprep.subr.bf16.mxu0 %v13664_v4  ;;  %v13730_v4 = vld [vmem:[%s18464_s4 + $0x32c] ss:$20 sps:$4 sm:$0xff]  }
 0x2d3   : > { %6413 = vmatpush1.bf16.msra.mxu1 %v13659_v17  ;;  %v13725_v17 = vld [vmem:[%s18464_s4 + $0x1e0] ss:$20 sps:$4 sm:$0xff]  }
 0x2d4   : > { %6582 = vmatpush1.bf16.msra.mxu0 %v13662_v1  ;;  %6414 = vmatprep.subr.bf16.mxu1 %v13667_v8  ;;  %v13728_v1 = vld [vmem:[%s18464_s4 + $0x328] ss:$20 sps:$4 sm:$0xff]   ;;  %v13733_v8 = vld [vmem:[%s18464_s4 + $0x20c] ss:$20 sps:$4 sm:$0xff]  }
 0x2d5   : > { %6583 = vmatprep.subr.bf16.mxu0 %v13670_v58  ;;  %v13736_v58 = vld [vmem:[%s18464_s4 + $0x354] ss:$20 sps:$4 sm:$0xff]  }
 0x2d6   : > { %5315 = vmatmul.mubr.bf16.gmra.mrb[68].mxu1 %v16108_v6  ;;  %v13682_v6 = vld [vmem:[%s18464_s4 + $0x1ec] ss:$20 sps:$4 sm:$0xff]  }
 0x2d7   : > { %6415 = vmatpush1.bf16.msra.mxu1 %v13665_v62  ;;  %6442 = vmatprep.mubr.bf16.mxu1 %v16278_v32  ;;  %v13731_v62 = vld [vmem:[%s18464_s4 + $0x208] ss:$20 sps:$4 sm:$0xff]  }
 0x2d8   : > { %6584 = vmatpush1.bf16.msra.mxu0 %v13668_v49  ;;  %6416 = vmatprep.subr.bf16.mxu1 %v13673_v16  ;;  %v13734_v49 = vld [vmem:[%s18464_s4 + $0x350] ss:$20 sps:$4 sm:$0xff]   ;;  %v13739_v16 = vld [vmem:[%s18464_s4 + $0x234] ss:$20 sps:$4 sm:$0xff]  }
 0x2d9   : > { %6585 = vmatprep.subr.bf16.mxu0 %v13676_v18  ;;  %v13742_v18 = vld [vmem:[%s18464_s4 + $0x37c] ss:$20 sps:$4 sm:$0xff]  }
 0x2db   : > { %6417 = vmatpush1.bf16.msra.mxu1 %v13671_v19  ;;  %v13737_v19 = vld [vmem:[%s18464_s4 + $0x230] ss:$20 sps:$4 sm:$0xff]  }
 0x2dc   : > { %6586 = vmatpush1.bf16.msra.mxu0 %v13674_v22  ;;  %6418 = vmatprep.subr.bf16.mxu1 %v13679_v55  ;;  %v13740_v22 = vld [vmem:[%s18464_s4 + $0x378] ss:$20 sps:$4 sm:$0xff]   ;;  %v13745_v55 = vld [vmem:[%s18464_s4 + $0x25c] ss:$20 sps:$4 sm:$0xff]  }
 0x2dd   : > { %6587 = vmatprep.subr.bf16.mxu0 %v13682_v6  ;;  %v13748_v6 = vld [vmem:[%s18464_s4 + $0x3a4] ss:$20 sps:$4 sm:$0xff]  }
 0x2df   : > { %6419 = vmatpush1.bf16.msra.mxu1 %v13677_v59  ;;  %v13743_v59 = vld [vmem:[%s18464_s4 + $0x258] ss:$20 sps:$4 sm:$0xff]  }
 0x2e0   : > { %6588 = vmatpush1.bf16.msra.mxu0 %v13680_v15  ;;  %6420 = vmatprep.subr.bf16.mxu1 %v13685_v60 }
 0x2e1   : > { %6589 = vmatprep.subr.bf16.mxu0 %v13688_v63  ;;  %v13746_v63 = vld [vmem:[%s18464_s4 + $0x3a0] ss:$20 sps:$4 sm:$0xff]  }
 0x2e3   : > { %6421 = vmatpush1.bf16.msra.mxu1 %v13683_v26  ;;  %v13751_v26 = vld [vmem:[%s18464_s4 + $0x284] ss:$20 sps:$4 sm:$0xff]  }
 0x2e4   : > { %6590 = vmatpush1.bf16.msra.mxu0 %v13686_v31  ;;  %6422 = vmatprep.subr.bf16.mxu1 %v13691_v0 }
 0x2e5   : > { %6591 = vmatprep.subr.bf16.mxu0 %v13694_v27  ;;  %v13754_v27 = vld [vmem:[%s18464_s4 + $0x3cc] ss:$20 sps:$4 sm:$0xff]  }
 0x2e7   : > { %6423 = vmatpush1.bf16.msra.mxu1 %v13689_v7 }
 0x2e8   : > { %6592 = vmatpush1.bf16.msra.mxu0 %v13692_v29  ;;  %6424 = vmatprep.subr.bf16.mxu1 %v13697_v33 }
 0x2e9   : > { %6593 = vmatprep.subr.bf16.mxu0 %v13700_v51 }
 0x2eb   : > { %6425 = vmatpush1.bf16.msra.mxu1 %v13695_v50  ;;  %v13749_v50 = vld [vmem:[%s18464_s4 + $0x280] ss:$20 sps:$4 sm:$0xff]  }
 0x2ec   : > { %6594 = vmatpush1.bf16.msra.mxu0 %v13698_v36  ;;  %6426 = vmatprep.subr.bf16.mxu1 %v13703_v37  ;;  %v13752_v36 = vld [vmem:[%s18464_s4 + $0x3c8] ss:$20 sps:$4 sm:$0xff]   ;;  %v13757_v37 = vld [vmem:[%s18464_s4 + $0x2ac] ss:$20 sps:$4 sm:$0xff]  }
 0x2ed   : > { %6614 = vmatprep.subr.bf16.mxu0 %v13706_v61  ;;  %v13760_v61 = vld [vmem:[%s18464_s4 + $0x3f4] ss:$20 sps:$4 sm:$0xff]  }
 0x2ef   : > { %6596 = vmatmul.mubr.bf16.vlgmr.msra.gmra.mrb[48].mxu0 %v16476_v12  ;;  %6427 = vmatpush1.bf16.msra.mxu1 %v13701_v35  ;;  %v13758_v35 = vld [vmem:[%s18464_s4 + $0x3f0] ss:$20 sps:$4 sm:$0xff]  }
 0x2f0   : > { %6605 = vmatprep.mubr.bf16.mxu0 %v16484_v39  ;;  %6615 = vmatpush1.bf16.msra.mxu0 %v13704_v38  ;;  %v13766_v38 = vld [vmem:[%s18464_s4 + $0x41c] ss:$20 sps:$4 sm:$0xff]  }
 0x2f1   : > { %6428 = vmatprep.subr.bf16.mxu1 %v13709_v9  ;;  %6616 = vmatprep.subr.bf16.mxu0 %v13712_v48  ;;  %v13761_v9 = vld [vmem:[%s18464_s4 + $0x2d0] ss:$20 sps:$4 sm:$0xff]   ;;  %v13764_v48 = vld [vmem:[%s18464_s4 + $0x418] ss:$20 sps:$4 sm:$0xff]  }
 0x2f3   : > { %6429 = vmatpush1.bf16.msra.mxu1 %v13707_v30  ;;  %v13769_v30 = vld [vmem:[%s18464_s4 + $0x2fc] ss:$20 sps:$4 sm:$0xff]  }
 0x2f4   : > { %6617 = vmatpush1.bf16.msra.mxu0 %v13710_v41  ;;  %6430 = vmatprep.subr.bf16.mxu1 %v13715_v42  ;;  %v13772_v41 = vld [vmem:[%s18464_s4 + $0x444] ss:$20 sps:$4 sm:$0xff]  }
 0x2f5   : > { %6618 = vmatprep.subr.bf16.mxu0 %v13718_v43  ;;  %v13767_v42 = vld [vmem:[%s18464_s4 + $0x2f8] ss:$20 sps:$4 sm:$0xff]   ;;  %v13770_v43 = vld [vmem:[%s18464_s4 + $0x440] ss:$20 sps:$4 sm:$0xff]  }
 0x2f7   : > { %6606 = vmatmul.mubr.bf16.gmra.mrb[68].mxu0 %v16506_v54  ;;  %6431 = vmatpush1.bf16.msra.mxu1 %v13713_v45  ;;  %v13778_v45 = vld [vmem:[%s18464_s4 + $0x46c] ss:$20 sps:$4 sm:$0xff]  }
 0x2f8   : > { %6619 = vmatpush1.bf16.msra.mxu0 %v13716_v52  ;;  %6646 = vmatprep.mubr.bf16.mxu0 %v16517_v14  ;;  %v13776_v52 = vld [vmem:[%s18464_s4 + $0x468] ss:$20 sps:$4 sm:$0xff]  }
 0x2f9   : > { %6432 = vmatprep.subr.bf16.mxu1 %v13721_v10  ;;  %6620 = vmatprep.subr.bf16.mxu0 %v13724_v57  ;;  %v13781_v10 = vld [vmem:[%s18464_s4 + $0x34c] ss:$20 sps:$4 sm:$0xff]   ;;  %v13784_v57 = vld [vmem:[%s18464_s4 + $0x494] ss:$20 sps:$4 sm:$0xff]  }
 0x2fb   : > { %6433 = vmatpush1.bf16.msra.mxu1 %v13719_v47  ;;  %v13779_v47 = vld [vmem:[%s18464_s4 + $0x348] ss:$20 sps:$4 sm:$0xff]  }
 0x2fc   : > { %6621 = vmatpush1.bf16.msra.mxu0 %v13722_v21  ;;  %6434 = vmatprep.subr.bf16.mxu1 %v13727_v3  ;;  %v13782_v21 = vld [vmem:[%s18464_s4 + $0x490] ss:$20 sps:$4 sm:$0xff]   ;;  %v13787_v3 = vld [vmem:[%s18464_s4 + $0x374] ss:$20 sps:$4 sm:$0xff]  }
 0x2fd   : > { %6622 = vmatprep.subr.bf16.mxu0 %v13730_v4  ;;  %v13790_v4 = vld [vmem:[%s18464_s4 + $0x4bc] ss:$20 sps:$4 sm:$0xff]  }
 0x2ff   : > { %6435 = vmatpush1.bf16.msra.mxu1 %v13725_v17  ;;  %v13785_v17 = vld [vmem:[%s18464_s4 + $0x370] ss:$20 sps:$4 sm:$0xff]  }
 0x300   : > { %6623 = vmatpush1.bf16.msra.mxu0 %v13728_v1  ;;  %6436 = vmatprep.subr.bf16.mxu1 %v13733_v8  ;;  %v13788_v1 = vld [vmem:[%s18464_s4 + $0x4b8] ss:$20 sps:$4 sm:$0xff]   ;;  %v13793_v8 = vld [vmem:[%s18464_s4 + $0x39c] ss:$20 sps:$4 sm:$0xff]  }
 0x301   : > { %6624 = vmatprep.subr.bf16.mxu0 %v13736_v58  ;;  %v13796_v58 = vld [vmem:[%s18464_s4 + $0x4e4] ss:$20 sps:$4 sm:$0xff]  }
 0x303   : > { %6437 = vmatpush1.bf16.msra.mxu1 %v13731_v62  ;;  %v13791_v62 = vld [vmem:[%s18464_s4 + $0x398] ss:$20 sps:$4 sm:$0xff]  }
 0x304   : > { %6625 = vmatpush1.bf16.msra.mxu0 %v13734_v49  ;;  %6438 = vmatprep.subr.bf16.mxu1 %v13739_v16  ;;  %v13794_v49 = vld [vmem:[%s18464_s4 + $0x4e0] ss:$20 sps:$4 sm:$0xff]   ;;  %v13799_v16 = vld [vmem:[%s18464_s4 + $0x3c4] ss:$20 sps:$4 sm:$0xff]  }
 0x305   : > { %6626 = vmatprep.subr.bf16.mxu0 %v13742_v18  ;;  %v13802_v18 = vld [vmem:[%s18464_s4 + $0x50c] ss:$20 sps:$4 sm:$0xff]  }
 0x307   : > { %6439 = vmatpush1.bf16.msra.mxu1 %v13737_v19  ;;  %v3271_v19 = vld [vmem:[#allocation2 + $0x10] sm:$0xff] }
 0x308   : > { %6627 = vmatpush1.bf16.msra.mxu0 %v13740_v22  ;;  %v16572_v15 = vpop.f32.mrb[44].mxu1  ;;  %v16574_v60 = vpop.f32.mrb[52].mxu0  ;;  %6440 = vmatprep.subr.bf16.mxu1 %v13745_v55  ;;  %v13797_v22 = vld [vmem:[%s18464_s4 + $0x3c0] ss:$20 sps:$4 sm:$0xff]   ;;  %v3282_v55 = vld [vmem:[#allocation2 + $0x68] sm:$0x3] }
 0x309   : > { %6628 = vmatprep.subr.bf16.mxu0 %v13748_v6  ;;  %v16582_v31 = vpop.f32.mrb[45].mxu1  ;;  %v16584_v0 = vpop.f32.mrb[53].mxu0  ;;  %v13800_v6 = vld [vmem:[%s18464_s4 + $0x508] ss:$20 sps:$4 sm:$0xff]  }
 0x30a   : > { %v4968_v7 = vpop.f32.mrb[46].mxu1  ;;  %v5121_v29 = vpop.f32.mrb[54].mxu0 }
 0x30b   : > { %6441 = vmatpush1.bf16.msra.mxu1 %v13743_v59  ;;  %v4969_v33 = vpop.f32.mrb[47].mxu1  ;;  %v5122_v51 = vpop.f32.mrb[55].mxu0  ;;  %v16695_v59 = vld [vmem:[#allocation2 + $0x38] sm:$0xff]  ;;  %v16706_v7 = vpack.c.bf16 %v3282_v55, %v3282_v55 }
 0x30c   : > { %6629 = vmatpush1.bf16.msra.mxu0 %v13746_v63  ;;  %6461 = vmatprep.subr.bf16.mxu1 %v13751_v26  ;;  %v16698_v63 = vpack.c.bf16 %v16695_v59, %v3271_v19  ;;  %v13805_v26 = vld [vmem:[%s18464_s4 + $0x3ec] ss:$20 sps:$4 sm:$0xff]   ;;  %v13803_v29 = vld [vmem:[%s18464_s4 + $0x3e8] ss:$20 sps:$4 sm:$0xff]   ;;  %v13806_v33 = vld [vmem:[%s18464_s4 + $0x530] ss:$20 sps:$4 sm:$0xff]  }
 0x30d   : > { %6630 = vmatprep.subr.bf16.mxu0 %v13754_v27  ;;  %v13808_v27 = vld [vmem:[%s18464_s4 + $0x534] ss:$20 sps:$4 sm:$0xff]   ;;  %v13848_v19 = vld [vmem:[%s18464_s4 + $0x3d0] ss:$20 sps:$4 sm:$0xff]  }
 0x30e   : > { %6443 = vmatmul.mubr.bf16.vlgmr.msra.gmra.mrb[40].mxu1 %v16476_v12  ;;  %v13811_v51 = vld [vmem:[%s18464_s4 + $0x414] ss:$20 sps:$4 sm:$0xff]  }
 0x30f   : > { %6452 = vmatprep.mubr.bf16.mxu1 %v16484_v39  ;;  %6462 = vmatpush1.bf16.msra.mxu1 %v13749_v50  ;;  %v13814_v50 = vld [vmem:[%s18464_s4 + $0x55c] ss:$20 sps:$4 sm:$0xff]  }
 0x310   : > { %6631 = vmatpush1.bf16.msra.mxu0 %v13752_v36  ;;  %6463 = vmatprep.subr.bf16.mxu1 %v13757_v37  ;;  %v3281_v36 = vld [vmem:[#allocation2 + $0x60] sm:$0x3]  ;;  %v13809_v37 = vld [vmem:[%s18464_s4 + $0x410] ss:$20 sps:$4 sm:$0xff]  }
 0x311   : > { %6632 = vmatprep.subr.bf16.mxu0 %v13760_v61  ;;  %v13812_v61 = vld [vmem:[%s18464_s4 + $0x558] ss:$20 sps:$4 sm:$0xff]  }
 0x313   : > { %6464 = vmatpush1.bf16.msra.mxu1 %v13755_v34  ;;  %v13817_v34 = vld [vmem:[%s18464_s4 + $0x43c] ss:$20 sps:$4 sm:$0xff]  }
 0x314   : > { %6633 = vmatpush1.bf16.msra.mxu0 %v13758_v35  ;;  %6465 = vmatprep.subr.bf16.mxu1 %v13763_v5  ;;  %v16731_v35 = vpack.c.bf16 %v3281_v36, %v3281_v36  ;;  %v13820_v5 = vld [vmem:[%s18464_s4 + $0x584] ss:$20 sps:$4 sm:$0xff]   ;;  %v13850_v36 = vld [vmem:[%s18464_s4 + $0x528] ss:$20 sps:$4 sm:$0xff]  }
 0x315   : > { %6634 = vmatprep.subr.bf16.mxu0 %v13766_v38  ;;  %v13815_v38 = vld [vmem:[%s18464_s4 + $0x438] ss:$20 sps:$4 sm:$0xff]  }
 0x316   : > { %6453 = vmatmul.mubr.bf16.gmra.mrb[72].mxu1 %v16506_v54 }
 0x317   : > { %6466 = vmatpush1.bf16.msra.mxu1 %v13761_v9  ;;  %6493 = vmatprep.mubr.bf16.mxu1 %v16517_v14  ;;  %v13818_v9 = vld [vmem:[%s18464_s4 + $0x580] ss:$20 sps:$4 sm:$0xff]  }
 0x318   : > { %6635 = vmatpush1.bf16.msra.mxu0 %v13764_v48  ;;  %6467 = vmatprep.subr.bf16.mxu1 %v13769_v30  ;;  %v13823_v48 = vld [vmem:[%s18464_s4 + $0x464] ss:$20 sps:$4 sm:$0xff]   ;;  %v13826_v30 = vld [vmem:[%s18464_s4 + $0x5ac] ss:$20 sps:$4 sm:$0xff]  }
 0x319   : > { %6636 = vmatprep.subr.bf16.mxu0 %v13772_v41  ;;  %v13821_v41 = vld [vmem:[%s18464_s4 + $0x460] ss:$20 sps:$4 sm:$0xff]  }
 0x31b   : > { %6468 = vmatpush1.bf16.msra.mxu1 %v13767_v42  ;;  %v13824_v42 = vld [vmem:[%s18464_s4 + $0x5a8] ss:$20 sps:$4 sm:$0xff]  }
 0x31c   : > { %6637 = vmatpush1.bf16.msra.mxu0 %v13770_v43  ;;  %6469 = vmatprep.subr.bf16.mxu1 %v13775_v44  ;;  %v13829_v43 = vld [vmem:[%s18464_s4 + $0x48c] ss:$20 sps:$4 sm:$0xff]   ;;  %v13832_v44 = vld [vmem:[%s18464_s4 + $0x5d4] ss:$20 sps:$4 sm:$0xff]  }
 0x31d   : > { %6638 = vmatprep.subr.bf16.mxu0 %v13778_v45  ;;  %v13827_v45 = vld [vmem:[%s18464_s4 + $0x488] ss:$20 sps:$4 sm:$0xff]  }
 0x31f   : > { %6470 = vmatpush1.bf16.msra.mxu1 %v13773_v46  ;;  %v13830_v46 = vld [vmem:[%s18464_s4 + $0x5d0] ss:$20 sps:$4 sm:$0xff]  }
 0x320   : > { %6639 = vmatpush1.bf16.msra.mxu0 %v13776_v52  ;;  %6471 = vmatprep.subr.bf16.mxu1 %v13781_v10  ;;  %v13835_v52 = vld [vmem:[%s18464_s4 + $0x4b4] ss:$20 sps:$4 sm:$0xff]   ;;  %v13838_v10 = vld [vmem:[%s18464_s4 + $0x5fc] ss:$20 sps:$4 sm:$0xff]  }
 0x321   : > { %6640 = vmatprep.subr.bf16.mxu0 %v13784_v57  ;;  %v13833_v57 = vld [vmem:[%s18464_s4 + $0x4b0] ss:$20 sps:$4 sm:$0xff]  }
 0x323   : > { %6472 = vmatpush1.bf16.msra.mxu1 %v13779_v47  ;;  %v13836_v47 = vld [vmem:[%s18464_s4 + $0x5f8] ss:$20 sps:$4 sm:$0xff]  }
 0x324   : > { %6641 = vmatpush1.bf16.msra.mxu0 %v13782_v21  ;;  %6473 = vmatprep.subr.bf16.mxu1 %v13787_v3  ;;  %v13841_v21 = vld [vmem:[%s18464_s4 + $0x4dc] ss:$20 sps:$4 sm:$0xff]   ;;  %v13844_v3 = vld [vmem:[%s18464_s4 + $0x624] ss:$20 sps:$4 sm:$0xff]  }
 0x325   : > { %6642 = vmatprep.subr.bf16.mxu0 %v13790_v4  ;;  %v13839_v4 = vld [vmem:[%s18464_s4 + $0x4d8] ss:$20 sps:$4 sm:$0xff]  }
 0x327   : > { %6474 = vmatpush1.bf16.msra.mxu1 %v13785_v17 }
 0x328   : > { %6643 = vmatpush1.bf16.msra.mxu0 %v13788_v1  ;;  %6475 = vmatprep.subr.bf16.mxu1 %v13793_v8  ;;  %v13842_v8 = vld [vmem:[%s18464_s4 + $0x620] ss:$20 sps:$4 sm:$0xff]  }
 0x329   : > { %6644 = vmatprep.subr.bf16.mxu0 %v13796_v58  ;;  %v13847_v58 = vld [vmem:[%s18464_s4 + $0x504] ss:$20 sps:$4 sm:$0xff]  }
 0x32b   : > { %6476 = vmatpush1.bf16.msra.mxu1 %v13791_v62 }
 0x32c   : > { %6645 = vmatpush1.bf16.msra.mxu0 %v13794_v49  ;;  %6477 = vmatprep.subr.bf16.mxu1 %v13799_v16 }
 0x32d   : > { %6665 = vmatprep.subr.bf16.mxu0 %v13802_v18 }
 0x32f   : > { %6647 = vmatmul.mubr.bf16.vlgmr.msra.gmra.mrb[48].mxu0 %v16698_v63  ;;  %6478 = vmatpush1.bf16.msra.mxu1 %v13797_v22 }
 0x330   : > { %6656 = vmatprep.mubr.bf16.mxu0 %v16706_v7  ;;  %6666 = vmatpush1.bf16.msra.mxu0 %v13800_v6 }
 0x331   : > { %6479 = vmatprep.subr.bf16.mxu1 %v13805_v26  ;;  %6667 = vmatprep.subr.bf16.mxu0 %v13808_v27 }
 0x333   : > { %6480 = vmatpush1.bf16.msra.mxu1 %v13803_v29  ;;  %v13845_v29 = vld [vmem:[%s18464_s4 + $0x500] ss:$20 sps:$4 sm:$0xff]  }
 0x334   : > { %6668 = vmatpush1.bf16.msra.mxu0 %v13806_v33  ;;  %6481 = vmatprep.subr.bf16.mxu1 %v13811_v51  ;;  %v16816_v33 = vld [vmem:[#allocation2 + $0x48] sm:$0xff] }
 0x335   : > { %6669 = vmatprep.subr.bf16.mxu0 %v13814_v50  ;;  %v13852_v51 = vld [vmem:[%s18464_s4 + $0x52c] ss:$20 sps:$4 sm:$0xff]  }
 0x336   : > { %v13853_v50 = vld [vmem:[%s18464_s4 + $0x3f8] ss:$20 sps:$4 sm:$0xff]  }
 0x337   : > { %6657 = vmatmul.mubr.bf16.gmra.mrb[72].mxu0 %v16731_v35  ;;  %6482 = vmatpush1.bf16.msra.mxu1 %v13809_v37  ;;  %v13854_v37 = vld [vmem:[%s18464_s4 + $0x2b8] ss:$20 sps:$4 sm:$0xff]  }
 0x338   : > { %6670 = vmatpush1.bf16.msra.mxu0 %v13812_v61  ;;  %6483 = vmatprep.subr.bf16.mxu1 %v13817_v34  ;;  %v13857_v61 = vld [vmem:[%s18464_s4 + $0x554] ss:$20 sps:$4 sm:$0xff]  }
 0x339   : > { %6671 = vmatprep.subr.bf16.mxu0 %v13820_v5  ;;  %6697 = vmatprep.mubr.bf16.mxu0 %v14369_v53  ;;  %v13858_v34 = vld [vmem:[%s18464_s4 + $0x420] ss:$20 sps:$4 sm:$0xff]   ;;  %v3283_v5 = vld [vmem:[#allocation2 + $0x70] sm:$0x3] }
 0x33b   : > { %6484 = vmatpush1.bf16.msra.mxu1 %v13815_v38  ;;  %v13855_v38 = vld [vmem:[%s18464_s4 + $0x550] ss:$20 sps:$4 sm:$0xff]  }
 0x33c   : > { %6672 = vmatpush1.bf16.msra.mxu0 %v13818_v9  ;;  %6485 = vmatprep.subr.bf16.mxu1 %v13823_v48  ;;  %v13859_v9 = vld [vmem:[%s18464_s4 + $0x2e0] ss:$20 sps:$4 sm:$0xff]   ;;  %v16849_v48 = vpack.c.bf16 %v3283_v5, %v3283_v5  ;;  %v6861_v5 = vld [vmem:[#allocation2 + $0x8] sm:$0xfc] }
 0x33d   : > { %6673 = vmatprep.subr.bf16.mxu0 %v13826_v30  ;;  %v13862_v30 = vld [vmem:[%s18464_s4 + $0x57c] ss:$20 sps:$4 sm:$0xff]  }
 0x33f   : > { %6486 = vmatpush1.bf16.msra.mxu1 %v13821_v41  ;;  %v13863_v41 = vld [vmem:[%s18464_s4 + $0x448] ss:$20 sps:$4 sm:$0xff]  }
 0x340   : > { %6674 = vmatpush1.bf16.msra.mxu0 %v13824_v42  ;;  %6487 = vmatprep.subr.bf16.mxu1 %v13829_v43  ;;  %v13860_v42 = vld [vmem:[%s18464_s4 + $0x578] ss:$20 sps:$4 sm:$0xff]   ;;  %v13864_v43 = vld [vmem:[%s18464_s4 + $0x308] ss:$20 sps:$4 sm:$0xff]  }
 0x341   : > { %6675 = vmatprep.subr.bf16.mxu0 %v13832_v44  ;;  %v13867_v44 = vld [vmem:[%s18464_s4 + $0x5a4] ss:$20 sps:$4 sm:$0xff]  }
 0x343   : > { %6488 = vmatpush1.bf16.msra.mxu1 %v13827_v45  ;;  %v13868_v45 = vld [vmem:[%s18464_s4 + $0x470] ss:$20 sps:$4 sm:$0xff]  }
 0x344   : > { %6676 = vmatpush1.bf16.msra.mxu0 %v13830_v46  ;;  %6489 = vmatprep.subr.bf16.mxu1 %v13835_v52  ;;  %v13865_v46 = vld [vmem:[%s18464_s4 + $0x5a0] ss:$20 sps:$4 sm:$0xff]  }
 0x345   : > { %6677 = vmatprep.subr.bf16.mxu0 %v13838_v10  ;;  %v13872_v52 = vld [vmem:[%s18464_s4 + $0x5cc] ss:$20 sps:$4 sm:$0xff]  }
 0x346   : > { %v13873_v10 = vld [vmem:[%s18464_s4 + $0x498] ss:$20 sps:$4 sm:$0xff]  }
 0x347   : > { %6490 = vmatpush1.bf16.msra.mxu1 %v13833_v57  ;;  %v13870_v57 = vld [vmem:[%s18464_s4 + $0x5c8] ss:$20 sps:$4 sm:$0xff]  }
 0x348   : > { %6678 = vmatpush1.bf16.msra.mxu0 %v13836_v47  ;;  %v5015_v17 = vpop.f32.mrb[48].mxu1  ;;  %v5168_v1 = vpop.f32.mrb[56].mxu0  ;;  %6491 = vmatprep.subr.bf16.mxu1 %v13841_v21  ;;  %v13874_v47 = vld [vmem:[%s18464_s4 + $0x358] ss:$20 sps:$4 sm:$0xff]   ;;  %v13877_v21 = vld [vmem:[%s18464_s4 + $0x5f4] ss:$20 sps:$4 sm:$0xff]  }
 0x349   : > { %v16796_v62 = vadd.f32 %v5015_v17, %v16572_v15  ;;  %v16799_v49 = vadd.f32 %v5168_v1, %v16574_v60  ;;  %v5017_v16 = vpop.f32.mrb[49].mxu1  ;;  %v5170_v18 = vpop.f32.mrb[57].mxu0  ;;  %6679 = vmatprep.subr.bf16.mxu0 %v13844_v3  ;;  %v3273_v15 = vld [vmem:[#allocation2 + $0x20] sm:$0xff]  ;;  %v13882_v1 = vld [vmem:[%s18464_s4 + $0x61c] ss:$20 sps:$4 sm:$0xff]  }
 0x34a   : > { %v16805_v22 = vadd.f32 %v5017_v16, %v16582_v31  ;;  %v16808_v55 = vadd.f32 %v5170_v18, %v16584_v0  ;;  %v5019_v6 = vpop.f32.mrb[50].mxu1  ;;  %v5172_v26 = vpop.f32.mrb[58].mxu0  ;;  %v13849_v31 = vld [vmem:[%s18464_s4 + $0x290] ss:$20 sps:$4 sm:$0xff]   ;;  %v16819_v0 = vpack.c.bf16 %v16816_v33, %v3273_v15  ;;  %v13878_v3 = vld [vmem:[%s18464_s4 + $0x4c0] ss:$20 sps:$4 sm:$0xff]  }
 0x34b   : > { %6492 = vmatpush1.bf16.msra.mxu1 %v13839_v4  ;;  %v5020_v27 = vpop.f32.mrb[51].mxu1  ;;  %v5173_v60 = vpop.f32.mrb[59].mxu0  ;;  %v13875_v4 = vld [vmem:[%s18464_s4 + $0x5f0] ss:$20 sps:$4 sm:$0xff]   ;;  %v13879_v17 = vld [vmem:[%s18464_s4 + $0x380] ss:$20 sps:$4 sm:$0xff]  }
 0x34c   : > { %6680 = vmatpush1.bf16.msra.mxu0 %v13842_v8  ;;  %6512 = vmatprep.subr.bf16.mxu1 %v13847_v58  ;;  %v13883_v8 = vld [vmem:[%s18464_s4 + $0x4e8] ss:$20 sps:$4 sm:$0xff]   ;;  %v13880_v16 = vld [vmem:[%s18464_s4 + $0x618] ss:$20 sps:$4 sm:$0xff]   ;;  %v13885_v15 = vld [vmem:[%s18464_s4 + $0x150] ss:$20 sps:$4 sm:$0xff]  }
 0x34d   : > { %12541 = vmatprep.subr.bf16.mxu0 %v13848_v19  ;;  %v13884_v18 = vld [vmem:[%s18464_s4 + $0x3a8] ss:$20 sps:$4 sm:$0xff]   ;;  %v13888_v27 = vld [vmem:[%s18464_s4 + $0xc8c] ss:$20 sps:$4 sm:$0xff]  }
 0x34e   : > { %6494 = vmatmul.mubr.bf16.vlgmr.msra.gmra.mrb[40].mxu1 %v16698_v63 }
 0x34f   : > { %6698 = vmatmul.mubr.bf16.vlgmr.msra.gmra.mrb[48].mxu0 %v16819_v0  ;;  %6503 = vmatprep.mubr.bf16.mxu1 %v16706_v7 }
 0x350   : > { %6513 = vmatpush1.bf16.msra.mxu1 %v13845_v29  ;;  %12542 = vmatpush3.bf16.msra.mxu0 %v13849_v31 }
 0x351   : > { %6514 = vmatprep.subr.bf16.mxu1 %v13852_v51  ;;  %12543 = vmatprep.subr.bf16.mxu0 %v13853_v50 }
 0x352   : > { %6707 = vmatprep.mubr.bf16.mxu0 %v14369_v53 }
 0x354   : > { %6515 = vmatpush1.bf16.msra.mxu1 %v13850_v36  ;;  %12544 = vmatpush3.bf16.msra.mxu0 %v13854_v37 }
 0x355   : > { %6516 = vmatprep.subr.bf16.mxu1 %v13857_v61  ;;  %12545 = vmatprep.subr.bf16.mxu0 %v13858_v34  ;;  %v13889_v61 = vld [vmem:[%s18464_s4 + $0x10] ss:$20 sps:$4 sm:$0xff]   ;;  %v13893_v34 = vld [vmem:[%s18464_s4 + $0xcb4] ss:$20 sps:$4 sm:$0xff]  }
 0x356   : > { %6504 = vmatmul.mubr.bf16.gmra.mrb[76].mxu1 %v16731_v35 }
 0x357   : > { %6708 = vmatmul.mubr.bf16.gmra.mrb[76].mxu0 %v16849_v48  ;;  %6544 = vmatprep.mubr.bf16.mxu1 %v14369_v53 }
 0x358   : > { %6517 = vmatpush1.bf16.msra.mxu1 %v13855_v38  ;;  %12546 = vmatpush3.bf16.msra.mxu0 %v13859_v9  ;;  %v13894_v38 = vld [vmem:[%s18464_s4 + $0x38] ss:$20 sps:$4 sm:$0xff]  }
 0x359   : > { %6796 = vmatprep.mubr.bf16.mxu0 %v16517_v14  ;;  %6518 = vmatprep.subr.bf16.mxu1 %v13862_v30  ;;  %v13869_v14 = vld [vmem:[%s18464_s4 + $0x330] ss:$20 sps:$4 sm:$0xff]  }
 0x35a   : > { %12547 = vmatprep.subr.bf16.mxu0 %v13863_v41  ;;  %v13891_v30 = vld [vmem:[%s18464_s4 + $0xcb0] ss:$20 sps:$4 sm:$0xff]   ;;  %v13895_v41 = vld [vmem:[%s18464_s4 + $0x1a0] ss:$20 sps:$4 sm:$0xff]  }
 0x35c   : > { %6519 = vmatpush1.bf16.msra.mxu1 %v13860_v42  ;;  %12548 = vmatpush3.bf16.msra.mxu0 %v13864_v43  ;;  %v13899_v42 = vld [vmem:[%s18464_s4 + $0x60] ss:$20 sps:$4 sm:$0xff]  }
 0x35d   : > { %6520 = vmatprep.subr.bf16.mxu1 %v13867_v44  ;;  %12549 = vmatprep.subr.bf16.mxu0 %v13868_v45  ;;  %v13896_v44 = vld [vmem:[%s18464_s4 + $0xcd8] ss:$20 sps:$4 sm:$0xff]  }
 0x360   : > { %6521 = vmatpush1.bf16.msra.mxu1 %v13865_v46  ;;  %12550 = vmatpush3.bf16.msra.mxu0 %v13869_v14  ;;  %v13900_v46 = vld [vmem:[%s18464_s4 + $0x1c8] ss:$20 sps:$4 sm:$0xff]  }
 0x361   : > { %6522 = vmatprep.subr.bf16.mxu1 %v13872_v52  ;;  %12551 = vmatprep.subr.bf16.mxu0 %v13873_v10  ;;  %v13904_v52 = vld [vmem:[%s18464_s4 + $0x88] ss:$20 sps:$4 sm:$0xff]   ;;  %v13901_v10 = vld [vmem:[%s18464_s4 + $0xd00] ss:$20 sps:$4 sm:$0xff]  }
 0x364   : > { %6523 = vmatpush1.bf16.msra.mxu1 %v13870_v57  ;;  %12552 = vmatpush3.bf16.msra.mxu0 %v13874_v47  ;;  %v13909_v57 = vld [vmem:[%s18464_s4 + $0xb0] ss:$20 sps:$4 sm:$0xff]   ;;  %v13906_v47 = vld [vmem:[%s18464_s4 + $0xd28] ss:$20 sps:$4 sm:$0xff]  }
 0x365   : > { %6524 = vmatprep.subr.bf16.mxu1 %v13877_v21  ;;  %12553 = vmatprep.subr.bf16.mxu0 %v13878_v3  ;;  %v13910_v21 = vld [vmem:[%s18464_s4 + $0x218] ss:$20 sps:$4 sm:$0xff]   ;;  %v13913_v3 = vld [vmem:[%s18464_s4 + $0xd54] ss:$20 sps:$4 sm:$0xff]  }
 0x368   : > { %6525 = vmatpush1.bf16.msra.mxu1 %v13875_v4  ;;  %12554 = vmatpush3.bf16.msra.mxu0 %v13879_v17  ;;  %v5066_v58 = vpop.f32.mrb[52].mxu1  ;;  %v13914_v17 = vld [vmem:[%s18464_s4 + $0xd8] ss:$20 sps:$4 sm:$0xff]  }
 0x369   : > { %v16916_v19 = vadd.f32 %v5066_v58, %v16796_v62  ;;  %v5219_v6 = vpop.f32.mrb[60].mxu0  ;;  %v5068_v26 = vpop.f32.mrb[53].mxu1  ;;  %6526 = vmatprep.subr.bf16.mxu1 %v13882_v1  ;;  %12555 = vmatprep.subr.bf16.mxu0 %v13883_v8  ;;  %v13911_v58 = vld [vmem:[%s18464_s4 + $0xd50] ss:$20 sps:$4 sm:$0xff]  }
 0x36a   : > { %v16925_v60 = vadd.f32 %v5219_v6, %v16799_v49  ;;  %v16928_v29 = vadd.f32 %v5068_v26, %v16805_v22  ;;  %v5221_v62 = vpop.f32.mrb[61].mxu0  ;;  %v5070_v31 = vpop.f32.mrb[54].mxu1  ;;  %v13886_v49 = vld [vmem:[%s18464_s4 + $0xc88] ss:$20 sps:$4 sm:$0xff]   ;;  %v13890_v22 = vld [vmem:[%s18464_s4 + $0x178] ss:$20 sps:$4 sm:$0xff]  }
 0x36b   : > { %v16931_v51 = vadd.f32 %v5221_v62, %v16808_v55  ;;  %v5223_v50 = vpop.f32.mrb[62].mxu0  ;;  %v5071_v36 = vpop.f32.mrb[55].mxu1  ;;  %v6866_v55 = vld [vmem:[#allocation2 + $0x58] sm:$0xf] }
 0x36c   : > { %6527 = vmatpush1.bf16.msra.mxu1 %v13880_v16  ;;  %12556 = vmatpush3.bf16.msra.mxu0 %v13884_v18  ;;  %v5224_v37 = vpop.f32.mrb[63].mxu0  ;;  %v6876_v9 = vpack.c.bf16 %v6866_v55, %v6866_v55  ;;  %v13915_v16 = vld [vmem:[%s18464_s4 + $0x240] ss:$20 sps:$4 sm:$0xff]   ;;  %v13924_v55 = vld [vmem:[%s18464_s4 + $0x128] ss:$20 sps:$4 sm:$0xff]  }
 0x36d   : > { %12513 = vmatprep.subr.bf16.mxu1 %v13885_v15  ;;  %8349 = vmatprep.subr.bf16.mxu0 %v13888_v27  ;;  %v13918_v15 = vld [vmem:[%s18464_s4 + $0xd7c] ss:$20 sps:$4 sm:$0xff]   ;;  %v13919_v36 = vld [vmem:[%s18464_s4 + $0x100] ss:$20 sps:$4 sm:$0xff]   ;;  %v13916_v37 = vld [vmem:[%s18464_s4 + $0xd78] ss:$20 sps:$4 sm:$0xff]  }
 0x36e   : > { %v16965_v43 = vrot.slane %v6876_v9, 1 }
 0x36f   : > { %6545 = vmatmul.mubr.bf16.vlgmr.msra.gmra.mrb[40].mxu1 %v16819_v0  ;;  %6797 = vmatmul.mubr.bf16.vlgmr.msra.gmra.mrb[80].mxu0 %v16698_v63  ;;  %v13898_v63 = vld [vmem:[%s18464_s4 + $0xcdc] ss:$20 sps:$4 sm:$0xff]  }
 0x370   : > { %12514 = vmatpush3.bf16.msra.mxu1 %v13889_v61  ;;  %6804 = vmatprep.mubr.bf16.mxu0 %v16706_v7  ;;  %v6871_v7 = vpack.c.bf16 %v16275_v56, %v6861_v5  ;;  %v13903_v56 = vld [vmem:[%s18464_s4 + $0xd04] ss:$20 sps:$4 sm:$0xff]   ;;  %v13920_v61 = vld [vmem:[%s18464_s4 + $0x268] ss:$20 sps:$4 sm:$0xff]   ;;  %v13921_v5 = vld [vmem:[%s18464_s4 + $0xda0] ss:$20 sps:$4 sm:$0xff]  }
 0x371   : > { %8350 = vmatpush1.bf16.msra.mxu0 %v13886_v49  ;;  %12515 = vmatprep.subr.bf16.mxu1 %v13890_v22  ;;  %v13923_v49 = vld [vmem:[%s18464_s4 + $0xda4] ss:$20 sps:$4 sm:$0xff]  }
 0x372   : > { %8351 = vmatprep.subr.bf16.mxu0 %v13893_v34  ;;  %6554 = vmatprep.mubr.bf16.mxu1 %v14369_v53  ;;  %v7134_v45 = vrot.slane %v6871_v7, 1  ;;  %v13926_v7 = vld [vmem:[%s18464_s4 + $0xdc8] ss:$20 sps:$4 sm:$0xff]  }
 0x374   : > { %12516 = vmatpush3.bf16.msra.mxu1 %v13894_v38  ;;  %v16981_v14 = vsel %vm2731_vm2, %v7134_v45, %v16965_v43  ;;  %v13925_v38 = vld [vmem:[%s18464_s4 + $0x510] ss:$20 sps:$4 sm:$0xff]  }
 0x375   : > { %8352 = vmatpush1.bf16.msra.mxu0 %v13891_v30  ;;  %12517 = vmatprep.subr.bf16.mxu1 %v13895_v41  ;;  %v13928_v41 = vld [vmem:[%s18464_s4 + $0xdcc] ss:$20 sps:$4 sm:$0xff]   ;;  %v13930_v45 = vld [vmem:[%s18464_s4 + $0xdf0] ss:$20 sps:$4 sm:$0xff]  }
 0x376   : > { %8353 = vmatprep.subr.bf16.mxu0 %v13898_v63 }
 0x377   : > { %6555 = vmatmul.mubr.bf16.gmra.mrb[80].mxu1 %v16849_v48  ;;  %6805 = vmatmul.mubr.bf16.gmra.mrb[84].mxu0 %v16731_v35  ;;  %v13905_v35 = vld [vmem:[%s18464_s4 + $0x1f0] ss:$20 sps:$4 sm:$0xff]  }
 0x378   : > { %12518 = vmatpush3.bf16.msra.mxu1 %v13899_v42  ;;  %6748 = vmatprep.mubr.bf16.mxu1 %v16278_v32  ;;  %v13908_v32 = vld [vmem:[%s18464_s4 + $0xd2c] ss:$20 sps:$4 sm:$0xff]  }
 0x379   : > { %8354 = vmatpush1.bf16.msra.mxu0 %v13896_v44  ;;  %8381 = vmatprep.mubr.bf16.mxu0 %v16981_v14  ;;  %v13929_v42 = vld [vmem:[%s18464_s4 + $0x538] ss:$20 sps:$4 sm:$0xff]   ;;  %v13932_v44 = vld [vmem:[%s18464_s4 + $0xdf4] ss:$20 sps:$4 sm:$0xff]  }
 0x37a   : > { %12519 = vmatprep.subr.bf16.mxu1 %v13900_v46  ;;  %8355 = vmatprep.subr.bf16.mxu0 %v13903_v56  ;;  %v13933_v46 = vld [vmem:[%s18464_s4 + $0x560] ss:$20 sps:$4 sm:$0xff]   ;;  %v13936_v56 = vld [vmem:[%s18464_s4 + $0xe1c] ss:$20 sps:$4 sm:$0xff]  }
 0x37c   : > { %12520 = vmatpush3.bf16.msra.mxu1 %v13904_v52  ;;  %v13940_v52 = vld [vmem:[%s18464_s4 + $0xe44] ss:$20 sps:$4 sm:$0xff]  }
 0x37d   : > { %8356 = vmatpush1.bf16.msra.mxu0 %v13901_v10  ;;  %12521 = vmatprep.subr.bf16.mxu1 %v13905_v35  ;;  %v13938_v10 = vld [vmem:[%s18464_s4 + $0xe40] ss:$20 sps:$4 sm:$0xff]   ;;  %v13941_v35 = vld [vmem:[%s18464_s4 + $0x5b0] ss:$20 sps:$4 sm:$0xff]  }
 0x37e   : > { %8357 = vmatprep.subr.bf16.mxu0 %v13908_v32  ;;  %v13944_v32 = vld [vmem:[%s18464_s4 + $0xe6c] ss:$20 sps:$4 sm:$0xff]  }
 0x380   : > { %12522 = vmatpush3.bf16.msra.mxu1 %v13909_v57  ;;  %v12463_v4 = vpop.f32.mrb[56].mxu1  ;;  %v13948_v57 = vld [vmem:[%s18464_s4 + $0xe94] ss:$20 sps:$4 sm:$0xff]  }
 0x381   : > { %8358 = vmatpush1.bf16.msra.mxu0 %v13906_v47  ;;  %v17011_v1 = vpop.f32.mrb[64].mxu0  ;;  %v12464_v8 = vpop.f32.mrb[57].mxu1  ;;  %12523 = vmatprep.subr.bf16.mxu1 %v13910_v21  ;;  %v13946_v21 = vld [vmem:[%s18464_s4 + $0xe90] ss:$20 sps:$4 sm:$0xff]  }
 0x382   : > { %v17019_v18 = vadd.f32 %v12464_v8, %v12463_v4  ;;  %v17021_v6 = vpop.f32.mrb[65].mxu0  ;;  %8359 = vmatprep.subr.bf16.mxu0 %v13913_v3  ;;  %v12466_v26 = vpop.f32.mrb[58].mxu1  ;;  %v13949_v3 = vld [vmem:[%s18464_s4 + $0x600] ss:$20 sps:$4 sm:$0xff]  }
 0x383   : > { %v12765_v27 = vpop.f32.mrb[66].mxu0  ;;  %v12467_v62 = vpop.f32.mrb[59].mxu1 }
 0x384   : > { %12524 = vmatpush3.bf16.msra.mxu1 %v13914_v17  ;;  %v17026_v31 = vadd.f32 %v12467_v62, %v12466_v26  ;;  %v17028_v50 = vpop.f32.mrb[67].mxu0  ;;  %v13952_v17 = vld [vmem:[%s18464_s4 + $0xebc] ss:$20 sps:$4 sm:$0xff]   ;;  %v13950_v62 = vld [vmem:[%s18464_s4 + $0xeb8] ss:$20 sps:$4 sm:$0xff]  }
 0x385   : > { %8360 = vmatpush1.bf16.msra.mxu0 %v13911_v58  ;;  %12525 = vmatprep.subr.bf16.mxu1 %v13915_v16  ;;  %v6865_v26 = vld [vmem:[#allocation2 + $0x50] sm:$0xf] }
 0x386   : > { %8361 = vmatprep.subr.bf16.mxu0 %v13918_v15 }
 0x388   : > { %12526 = vmatpush3.bf16.msra.mxu1 %v13919_v36  ;;  %v12469_v22 = vpop.f32.mrb[60].mxu1  ;;  %v13953_v36 = vld [vmem:[%s18464_s4 + $0x628] ss:$20 sps:$4 sm:$0xff]  }
 0x389   : > { %8362 = vmatpush1.bf16.msra.mxu0 %v13916_v37  ;;  %v12470_v34 = vpop.f32.mrb[61].mxu1  ;;  %12527 = vmatprep.subr.bf16.mxu1 %v13920_v61  ;;  %v13956_v37 = vld [vmem:[%s18464_s4 + $0xee4] ss:$20 sps:$4 sm:$0xff]  }
 0x38a   : > { %v17051_v9 = vadd.f32 %v12470_v34, %v12469_v22  ;;  %8363 = vmatprep.subr.bf16.mxu0 %v13923_v49  ;;  %v12472_v30 = vpop.f32.mrb[62].mxu1  ;;  %v6860_v61 = vld [vmem:[#allocation2] sm:$0xfc] }
 0x38b   : > { %v12473_v63 = vpop.f32.mrb[63].mxu1  ;;  %v13954_v34 = vld [vmem:[%s18464_s4 + $0xee0] ss:$20 sps:$4 sm:$0xff]  }
 0x38c   : > { %12528 = vmatpush3.bf16.msra.mxu1 %v13924_v55 }
 0x38d   : > { %8364 = vmatpush1.bf16.msra.mxu0 %v13921_v5  ;;  %12766 = vmatprep.subr.bf16.mxu1 %v13925_v38  ;;  %v13959_v5 = vld [vmem:[%s18464_s4 + $0xc84] ss:$20 sps:$4 sm:$0xff]  }
 0x38e   : > { %8365 = vmatprep.subr.bf16.mxu0 %v13928_v41 }
 0x38f   : > { %6749 = vmatmul.mubr.bf16.vlgmr.msra.gmra.mrb[84].mxu1 %v16476_v12  ;;  %v13934_v12 = vld [vmem:[%s18464_s4 + $0xe18] ss:$20 sps:$4 sm:$0xff]  }
 0x390   : > { %6756 = vmatprep.mubr.bf16.mxu1 %v16484_v39  ;;  %12767 = vmatpush3.bf16.msra.mxu1 %v13925_v38  ;;  %v13937_v39 = vld [vmem:[%s18464_s4 + $0x588] ss:$20 sps:$4 sm:$0xff]   ;;  %v6870_v38 = vpack.c.bf16 %v16473_v40, %v6860_v61  ;;  %v13990_v61 = vld [vmem:[%s18464_s4 + $0xfd0] ss:$20 sps:$4 sm:$0xff]  }
 0x391   : > { %8366 = vmatpush1.bf16.msra.mxu0 %v13926_v7  ;;  %12768 = vmatprep.subr.bf16.mxu1 %v13929_v42 }
 0x392   : > { %8367 = vmatprep.subr.bf16.mxu0 %v13932_v44  ;;  %v13957_v44 = vld [vmem:[%s18464_s4 + $0xc80] ss:$20 sps:$4 sm:$0xff]  }
 0x394   : > { %12769 = vmatpush3.bf16.msra.mxu1 %v13929_v42 }
 0x395   : > { %8368 = vmatpush1.bf16.msra.mxu0 %v13930_v45  ;;  %12770 = vmatprep.subr.bf16.mxu1 %v13933_v46  ;;  %v6868_v45 = vld [vmem:[#allocation2 + $0x68] sm:$0xf] }
 0x396   : > { %8369 = vmatprep.subr.bf16.mxu0 %v13936_v56  ;;  %v13965_v56 = vld [vmem:[%s18464_s4 + $0xcac] ss:$20 sps:$4 sm:$0xff]  }
 0x397   : > { %6757 = vmatmul.mubr.bf16.gmra.mrb[88].mxu1 %v16506_v54  ;;  %v13942_v54 = vld [vmem:[%s18464_s4 + $0xe68] ss:$20 sps:$4 sm:$0xff]  }
 0x398   : > { %12771 = vmatpush3.bf16.msra.mxu1 %v13933_v46  ;;  %12782 = vmatprep.mubr.bf16.mxu1 %v16819_v0  ;;  %v13945_v0 = vld [vmem:[%s18464_s4 + $0x5d8] ss:$20 sps:$4 sm:$0xff]   ;;  %v13960_v46 = vld [vmem:[%s18464_s4 + $0xf08] ss:$20 sps:$4 sm:$0xff]  }
 0x399   : > { %8370 = vmatpush1.bf16.msra.mxu0 %v13934_v12  ;;  %12772 = vmatprep.subr.bf16.mxu1 %v13937_v39 }
 0x39a   : > { %8371 = vmatprep.subr.bf16.mxu0 %v13940_v52 }
 0x39c   : > { %12773 = vmatpush3.bf16.msra.mxu1 %v13937_v39  ;;  %v6863_v39 = vld [vmem:[#allocation2 + $0x18] sm:$0xfc] }
 0x39d   : > { %8372 = vmatpush1.bf16.msra.mxu0 %v13938_v10  ;;  %12774 = vmatprep.subr.bf16.mxu1 %v13941_v35  ;;  %v13963_v10 = vld [vmem:[%s18464_s4 + $0xca8] ss:$20 sps:$4 sm:$0xff]  }
 0x39e   : > { %8373 = vmatprep.subr.bf16.mxu0 %v13944_v32  ;;  %v6873_v32 = vpack.c.bf16 %v16514_v2, %v6863_v39  ;;  %v13972_v2 = vld [vmem:[%s18464_s4 + $0xf58] ss:$20 sps:$4 sm:$0xff]   ;;  %v14019_v39 = vld [vmem:[%s18464_s4 + $0xe14] ss:$20 sps:$4 sm:$0xff]  }
 0x3a0   : > { %12775 = vmatpush3.bf16.msra.mxu1 %v13941_v35  ;;  %v13971_v35 = vld [vmem:[%s18464_s4 + $0xcd4] ss:$20 sps:$4 sm:$0xff]  }
 0x3a1   : > { %8374 = vmatpush1.bf16.msra.mxu0 %v13942_v54  ;;  %v12491_v47 = vpop.f32.mrb[64].mxu1  ;;  %12776 = vmatprep.subr.bf16.mxu1 %v13945_v0  ;;  %v13974_v54 = vld [vmem:[%s18464_s4 + $0xf5c] ss:$20 sps:$4 sm:$0xff]  }
 0x3a2   : > { %v12492_v4 = vpop.f32.mrb[65].mxu1  ;;  %8375 = vmatprep.subr.bf16.mxu0 %v13948_v57 }
 0x3a3   : > { %v12493_v8 = vadd.f32 %v12492_v4, %v12491_v47  ;;  %v12494_v58 = vpop.f32.mrb[66].mxu1  ;;  %v13977_v47 = vld [vmem:[%s18464_s4 + $0xcfc] ss:$20 sps:$4 sm:$0xff]  }
 0x3a4   : > { %12777 = vmatpush3.bf16.msra.mxu1 %v13945_v0  ;;  %v12495_v16 = vpop.f32.mrb[67].mxu1  ;;  %v13969_v0 = vld [vmem:[%s18464_s4 + $0xcd0] ss:$20 sps:$4 sm:$0xff]  }
 0x3a5   : > { %v5309_v15 = vadd.f32 %v12493_v8, %v17019_v18  ;;  %8376 = vmatpush1.bf16.msra.mxu0 %v13946_v21  ;;  %v12496_v27 = vadd.f32 %v12495_v16, %v12494_v58  ;;  %12778 = vmatprep.subr.bf16.mxu1 %v13949_v3  ;;  %v6875_v18 = vpack.c.bf16 %v6865_v26, %v6865_v26  ;;  %v7140_v21 = vrot.slane %v6873_v32, 1  ;;  %v13983_v8 = vld [vmem:[%s18464_s4 + $0xd24] ss:$20 sps:$4 sm:$0xff]   ;;  %v13978_v58 = vld [vmem:[%s18464_s4 + $0xf80] ss:$20 sps:$4 sm:$0xff]  }
 0x3a6   : > { %8377 = vmatprep.subr.bf16.mxu0 %v13952_v17  ;;  %v13975_v17 = vld [vmem:[%s18464_s4 + $0xcf8] ss:$20 sps:$4 sm:$0xff]   ;;  %v13981_v26 = vld [vmem:[%s18464_s4 + $0xd20] ss:$20 sps:$4 sm:$0xff]  }
 0x3a7   : > { %v5312_v49 = vadd.f32 %v12496_v27, %v17026_v31  ;;  %v17126_v22 = vadd.f32 %v17021_v6, %v5309_v15  ;;  %v13962_v6 = vld [vmem:[%s18464_s4 + $0xf0c] ss:$20 sps:$4 sm:$0xff]   ;;  %v17141_v7 = vrot.slane %v6875_v18, 1  ;;  %v13984_v27 = vld [vmem:[%s18464_s4 + $0xfa8] ss:$20 sps:$4 sm:$0xff]  }
 0x3a8   : > { %12779 = vmatpush3.bf16.msra.mxu1 %v13949_v3  ;;  %v13980_v3 = vld [vmem:[%s18464_s4 + $0xf84] ss:$20 sps:$4 sm:$0xff]   ;;  %v13986_v16 = vld [vmem:[%s18464_s4 + $0xfac] ss:$20 sps:$4 sm:$0xff]  }
 0x3a9   : > { %8378 = vmatpush1.bf16.msra.mxu0 %v13950_v62  ;;  %v12497_v55 = vpop.f32.mrb[68].mxu1  ;;  %12780 = vmatprep.subr.bf16.mxu1 %v13953_v36  ;;  %v17136_v31 = vadd.f32 %v17028_v50, %v5312_v49  ;;  %v7131_v50 = vrot.slane %v6870_v38, 1  ;;  %v13989_v15 = vld [vmem:[%s18464_s4 + $0xd4c] ss:$20 sps:$4 sm:$0xff]   ;;  %v13992_v62 = vld [vmem:[%s18464_s4 + $0xfd4] ss:$20 sps:$4 sm:$0xff]  }
 0x3aa   : > { %v12498_v30 = vpop.f32.mrb[69].mxu1  ;;  %8379 = vmatprep.subr.bf16.mxu0 %v13956_v37  ;;  %v13995_v37 = vld [vmem:[%s18464_s4 + $0xd74] ss:$20 sps:$4 sm:$0xff]   ;;  %v13998_v49 = vld [vmem:[%s18464_s4 + $0xffc] ss:$20 sps:$4 sm:$0xff]  }
 0x3ab   : > { %v12499_v41 = vadd.f32 %v12498_v30, %v12497_v55  ;;  %v12500_v63 = vpop.f32.mrb[70].mxu1  ;;  %v17156_v12 = vsel %vm2731_vm2, %v7131_v50, %v17141_v7  ;;  %v13993_v18 = vld [vmem:[%s18464_s4 + $0xd70] ss:$20 sps:$4 sm:$0xff]   ;;  %v13999_v38 = vld [vmem:[%s18464_s4 + $0xd98] ss:$20 sps:$4 sm:$0xff]  }
 0x3ac   : > { %12781 = vmatpush3.bf16.msra.mxu1 %v13953_v36  ;;  %v12501_v42 = vpop.f32.mrb[71].mxu1  ;;  %v13987_v36 = vld [vmem:[%s18464_s4 + $0xd48] ss:$20 sps:$4 sm:$0xff]   ;;  %v14007_v30 = vld [vmem:[%s18464_s4 + $0xdc4] ss:$20 sps:$4 sm:$0xff]  }
 0x3ad   : > { %v5317_v40 = vadd.f32 %v12499_v41, %v17051_v9  ;;  %8380 = vmatpush1.bf16.msra.mxu0 %v13954_v34  ;;  %8196 = vmatprep.subr.bf16.mxu1 %v13959_v5  ;;  %v13968_v9 = vld [vmem:[%s18464_s4 + $0xf34] ss:$20 sps:$4 sm:$0xff]   ;;  %v14001_v55 = vld [vmem:[%s18464_s4 + $0xd9c] ss:$20 sps:$4 sm:$0xff]   ;;  %v13996_v34 = vld [vmem:[%s18464_s4 + $0xff8] ss:$20 sps:$4 sm:$0xff]  }
 0x3ae   : > { %8400 = vmatprep.subr.bf16.mxu0 %v13962_v6  ;;  %v14004_v5 = vld [vmem:[%s18464_s4 + $0x1024] ss:$20 sps:$4 sm:$0xff]   ;;  %v14002_v41 = vld [vmem:[%s18464_s4 + $0x1020] ss:$20 sps:$4 sm:$0xff]  }
 0x3af   : > { %12783 = vmatmul.mubr.bf16.vlgmr.msra.gmra.mrb[92].mxu1 %v16849_v48  ;;  %v17162_v52 = vadd.f32 %v17011_v1, %v5317_v40  ;;  %v6878_v48 = vpack.c.bf16 %v6868_v45, %v6868_v45  ;;  %v13966_v1 = vld [vmem:[%s18464_s4 + $0xf30] ss:$20 sps:$4 sm:$0xff]   ;;  %v14005_v45 = vld [vmem:[%s18464_s4 + $0xdc0] ss:$20 sps:$4 sm:$0xff]   ;;  %v14020_v32 = vld [vmem:[%s18464_s4 + $0x1098] ss:$20 sps:$4 sm:$0xff]  }
 0x3b0   : > { %8382 = vmatmul.mubr.bf16.vlgmr.msra.gmra.mrb[48].mxu0 %v17156_v12  ;;  %8197 = vmatpush1.bf16.msra.mxu1 %v13957_v44  ;;  %v14010_v44 = vld [vmem:[%s18464_s4 + $0x104c] ss:$20 sps:$4 sm:$0xff]  }
 0x3b1   : > { %8228 = vmatprep.mubr.bf16.mxu1 %v16981_v14  ;;  %8391 = vmatprep.mubr.bf16.mxu0 %v16965_v43  ;;  %v17183_v57 = vrot.slane %v6878_v48, 1  ;;  %v14022_v48 = vld [vmem:[%s18464_s4 + $0x109c] ss:$20 sps:$4 sm:$0xff]  }
 0x3b2   : > { %8401 = vmatpush1.bf16.msra.mxu0 %v13960_v46  ;;  %8198 = vmatprep.subr.bf16.mxu1 %v13965_v56  ;;  %v14008_v56 = vld [vmem:[%s18464_s4 + $0x1048] ss:$20 sps:$4 sm:$0xff]  }
 0x3b3   : > { %8402 = vmatprep.subr.bf16.mxu0 %v13968_v9  ;;  %v17197_v4 = vsel %vm2731_vm2, %v7140_v21, %v17183_v57  ;;  %v14011_v9 = vld [vmem:[%s18464_s4 + $0xde8] ss:$20 sps:$4 sm:$0xff]   ;;  %v14034_v21 = vld [vmem:[%s18464_s4 + $0x10ec] ss:$20 sps:$4 sm:$0xff]  }
 0x3b4   : > { %8199 = vmatpush1.bf16.msra.mxu1 %v13963_v10  ;;  %v14014_v10 = vld [vmem:[%s18464_s4 + $0x1070] ss:$20 sps:$4 sm:$0xff]  }
 0x3b5   : > { %8200 = vmatprep.subr.bf16.mxu1 %v13971_v35  ;;  %v14017_v35 = vld [vmem:[%s18464_s4 + $0xe10] ss:$20 sps:$4 sm:$0xff]  }
 0x3b6   : > { %8403 = vmatpush1.bf16.msra.mxu0 %v13966_v1  ;;  %v14025_v1 = vld [vmem:[%s18464_s4 + $0xe3c] ss:$20 sps:$4 sm:$0xff]  }
 0x3b7   : > { %8404 = vmatprep.subr.bf16.mxu0 %v13974_v54  ;;  %v14028_v54 = vld [vmem:[%s18464_s4 + $0x10c4] ss:$20 sps:$4 sm:$0xff]  }
 0x3b8   : > { %8392 = vmatmul.mubr.bf16.gmra.mrb[88].mxu0 %v17141_v7  ;;  %8201 = vmatpush1.bf16.msra.mxu1 %v13969_v0  ;;  %v14023_v0 = vld [vmem:[%s18464_s4 + $0xe38] ss:$20 sps:$4 sm:$0xff]  }
 0x3b9   : > { %8432 = vmatprep.mubr.bf16.mxu0 %v17197_v4  ;;  %8202 = vmatprep.subr.bf16.mxu1 %v13977_v47  ;;  %v14031_v47 = vld [vmem:[%s18464_s4 + $0xe64] ss:$20 sps:$4 sm:$0xff]  }
 0x3ba   : > { %8405 = vmatpush1.bf16.msra.mxu0 %v13972_v2  ;;  %v14026_v2 = vld [vmem:[%s18464_s4 + $0x10c0] ss:$20 sps:$4 sm:$0xff]  }
 0x3bb   : > { %8406 = vmatprep.subr.bf16.mxu0 %v13980_v3  ;;  %v14029_v3 = vld [vmem:[%s18464_s4 + $0xe60] ss:$20 sps:$4 sm:$0xff]  }
 0x3bc   : > { %8203 = vmatpush1.bf16.msra.mxu1 %v13975_v17  ;;  %v14037_v17 = vld [vmem:[%s18464_s4 + $0xe8c] ss:$20 sps:$4 sm:$0xff]  }
 0x3bd   : > { %8204 = vmatprep.subr.bf16.mxu1 %v13983_v8  ;;  %v14032_v8 = vld [vmem:[%s18464_s4 + $0x10e8] ss:$20 sps:$4 sm:$0xff]  }
 0x3be   : > { %8407 = vmatpush1.bf16.msra.mxu0 %v13978_v58  ;;  %v14040_v58 = vld [vmem:[%s18464_s4 + $0x1114] ss:$20 sps:$4 sm:$0xff]  }
 0x3bf   : > { %8408 = vmatprep.subr.bf16.mxu0 %v13986_v16  ;;  %v14035_v16 = vld [vmem:[%s18464_s4 + $0xe88] ss:$20 sps:$4 sm:$0xff]  }
 0x3c0   : > { %8205 = vmatpush1.bf16.msra.mxu1 %v13981_v26  ;;  %v14043_v26 = vld [vmem:[%s18464_s4 + $0xeb4] ss:$20 sps:$4 sm:$0xff]  }
 0x3c1   : > { %8206 = vmatprep.subr.bf16.mxu1 %v13989_v15  ;;  %v14038_v15 = vld [vmem:[%s18464_s4 + $0x1110] ss:$20 sps:$4 sm:$0xff]  }
 0x3c2   : > { %8409 = vmatpush1.bf16.msra.mxu0 %v13984_v27  ;;  %v14046_v27 = vld [vmem:[%s18464_s4 + $0x113c] ss:$20 sps:$4 sm:$0xff]  }
 0x3c3   : > { %8410 = vmatprep.subr.bf16.mxu0 %v13992_v62  ;;  %v14041_v62 = vld [vmem:[%s18464_s4 + $0xeb0] ss:$20 sps:$4 sm:$0xff]  }
 0x3c4   : > { %8207 = vmatpush1.bf16.msra.mxu1 %v13987_v36  ;;  %v14049_v36 = vld [vmem:[%s18464_s4 + $0xedc] ss:$20 sps:$4 sm:$0xff]  }
 0x3c5   : > { %8208 = vmatprep.subr.bf16.mxu1 %v13995_v37  ;;  %v6867_v37 = vld [vmem:[#allocation2 + $0x60] sm:$0xf] }
 0x3c6   : > { %8411 = vmatpush1.bf16.msra.mxu0 %v13990_v61  ;;  %v14044_v61 = vld [vmem:[%s18464_s4 + $0x1138] ss:$20 sps:$4 sm:$0xff]  }
 0x3c7   : > { %8412 = vmatprep.subr.bf16.mxu0 %v13998_v49  ;;  %v14052_v49 = vld [vmem:[%s18464_s4 + $0x1164] ss:$20 sps:$4 sm:$0xff]  }
 0x3c8   : > { %8209 = vmatpush1.bf16.msra.mxu1 %v13993_v18  ;;  %v6862_v18 = vld [vmem:[#allocation2 + $0x10] sm:$0xfc] }
 0x3c9   : > { %8210 = vmatprep.subr.bf16.mxu1 %v14001_v55  ;;  %v14047_v55 = vld [vmem:[%s18464_s4 + $0xed8] ss:$20 sps:$4 sm:$0xff]  }
 0x3ca   : > { %8413 = vmatpush1.bf16.msra.mxu0 %v13996_v34  ;;  %v6607_v6 = vpop.f32.mrb[68].mxu0  ;;  %v6877_v34 = vpack.c.bf16 %v6867_v37, %v6867_v37  ;;  %v14097_v37 = vld [vmem:[%s18464_s4 + $0x101c] ss:$20 sps:$4 sm:$0xff]  }
 0x3cb   : > { %v17258_v63 = vadd.f32 %v6607_v6, %v16925_v60  ;;  %v6609_v42 = vpop.f32.mrb[69].mxu0  ;;  %8414 = vmatprep.subr.bf16.mxu0 %v14004_v5  ;;  %v14013_v60 = vld [vmem:[%s18464_s4 + $0xdec] ss:$20 sps:$4 sm:$0xff]  }
 0x3cc   : > { %v17264_v40 = vadd.f32 %v6609_v42, %v16931_v51  ;;  %v6611_v50 = vpop.f32.mrb[70].mxu0  ;;  %8211 = vmatpush1.bf16.msra.mxu1 %v13999_v38  ;;  %v14016_v51 = vld [vmem:[%s18464_s4 + $0x1074] ss:$20 sps:$4 sm:$0xff]   ;;  %v14055_v38 = vld [vmem:[%s18464_s4 + $0xf04] ss:$20 sps:$4 sm:$0xff]   ;;  %v6872_v42 = vpack.c.bf16 %v16695_v59, %v6862_v18 }
 0x3cd   : > { %v6612_v46 = vpop.f32.mrb[71].mxu0  ;;  %8212 = vmatprep.subr.bf16.mxu1 %v14007_v30  ;;  %v14061_v59 = vld [vmem:[%s18464_s4 + $0xf2c] ss:$20 sps:$4 sm:$0xff]   ;;  %v14100_v18 = vld [vmem:[%s18464_s4 + $0x12a4] ss:$20 sps:$4 sm:$0xff]  }
 0x3ce   : > { %8415 = vmatpush1.bf16.msra.mxu0 %v14002_v41  ;;  %v14050_v41 = vld [vmem:[%s18464_s4 + $0x1160] ss:$20 sps:$4 sm:$0xff]  }
 0x3cf   : > { %8416 = vmatprep.subr.bf16.mxu0 %v14010_v44 }
 0x3d0   : > { %8213 = vmatpush1.bf16.msra.mxu1 %v14005_v45  ;;  %v14058_v45 = vld [vmem:[%s18464_s4 + $0x118c] ss:$20 sps:$4 sm:$0xff]  }
 0x3d1   : > { %8214 = vmatprep.subr.bf16.mxu1 %v14013_v60  ;;  %v17372_v60 = vrot.slane %v6877_v34, 1  ;;  %v14095_v34 = vld [vmem:[%s18464_s4 + $0x1018] ss:$20 sps:$4 sm:$0xff]  }
 0x3d2   : > { %8417 = vmatpush1.bf16.msra.mxu0 %v14008_v56  ;;  %v14056_v56 = vld [vmem:[%s18464_s4 + $0x1188] ss:$20 sps:$4 sm:$0xff]  }
 0x3d3   : > { %8418 = vmatprep.subr.bf16.mxu0 %v14016_v51  ;;  %v14064_v51 = vld [vmem:[%s18464_s4 + $0x11b4] ss:$20 sps:$4 sm:$0xff]  }
 0x3d4   : > { %8215 = vmatpush1.bf16.msra.mxu1 %v14011_v9 }
 0x3d5   : > { %8216 = vmatprep.subr.bf16.mxu1 %v14019_v39  ;;  %v14059_v39 = vld [vmem:[%s18464_s4 + $0xf28] ss:$20 sps:$4 sm:$0xff]  }
 0x3d6   : > { %8419 = vmatpush1.bf16.msra.mxu0 %v14014_v10  ;;  %v14067_v10 = vld [vmem:[%s18464_s4 + $0xf54] ss:$20 sps:$4 sm:$0xff]  }
 0x3d7   : > { %8420 = vmatprep.subr.bf16.mxu0 %v14022_v48  ;;  %v14062_v48 = vld [vmem:[%s18464_s4 + $0x11b0] ss:$20 sps:$4 sm:$0xff]  }
 0x3d8   : > { %8217 = vmatpush1.bf16.msra.mxu1 %v14017_v35  ;;  %v14070_v35 = vld [vmem:[%s18464_s4 + $0x11dc] ss:$20 sps:$4 sm:$0xff]  }
 0x3d9   : > { %8218 = vmatprep.subr.bf16.mxu1 %v14025_v1  ;;  %v14065_v1 = vld [vmem:[%s18464_s4 + $0xf50] ss:$20 sps:$4 sm:$0xff]  }
 0x3da   : > { %8421 = vmatpush1.bf16.msra.mxu0 %v14020_v32  ;;  %v14073_v32 = vld [vmem:[%s18464_s4 + $0xf7c] ss:$20 sps:$4 sm:$0xff]  }
 0x3db   : > { %8422 = vmatprep.subr.bf16.mxu0 %v14028_v54  ;;  %v14068_v54 = vld [vmem:[%s18464_s4 + $0x11d8] ss:$20 sps:$4 sm:$0xff]  }
 0x3dc   : > { %8219 = vmatpush1.bf16.msra.mxu1 %v14023_v0  ;;  %v14076_v0 = vld [vmem:[%s18464_s4 + $0x1204] ss:$20 sps:$4 sm:$0xff]  }
 0x3dd   : > { %8220 = vmatprep.subr.bf16.mxu1 %v14031_v47  ;;  %v14071_v47 = vld [vmem:[%s18464_s4 + $0xf78] ss:$20 sps:$4 sm:$0xff]  }
 0x3de   : > { %8423 = vmatpush1.bf16.msra.mxu0 %v14026_v2  ;;  %v14079_v2 = vld [vmem:[%s18464_s4 + $0xfa4] ss:$20 sps:$4 sm:$0xff]  }
 0x3df   : > { %8424 = vmatprep.subr.bf16.mxu0 %v14034_v21  ;;  %v14074_v21 = vld [vmem:[%s18464_s4 + $0x1200] ss:$20 sps:$4 sm:$0xff]  }
 0x3e0   : > { %8221 = vmatpush1.bf16.msra.mxu1 %v14029_v3  ;;  %v14082_v3 = vld [vmem:[%s18464_s4 + $0x122c] ss:$20 sps:$4 sm:$0xff]  }
 0x3e1   : > { %8222 = vmatprep.subr.bf16.mxu1 %v14037_v17  ;;  %v14077_v17 = vld [vmem:[%s18464_s4 + $0xfa0] ss:$20 sps:$4 sm:$0xff]  }
 0x3e2   : > { %8425 = vmatpush1.bf16.msra.mxu0 %v14032_v8  ;;  %v14085_v8 = vld [vmem:[%s18464_s4 + $0xfcc] ss:$20 sps:$4 sm:$0xff]  }
 0x3e3   : > { %8426 = vmatprep.subr.bf16.mxu0 %v14040_v58  ;;  %v14080_v58 = vld [vmem:[%s18464_s4 + $0x1228] ss:$20 sps:$4 sm:$0xff]  }
 0x3e4   : > { %8223 = vmatpush1.bf16.msra.mxu1 %v14035_v16  ;;  %v14088_v16 = vld [vmem:[%s18464_s4 + $0x1254] ss:$20 sps:$4 sm:$0xff]  }
 0x3e5   : > { %8224 = vmatprep.subr.bf16.mxu1 %v14043_v26  ;;  %v14083_v26 = vld [vmem:[%s18464_s4 + $0xfc8] ss:$20 sps:$4 sm:$0xff]  }
 0x3e6   : > { %8427 = vmatpush1.bf16.msra.mxu0 %v14038_v15  ;;  %v14091_v15 = vld [vmem:[%s18464_s4 + $0xff4] ss:$20 sps:$4 sm:$0xff]  }
 0x3e7   : > { %8428 = vmatprep.subr.bf16.mxu0 %v14046_v27  ;;  %v14086_v27 = vld [vmem:[%s18464_s4 + $0x1250] ss:$20 sps:$4 sm:$0xff]  }
 0x3e8   : > { %8225 = vmatpush1.bf16.msra.mxu1 %v14041_v62  ;;  %v14094_v62 = vld [vmem:[%s18464_s4 + $0x127c] ss:$20 sps:$4 sm:$0xff]  }
 0x3e9   : > { %v6454_v5 = vpop.f32.mrb[72].mxu1  ;;  %8226 = vmatprep.subr.bf16.mxu1 %v14049_v36  ;;  %v14089_v36 = vld [vmem:[%s18464_s4 + $0xff0] ss:$20 sps:$4 sm:$0xff]  }
 0x3ea   : > { %8429 = vmatpush1.bf16.msra.mxu0 %v14044_v61  ;;  %v17357_v30 = vadd.f32 %v6454_v5, %v16916_v19  ;;  %v6456_v6 = vpop.f32.mrb[73].mxu1  ;;  %v14053_v19 = vld [vmem:[%s18464_s4 + $0xf00] ss:$20 sps:$4 sm:$0xff]   ;;  %v6869_v61 = vld [vmem:[#allocation2 + $0x70] sm:$0xf] }
 0x3eb   : > { %v17364_v44 = vadd.f32 %v6456_v6, %v16928_v29  ;;  %8430 = vmatprep.subr.bf16.mxu0 %v14052_v49  ;;  %v6458_v50 = vpop.f32.mrb[74].mxu1  ;;  %v7137_v29 = vrot.slane %v6872_v42, 1  ;;  %v14092_v49 = vld [vmem:[%s18464_s4 + $0x1278] ss:$20 sps:$4 sm:$0xff]   ;;  %v6879_v5 = vpack.c.bf16 %v6869_v61, %v6869_v61  ;;  %v14138_v61 = vld [vmem:[%s18464_s4 + $0x115c] ss:$20 sps:$4 sm:$0xff]  }
 0x3ec   : > { %8227 = vmatpush1.bf16.msra.mxu1 %v14047_v55  ;;  %v6459_v46 = vpop.f32.mrb[75].mxu1  ;;  %v6864_v55 = vld [vmem:[#allocation2 + $0x20] sm:$0xfc] }
 0x3ed   : > { %8247 = vmatprep.subr.bf16.mxu1 %v14055_v38  ;;  %v17386_v9 = vsel %vm2731_vm2, %v7137_v29, %v17372_v60  ;;  %v14103_v38 = vld [vmem:[%s18464_s4 + $0x1044] ss:$20 sps:$4 sm:$0xff]   ;;  %v6874_v42 = vpack.c.bf16 %v16816_v33, %v6864_v55  ;;  %v14101_v29 = vld [vmem:[%s18464_s4 + $0x1040] ss:$20 sps:$4 sm:$0xff]  }
 0x3ee   : > { %8431 = vmatpush1.bf16.msra.mxu0 %v14050_v41  ;;  %v14098_v41 = vld [vmem:[%s18464_s4 + $0x12a0] ss:$20 sps:$4 sm:$0xff]   ;;  %v14104_v46 = vld [vmem:[%s18464_s4 + $0xdd0] ss:$20 sps:$4 sm:$0xff]   ;;  %v14136_v55 = vld [vmem:[%s18464_s4 + $0x1158] ss:$20 sps:$4 sm:$0xff]  }
 0x3ef   : > { %8229 = vmatmul.mubr.bf16.vlgmr.msra.gmra.mrb[40].mxu1 %v17156_v12  ;;  %8451 = vmatprep.subr.bf16.mxu0 %v14058_v45 }
 0x3f0   : > { %8238 = vmatprep.mubr.bf16.mxu1 %v16965_v43  ;;  %8248 = vmatpush1.bf16.msra.mxu1 %v14053_v19 }
 0x3f1   : > { %8433 = vmatmul.mubr.bf16.vlgmr.msra.gmra.mrb[48].mxu0 %v17386_v9  ;;  %8249 = vmatprep.subr.bf16.mxu1 %v14061_v59 }
 0x3f2   : > { %8442 = vmatprep.mubr.bf16.mxu0 %v17183_v57  ;;  %8452 = vmatpush1.bf16.msra.mxu0 %v14056_v56  ;;  %v17489_v56 = vrot.slane %v6879_v5, 1  ;;  %v14143_v5 = vld [vmem:[%s18464_s4 + $0x1184] ss:$20 sps:$4 sm:$0xff]  }
 0x3f3   : > { %8453 = vmatprep.subr.bf16.mxu0 %v14064_v51  ;;  %v7143_v51 = vrot.slane %v6874_v42, 1  ;;  %v14140_v42 = vld [vmem:[%s18464_s4 + $0xda8] ss:$20 sps:$4 sm:$0xff]  }
 0x3f4   : > { %8250 = vmatpush1.bf16.msra.mxu1 %v14059_v39  ;;  %v14109_v39 = vld [vmem:[%s18464_s4 + $0xdf8] ss:$20 sps:$4 sm:$0xff]  }
 0x3f5   : > { %8251 = vmatprep.subr.bf16.mxu1 %v14067_v10  ;;  %v17502_v10 = vsel %vm2731_vm2, %v7143_v51, %v17489_v56 }
 0x3f6   : > { %8454 = vmatpush1.bf16.msra.mxu0 %v14062_v48  ;;  %v14106_v48 = vld [vmem:[%s18464_s4 + $0x1068] ss:$20 sps:$4 sm:$0xff]  }
 0x3f7   : > { %8239 = vmatmul.mubr.bf16.gmra.mrb[96].mxu1 %v17141_v7  ;;  %8455 = vmatprep.subr.bf16.mxu0 %v14070_v35  ;;  %v14113_v35 = vld [vmem:[%s18464_s4 + $0x1094] ss:$20 sps:$4 sm:$0xff]  }
 0x3f8   : > { %8252 = vmatpush1.bf16.msra.mxu1 %v14065_v1  ;;  %8279 = vmatprep.mubr.bf16.mxu1 %v17197_v4  ;;  %v14110_v1 = vld [vmem:[%s18464_s4 + $0xcb8] ss:$20 sps:$4 sm:$0xff]  }
 0x3f9   : > { %8443 = vmatmul.mubr.bf16.gmra.mrb[92].mxu0 %v17372_v60  ;;  %8253 = vmatprep.subr.bf16.mxu1 %v14073_v32  ;;  %v14114_v32 = vld [vmem:[%s18464_s4 + $0xe20] ss:$20 sps:$4 sm:$0xff]  }
 0x3fa   : > { %8456 = vmatpush1.bf16.msra.mxu0 %v14068_v54  ;;  %8483 = vmatprep.mubr.bf16.mxu0 %v14369_v53  ;;  %v14111_v54 = vld [vmem:[%s18464_s4 + $0x1090] ss:$20 sps:$4 sm:$0xff]  }
 0x3fb   : > { %8457 = vmatprep.subr.bf16.mxu0 %v14076_v0  ;;  %v14118_v0 = vld [vmem:[%s18464_s4 + $0x10bc] ss:$20 sps:$4 sm:$0xff]  }
 0x3fc   : > { %8254 = vmatpush1.bf16.msra.mxu1 %v14071_v47  ;;  %v14115_v47 = vld [vmem:[%s18464_s4 + $0xce0] ss:$20 sps:$4 sm:$0xff]  }
 0x3fd   : > { %8255 = vmatprep.subr.bf16.mxu1 %v14079_v2  ;;  %v14119_v2 = vld [vmem:[%s18464_s4 + $0xe48] ss:$20 sps:$4 sm:$0xff]  }
 0x3fe   : > { %8458 = vmatpush1.bf16.msra.mxu0 %v14074_v21  ;;  %v14116_v21 = vld [vmem:[%s18464_s4 + $0x10b8] ss:$20 sps:$4 sm:$0xff]  }
 0x3ff   : > { %8459 = vmatprep.subr.bf16.mxu0 %v14082_v3  ;;  %v14123_v3 = vld [vmem:[%s18464_s4 + $0x10e4] ss:$20 sps:$4 sm:$0xff]  }
 0x400   : > { %8256 = vmatpush1.bf16.msra.mxu1 %v14077_v17  ;;  %v14120_v17 = vld [vmem:[%s18464_s4 + $0xd08] ss:$20 sps:$4 sm:$0xff]  }
 0x401   : > { %8257 = vmatprep.subr.bf16.mxu1 %v14085_v8  ;;  %v14124_v8 = vld [vmem:[%s18464_s4 + $0xe70] ss:$20 sps:$4 sm:$0xff]  }
 0x402   : > { %8460 = vmatpush1.bf16.msra.mxu0 %v14080_v58  ;;  %v14121_v58 = vld [vmem:[%s18464_s4 + $0x10e0] ss:$20 sps:$4 sm:$0xff]  }
 0x403   : > { %8461 = vmatprep.subr.bf16.mxu0 %v14088_v16  ;;  %v14128_v16 = vld [vmem:[%s18464_s4 + $0x110c] ss:$20 sps:$4 sm:$0xff]  }
 0x404   : > { %8258 = vmatpush1.bf16.msra.mxu1 %v14083_v26  ;;  %v14129_v26 = vld [vmem:[%s18464_s4 + $0xe98] ss:$20 sps:$4 sm:$0xff]  }
 0x405   : > { %8259 = vmatprep.subr.bf16.mxu1 %v14091_v15  ;;  %v14126_v15 = vld [vmem:[%s18464_s4 + $0x1108] ss:$20 sps:$4 sm:$0xff]  }
 0x406   : > { %8462 = vmatpush1.bf16.msra.mxu0 %v14086_v27  ;;  %v14133_v27 = vld [vmem:[%s18464_s4 + $0x1134] ss:$20 sps:$4 sm:$0xff]  }
 0x407   : > { %8463 = vmatprep.subr.bf16.mxu0 %v14094_v62  ;;  %v14130_v62 = vld [vmem:[%s18464_s4 + $0xd58] ss:$20 sps:$4 sm:$0xff]  }
 0x408   : > { %8260 = vmatpush1.bf16.msra.mxu1 %v14089_v36  ;;  %v14134_v36 = vld [vmem:[%s18464_s4 + $0xec0] ss:$20 sps:$4 sm:$0xff]  }
 0x409   : > { %8261 = vmatprep.subr.bf16.mxu1 %v14097_v37  ;;  %v14131_v37 = vld [vmem:[%s18464_s4 + $0x1130] ss:$20 sps:$4 sm:$0xff]  }
 0x40a   : > { %8464 = vmatpush1.bf16.msra.mxu0 %v14092_v49  ;;  %v6658_v6 = vpop.f32.mrb[72].mxu0  ;;  %v14135_v49 = vld [vmem:[%s18464_s4 + $0xd80] ss:$20 sps:$4 sm:$0xff]  }
 0x40b   : > { %v17478_v50 = vadd.f32 %v6658_v6, %v17258_v63  ;;  %v6660_v45 = vpop.f32.mrb[73].mxu0  ;;  %8465 = vmatprep.subr.bf16.mxu0 %v14100_v18  ;;  %v14108_v63 = vld [vmem:[%s18464_s4 + $0x106c] ss:$20 sps:$4 sm:$0xff]   ;;  %v14139_v18 = vld [vmem:[%s18464_s4 + $0xee8] ss:$20 sps:$4 sm:$0xff]  }
 0x40c   : > { %v17484_v19 = vadd.f32 %v6660_v45, %v17264_v40  ;;  %v6662_v59 = vpop.f32.mrb[74].mxu0  ;;  %8262 = vmatpush1.bf16.msra.mxu1 %v14095_v34  ;;  %v14105_v40 = vld [vmem:[%s18464_s4 + $0xc90] ss:$20 sps:$4 sm:$0xff]  }
 0x40d   : > { %v6663_v33 = vpop.f32.mrb[75].mxu0  ;;  %8263 = vmatprep.subr.bf16.mxu1 %v14103_v38 }
 0x40e   : > { %8466 = vmatpush1.bf16.msra.mxu0 %v14098_v41 }
 0x40f   : > { %12579 = vmatprep.subr.bf16.mxu0 %v14104_v46 }
 0x410   : > { %8264 = vmatpush1.bf16.msra.mxu1 %v14101_v29 }
 0x411   : > { %8484 = vmatmul.mubr.bf16.vlgmr.msra.gmra.mrb[48].mxu0 %v17502_v10  ;;  %8265 = vmatprep.subr.bf16.mxu1 %v14108_v63 }
 0x412   : > { %12580 = vmatpush3.bf16.msra.mxu0 %v14105_v40  ;;  %8493 = vmatprep.mubr.bf16.mxu0 %v14369_v53 }
 0x413   : > { %12581 = vmatprep.subr.bf16.mxu0 %v14109_v39  ;;  %v14145_v39 = vld [vmem:[%s18464_s4 + $0x11a8] ss:$20 sps:$4 sm:$0xff]  }
 0x414   : > { %8266 = vmatpush1.bf16.msra.mxu1 %v14106_v48  ;;  %v14151_v48 = vld [vmem:[%s18464_s4 + $0x11d4] ss:$20 sps:$4 sm:$0xff]  }
 0x415   : > { %8267 = vmatprep.subr.bf16.mxu1 %v14113_v35  ;;  %v14152_v35 = vld [vmem:[%s18464_s4 + $0x11e0] ss:$20 sps:$4 sm:$0xff]  }
 0x416   : > { %12582 = vmatpush3.bf16.msra.mxu0 %v14110_v1  ;;  %v14149_v1 = vld [vmem:[%s18464_s4 + $0x11d0] ss:$20 sps:$4 sm:$0xff]  }
 0x417   : > { %12583 = vmatprep.subr.bf16.mxu0 %v14114_v32  ;;  %v14153_v32 = vld [vmem:[%s18464_s4 + $0x11f8] ss:$20 sps:$4 sm:$0xff]  }
 0x418   : > { %8268 = vmatpush1.bf16.msra.mxu1 %v14111_v54  ;;  %v14159_v54 = vld [vmem:[%s18464_s4 + $0x1224] ss:$20 sps:$4 sm:$0xff]  }
 0x419   : > { %8494 = vmatmul.mubr.bf16.gmra.mrb[96].mxu0 %v17489_v56  ;;  %8269 = vmatprep.subr.bf16.mxu1 %v14118_v0  ;;  %v14160_v0 = vld [vmem:[%s18464_s4 + $0x1230] ss:$20 sps:$4 sm:$0xff]  }
 0x41a   : > { %12584 = vmatpush3.bf16.msra.mxu0 %v14115_v47  ;;  %8534 = vmatprep.mubr.bf16.mxu0 %v16981_v14  ;;  %v14125_v14 = vld [vmem:[%s18464_s4 + $0xd30] ss:$20 sps:$4 sm:$0xff]   ;;  %v14157_v47 = vld [vmem:[%s18464_s4 + $0x1220] ss:$20 sps:$4 sm:$0xff]  }
 0x41b   : > { %12585 = vmatprep.subr.bf16.mxu0 %v14119_v2  ;;  %v14164_v2 = vld [vmem:[%s18464_s4 + $0x1258] ss:$20 sps:$4 sm:$0xff]  }
 0x41c   : > { %8270 = vmatpush1.bf16.msra.mxu1 %v14116_v21  ;;  %v14161_v21 = vld [vmem:[%s18464_s4 + $0x1248] ss:$20 sps:$4 sm:$0xff]  }
 0x41d   : > { %8271 = vmatprep.subr.bf16.mxu1 %v14123_v3  ;;  %v14167_v3 = vld [vmem:[%s18464_s4 + $0x1274] ss:$20 sps:$4 sm:$0xff]  }
 0x41e   : > { %12586 = vmatpush3.bf16.msra.mxu0 %v14120_v17 }
 0x41f   : > { %12587 = vmatprep.subr.bf16.mxu0 %v14124_v8 }
 0x420   : > { %8272 = vmatpush1.bf16.msra.mxu1 %v14121_v58  ;;  %v14168_v58 = vld [vmem:[%s18464_s4 + $0x1280] ss:$20 sps:$4 sm:$0xff]  }
 0x421   : > { %8273 = vmatprep.subr.bf16.mxu1 %v14128_v16 }
 0x422   : > { %12588 = vmatpush3.bf16.msra.mxu0 %v14125_v14 }
 0x423   : > { %12589 = vmatprep.subr.bf16.mxu0 %v14129_v26  ;;  %v14165_v26 = vld [vmem:[%s18464_s4 + $0x1270] ss:$20 sps:$4 sm:$0xff]  }
 0x424   : > { %8274 = vmatpush1.bf16.msra.mxu1 %v14126_v15 }
 0x425   : > { %8275 = vmatprep.subr.bf16.mxu1 %v14133_v27  ;;  %v14171_v27 = vld [vmem:[%s18464_s4 + $0x129c] ss:$20 sps:$4 sm:$0xff]  }
 0x426   : > { %12590 = vmatpush3.bf16.msra.mxu0 %v14130_v62 }
 0x427   : > { %12591 = vmatprep.subr.bf16.mxu0 %v14134_v36  ;;  %v14172_v36 = vld [vmem:[%s18464_s4 + $0x12a8] ss:$20 sps:$4 sm:$0xff]  }
 0x428   : > { %8276 = vmatpush1.bf16.msra.mxu1 %v14131_v37  ;;  %v14169_v37 = vld [vmem:[%s18464_s4 + $0x1298] ss:$20 sps:$4 sm:$0xff]  }
 0x429   : > { %v6505_v34 = vpop.f32.mrb[76].mxu1  ;;  %8277 = vmatprep.subr.bf16.mxu1 %v14138_v61  ;;  %v14173_v61 = vld [vmem:[%s18464_s4 + $0x1050] ss:$20 sps:$4 sm:$0xff]  }
 0x42a   : > { %12592 = vmatpush3.bf16.msra.mxu0 %v14135_v49  ;;  %v17587_v38 = vadd.f32 %v6505_v34, %v17357_v30  ;;  %v6709_v6 = vpop.f32.mrb[76].mxu0  ;;  %v6507_v41 = vpop.f32.mrb[77].mxu1  ;;  %v14144_v30 = vld [vmem:[%s18464_s4 + $0x1190] ss:$20 sps:$4 sm:$0xff]  }
 0x42b   : > { %v17593_v45 = vadd.f32 %v6709_v6, %v17478_v50  ;;  %v17596_v46 = vadd.f32 %v6507_v41, %v17364_v44  ;;  %v6711_v59 = vpop.f32.mrb[77].mxu0  ;;  %12593 = vmatprep.subr.bf16.mxu0 %v14139_v18  ;;  %v6509_v29 = vpop.f32.mrb[78].mxu1  ;;  %v14141_v50 = vld [vmem:[%s18464_s4 + $0x1180] ss:$20 sps:$4 sm:$0xff]  }
 0x42c   : > { %v17602_v33 = vadd.f32 %v6711_v59, %v17484_v19  ;;  %v6713_v63 = vpop.f32.mrb[78].mxu0  ;;  %8278 = vmatpush1.bf16.msra.mxu1 %v14136_v55  ;;  %v6510_v51 = vpop.f32.mrb[79].mxu1  ;;  %v14147_v44 = vld [vmem:[%s18464_s4 + $0x11ac] ss:$20 sps:$4 sm:$0xff]   ;;  %v14174_v29 = vld [vmem:[%s18464_s4 + $0xf10] ss:$20 sps:$4 sm:$0xff]  }
 0x42d   : > { %v6714_v40 = vpop.f32.mrb[79].mxu0  ;;  %8298 = vmatprep.subr.bf16.mxu1 %v14143_v5  ;;  %v14148_v19 = vld [vmem:[%s18464_s4 + $0x11b8] ss:$20 sps:$4 sm:$0xff]   ;;  %v14177_v51 = vld [vmem:[%s18464_s4 + $0x10a0] ss:$20 sps:$4 sm:$0xff]  }
 0x42e   : > { %12594 = vmatpush3.bf16.msra.mxu0 %v14140_v42  ;;  %v14181_v40 = vld [vmem:[%s18464_s4 + $0x10f0] ss:$20 sps:$4 sm:$0xff]  }
 0x42f   : > { %8280 = vmatmul.mubr.bf16.vlgmr.msra.gmra.mrb[40].mxu1 %v17386_v9  ;;  %12786 = vmatprep.subr.bf16.mxu0 %v14144_v30 }
 0x430   : > { %8289 = vmatprep.mubr.bf16.mxu1 %v17183_v57  ;;  %8299 = vmatpush1.bf16.msra.mxu1 %v14141_v50  ;;  %v14178_v50 = vld [vmem:[%s18464_s4 + $0xf60] ss:$20 sps:$4 sm:$0xff]  }
 0x431   : > { %8535 = vmatmul.mubr.bf16.vlgmr.msra.gmra.mrb[100].mxu0 %v17156_v12  ;;  %8300 = vmatprep.subr.bf16.mxu1 %v14147_v44  ;;  %v14155_v12 = vld [vmem:[%s18464_s4 + $0x11fc] ss:$20 sps:$4 sm:$0xff]  }
 0x432   : > { %8542 = vmatprep.mubr.bf16.mxu0 %v16965_v43  ;;  %12787 = vmatpush3.bf16.msra.mxu0 %v14144_v30  ;;  %v14156_v43 = vld [vmem:[%s18464_s4 + $0x1208] ss:$20 sps:$4 sm:$0xff]   ;;  %v14182_v44 = vld [vmem:[%s18464_s4 + $0xfb0] ss:$20 sps:$4 sm:$0xff]  }
 0x433   : > { %12788 = vmatprep.subr.bf16.mxu0 %v14148_v19 }
 0x434   : > { %8301 = vmatpush1.bf16.msra.mxu1 %v14145_v39 }
 0x435   : > { %8302 = vmatprep.subr.bf16.mxu1 %v14151_v48 }
 0x436   : > { %12789 = vmatpush3.bf16.msra.mxu0 %v14148_v19  ;;  %v14185_v19 = vld [vmem:[%s18464_s4 + $0x1140] ss:$20 sps:$4 sm:$0xff]  }
 0x437   : > { %8290 = vmatmul.mubr.bf16.gmra.mrb[100].mxu1 %v17372_v60  ;;  %12790 = vmatprep.subr.bf16.mxu0 %v14152_v35 }
 0x438   : > { %8303 = vmatpush1.bf16.msra.mxu1 %v14149_v1  ;;  %8330 = vmatprep.mubr.bf16.mxu1 %v14369_v53 }
 0x439   : > { %8543 = vmatmul.mubr.bf16.gmra.mrb[104].mxu0 %v17141_v7  ;;  %8304 = vmatprep.subr.bf16.mxu1 %v14155_v12  ;;  %v14163_v7 = vld [vmem:[%s18464_s4 + $0x124c] ss:$20 sps:$4 sm:$0xff]  }
 0x43a   : > { %12791 = vmatpush3.bf16.msra.mxu0 %v14152_v35  ;;  %12802 = vmatprep.mubr.bf16.mxu0 %v17502_v10  ;;  %v14186_v12 = vld [vmem:[%s18464_s4 + $0x1000] ss:$20 sps:$4 sm:$0xff]  }
 0x43b   : > { %12792 = vmatprep.subr.bf16.mxu0 %v14156_v43 }
 0x43c   : > { %8305 = vmatpush1.bf16.msra.mxu1 %v14153_v32  ;;  %v14187_v32 = vld [vmem:[%s18464_s4 + $0x1168] ss:$20 sps:$4 sm:$0xff]  }
 0x43d   : > { %8306 = vmatprep.subr.bf16.mxu1 %v14159_v54 }
 0x43e   : > { %12793 = vmatpush3.bf16.msra.mxu0 %v14156_v43 }
 0x43f   : > { %12794 = vmatprep.subr.bf16.mxu0 %v14160_v0 }
 0x440   : > { %8307 = vmatpush1.bf16.msra.mxu1 %v14157_v47 }
 0x441   : > { %8308 = vmatprep.subr.bf16.mxu1 %v14163_v7  ;;  %v14188_v7 = vld [vmem:[%s18464_s4 + $0x1028] ss:$20 sps:$4 sm:$0xff]  }
 0x442   : > { %12795 = vmatpush3.bf16.msra.mxu0 %v14160_v0  ;;  %v12557_v17 = vpop.f32.mrb[80].mxu0 }
 0x443   : > { %v12558_v8 = vpop.f32.mrb[81].mxu0  ;;  %12796 = vmatprep.subr.bf16.mxu0 %v14164_v2 }
 0x444   : > { %v17666_v16 = vadd.f32 %v12558_v8, %v12557_v17  ;;  %v12560_v14 = vpop.f32.mrb[82].mxu0  ;;  %8309 = vmatpush1.bf16.msra.mxu1 %v14161_v21 }
 0x445   : > { %v12561_v15 = vpop.f32.mrb[83].mxu0  ;;  %8310 = vmatprep.subr.bf16.mxu1 %v14167_v3 }
 0x446   : > { %12797 = vmatpush3.bf16.msra.mxu0 %v14164_v2  ;;  %v17674_v62 = vadd.f32 %v12561_v15, %v12560_v14 }
 0x447   : > { %12798 = vmatprep.subr.bf16.mxu0 %v14168_v58 }
 0x448   : > { %8311 = vmatpush1.bf16.msra.mxu1 %v14165_v26 }
 0x449   : > { %8312 = vmatprep.subr.bf16.mxu1 %v14171_v27 }
 0x44a   : > { %12799 = vmatpush3.bf16.msra.mxu0 %v14168_v58  ;;  %v6556_v49 = vpop.f32.mrb[80].mxu1  ;;  %v12563_v18 = vpop.f32.mrb[84].mxu0 }
 0x44b   : > { %v17686_v55 = vadd.f32 %v6556_v49, %v17587_v38  ;;  %v6558_v34 = vpop.f32.mrb[81].mxu1  ;;  %v12564_v5 = vpop.f32.mrb[85].mxu0  ;;  %12800 = vmatprep.subr.bf16.mxu0 %v14172_v36  ;;  %v14175_v38 = vld [vmem:[%s18464_s4 + $0x1078] ss:$20 sps:$4 sm:$0xff]  }
 0x44c   : > { %v17689_v6 = vadd.f32 %v6558_v34, %v17596_v46  ;;  %v12565_v41 = vadd.f32 %v12564_v5, %v12563_v18  ;;  %v6560_v42 = vpop.f32.mrb[82].mxu1  ;;  %v12566_v59 = vpop.f32.mrb[86].mxu0  ;;  %8313 = vmatpush1.bf16.msra.mxu1 %v14169_v37  ;;  %v14176_v46 = vld [vmem:[%s18464_s4 + $0xf38] ss:$20 sps:$4 sm:$0xff]  }
 0x44d   : > { %v6561_v30 = vpop.f32.mrb[83].mxu1  ;;  %v12567_v63 = vpop.f32.mrb[87].mxu0  ;;  %12607 = vmatprep.subr.bf16.mxu1 %v14173_v61 }
 0x44e   : > { %12801 = vmatpush3.bf16.msra.mxu0 %v14172_v36  ;;  %v17758_v63 = vld [vmem:[%s18465_s5] sm:$0x1f] }
 0x44f   : > { %8331 = vmatmul.mubr.bf16.vlgmr.msra.gmra.mrb[40].mxu1 %v17502_v10  ;;  %v14179_v10 = vld [vmem:[%s18464_s4 + $0x10c8] ss:$20 sps:$4 sm:$0xff]  }
 0x450   : > { %12608 = vmatpush3.bf16.msra.mxu1 %v14174_v29  ;;  %8340 = vmatprep.mubr.bf16.mxu1 %v14369_v53  ;;  %v14180_v53 = vld [vmem:[%s18464_s4 + $0xf88] ss:$20 sps:$4 sm:$0xff]  }
 0x451   : > { %12803 = vmatmul.mubr.bf16.vlgmr.msra.gmra.mrb[108].mxu0 %v17489_v56  ;;  %12609 = vmatprep.subr.bf16.mxu1 %v14175_v38  ;;  %v8674_v38 = vrot.slane %v17758_v63, %v3209_v24 }
 0x454   : > { %12610 = vmatpush3.bf16.msra.mxu1 %v14176_v46  ;;  %v8678_v46 = vrot.slane %v17758_v63, %v3213_v25 }
 0x455   : > { %12611 = vmatprep.subr.bf16.mxu1 %v14177_v51 }
 0x457   : > { %8341 = vmatmul.mubr.bf16.gmra.mrb[104].mxu1 %v17489_v56  ;;  %v14183_v56 = vld [vmem:[%s18464_s4 + $0x1118] ss:$20 sps:$4 sm:$0xff]  }
 0x458   : > { %12612 = vmatpush3.bf16.msra.mxu1 %v14178_v50  ;;  %8582 = vmatprep.mubr.bf16.mxu1 %v17197_v4  ;;  %v14184_v4 = vld [vmem:[%s18464_s4 + $0xfd8] ss:$20 sps:$4 sm:$0xff]  }
 0x459   : > { %12613 = vmatprep.subr.bf16.mxu1 %v14179_v10 }
 0x45c   : > { %12614 = vmatpush3.bf16.msra.mxu1 %v14180_v53 }
 0x45d   : > { %12615 = vmatprep.subr.bf16.mxu1 %v14181_v40 }
 0x460   : > { %12616 = vmatpush3.bf16.msra.mxu1 %v14182_v44 }
 0x461   : > { %12617 = vmatprep.subr.bf16.mxu1 %v14183_v56 }
 0x462   : > { %v12529_v39 = vpop.f32.mrb[84].mxu1 }
 0x463   : > { %v12530_v48 = vpop.f32.mrb[85].mxu1 }
 0x464   : > { %v12531_v35 = vadd.f32 %v12530_v48, %v12529_v39  ;;  %v12532_v1 = vpop.f32.mrb[86].mxu1  ;;  %12618 = vmatpush3.bf16.msra.mxu1 %v14184_v4 }
 0x465   : > { %v12533_v43 = vpop.f32.mrb[87].mxu1  ;;  %12619 = vmatprep.subr.bf16.mxu1 %v14185_v19 }
 0x466   : > { %v6751_v54 = vadd.f32 %v12531_v35, %v17126_v22  ;;  %v12534_v0 = vadd.f32 %v12533_v43, %v12532_v1 }
 0x468   : > { %v6754_v47 = vadd.f32 %v12534_v0, %v17136_v31  ;;  %12620 = vmatpush3.bf16.msra.mxu1 %v14186_v12  ;;  %v6799_v2 = vadd.f32 %v17666_v16, %v6751_v54 }
 0x469   : > { %12621 = vmatprep.subr.bf16.mxu1 %v14187_v32 }
 0x46a   : > { %v12535_v21 = vpop.f32.mrb[88].mxu1  ;;  %v6802_v3 = vadd.f32 %v17674_v62, %v6754_v47 }
 0x46b   : > { %v12536_v17 = vpop.f32.mrb[89].mxu1 }
 0x46c   : > { %v12537_v8 = vadd.f32 %v12536_v17, %v12535_v21  ;;  %v12538_v58 = vpop.f32.mrb[90].mxu1  ;;  %12622 = vmatpush3.bf16.msra.mxu1 %v14188_v7 }
 0x46d   : > { %v12539_v14 = vpop.f32.mrb[91].mxu1 }
 0x46e   : > { %v6759_v22 = vadd.f32 %v12537_v8, %v17162_v52 }
 0x46f   : > { %8583 = vmatmul.mubr.bf16.vlgmr.msra.gmra.mrb[108].mxu1 %v17386_v9 }
 0x470   : > { %8590 = vmatprep.mubr.bf16.mxu1 %v17183_v57  ;;  %v6807_v31 = vadd.f32 %v12565_v41, %v6759_v22 }
 0x477   : > { %8591 = vmatmul.mubr.bf16.gmra.mrb[112].mxu1 %v17372_v60 }
 0x482   : > { %v12784_v26 = vpop.f32.mrb[92].mxu1 }
 0x483   : > { %v17749_v16 = vadd.f32 %v12784_v26, %v6807_v31  ;;  %v6846_v15 = vpop.f32.mrb[93].mxu1 }
 0x484   : > { %v17751_v27 = vadd.f32 %v6846_v15, %v6799_v2  ;;  %v12785_v62 = vpop.f32.mrb[94].mxu1 }
 0x485   : > { %v6849_v36 = vpop.f32.mrb[95].mxu1 }
 0x486   : > { %v17753_v37 = vadd.f32 %v6849_v36, %v6802_v3 }
 0x48b   : > { %v8393_v61 = vpop.f32.mrb[88].mxu0 }
 0x48c   : > { %v8395_v49 = vpop.f32.mrb[89].mxu0 }
 0x48d   : > { %v8397_v52 = vpop.f32.mrb[90].mxu0 }
 0x48e   : > { %v8398_v18 = vpop.f32.mrb[91].mxu0 }
 0x4ca   : > { %v8240_v9 = vpop.f32.mrb[96].mxu1 }
 0x4cb   : > { %v8242_v34 = vpop.f32.mrb[97].mxu1 }
 0x4cc   : > { %v8444_v57 = vpop.f32.mrb[92].mxu0  ;;  %v8244_v5 = vpop.f32.mrb[98].mxu1 }
 0x4cd   : > { %v8445_v41 = vadd.f32 %v8444_v57, %v8393_v61  ;;  %v8446_v60 = vpop.f32.mrb[93].mxu0  ;;  %v8245_v42 = vpop.f32.mrb[99].mxu1  ;;  %v8666_v57 = vrot.slane %v17758_v63, %v15806_v23  ;;  %v8670_v5 = vrot.slane %v17758_v63, %v15815_v11 }
 0x4ce   : > { %v8447_v59 = vadd.f32 %v8446_v60, %v8395_v49  ;;  %v8448_v29 = vpop.f32.mrb[94].mxu0 }
 0x4cf   : > { %v8449_v30 = vpop.f32.mrb[95].mxu0 }
 0x4e4   : > { %v8485_v51 = vpop.f32.mrb[48].mxu0 }
 0x4e5   : > { %v8690_v50 = vadd.f32 %v8674_v38, %v8485_v51  ;;  %v8487_v10 = vpop.f32.mrb[49].mxu0 }
 0x4e6   : > { %v8691_v53 = vadd.f32 %v8678_v46, %v8487_v10  ;;  %v8489_v40 = vpop.f32.mrb[50].mxu0 }
 0x4e7   : > { %v17766_v44 = vmax.f32 %v8690_v50, 0.0  ;;  %v8695_v56 = vadd.f32 %v8674_v38, %v8489_v40  ;;  %v8491_v4 = vpop.f32.mrb[51].mxu0 }
 0x4e8   : > { %v17768_v19 = vmax.f32 %v8691_v53, 0.0  ;;  %v8696_v39 = vadd.f32 %v8678_v46, %v8491_v4 }
 0x4e9   : > { %v17770_v48 = vmax.f32 %v8695_v56, 0.0  ;;  %8867 = vrot.lane.b32.xlu0 %v17766_v44, %s14370_s18 }
 0x4ea   : > { %v17774_v24 = vmax.f32 %v8696_v39, 0.0 }
 0x4eb   : > { %8869 = vrot.lane.b32.xlu1 %v17770_v48, %s14370_s18 }
 0x4ec   : > { %v8495_v25 = vpop.f32.mrb[96].mxu0 }
 0x4ed   : > { %v8496_v35 = vadd.f32 %v8495_v25, %v8445_v41  ;;  %v8497_v1 = vpop.f32.mrb[97].mxu0  ;;  %8879 = vrot.lane.b32.xlu0 %v17766_v44, %s14371_s25 }
 0x4ee   : > { %v8498_v12 = vadd.f32 %v8497_v1, %v8447_v59  ;;  %v8499_v43 = vpop.f32.mrb[98].mxu0 }
 0x4ef   : > { %v8658_v32 = vadd.f32 %v8496_v35, %v17593_v45  ;;  %v8500_v54 = vpop.f32.mrb[99].mxu0  ;;  %8881 = vrot.lane.b32.xlu1 %v17770_v48, %s14371_s25 }
 0x4f0   : > { %v8659_v0 = vadd.f32 %v8498_v12, %v17602_v33 }
 0x4f1   : > { %v8700_v47 = vadd.f32 %v8674_v38, %v8658_v32 }
 0x4f2   : > { %v8701_v7 = vadd.f32 %v8678_v46, %v8659_v0 }
 0x4f3   : > { %v8715_v2 = vmax.f32 %v8700_v47, 0.0 }
 0x4f4   : > { %v8716_v21 = vmax.f32 %v8701_v7, 0.0 }
 0x4f5   : > { %8731 = vst [vmem:[#allocation3 + $0x60] sm:$0x3] %v8715_v2 }
 0x4f6   : > { %8732 = vst [vmem:[#allocation3 + $0x68] sm:$0x3] %v8716_v21 }
 0x504   : > { %v12595_v3 = vpop.f32.mrb[100].mxu0 }
 0x505   : > { %v12596_v17 = vpop.f32.mrb[101].mxu0 }
 0x506   : > { %v12597_v8 = vadd.f32 %v12596_v17, %v12595_v3  ;;  %v12598_v58 = vpop.f32.mrb[102].mxu0 }
 0x507   : > { %v12599_v14 = vpop.f32.mrb[103].mxu0 }
 0x508   : > { %v12600_v22 = vadd.f32 %v12599_v14, %v12598_v58 }
 0x50a   : > { %v8291_v31 = vpop.f32.mrb[100].mxu1 }
 0x50b   : > { %v8292_v45 = vadd.f32 %v8291_v31, %v8240_v9  ;;  %v8293_v26 = vpop.f32.mrb[101].mxu1 }
 0x50c   : > { %v12601_v15 = vpop.f32.mrb[104].mxu0  ;;  %v8294_v62 = vadd.f32 %v8293_v26, %v8242_v34  ;;  %v8295_v36 = vpop.f32.mrb[102].mxu1 }
 0x50d   : > { %v12602_v61 = vpop.f32.mrb[105].mxu0  ;;  %v8296_v33 = vpop.f32.mrb[103].mxu1 }
 0x50e   : > { %v12603_v49 = vadd.f32 %v12602_v61, %v12601_v15  ;;  %v12604_v52 = vpop.f32.mrb[106].mxu0 }
 0x50f   : > { %v12605_v18 = vpop.f32.mrb[107].mxu0 }
 0x522   : > { %v8332_v41 = vpop.f32.mrb[40].mxu1 }
 0x523   : > { %v8688_v60 = vadd.f32 %v8666_v57, %v8332_v41  ;;  %v8334_v42 = vpop.f32.mrb[41].mxu1 }
 0x524   : > { %v12804_v59 = vpop.f32.mrb[108].mxu0  ;;  %v8689_v9 = vadd.f32 %v8670_v5, %v8334_v42  ;;  %v8336_v29 = vpop.f32.mrb[42].mxu1 }
 0x525   : > { %v17788_v30 = vmax.f32 %v8688_v60, 0.0  ;;  %v8632_v34 = vpop.f32.mrb[109].mxu0  ;;  %v8693_v38 = vadd.f32 %v8666_v57, %v8336_v29  ;;  %v8338_v46 = vpop.f32.mrb[43].mxu1 }
 0x526   : > { %v17790_v51 = vmax.f32 %v8689_v9, 0.0  ;;  %v12805_v50 = vpop.f32.mrb[110].mxu0  ;;  %v8694_v10 = vadd.f32 %v8670_v5, %v8338_v46 }
 0x527   : > { %v17792_v53 = vmax.f32 %v8693_v38, 0.0  ;;  %v8635_v40 = vpop.f32.mrb[111].mxu0 }
 0x528   : > { %v17794_v56 = vmax.f32 %v8694_v10, 0.0  ;;  %8791 = vrot.lane.b32.xlu1 %v17790_v51, %s14371_s25  ;;  %8779 = vrot.lane.b32.xlu0 %v17790_v51, %s14370_s18 }
 0x52a   : > { %v8342_v4 = vpop.f32.mrb[104].mxu1 }
 0x52b   : > { %v8343_v39 = vadd.f32 %v8342_v4, %v8292_v45  ;;  %v8344_v25 = vpop.f32.mrb[105].mxu1  ;;  %v14189_v4 = vld [vmem:[%s18466_s6] ss:$8 sps:$4 sm:$0xff]  }
 0x52c   : > { %v8345_v35 = vadd.f32 %v8344_v25, %v8294_v62  ;;  %v8346_v1 = vpop.f32.mrb[106].mxu1  ;;  %8793 = vrot.lane.b32.xlu1 %v17794_v56, %s14371_s25  ;;  %8781 = vrot.lane.b32.xlu0 %v17794_v56, %s14370_s18  ;;  %v14197_v25 = vld [vmem:[%s18466_s6 + $0xc4] ss:$8 sps:$4 sm:$0xff]  }
 0x52d   : > { %v8656_v12 = vadd.f32 %v8343_v39, %v17686_v55  ;;  %v8347_v43 = vpop.f32.mrb[107].mxu1  ;;  %v8682_v55 = vrot.slane %v17758_v63, %v3217_v13  ;;  %v14195_v39 = vld [vmem:[%s18466_s6 + $0xc0] ss:$8 sps:$4 sm:$0xff]   ;;  %9252 = vmatprep.subr.bf16.mxu1 %v14197_v25 }
 0x52e   : > { %v8657_v32 = vadd.f32 %v8345_v35, %v17689_v6  ;;  %v14192_v43 = vld [vmem:[%s18466_s6 + $0x10] ss:$8 sps:$4 sm:$0xff]   ;;  %9253 = vmatpush1.bf16.msra.mxu1 %v14195_v39 }
 0x52f   : > { %v8698_v54 = vadd.f32 %v8666_v57, %v8656_v12 }
 0x530   : > { %v8699_v0 = vadd.f32 %v8670_v5, %v8657_v32  ;;  %v14203_v32 = vld [vmem:[%s18466_s6 + $0xd4] ss:$8 sps:$4 sm:$0xff]  }
 0x531   : > { %v8713_v47 = vmax.f32 %v8698_v54, 0.0  ;;  %v14200_v54 = vld [vmem:[%s18466_s6 + $0x24] ss:$8 sps:$4 sm:$0xff]   ;;  %9254 = vmatprep.subr.bf16.mxu1 %v14203_v32 }
 0x532   : > { %v8714_v7 = vmax.f32 %v8699_v0, 0.0  ;;  %v14201_v0 = vld [vmem:[%s18466_s6 + $0xd0] ss:$8 sps:$4 sm:$0xff]   ;;  %v14245_v32 = vld [vmem:[%s18466_s6 + $0x144] ss:$8 sps:$4 sm:$0xff]  }
 0x533   : > { %8729 = vst [vmem:[#allocation3 + $0x50] sm:$0x3] %v8713_v47  ;;  %9255 = vmatpush1.bf16.msra.mxu1 %v14201_v0  ;;  %v8840_v0 = vld [vmem:[#allocation3 + $0x60] sm:$0x3] }
 0x534   : > { %8730 = vst [vmem:[#allocation3 + $0x58] sm:$0x3] %v8714_v7  ;;  %v14209_v7 = vld [vmem:[%s18466_s6 + $0xe4] ss:$8 sps:$4 sm:$0xff]  }
 0x535   : > { %9256 = vmatprep.subr.bf16.mxu1 %v14209_v7 }
 0x53a   : > { %v8772_v39 = vld [vmem:[#allocation3 + $0x50] sm:$0x3] }
 0x542   : > { %v12623_v2 = vpop.f32.mrb[108].mxu1 }
 0x543   : > { %v12624_v21 = vpop.f32.mrb[109].mxu1 }
 0x544   : > { %v12625_v3 = vadd.f32 %v12624_v21, %v12623_v2  ;;  %v12626_v17 = vpop.f32.mrb[110].mxu1 }
 0x545   : > { %v12627_v58 = vpop.f32.mrb[111].mxu1 }
 0x546   : > { %v8585_v14 = vadd.f32 %v12625_v3, %v12597_v8  ;;  %v12628_v31 = vadd.f32 %v12627_v58, %v12626_v17  ;;  %v14198_v3 = vld [vmem:[%s18466_s6 + $0x20] ss:$8 sps:$4 sm:$0xff]   ;;  %v14206_v58 = vld [vmem:[%s18466_s6 + $0x34] ss:$8 sps:$4 sm:$0xff]  }
 0x548   : > { %v8633_v45 = vadd.f32 %v8632_v34, %v8585_v14  ;;  %v8588_v26 = vadd.f32 %v12628_v31, %v12600_v22  ;;  %v14207_v14 = vld [vmem:[%s18466_s6 + $0xe0] ss:$8 sps:$4 sm:$0xff]  }
 0x549   : > { %9257 = vmatpush1.bf16.msra.mxu1 %v14207_v14 }
 0x54a   : > { %v8650_v6 = vadd.f32 %v8633_v45, %v17751_v27  ;;  %v8636_v15 = vadd.f32 %v8635_v40, %v8588_v26  ;;  %v12629_v62 = vpop.f32.mrb[112].mxu1  ;;  %v14204_v45 = vld [vmem:[%s18466_s6 + $0x30] ss:$8 sps:$4 sm:$0xff]   ;;  %v14212_v26 = vld [vmem:[%s18466_s6 + $0x44] ss:$8 sps:$4 sm:$0xff]  }
 0x54b   : > { %v12630_v36 = vpop.f32.mrb[113].mxu1 }
 0x54c   : > { %v8692_v61 = vadd.f32 %v8682_v55, %v8650_v6  ;;  %v8655_v33 = vadd.f32 %v8636_v15, %v17753_v37  ;;  %v12631_v52 = vadd.f32 %v12630_v36, %v12629_v62  ;;  %v12632_v18 = vpop.f32.mrb[114].mxu1  ;;  %v14213_v6 = vld [vmem:[%s18466_s6 + $0xf0] ss:$8 sps:$4 sm:$0xff]   ;;  %v14221_v15 = vld [vmem:[%s18466_s6 + $0x104] ss:$8 sps:$4 sm:$0xff]  }
 0x54d   : > { %v12633_v57 = vpop.f32.mrb[115].mxu1  ;;  %v14210_v62 = vld [vmem:[%s18466_s6 + $0x40] ss:$8 sps:$4 sm:$0xff]   ;;  %v14218_v36 = vld [vmem:[%s18466_s6 + $0x54] ss:$8 sps:$4 sm:$0xff]  }
 0x54e   : > { %v8707_v8 = vmax.f32 %v8692_v61, 0.0  ;;  %v8697_v5 = vadd.f32 %v8682_v55, %v8655_v33  ;;  %v8593_v41 = vadd.f32 %v12631_v52, %v12603_v49  ;;  %v8775_v49 = vld [vmem:[#allocation3 + $0x58] sm:$0x3]  ;;  %v14219_v61 = vld [vmem:[%s18466_s6 + $0x100] ss:$8 sps:$4 sm:$0xff]  }
 0x54f   : > { %v14216_v33 = vld [vmem:[%s18466_s6 + $0x50] ss:$8 sps:$4 sm:$0xff]  }
 0x550   : > { %8723 = vst.msk [vmem:[#allocation3 + $0x20] sm:$0xff] %vm8722_vm3, %v8707_v8  ;;  %v8712_v13 = vmax.f32 %v8697_v5, 0.0  ;;  %v8641_v63 = vadd.f32 %v12804_v59, %v8593_v41 }
 0x552   : > { %8728 = vst.msk [vmem:[#allocation3 + $0x48] sm:$0xff] %vm8722_vm3, %v8712_v13  ;;  %v8660_v27 = vadd.f32 %v8641_v63, %v17749_v16  ;;  %v17820_v16 = vld [vmem:[#allocation3 + $0x60] sm:$0x3] }
 0x554   : > { %v8702_v22 = vadd.f32 %v8682_v55, %v8660_v27  ;;  %v14215_v55 = vld [vmem:[%s18466_s6 + $0xf4] ss:$8 sps:$4 sm:$0xff]   ;;  %v14224_v27 = vld [vmem:[%s18466_s6 + $0x64] ss:$8 sps:$4 sm:$0xff]  }
 0x555   : > { %9258 = vmatprep.subr.bf16.mxu1 %v14215_v55 }
 0x556   : > { %v8717_v60 = vmax.f32 %v8702_v22, 0.0  ;;  %9259 = vmatpush1.bf16.msra.mxu1 %v14213_v6  ;;  %v14249_v6 = vld [vmem:[%s18466_s6 + $0x150] ss:$8 sps:$4 sm:$0xff]  }
 0x557   : > { %v8944_v42 = vld [vmem:[#allocation3 + $0x20] sm:$0xff]  ;;  %9260 = vmatprep.subr.bf16.mxu1 %v14221_v15 }
 0x558   : > { %8734 = vst.msk [vmem:[#allocation3 + $0x70] sm:$0x3] %vm8733_vm4, %v8717_v60  ;;  %8950 = vrot.lane.b32.xlu0 %v8944_v42, %s14370_s18  ;;  %v14222_v60 = vld [vmem:[%s18466_s6 + $0x60] ss:$8 sps:$4 sm:$0xff]  }
 0x559   : > { %v8945_v37 = vld [vmem:[#allocation3 + $0x48] sm:$0xff] }
 0x55a   : > { %8952 = vrot.lane.b32.xlu1 %v8945_v37, %s14370_s18  ;;  %9261 = vmatpush1.bf16.msra.mxu1 %v14219_v61 }
 0x55b   : > { %v8868_v59 = vpop.permute.xlu0 %8867 }
 0x55c   : > { %8962 = vrot.lane.b32.xlu0 %v8944_v42, %s14371_s25  ;;  %v8876_v38 = vmax.f32 %v17766_v44, %v8868_v59  ;;  %v14227_v42 = vld [vmem:[%s18466_s6 + $0x114] ss:$8 sps:$4 sm:$0xff]   ;;  %v17942_v59 = vld [vmem:[#allocation3 + $0x50] sm:$0x3] }
 0x55d   : > { %v8870_v9 = vpop.permute.xlu1 %8869  ;;  %9262 = vmatprep.subr.bf16.mxu1 %v14227_v42  ;;  %v8943_v42 = vld [vmem:[#allocation3 + $0x68] sm:$0x3] }
 0x55e   : > { %8964 = vrot.lane.b32.xlu1 %v8945_v37, %s14371_s25  ;;  %v8877_v50 = vmax.f32 %v17770_v48, %v8870_v9  ;;  %v14225_v37 = vld [vmem:[%s18466_s6 + $0x110] ss:$8 sps:$4 sm:$0xff]   ;;  %v14230_v9 = vld [vmem:[%s18466_s6 + $0x74] ss:$8 sps:$4 sm:$0xff]  }
 0x55f   : > { %v8946_v29 = vld [vmem:[#allocation3 + $0x70] sm:$0x3]  ;;  %v8880_v34 = vpop.permute.xlu0 %8879  ;;  %9263 = vmatpush1.bf16.msra.mxu1 %v14225_v37 }
 0x560   : > { %8783 = vrot.lane.b32.xlu0 %v8775_v49, %s14370_s18  ;;  %v8888_v10 = vmax.f32 %v8876_v38, %v8880_v34  ;;  %v14228_v34 = vld [vmem:[%s18466_s6 + $0x70] ss:$8 sps:$4 sm:$0xff]   ;;  %v14231_v38 = vld [vmem:[%s18466_s6 + $0x120] ss:$8 sps:$4 sm:$0xff]  }
 0x561   : > { %v8882_v46 = vpop.permute.xlu1 %8881 }
 0x562   : > { %8795 = vrot.lane.b32.xlu1 %v8775_v49, %s14371_s25  ;;  %v8889_v40 = vmax.f32 %v8877_v50, %v8882_v46  ;;  %v14233_v46 = vld [vmem:[%s18466_s6 + $0x124] ss:$8 sps:$4 sm:$0xff]  }
 0x563   : > { %v14236_v50 = vld [vmem:[%s18466_s6 + $0x84] ss:$8 sps:$4 sm:$0xff]   ;;  %9264 = vmatprep.subr.bf16.mxu1 %v14233_v46 }
 0x564   : > { %8871 = vrot.lane.b32.xlu0 %v17820_v16, %s14370_s18  ;;  %9265 = vmatpush1.bf16.msra.mxu1 %v14231_v38 }
 0x566   : > { %8743 = vrot.lane.b32.xlu1 %v17792_v53, %s14370_s18 }
 0x568   : > { %8883 = vrot.lane.b32.xlu0 %v17820_v16, %s14371_s25 }
 0x56a   : > { %8755 = vrot.lane.b32.xlu1 %v17792_v53, %s14371_s25 }
 0x56c   : > { %8741 = vrot.lane.b32.xlu0 %v17788_v30, %s14370_s18 }
 0x56e   : > { %8828 = vrot.lane.b32.xlu1 %v17794_v56, %s14370_s18 }
 0x570   : > { %8753 = vrot.lane.b32.xlu0 %v17788_v30, %s14371_s25 }
 0x572   : > { %8916 = vrot.lane.b32.xlu1 %v17774_v24, %s14370_s18 }
 0x574   : > { %8826 = vrot.lane.b32.xlu0 %v17790_v51, %s14370_s18 }
 0x576   : > { %8846 = vrot.lane.b32.xlu1 %v17770_v48, %s14371_s25  ;;  %v14194_v48 = vld [vmem:[%s18466_s6 + $0x14] ss:$8 sps:$4 sm:$0xff]  }
 0x578   : > { %8914 = vrot.lane.b32.xlu0 %v17768_v19, %s14370_s18 }
 0x57a   : > { %8928 = vrot.lane.b32.xlu1 %v17774_v24, %s14371_s25 }
 0x57c   : > { %8844 = vrot.lane.b32.xlu0 %v17766_v44, %s14371_s25  ;;  %v14191_v44 = vld [vmem:[%s18466_s6 + $0x4] ss:$8 sps:$4 sm:$0xff]  }
 0x57d   : > { %9416 = vmatprep.subr.bf16.mxu0 %v14191_v44  ;;  %v14239_v44 = vld [vmem:[%s18466_s6 + $0x134] ss:$8 sps:$4 sm:$0xff]  }
 0x57e   : > { %8954 = vrot.lane.b32.xlu1 %v8946_v29, %s14370_s18  ;;  %9417 = vmatpush1.bf16.msra.mxu0 %v14189_v4  ;;  %v14234_v4 = vld [vmem:[%s18466_s6 + $0x80] ss:$8 sps:$4 sm:$0xff]  }
 0x57f   : > { %9418 = vmatprep.subr.bf16.mxu0 %v14194_v48  ;;  %v14242_v48 = vld [vmem:[%s18466_s6 + $0x94] ss:$8 sps:$4 sm:$0xff]   ;;  %9266 = vmatprep.subr.bf16.mxu1 %v14239_v44 }
 0x580   : > { %8926 = vrot.lane.b32.xlu0 %v17768_v19, %s14371_s25 }
 0x582   : > { %8966 = vrot.lane.b32.xlu1 %v8946_v29, %s14371_s25  ;;  %9419 = vmatpush1.bf16.msra.mxu0 %v14192_v43 }
 0x583   : > { %9420 = vmatprep.subr.bf16.mxu0 %v14200_v54 }
 0x584   : > { %8894 = vrot.lane.b32.xlu0 %v8888_v10, %s14371_s25 }
 0x586   : > { %8896 = vrot.lane.b32.xlu1 %v8889_v40, %s14371_s25  ;;  %9421 = vmatpush1.bf16.msra.mxu0 %v14198_v3  ;;  %v17963_v40 = vld [vmem:[#allocation3 + $0x58] sm:$0x3] }
 0x587   : > { %9422 = vmatprep.subr.bf16.mxu0 %v14206_v58  ;;  %v14251_v58 = vld [vmem:[%s18466_s6 + $0x154] ss:$8 sps:$4 sm:$0xff]  }
 0x58a   : > { %9423 = vmatpush1.bf16.msra.mxu0 %v14204_v45 }
 0x58b   : > { %9424 = vmatprep.subr.bf16.mxu0 %v14212_v26 }
 0x58e   : > { %9425 = vmatpush1.bf16.msra.mxu0 %v14210_v62 }
 0x58f   : > { %9426 = vmatprep.subr.bf16.mxu0 %v14218_v36  ;;  %v14252_v36 = vld [vmem:[%s18466_s6 + $0xb0] ss:$8 sps:$4 sm:$0xff]  }
 0x592   : > { %9427 = vmatpush1.bf16.msra.mxu0 %v14216_v33  ;;  %v14255_v33 = vld [vmem:[%s18466_s6 + $0x160] ss:$8 sps:$4 sm:$0xff]  }
 0x593   : > { %9428 = vmatprep.subr.bf16.mxu0 %v14224_v27 }
 0x596   : > { %9429 = vmatpush1.bf16.msra.mxu0 %v14222_v60 }
 0x597   : > { %9430 = vmatprep.subr.bf16.mxu0 %v14230_v9 }
 0x59a   : > { %v8792_v35 = vpop.permute.xlu1 %8791  ;;  %v8780_v1 = vpop.permute.xlu0 %8779  ;;  %9431 = vmatpush1.bf16.msra.mxu0 %v14228_v34 }
 0x59b   : > { %v8788_v12 = vmax.f32 %v17788_v30, %v8780_v1  ;;  %9432 = vmatprep.subr.bf16.mxu0 %v14236_v50  ;;  %v14237_v1 = vld [vmem:[%s18466_s6 + $0x130] ss:$8 sps:$4 sm:$0xff]  }
 0x59c   : > { %9267 = vmatpush1.bf16.msra.mxu1 %v14237_v1 }
 0x59d   : > { %v8800_v47 = vmax.f32 %v8788_v12, %v8792_v35  ;;  %v17976_v35 = vld [vmem:[#allocation3 + $0x68] sm:$0x3]  ;;  %9268 = vmatprep.subr.bf16.mxu1 %v14245_v32 }
 0x59e   : > { %v8782_v2 = vpop.permute.xlu0 %8781  ;;  %v8794_v17 = vpop.permute.xlu1 %8793  ;;  %9433 = vmatpush1.bf16.msra.mxu0 %v14234_v4 }
 0x59f   : > { %v8789_v21 = vmax.f32 %v17792_v53, %v8782_v2  ;;  %8806 = vrot.lane.b32.xlu0 %v8800_v47, %s14371_s25  ;;  %v14240_v47 = vld [vmem:[%s18466_s6 + $0x90] ss:$8 sps:$4 sm:$0xff]   ;;  %9434 = vmatprep.subr.bf16.mxu0 %v14242_v48 }
 0x5a1   : > { %v8801_v31 = vmax.f32 %v8789_v21, %v8794_v17  ;;  %v14243_v21 = vld [vmem:[%s18466_s6 + $0x140] ss:$8 sps:$4 sm:$0xff]  }
 0x5a2   : > { %9435 = vmatpush1.bf16.msra.mxu0 %v14240_v47  ;;  %9269 = vmatpush1.bf16.msra.mxu1 %v14243_v21 }
 0x5a3   : > { %8808 = vrot.lane.b32.xlu1 %v8801_v31, %s14371_s25  ;;  %v14246_v31 = vld [vmem:[%s18466_s6 + $0xa0] ss:$8 sps:$4 sm:$0xff]   ;;  %9270 = vmatprep.subr.bf16.mxu1 %v14251_v58 }
 0x5a6   : > { %9271 = vmatpush1.bf16.msra.mxu1 %v14249_v6 }
 0x5ca   : > { %v8951_v52 = vpop.permute.xlu0 %8950 }
 0x5cb   : > { %v8959_v57 = vmax.f32 %v17768_v19, %v8951_v52  ;;  %v14260_v52 = vld [vmem:[%s18466_s6 + $0x174] ss:$8 sps:$4 sm:$0xff]  }
 0x5cc   : > { %v8953_v18 = vpop.permute.xlu1 %8952 }
 0x5cd   : > { %v8960_v5 = vmax.f32 %v17774_v24, %v8953_v18 }
 0x5ce   : > { %v8963_v8 = vpop.permute.xlu0 %8962 }
 0x5cf   : > { %v8971_v41 = vmax.f32 %v8959_v57, %v8963_v8  ;;  %v14258_v8 = vld [vmem:[%s18466_s6 + $0x170] ss:$8 sps:$4 sm:$0xff]  }
 0x5d0   : > { %v8965_v13 = vpop.permute.xlu1 %8964 }
 0x5d1   : > { %v8972_v63 = vmax.f32 %v8960_v5, %v8965_v13  ;;  %8977 = vrot.lane.b32.xlu0 %v8971_v41, %s14371_s25  ;;  %v14263_v41 = vld [vmem:[%s18466_s6 + $0x184] ss:$8 sps:$4 sm:$0xff]  }
 0x5d2   : > { %v8784_v22 = vpop.permute.xlu0 %8783 }
 0x5d3   : > { %8979 = vrot.lane.b32.xlu1 %v8972_v63, %s14371_s25  ;;  %v8790_v12 = vmax.f32 %v8772_v39, %v8784_v22 }
 0x5d4   : > { %v8796_v49 = vpop.permute.xlu1 %8795 }
 0x5d5   : > { %8745 = vrot.lane.b32.xlu0 %v17942_v59, %s14370_s18  ;;  %v8802_v3 = vmax.f32 %v8790_v12, %v8796_v49 }
 0x5d6   : > { %v8872_v29 = vpop.permute.xlu0 %8871 }
 0x5d7   : > { %8757 = vrot.lane.b32.xlu1 %v17942_v59, %s14371_s25  ;;  %v8878_v17 = vmax.f32 %v17820_v16, %v8872_v29  ;;  %v14254_v16 = vld [vmem:[%s18466_s6 + $0xb4] ss:$8 sps:$4 sm:$0xff]  }
 0x5d8   : > { %v8744_v10 = vpop.permute.xlu1 %8743 }
 0x5d9   : > { %8830 = vrot.lane.b32.xlu0 %v17963_v40, %s14370_s18  ;;  %v8751_v43 = vmax.f32 %v17792_v53, %v8744_v10  ;;  %v14248_v53 = vld [vmem:[%s18466_s6 + $0xa4] ss:$8 sps:$4 sm:$0xff]  }
 0x5da   : > { %v8884_v25 = vpop.permute.xlu0 %8883  ;;  %9436 = vmatprep.subr.bf16.mxu0 %v14248_v53 }
 0x5db   : > { %8918 = vrot.lane.b32.xlu1 %v17976_v35, %s14370_s18  ;;  %v8890_v55 = vmax.f32 %v8878_v17, %v8884_v25  ;;  %9437 = vmatpush1.bf16.msra.mxu0 %v14246_v31 }
 0x5dc   : > { %v8756_v54 = vpop.permute.xlu1 %8755  ;;  %9438 = vmatprep.subr.bf16.mxu0 %v14254_v16 }
 0x5dd   : > { %v8763_v7 = vmax.f32 %v8751_v43, %v8756_v54  ;;  %8848 = vrot.lane.b32.xlu0 %v8840_v0, %s14371_s25 }
 0x5de   : > { %v8742_v2 = vpop.permute.xlu0 %8741 }
 0x5df   : > { %8767 = vst.msk [vmem:[#allocation4 + $0x10] sm:$0xff] %vm8765_vm5, %v8763_v7  ;;  %8930 = vrot.lane.b32.xlu1 %v17976_v35, %s14371_s25  ;;  %v8750_v45 = vmax.f32 %v17788_v30, %v8742_v2  ;;  %v14257_v30 = vld [vmem:[%s18466_s6 + $0x164] ss:$8 sps:$4 sm:$0xff]   ;;  %9439 = vmatpush1.bf16.msra.mxu0 %v14252_v36 }
 0x5e0   : > { %v8829_v14 = vpop.permute.xlu1 %8828  ;;  %9272 = vmatprep.subr.bf16.mxu1 %v14257_v30 }
 0x5e1   : > { %8810 = vrot.lane.b32.xlu0 %v8802_v3, %s14371_s25  ;;  %9273 = vmatpush1.bf16.msra.mxu1 %v14255_v33 }
 0x5e2   : > { %v8754_v26 = vpop.permute.xlu0 %8753  ;;  %9274 = vmatprep.subr.bf16.mxu1 %v14260_v52 }
 0x5e3   : > { %v8762_v15 = vmax.f32 %v8750_v45, %v8754_v26  ;;  %8898 = vrot.lane.b32.xlu1 %v8890_v55, %s14371_s25 }
 0x5e4   : > { %v8917_v62 = vpop.permute.xlu1 %8916 }
 0x5e5   : > { %8766 = vst.msk [vmem:[#allocation4] sm:$0xff] %vm8765_vm5, %v8762_v15  ;;  %v8924_v5 = vmax.f32 %v17774_v24, %v8917_v62  ;;  %9275 = vmatpush1.bf16.msra.mxu1 %v14258_v8 }
 0x5e6   : > { %v8827_v61 = vpop.permute.xlu0 %8826  ;;  %9614 = vmatprep.subr.bf16.mxu1 %v14263_v41 }
 0x5e7   : > { %v8835_v38 = vmax.f32 %v17790_v51, %v8827_v61 }
 0x5e8   : > { %v8847_v18 = vpop.permute.xlu1 %8846 }
 0x5ea   : > { %v8915_v57 = vpop.permute.xlu0 %8914 }
 0x5eb   : > { %v8923_v60 = vmax.f32 %v17768_v19, %v8915_v57  ;;  %v8836_v19 = vmax.f32 %v17794_v56, %v8829_v14  ;;  %v14284_v56 = vld [vmem:[%s18466_s6 + $0x1f4] ss:$8 sps:$4 sm:$0xff]  }
 0x5ec   : > { %v8929_v13 = vpop.permute.xlu1 %8928 }
 0x5ed   : > { %v8936_v63 = vmax.f32 %v8924_v5, %v8929_v13  ;;  %v8854_v4 = vmax.f32 %v8836_v19, %v8847_v18  ;;  %v14261_v19 = vld [vmem:[%s18466_s6 + $0x180] ss:$8 sps:$4 sm:$0xff]  }
 0x5ee   : > { %v8845_v27 = vpop.permute.xlu0 %8844 }
 0x5ef   : > { %8939 = vst.msk [vmem:[#allocation4 + $0x18] sm:$0xff] %vm8765_vm5, %v8936_v63  ;;  %v8853_v46 = vmax.f32 %v8835_v38, %v8845_v27 }
 0x5f0   : > { %v8955_v22 = vpop.permute.xlu1 %8954 }
 0x5f1   : > { %v8961_v49 = vmax.f32 %v8943_v42, %v8955_v22 }
 0x5f2   : > { %v8927_v37 = vpop.permute.xlu0 %8926 }
 0x5f3   : > { %v8935_v9 = vmax.f32 %v8923_v60, %v8927_v37 }
 0x5f4   : > { %v8967_v24 = vpop.permute.xlu1 %8966 }
 0x5f5   : > { %8938 = vst.msk [vmem:[#allocation4 + $0x8] sm:$0xff] %vm8765_vm5, %v8935_v9  ;;  %v8973_v29 = vmax.f32 %v8961_v49, %v8967_v24 }
 0x5f6   : > { %v8895_v34 = vpop.permute.xlu0 %8894 }
 0x5f7   : > { %8981 = vrot.lane.b32.xlu0 %v8973_v29, %s14371_s25 }
 0x5f8   : > { %v8897_v50 = vpop.permute.xlu1 %8896 }
 0x611   : > { %v8807_v10 = vpop.permute.xlu0 %8806 }
 0x612   : > { %8816 = vst.msk [vmem:[#allocation4] sm:$0xff] %vm8815_vm6, %v8807_v10 }
 0x613   : > { %8857 = vst.msk [vmem:[#allocation4] sm:$0xff] %vm8856_vm7, %v8853_v46 }
 0x614   : > { %8904 = vst.msk [vmem:[#allocation4] sm:$0xff] %vm8903_vm8, %v8895_v34 }
 0x615   : > { %v8809_v44 = vpop.permute.xlu1 %8808 }
 0x616   : > { %8817 = vst.msk [vmem:[#allocation4 + $0x10] sm:$0xff] %vm8815_vm6, %v8809_v44  ;;  %v14266_v44 = vld [vmem:[%s18466_s6 + $0x194] ss:$8 sps:$4 sm:$0xff]  }
 0x617   : > { %8858 = vst.msk [vmem:[#allocation4 + $0x10] sm:$0xff] %vm8856_vm7, %v8854_v4 }
 0x618   : > { %8905 = vst.msk [vmem:[#allocation4 + $0x10] sm:$0xff] %vm8903_vm8, %v8897_v50 }
 0x643   : > { %v8978_v48 = vpop.permute.xlu0 %8977 }
 0x644   : > { %8986 = vst.msk [vmem:[#allocation4 + $0x8] sm:$0xff] %vm8815_vm6, %v8978_v48  ;;  %v14264_v48 = vld [vmem:[%s18466_s6 + $0x190] ss:$8 sps:$4 sm:$0xff]  }
 0x645   : > { %v8980_v51 = vpop.permute.xlu1 %8979 }
 0x646   : > { %8987 = vst.msk [vmem:[#allocation4 + $0x18] sm:$0xff] %vm8815_vm6, %v8980_v51 }
 0x647   : > { %v8746_v39 = vpop.permute.xlu0 %8745 }
 0x648   : > { %v8752_v25 = vmax.f32 %v17942_v59, %v8746_v39  ;;  %v14269_v39 = vld [vmem:[%s18466_s6 + $0x1a4] ss:$8 sps:$4 sm:$0xff]  }
 0x649   : > { %v8758_v1 = vpop.permute.xlu1 %8757 }
 0x64a   : > { %v8764_v12 = vmax.f32 %v8752_v25, %v8758_v1  ;;  %v14267_v25 = vld [vmem:[%s18466_s6 + $0x1a0] ss:$8 sps:$4 sm:$0xff]   ;;  %v14272_v1 = vld [vmem:[%s18466_s6 + $0x1b4] ss:$8 sps:$4 sm:$0xff]  }
 0x64b   : > { %v8989_v43 = vld [vmem:[#allocation4] ss:$8 sm:$0x3]  ;;  %v8991_v32 = vld [vmem:[#allocation4 + $0x1] ss:$8 sm:$0x3]  ;;  %v8831_v54 = vpop.permute.xlu0 %8830 }
 0x64c   : > { %v8992_v0 = vmax.f32 %v8989_v43, %v8991_v32  ;;  %v8994_v47 = vld [vmem:[#allocation4 + $0x2] ss:$8 sm:$0x3]  ;;  %v9003_v7 = vld [vmem:[#allocation4 + $0x3] ss:$8 sm:$0x3]  ;;  %v8837_v61 = vmax.f32 %v17963_v40, %v8831_v54 }
 0x64d   : > { %8769 = vst.msk [vmem:[#allocation4 + $0x20] sm:$0x3] %vm8768_vm9, %v8764_v12  ;;  %v9005_v53 = vld [vmem:[#allocation4 + $0x4] ss:$8 sm:$0x3]  ;;  %v8919_v21 = vpop.permute.xlu1 %8918 }
 0x64e   : > { %v9008_v2 = vld [vmem:[#allocation4 + $0x5] ss:$8 sm:$0x3]  ;;  %v8995_v59 = vmax.f32 %v8992_v0, %v8994_v47  ;;  %v9006_v3 = vmax.f32 %v9003_v7, %v9005_v53  ;;  %v9014_v17 = vld [vmem:[#allocation4 + $0x6] ss:$8 sm:$0x3]  ;;  %v8925_v6 = vmax.f32 %v17976_v35, %v8919_v21 }
 0x64f   : > { %v9016_v58 = vld [vmem:[#allocation4 + $0x7] ss:$8 sm:$0x3]  ;;  %v9019_v31 = vld [vmem:[#allocation4 + $0x10] ss:$8 sm:$0x3]  ;;  %v8849_v45 = vpop.permute.xlu0 %8848 }
 0x650   : > { %v9017_v14 = vmax.f32 %v9014_v17, %v9016_v58  ;;  %v9025_v55 = vld [vmem:[#allocation4 + $0x11] ss:$8 sm:$0x3]  ;;  %9000 = vst.msk [vmem:[#allocation5] ss:$8 sm:$0x3] %vm18048_vm10, %v8995_v59  ;;  %v9009_v16 = vmax.f32 %v9006_v3, %v9008_v2  ;;  %v8855_v5 = vmax.f32 %v8837_v61, %v8849_v45 }
 0x651   : > { %v9027_v26 = vld [vmem:[#allocation4 + $0x12] ss:$8 sm:$0x3]  ;;  %v9036_v62 = vld [vmem:[#allocation4 + $0x14] ss:$8 sm:$0x3]  ;;  %v8931_v33 = vpop.permute.xlu1 %8930 }
 0x652   : > { %v9020_v15 = vmax.f32 %v9017_v14, %v9019_v31  ;;  %v9028_v30 = vmax.f32 %v9025_v55, %v9027_v26  ;;  %v9038_v36 = vld [vmem:[#allocation4 + $0x15] ss:$8 sm:$0x3]  ;;  %9011 = vst.msk [vmem:[#allocation5 + $0x1] ss:$8 sm:$0x3] %vm18048_vm10, %v9009_v16  ;;  %v8937_v57 = vmax.f32 %v8925_v6, %v8931_v33 }
 0x653   : > { %v9030_v52 = vld [vmem:[#allocation4 + $0x13] ss:$8 sm:$0x3]  ;;  %v9039_v18 = vmax.f32 %v9036_v62, %v9038_v36  ;;  %v9041_v35 = vld [vmem:[#allocation4 + $0x16] ss:$8 sm:$0x3]  ;;  %v8811_v41 = vpop.permute.xlu0 %8810 }
 0x654   : > { %9022 = vst.msk [vmem:[#allocation5 + $0x2] ss:$8 sm:$0x3] %vm18048_vm10, %v9020_v15  ;;  %v9031_v8 = vmax.f32 %v9028_v30, %v9030_v52  ;;  %v14270_v12 = vld [vmem:[%s18466_s6 + $0x1b0] ss:$8 sps:$4 sm:$0xff]   ;;  %v14297_v52 = vld [vmem:[%s18468_s8 + $0x140] sm:$0xff]  }
 0x655   : > { %v9042_v13 = vmax.f32 %v9039_v18, %v9041_v35  ;;  %8940 = vst.msk [vmem:[#allocation4 + $0x28] sm:$0x3] %vm8768_vm9, %v8937_v57  ;;  %v8899_v40 = vpop.permute.xlu1 %8898  ;;  %v14275_v43 = vld [vmem:[%s18466_s6 + $0x1c4] ss:$8 sps:$4 sm:$0xff]   ;;  %v14273_v53 = vld [vmem:[%s18466_s6 + $0x1c0] ss:$8 sps:$4 sm:$0xff]  }
 0x656   : > { %8819 = vst.msk [vmem:[#allocation4 + $0x20] sm:$0x3] %vm8818_vm11, %v8811_v41  ;;  %v9047_v32 = vld [vmem:[#allocation4 + $0x17] ss:$8 sm:$0x3] }
 0x657   : > { %9033 = vst.msk [vmem:[#allocation5 + $0x3] ss:$8 sm:$0x3] %vm18048_vm10, %v9031_v8  ;;  %9044 = vst.msk [vmem:[#allocation5 + $0x4] ss:$8 sm:$0x3] %vm18048_vm10, %v9042_v13 }
 0x658   : > { %8860 = vst.msk [vmem:[#allocation4 + $0x20] sm:$0x3] %vm8859_vm12, %v8855_v5  ;;  %v14278_v2 = vld [vmem:[%s18466_s6 + $0x1d4] ss:$8 sps:$4 sm:$0xff]   ;;  %v14276_v21 = vld [vmem:[%s18466_s6 + $0x1d0] ss:$8 sps:$4 sm:$0xff]  }
 0x659   : > { %8907 = vst.msk [vmem:[#allocation4 + $0x20] sm:$0x3] %vm8906_vm13, %v8899_v40  ;;  %v14281_v59 = vld [vmem:[%s18466_s6 + $0x1e4] ss:$8 sps:$4 sm:$0xff]   ;;  %v14279_v3 = vld [vmem:[%s18466_s6 + $0x1e0] ss:$8 sps:$4 sm:$0xff]  }
 0x65a   : > { %v14282_v14 = vld [vmem:[%s18466_s6 + $0x1f0] ss:$8 sps:$4 sm:$0xff]   ;;  %v14287_v55 = vld [vmem:[%s18466_s6 + $0x204] ss:$8 sps:$4 sm:$0xff]   ;;  %v14285_v45 = vld [vmem:[%s18466_s6 + $0x200] ss:$8 sps:$4 sm:$0xff]  }
 0x65b   : > { %v14290_v16 = vld [vmem:[%s18466_s6 + $0x214] ss:$8 sps:$4 sm:$0xff]   ;;  %v14288_v26 = vld [vmem:[%s18466_s6 + $0x210] ss:$8 sps:$4 sm:$0xff]   ;;  %v14293_v6 = vld [vmem:[%s18466_s6 + $0x224] ss:$8 sps:$4 sm:$0xff]  }
 0x65c   : > { %v14291_v15 = vld [vmem:[%s18466_s6 + $0x220] ss:$8 sps:$4 sm:$0xff]   ;;  %v14296_v30 = vld [vmem:[%s18466_s6 + $0x234] ss:$8 sps:$4 sm:$0xff]   ;;  %v14294_v36 = vld [vmem:[%s18466_s6 + $0x230] ss:$8 sps:$4 sm:$0xff]  }
 0x65d   : > { %v14298_v18 = vld [vmem:[%s18468_s8 + $0x100] sm:$0xff]   ;;  %v14301_v35 = vld [vmem:[%s18468_s8 + $0x148] sm:$0xff]   ;;  %v14305_v40 = vld [vmem:[%s18468_s8 + $0x150] sm:$0xff]  }
 0x65e   : > { %v9058_v63 = vld [vmem:[#allocation5 + $0x8] sm:$0xf]  ;;  %v9057_v27 = vld [vmem:[#allocation5] sm:$0xf] }
 0x65f   : > { %v9060_v22 = vpack.c.bf16 %v9058_v63, %v9058_v63  ;;  %v9059_v60 = vpack.c.bf16 %v9057_v27, %v9057_v27  ;;  %v9086_v42 = vld [vmem:[#allocation5 + $0x8] sm:$0x1e]  ;;  %v9085_v37 = vld [vmem:[#allocation5] sm:$0x1e]  ;;  %v14306_v63 = vld [vmem:[%s18468_s8 + $0x110] sm:$0xff]  }
 0x660   : > { %v9088_v49 = vpack.c.bf16 %v9086_v42, %v9086_v42  ;;  %v9087_v9 = vpack.c.bf16 %v9085_v37, %v9085_v37  ;;  %v14299_v57 = vld [vmem:[%s18468_s8 + $0xc0] sm:$0xff]   ;;  %v14302_v5 = vld [vmem:[%s18468_s8 + $0x108] sm:$0xff]   ;;  %v14307_v27 = vld [vmem:[%s18468_s8 + $0xd0] sm:$0xff]  }
 0x661   : > { %12281 = vmatprep.mubr.msk.bf16.mxu0 %vm8722_vm3, %v9060_v22  ;;  %v14300_v8 = vld [vmem:[%s18468_s8 + $0x80] sm:$0xff]   ;;  %12645 = vmatprep.subr.bf16.mxu0 %v14299_v57  ;;  %v14303_v41 = vld [vmem:[%s18468_s8 + $0xc8] sm:$0xff]   ;;  %v14308_v22 = vld [vmem:[%s18468_s8 + $0x90] sm:$0xff]  }
 0x662   : > { %9449 = vmatmul.mubr.bf16.vlgmr.msra.gmra.mrb[112].mxu0 %v9059_v60  ;;  %v9124_v24 = vshll.u32 %v9088_v49, 16  ;;  %v9117_v29 = vshll.u32 %v9087_v9, 16  ;;  %v9122_v34 = vshrl.u32 %v9088_v49, 16  ;;  %v9115_v46 = vshrl.u32 %v9087_v9, 16  ;;  %v14304_v13 = vld [vmem:[%s18468_s8 + $0x88] sm:$0xff]   ;;  %v14309_v60 = vld [vmem:[%s18468_s8 + $0x158] sm:$0xff]  }
 0x663   : > { %12646 = vmatpush3.bf16.msra.mxu0 %v14300_v8  ;;  %v14310_v42 = vld [vmem:[%s18468_s8 + $0x118] sm:$0xff]   ;;  %v14313_v49 = vld [vmem:[%s18468_s8 + $0x160] sm:$0xff]  }
 0x664   : > { %v9126_v38 = vrot.slane %v9124_v24, 1  ;;  %v9119_v50 = vrot.slane %v9117_v29, 1  ;;  %12647 = vmatprep.subr.bf16.mxu0 %v14303_v41  ;;  %v14311_v37 = vld [vmem:[%s18468_s8 + $0xd8] sm:$0xff]   ;;  %v14314_v24 = vld [vmem:[%s18468_s8 + $0x120] sm:$0xff]  }
 0x665   : > { %v14312_v9 = vld [vmem:[%s18468_s8 + $0x98] sm:$0xff]   ;;  %v14315_v29 = vld [vmem:[%s18468_s8 + $0xe0] sm:$0xff]  }
 0x666   : > { %v9127_v10 = vor.u32 %v9126_v38, %v9122_v34  ;;  %v9120_v4 = vor.u32 %v9119_v50, %v9115_v46  ;;  %v14317_v34 = vld [vmem:[%s18468_s8 + $0x168] sm:$0xff]   ;;  %v14316_v38 = vld [vmem:[%s18468_s8 + $0xa0] sm:$0xff]  }
 0x667   : > { %12648 = vmatpush3.bf16.msra.mxu0 %v14304_v13  ;;  %v14318_v46 = vld [vmem:[%s18468_s8 + $0x128] sm:$0xff]  }
 0x668   : > { %12256 = vmatprep.mubr.msk.bf16.mxu1 %vm8722_vm3, %v9127_v10  ;;  %12649 = vmatprep.subr.bf16.mxu0 %v14307_v27  ;;  %v14319_v50 = vld [vmem:[%s18468_s8 + $0xe8] sm:$0xff]   ;;  %v14321_v10 = vld [vmem:[%s18468_s8 + $0x170] sm:$0xff]  }
 0x669   : > { %9285 = vmatmul.mubr.bf16.vlgmr.msra.gmra.mrb[116].mxu1 %v9120_v4  ;;  %v8982_v51 = vpop.permute.xlu0 %8981  ;;  %v14322_v4 = vld [vmem:[%s18468_s8 + $0x130] sm:$0xff]  }
 0x66a   : > { %9615 = vmatpush1.bf16.msra.mxu1 %v14261_v19  ;;  %8988 = vst.msk [vmem:[#allocation4 + $0x28] sm:$0x3] %vm8818_vm11, %v8982_v51  ;;  %v14320_v19 = vld [vmem:[%s18468_s8 + $0xa8] sm:$0xff]   ;;  %v14324_v51 = vld [vmem:[%s18468_s8 + $0xb0] sm:$0xff]  }
 0x66b   : > { %9616 = vmatprep.subr.bf16.mxu1 %v14266_v44  ;;  %12650 = vmatpush3.bf16.msra.mxu0 %v14308_v22  ;;  %v14323_v44 = vld [vmem:[%s18468_s8 + $0xf0] sm:$0xff]  }
 0x66c   : > { %12651 = vmatprep.subr.bf16.mxu0 %v14311_v37 }
 0x66e   : > { %9617 = vmatpush1.bf16.msra.mxu1 %v14264_v48  ;;  %v14325_v48 = vld [vmem:[%s18468_s8 + $0x178] sm:$0xff]  }
 0x66f   : > { %9618 = vmatprep.subr.bf16.mxu1 %v14269_v39  ;;  %12652 = vmatpush3.bf16.msra.mxu0 %v14312_v9  ;;  %v14326_v39 = vld [vmem:[%s18468_s8 + $0x138] sm:$0xff]   ;;  %v14332_v9 = vld [vmem:[%s18468_s8] sm:$0xff]  }
 0x670   : > { %12653 = vmatprep.subr.bf16.mxu0 %v14315_v29  ;;  %v14334_v29 = vld [vmem:[%s18468_s8 + $0x48] sm:$0xff]  }
 0x671   : > { %v9049_v54 = vld [vmem:[#allocation4 + $0x20] ss:$8 sm:$0x3]  ;;  %v9052_v47 = vld [vmem:[#allocation4 + $0x21] ss:$8 sm:$0x3] }
 0x672   : > { %9619 = vmatpush1.bf16.msra.mxu1 %v14267_v25  ;;  %v9050_v0 = vmax.f32 %v9047_v32, %v9049_v54  ;;  %v14327_v25 = vld [vmem:[%s18468_s8 + $0xf8] sm:$0xff]  }
 0x673   : > { %9620 = vmatprep.subr.bf16.mxu1 %v14272_v1  ;;  %12654 = vmatpush3.bf16.msra.mxu0 %v14316_v38  ;;  %v14329_v1 = vld [vmem:[%s18468_s8 + $0xb8] sm:$0xff]   ;;  %v14335_v38 = vld [vmem:[%s18468_s8 + $0x8] sm:$0xff]  }
 0x674   : > { %v9053_v7 = vmax.f32 %v9050_v0, %v9052_v47  ;;  %12655 = vmatprep.subr.bf16.mxu0 %v14319_v50  ;;  %v14337_v50 = vld [vmem:[%s18468_s8 + $0x10] sm:$0xff]  }
 0x676   : > { %9621 = vmatpush1.bf16.msra.mxu1 %v14270_v12  ;;  %9055 = vst.msk [vmem:[#allocation5 + $0x5] ss:$8 sm:$0x3] %vm18048_vm10, %v9053_v7  ;;  %v14331_v12 = vld [vmem:[%s18468_s8 + $0x40] sm:$0xff]  }
 0x677   : > { %9622 = vmatprep.subr.bf16.mxu1 %v14275_v43  ;;  %12656 = vmatpush3.bf16.msra.mxu0 %v14320_v19  ;;  %v14339_v19 = vld [vmem:[%s18468_s8 + $0x18] sm:$0xff]  }
 0x678   : > { %12657 = vmatprep.subr.bf16.mxu0 %v14323_v44  ;;  %v14341_v44 = vld [vmem:[%s18468_s8 + $0x20] sm:$0xff]  }
 0x67a   : > { %9623 = vmatpush1.bf16.msra.mxu1 %v14273_v53 }
 0x67b   : > { %9624 = vmatprep.subr.bf16.mxu1 %v14278_v2  ;;  %12658 = vmatpush3.bf16.msra.mxu0 %v14324_v51  ;;  %v14343_v51 = vld [vmem:[%s18468_s8 + $0x28] sm:$0xff]  }
 0x67c   : > { %12659 = vmatprep.subr.bf16.mxu0 %v14327_v25  ;;  %v14345_v25 = vld [vmem:[%s18468_s8 + $0x30] sm:$0xff]  }
 0x67d   : > { %v9458_v17 = vld [vmem:[#allocation5 + $0x8] sm:$0x3c]  ;;  %v9457_v62 = vld [vmem:[#allocation5] sm:$0x3c] }
 0x67e   : > { %9625 = vmatpush1.bf16.msra.mxu1 %v14276_v21  ;;  %v9460_v58 = vpack.c.bf16 %v9458_v17, %v9458_v17  ;;  %v9459_v61 = vpack.c.bf16 %v9457_v62, %v9457_v62 }
 0x67f   : > { %9626 = vmatprep.subr.bf16.mxu1 %v14281_v59  ;;  %12660 = vmatpush3.bf16.msra.mxu0 %v14329_v1  ;;  %v14346_v1 = vld [vmem:[%s18468_s8 + $0x78] sm:$0xff]  }
 0x680   : > { %v9489_v31 = vrot.slane %v9460_v58, 1  ;;  %v9488_v33 = vrot.slane %v9459_v61, 1  ;;  %12667 = vmatprep.subr.bf16.mxu0 %v14331_v12  ;;  %v14347_v12 = vld [vmem:[%s18468_s8 + $0x38] sm:$0xff]  }
 0x682   : > { %9627 = vmatpush1.bf16.msra.mxu1 %v14279_v3  ;;  %12330 = vmatprep.mubr.msk.bf16.mxu1 %vm8722_vm3, %v9489_v31  ;;  %v9657_v3 = vld [vmem:[%s18467_s7] sm:$0x3] }
 0x683   : > { %9628 = vmatprep.subr.bf16.mxu1 %v14284_v56  ;;  %v9662_v56 = vrot.slane %v9657_v3, %v15806_v23  ;;  %v9666_v58 = vrot.slane %v9657_v3, %v15815_v11 }
 0x686   : > { %9629 = vmatpush1.bf16.msra.mxu1 %v14282_v14 }
 0x687   : > { %9630 = vmatprep.subr.bf16.mxu1 %v14287_v55 }
 0x68a   : > { %9631 = vmatpush1.bf16.msra.mxu1 %v14285_v45 }
 0x68b   : > { %9632 = vmatprep.subr.bf16.mxu1 %v14290_v16 }
 0x68e   : > { %9633 = vmatpush1.bf16.msra.mxu1 %v14288_v26 }
 0x68f   : > { %9634 = vmatprep.subr.bf16.mxu1 %v14293_v6 }
 0x692   : > { %9635 = vmatpush1.bf16.msra.mxu1 %v14291_v15 }
 0x693   : > { %9636 = vmatprep.subr.bf16.mxu1 %v14296_v30 }
 0x696   : > { %9637 = vmatpush1.bf16.msra.mxu1 %v14294_v36 }
 0x697   : > { %12689 = vmatprep.subr.bf16.mxu1 %v14297_v52 }
 0x699   : > { %9647 = vmatmul.mubr.bf16.vlgmr.msra.gmra.mrb[120].mxu1 %v9488_v33 }
 0x69a   : > { %12690 = vmatpush3.bf16.msra.mxu1 %v14298_v18 }
 0x69b   : > { %12691 = vmatprep.subr.bf16.mxu1 %v14301_v35 }
 0x69e   : > { %12692 = vmatpush3.bf16.msra.mxu1 %v14302_v5 }
 0x69f   : > { %12693 = vmatprep.subr.bf16.mxu1 %v14305_v40 }
 0x6a2   : > { %12694 = vmatpush3.bf16.msra.mxu1 %v14306_v63 }
 0x6a3   : > { %12695 = vmatprep.subr.bf16.mxu1 %v14309_v60 }
 0x6a6   : > { %12696 = vmatpush3.bf16.msra.mxu1 %v14310_v42 }
 0x6a7   : > { %12697 = vmatprep.subr.bf16.mxu1 %v14313_v49 }
 0x6aa   : > { %12698 = vmatpush3.bf16.msra.mxu1 %v14314_v24 }
 0x6ab   : > { %12699 = vmatprep.subr.bf16.mxu1 %v14317_v34 }
 0x6ae   : > { %12700 = vmatpush3.bf16.msra.mxu1 %v14318_v46  ;;  %v14336_v46 = vld [vmem:[%s18468_s8 + $0x50] sm:$0xff]  }
 0x6af   : > { %12701 = vmatprep.subr.bf16.mxu1 %v14321_v10  ;;  %v14338_v10 = vld [vmem:[%s18468_s8 + $0x58] sm:$0xff]  }
 0x6b2   : > { %12702 = vmatpush3.bf16.msra.mxu1 %v14322_v4  ;;  %v14340_v4 = vld [vmem:[%s18468_s8 + $0x60] sm:$0xff]  }
 0x6b3   : > { %12703 = vmatprep.subr.bf16.mxu1 %v14325_v48  ;;  %v14342_v48 = vld [vmem:[%s18468_s8 + $0x68] sm:$0xff]  }
 0x6b6   : > { %12704 = vmatpush3.bf16.msra.mxu1 %v14326_v39  ;;  %v14344_v39 = vld [vmem:[%s18468_s8 + $0x70] sm:$0xff]  }
 0x735   : > { %v9450_v43 = vpop.f32.mrb[112].mxu0 }
 0x736   : > { %v9452_v32 = vpop.f32.mrb[113].mxu0 }
 0x737   : > { %v9454_v54 = vpop.f32.mrb[114].mxu0 }
 0x738   : > { %v9455_v0 = vpop.f32.mrb[115].mxu0  ;;  %v10254_v54 = vld [vmem:[%s18470_s10 + $0x18] sm:$0xff] }
 0x739   : > { %v10251_v0 = vld [vmem:[%s18470_s10] sm:$0xff] }
 0x73c   : > { %v9286_v47 = vpop.f32.mrb[116].mxu1 }
 0x73d   : > { %v9451_v7 = vadd.f32 %v9450_v43, %v9286_v47  ;;  %v9288_v53 = vpop.f32.mrb[117].mxu1 }
 0x73e   : > { %v9453_v2 = vadd.f32 %v9452_v32, %v9288_v53  ;;  %v9290_v21 = vpop.f32.mrb[118].mxu1  ;;  %v10252_v32 = vld [vmem:[%s18470_s10 + $0x8] sm:$0xff] }
 0x73f   : > { %v9291_v59 = vpop.f32.mrb[119].mxu1  ;;  %v12806_v47 = vpack.c.bf16 %v10254_v54, %v10252_v32  ;;  %v10365_v54 = vld [vmem:[%s18472_s12 + $0x20] sm:$0xff] }
 0x76c   : > { %v9648_v17 = vpop.f32.mrb[120].mxu1 }
 0x76d   : > { %v9655_v14 = vadd.f32 %v9648_v17, %v9451_v7  ;;  %v9650_v31 = vpop.f32.mrb[121].mxu1  ;;  %v10253_v7 = vld [vmem:[%s18470_s10 + $0x10] sm:$0xff] }
 0x76e   : > { %v9656_v55 = vadd.f32 %v9650_v31, %v9453_v2  ;;  %v9652_v45 = vpop.f32.mrb[122].mxu1  ;;  %v12808_v53 = vpack.c.bf16 %v10253_v7, %v10251_v0  ;;  %v10366_v0 = vld [vmem:[%s18472_s12 + $0x28] sm:$0xff]  ;;  %v10384_v7 = vld [vmem:[%s18472_s12 + $0xb8] sm:$0xff] }
 0x76f   : > { %v9669_v16 = vadd.f32 %v9662_v56, %v9655_v14  ;;  %v9653_v26 = vpop.f32.mrb[123].mxu1 }
 0x770   : > { %v9670_v6 = vadd.f32 %v9666_v58, %v9656_v55 }
 0x771   : > { %v9671_v15 = vmax.f32 %v9669_v16, 0.0 }
 0x772   : > { %v9672_v30 = vmax.f32 %v9670_v6, 0.0 }
 0x774   : > { %v9675_v62 = vcombine.low %v9671_v15, %v9672_v30 }
 0x776   : > { %9677 = vst [vmem:[#allocation6] sm:$0xff] %v9675_v62  ;;  %v12443_v62 = vld [vmem:[%s18469_s9] ss:$0 sm:$0xff] }
 0x77d   : > { %v10043_v36 = vld [vmem:[#allocation6] sm:$0xcc]  ;;  %v9678_v41 = vld [vmem:[#allocation6] sm:$0x33] }
 0x77e   : > { %v9716_v61 = vld [vmem:[#allocation6] sm:$0x66]  ;;  %v10045_v33 = vcombine.high %v10043_v36, %v10043_v36  ;;  %v10047_v57 = vpack.c.bf16 %v10043_v36, %v10043_v36  ;;  %v9680_v42 = vcombine.high %v9678_v41, %v9678_v41  ;;  %v9682_v43 = vpack.c.bf16 %v9678_v41, %v9678_v41 }
 0x77f   : > { %v9718_v52 = vcombine.high %v9716_v61, %v9716_v61  ;;  %v9720_v18 = vpack.c.bf16 %v9716_v61, %v9716_v61  ;;  %v14372_v41 = vmov 0.0  }
 0x780   : > { %v10048_v8 = vpack.c.bf16 %v10045_v33, %v10045_v33  ;;  %v10084_v63 = vrot.slane %v10047_v57, 1  ;;  %v9683_v34 = vpack.c.bf16 %v9680_v42, %v9680_v42  ;;  %v10256_v33 = vld [vmem:[%s18470_s10 + $0x28] sm:$0xff] }
 0x781   : > { %v9721_v35 = vpack.c.bf16 %v9718_v52, %v9718_v52  ;;  %v9758_v5 = vshll.u32 %v9720_v18, 16  ;;  %v9756_v37 = vshrl.u32 %v9720_v18, 16  ;;  %v10258_v52 = vld [vmem:[%s18470_s10 + $0x38] sm:$0xff]  ;;  %v10255_v18 = vld [vmem:[%s18470_s10 + $0x20] sm:$0xff] }
 0x782   : > { %v10085_v13 = vrot.slane %v10048_v8, 1  ;;  %v12810_v57 = vpack.c.bf16 %v10258_v52, %v10256_v33  ;;  %v10257_v8 = vld [vmem:[%s18470_s10 + $0x30] sm:$0xff]  ;;  %v10372_v52 = vld [vmem:[%s18472_s12 + $0x58] sm:$0xff] }
 0x783   : > { %v9765_v40 = vshll.u32 %v9721_v35, 16  ;;  %v9760_v27 = vrot.slane %v9758_v5, 1  ;;  %v9763_v22 = vshrl.u32 %v9721_v35, 16  ;;  %v10260_v35 = vld [vmem:[%s18470_s10 + $0x48] sm:$0xff]  ;;  %v10262_v5 = vld [vmem:[%s18470_s10 + $0x58] sm:$0xff] }
 0x784   : > { %10216 = vmatprep.mubr.bf16.mxu1 %v10085_v13  ;;  %v12812_v13 = vpack.c.bf16 %v10257_v8, %v10255_v18  ;;  %v10389_v18 = vld [vmem:[%s18472_s12 + $0xe0] sm:$0xff] }
 0x785   : > { %v9767_v60 = vrot.slane %v9765_v40, 1  ;;  %10217 = vmatmul.mubr.bf16.vlgmr.msra.gmra.mrb[124].mxu1 %v10084_v63  ;;  %v9761_v24 = vor.u32 %v9760_v27, %v9756_v37  ;;  %v12814_v40 = vpack.c.bf16 %v10262_v5, %v10260_v35  ;;  %v10259_v63 = vld [vmem:[%s18470_s10 + $0x40] sm:$0xff]  ;;  %v10261_v27 = vld [vmem:[%s18470_s10 + $0x50] sm:$0xff] }
 0x786   : > { %v12816_v42 = vpack.c.bf16 %v10261_v27, %v10259_v63  ;;  %v10373_v5 = vld [vmem:[%s18472_s12 + $0x60] sm:$0xff] }
 0x787   : > { %v9768_v49 = vor.u32 %v9767_v60, %v9763_v22  ;;  %v10264_v22 = vld [vmem:[%s18470_s10 + $0x68] sm:$0xff]  ;;  %v10266_v60 = vld [vmem:[%s18470_s10 + $0x78] sm:$0xff] }
 0x788   : > { %v12818_v37 = vpack.c.bf16 %v10266_v60, %v10264_v22  ;;  %v10375_v22 = vld [vmem:[%s18472_s12 + $0x70] sm:$0xff]  ;;  %v10376_v60 = vld [vmem:[%s18472_s12 + $0x78] sm:$0xff] }
 0x789   : > { %9899 = vmatprep.mubr.bf16.mxu0 %v9768_v49  ;;  %v10263_v49 = vld [vmem:[%s18470_s10 + $0x60] sm:$0xff] }
 0x78a   : > { %9900 = vmatmul.mubr.bf16.vlgmr.msra.gmra.mrb[116].mxu0 %v9761_v24 }
 0x78b   : > { %12668 = vmatpush3.bf16.msra.mxu0 %v14332_v9  ;;  %10035 = vmatprep.mubr.bf16.mxu0 %v9683_v34  ;;  %v10265_v9 = vld [vmem:[%s18470_s10 + $0x70] sm:$0xff] }
 0x78c   : > { %12669 = vmatprep.subr.bf16.mxu0 %v14334_v29  ;;  %v12820_v34 = vpack.c.bf16 %v10265_v9, %v10263_v49 }
 0x78f   : > { %12670 = vmatpush3.bf16.msra.mxu0 %v14335_v38  ;;  %v10377_v38 = vld [vmem:[%s18472_s12 + $0x80] sm:$0xff] }
 0x790   : > { %12671 = vmatprep.subr.bf16.mxu0 %v14336_v46  ;;  %v10378_v46 = vld [vmem:[%s18472_s12 + $0x88] sm:$0xff] }
 0x793   : > { %12672 = vmatpush3.bf16.msra.mxu0 %v14337_v50  ;;  %v10361_v50 = vld [vmem:[%s18472_s12] sm:$0xff] }
 0x794   : > { %12673 = vmatprep.subr.bf16.mxu0 %v14338_v10  ;;  %v12822_v10 = vpack.c.bf16 %v10378_v46, %v10377_v38 }
 0x796   : > { %12823 = vmatprep.subr.bf16.mxu1 %v12822_v10 }
 0x797   : > { %12674 = vmatpush3.bf16.msra.mxu0 %v14339_v19  ;;  %v10362_v19 = vld [vmem:[%s18472_s12 + $0x8] sm:$0xff] }
 0x798   : > { %12675 = vmatprep.subr.bf16.mxu0 %v14340_v4  ;;  %v10379_v4 = vld [vmem:[%s18472_s12 + $0x90] sm:$0xff] }
 0x79b   : > { %12676 = vmatpush3.bf16.msra.mxu0 %v14341_v44  ;;  %v10380_v44 = vld [vmem:[%s18472_s12 + $0x98] sm:$0xff] }
 0x79c   : > { %12677 = vmatprep.subr.bf16.mxu0 %v14342_v48  ;;  %v12824_v48 = vpack.c.bf16 %v10362_v19, %v10361_v50  ;;  %v10249_v50 = vld [vmem:[%s18471_s11] sm:$0x3] }
 0x79e   : > { %12825 = vmatpush3.bf16.msra.mxu1 %v12824_v48 }
 0x79f   : > { %12678 = vmatpush3.bf16.msra.mxu0 %v14343_v51  ;;  %v12826_v51 = vpack.c.bf16 %v10380_v44, %v10379_v4 }
 0x7a0   : > { %12679 = vmatprep.subr.bf16.mxu0 %v14344_v39  ;;  %v10363_v39 = vld [vmem:[%s18472_s12 + $0x10] sm:$0xff] }
 0x7a1   : > { %12827 = vmatprep.subr.bf16.mxu1 %v12826_v51  ;;  %v10476_v51 = vand.u32 127, %v3199_v20 }
 0x7a3   : > { %12680 = vmatpush3.bf16.msra.mxu0 %v14345_v25  ;;  %v10364_v25 = vld [vmem:[%s18472_s12 + $0x18] sm:$0xff]  ;;  %vm10477_vm15 = vcmp.lt.s32.totalorder %v10476_v51, 6 }
 0x7a4   : > { %12681 = vmatprep.subr.bf16.mxu0 %v14346_v1  ;;  %v10381_v1 = vld [vmem:[%s18472_s12 + $0xa0] sm:$0xff] }
 0x7a7   : > { %12682 = vmatpush3.bf16.msra.mxu0 %v14347_v12  ;;  %v10382_v12 = vld [vmem:[%s18472_s12 + $0xa8] sm:$0xff] }
 0x7a8   : > { %12807 = vmatprep.subr.bf16.mxu0 %v12806_v47  ;;  %v12830_v32 = vpack.c.bf16 %v10382_v12, %v10381_v1  ;;  %v10383_v47 = vld [vmem:[%s18472_s12 + $0xb0] sm:$0xff] }
 0x7aa   : > { %10036 = vmatmul.mubr.bf16.vlgmr.msra.gmra.mrb[120].mxu0 %v9682_v43  ;;  %v12828_v43 = vpack.c.bf16 %v10364_v25, %v10363_v39 }
 0x7ab   : > { %12809 = vmatpush1.bf16.msra.mxu0 %v12808_v53  ;;  %10334 = vmatprep.mubr.f32.mxu0 %v14372_v41  ;;  %v12832_v53 = vpack.c.bf16 %v10366_v0, %v10365_v54  ;;  %v10374_v41 = vld [vmem:[%s18472_s12 + $0x68] sm:$0xff] }
 0x7ac   : > { %12811 = vmatprep.subr.bf16.mxu0 %v12810_v57  ;;  %12829 = vmatpush3.bf16.msra.mxu1 %v12828_v43  ;;  %v10390_v57 = vld [vmem:[%s18472_s12 + $0xe8] sm:$0xff]  ;;  %v12848_v63 = vpack.c.bf16 %v10374_v41, %v10373_v5 }
 0x7ad   : > { %12831 = vmatprep.subr.bf16.mxu1 %v12830_v32  ;;  %v12846_v35 = vpack.c.bf16 %v10390_v57, %v10389_v18 }
 0x7af   : > { %12813 = vmatpush1.bf16.msra.mxu0 %v12812_v13  ;;  %v10391_v13 = vld [vmem:[%s18472_s12 + $0xf0] sm:$0xff] }
 0x7b0   : > { %12815 = vmatprep.subr.bf16.mxu0 %v12814_v40  ;;  %12833 = vmatpush3.bf16.msra.mxu1 %v12832_v53  ;;  %v10392_v40 = vld [vmem:[%s18472_s12 + $0xf8] sm:$0xff] }
 0x7b1   : > { %v12850_v27 = vpack.c.bf16 %v10392_v40, %v10391_v13 }
 0x7b3   : > { %12817 = vmatpush1.bf16.msra.mxu0 %v12816_v42  ;;  %v12852_v42 = vpack.c.bf16 %v10376_v60, %v10375_v22 }
 0x7b4   : > { %12819 = vmatprep.subr.bf16.mxu0 %v12818_v37  ;;  %v14373_v37 = vmov 1966171168  }
 0x7b5   : > { %v10345_v49 = vunpack.c.l.s4 %v14373_v37 }
 0x7b7   : > { %12821 = vmatpush1.bf16.msra.mxu0 %v12820_v34  ;;  %v10346_v9 = vunpack.c.0.s8 %v10345_v49 }
 0x858   : > { %v12705_v2 = vpop.f32.mrb[124].mxu1 }
 0x859   : > { %v12706_v21 = vpop.f32.mrb[125].mxu1 }
 0x85a   : > { %v12707_v59 = vadd.f32 %v12706_v21, %v12705_v2  ;;  %v12708_v3 = vpop.f32.mrb[126].mxu1  ;;  %v12834_v2 = vpack.c.bf16 %v10384_v7, %v10383_v47  ;;  %v10367_v21 = vld [vmem:[%s18472_s12 + $0x30] sm:$0xff] }
 0x85b   : > { %v12709_v56 = vpop.f32.mrb[127].mxu1  ;;  %v10385_v3 = vld [vmem:[%s18472_s12 + $0xc0] sm:$0xff] }
 0x85c   : > { %v10386_v56 = vld [vmem:[%s18472_s12 + $0xc8] sm:$0xff]  ;;  %12835 = vmatprep.subr.bf16.mxu1 %v12834_v2 }
 0x85d   : > { %v12661_v17 = vpop.f32.mrb[116].mxu0 }
 0x85e   : > { %v12662_v58 = vpop.f32.mrb[117].mxu0 }
 0x85f   : > { %v12663_v14 = vadd.f32 %v12662_v58, %v12661_v17  ;;  %v12664_v31 = vpop.f32.mrb[118].mxu0  ;;  %v12838_v58 = vpack.c.bf16 %v10386_v56, %v10385_v3 }
 0x860   : > { %v12665_v55 = vpop.f32.mrb[119].mxu0 }
 0x87d   : > { %v12683_v45 = vpop.f32.mrb[120].mxu0 }
 0x87e   : > { %v12684_v16 = vpop.f32.mrb[121].mxu0 }
 0x87f   : > { %v12685_v26 = vadd.f32 %v12684_v16, %v12683_v45  ;;  %v12686_v6 = vpop.f32.mrb[122].mxu0 }
 0x880   : > { %v12687_v15 = vpop.f32.mrb[123].mxu0  ;;  %v10369_v6 = vld [vmem:[%s18472_s12 + $0x40] sm:$0xff] }
 0x881   : > { %v10038_v30 = vadd.f32 %v12685_v26, %v12663_v14  ;;  %v10370_v15 = vld [vmem:[%s18472_s12 + $0x48] sm:$0xff] }
 0x883   : > { %v10224_v36 = vadd.f32 %v12707_v59, %v10038_v30  ;;  %v10368_v59 = vld [vmem:[%s18472_s12 + $0x38] sm:$0xff]  ;;  %v12840_v30 = vpack.c.bf16 %v10370_v15, %v10369_v6 }
 0x884   : > { %v12836_v17 = vpack.c.bf16 %v10368_v59, %v10367_v21 }
 0x885   : > { %v10232_v61 = vadd.f32 %v12443_v62, %v10224_v36  ;;  %v10387_v62 = vld [vmem:[%s18472_s12 + $0xd0] sm:$0xff]  ;;  %v10388_v36 = vld [vmem:[%s18472_s12 + $0xd8] sm:$0xff] }
 0x886   : > { %12837 = vmatpush3.bf16.msra.mxu1 %v12836_v17  ;;  %v12842_v33 = vpack.c.bf16 %v10388_v36, %v10387_v62 }
 0x887   : > { %10233 = vst [vmem:[#allocation7] sm:$0x3] %v10232_v61  ;;  %12839 = vmatprep.subr.bf16.mxu1 %v12838_v58  ;;  %v10371_v61 = vld [vmem:[%s18472_s12 + $0x50] sm:$0xff] }
 0x888   : > { %v12844_v8 = vpack.c.bf16 %v10372_v52, %v10371_v61 }
 0x88a   : > { %12841 = vmatpush3.bf16.msra.mxu1 %v12840_v30 }
 0x88b   : > { %12843 = vmatprep.subr.bf16.mxu1 %v12842_v33 }
 0x88e   : > { %v10240_v24 = vld [vmem:[#allocation7 + $0x1] sm:$0x1]  ;;  %v10234_v29 = vld [vmem:[#allocation7] sm:$0x1]  ;;  %12845 = vmatpush3.bf16.msra.mxu1 %v12844_v8 }
 0x88f   : > { %10243 = vrot.lane.b32.xlu0 %v10240_v24, %s14371_s25  ;;  %10236 = vrot.lane.b32.xlu1 %v10234_v29, %s14371_s25 }
 0x890   : > { %12847 = vmatprep.subr.bf16.mxu1 %v12846_v35 }
 0x892   : > { %12849 = vmatpush3.bf16.msra.mxu1 %v12848_v63 }
 0x893   : > { %12851 = vmatprep.subr.bf16.mxu1 %v12850_v27 }
 0x896   : > { %12853 = vmatpush3.bf16.msra.mxu1 %v12852_v42 }
 0x901   : > { %v10237_v14 = vpop.permute.xlu1 %10236  ;;  %v10244_v45 = vpop.permute.xlu0 %10243 }
 0x902   : > { %v10239_v31 = vmax.f32 %v10234_v29, %v10237_v14  ;;  %v10349_v29 = vsub.s32 %v10346_v9, %v15803_v28  ;;  %v10393_v28 = vld [vmem:[%s18473_s13] sm:$0x1] }
 0x904   : > { %v10241_v55 = vmax.f32 %v10239_v31, %v10240_v24 }
 0x906   : > { %v10246_v16 = vmax.f32 %v10241_v55, %v10244_v45 }
 0x908   : > { %10248 = vst.msk [vmem:[#allocation8] sm:$0x1] %vm10247_vm14, %v10246_v16 }
 0x90f   : > { %v10250_v26 = vld [vmem:[#allocation8] sm:$0x1] }
 0x910   : > { %12444 = vmatmul.mubr.msk.f32.vlgmr.msra.gmra.mrb[124].mxu0 %vm8722_vm3, %v10250_v26 }
 0x9e3   : > { %v10336_v24 = vpop.f32.mrb[124].mxu0 }
 0x9e4   : > { %v10338_v34 = vpop.f32.mrb[125].mxu0 }
 0x9e5   : > { %v10343_v38 = vcombine.low %v10336_v24, %v10338_v34 }
 0x9e7   : > { %v10350_v46 = vrot.slane %v10343_v38, %v10349_v29 }
 0x9e9   : > { %v10357_v10 = vrot.slane %v10350_v46, %v10349_v29 }
 0x9eb   : > { %v10359_v19 = vadd.f32 %v10357_v10, %v10249_v50 }
 0x9ed   : > { %v10360_v4 = vmax.f32 %v10359_v19, 0.0 }
 0x9ef   : > { %v10402_v44 = vrot.slane %v10360_v4, %v15815_v11  ;;  %v10398_v48 = vrot.slane %v10360_v4, %v15806_v23 }
 0x9f1   : > { %10469 = vmatprep.mubr.f32.mxu1 %v10402_v44 }
 0x9f2   : > { %10470 = vmatmul.mubr.f32.vlgmr.msra.gmra.mrb[128].mxu1 %v10398_v48 }
 0xac5   : > { %v12743_v39 = vpop.f32.mrb[128].mxu1 }
 0xac6   : > { %v12744_v25 = vpop.f32.mrb[129].mxu1 }
 0xac7   : > { %v12745_v1 = vadd.f32 %v12744_v25, %v12743_v39 }
 0xac9   : > { %v10472_v12 = vadd.f32 %v12745_v1, %v10393_v28 }
 0xacb   : > { %v10478_v43 = vsel %vm10477_vm15, %v10472_v12, -1e+30 }
 0xacc   : > { %v10480_v11 = vsel %vm10479_vm0, %v10478_v43, -inf }
 0xacd   : > { %10481 = vmax.xlane.f32.xlu1 %v10480_v11 }
 0xb5a   : > { %v10482_v23 = vpop.xlane.xlu1 %10481 }
 0xb5b   : > { %v10483_v32 = vsub.f32 %v10478_v43, %v10482_v23 }
 0xb5d   : > { %v10484_v54 = vmul.f32 1.442695, %v10483_v32 }
 0xb5f   : > { %14348 = vpow2.f32 %v10484_v54 }
 0xb69   : > { %v14349_v20 = vpop.eup %14348 }
 0xb6a   : > { %v10486_v0 = vsel %vm10479_vm0, %v14349_v20, 0.0 }
 0xb6b   : > { %10487 = vadd.xlane.f32.xlu0 %v10486_v0 }
 0xbf8   : > { %v10488_v47 = vpop.xlane.xlu0 %10487 }
 0xbf9   : > { %14350 = vrcp.f32 %v10488_v47 }
 0xc03   : > { %v14351_v7 = vpop.eup %14350 }
 0xc04   : > { %v10490_v53 = vmul.f32 %v14351_v7, %v14349_v20 }
 0xc06   : > { %v10491_v2 = vsel %vm10477_vm15, %v10490_v53, %v10472_v12 }
 0xc07   : > { %10492 = vst [vmem:[%s483_s15] sm:$0x1] %v10491_v2 }
 0xc08 PF: > { %s24_s29 = sadd.s32 1, %s14367_s29  }
 0xc09   : > { %p21_p4 = scmp.ge.s32.totalorder %s24_s29, 4  }
 0xc0b   :  { %23 = sbr.rel (!%p21_p4) target bundleno = 1 (0x1), region = 141 }

</bundles_post_ra>
